<compile_context>
chip_gen: v6e
topology: v6e:2x2x1
jax: 0.10.0
libtpu: 0.0.40
codegen_flags: <defaults>
</compile_context>

<pallas_src>
import numpy as np
import jax
import jax.numpy as jnp
from jax import lax
from jax.experimental import pallas as pl
from jax.experimental.pallas import tpu as pltpu

# ---- hyperparameters (mirror the PyTorch module's globals) ----
DIM = 32
LAYER_GNN = 2
LAYER_CNN = 2
LAYER_OUT = 2
WINDOW = 2
KSIZE = 2 * WINDOW + 1
N_FINGERPRINT = 20
N_WORD = 30
N_ATOMS = 8            # atoms per compound
N_WORDS = 16           # protein length in n-gram words

B_TILE = 16            # samples per grid step
BA = B_TILE * N_ATOMS  # 128 stacked atom rows per tile
BW = B_TILE * N_WORDS  # 256 stacked word rows per tile

# ---- packed parameter row offsets (all 8-row aligned) ----
OFF_EMB_FP = 0                                     # (N_FINGERPRINT, DIM)
OFF_EMB_WD = 24                                    # (N_WORD, DIM)
OFF_WGNN = 56                                      # (LAYER_GNN*DIM, DIM)
OFF_BGNN = 120                                     # (LAYER_GNN, DIM)
OFF_BAND = 128                                     # (LAYER_CNN*KSIZE*DIM, DIM)
OFF_CONVB = OFF_BAND + LAYER_CNN * KSIZE * DIM     # 448, (LAYER_CNN, DIM) broadcast rows
OFF_WATT = OFF_CONVB + 8                           # 456
OFF_BATT = OFF_WATT + DIM                          # 488
P32_ROWS = 496

OFF_WOUT = 0                                       # (LAYER_OUT*2DIM, 2DIM)
OFF_BOUT = LAYER_OUT * 2 * DIM                     # 128
OFF_WINT = OFF_BOUT + 8                            # 136, W_int padded to (2DIM, 2DIM)
OFF_BINT = OFF_WINT + 2 * DIM                      # 200
P64_ROWS = 208


# ======================================================================
# Kernel
# ======================================================================
def _cpi_kernel(fp_ref, adj_ref, wd_ref, p32_ref, p64_ref, out_ref):
    f32 = jnp.float32

    # ---------------- embeddings: one-hot @ table on the MXU ----------------
    fp_idx = fp_ref[...]                                              # (BA, 1) int32
    onehot_fp = (fp_idx == lax.broadcasted_iota(
        jnp.int32, (BA, N_FINGERPRINT), 1)).astype(f32)
    emb_fp = p32_ref[OFF_EMB_FP:OFF_EMB_FP + N_FINGERPRINT, :]
    xs = jnp.dot(onehot_fp, emb_fp, preferred_element_type=f32)       # (BA, DIM)

    wd_idx = wd_ref[...]                                              # (BW, 1) int32
    onehot_wd = (wd_idx == lax.broadcasted_iota(
        jnp.int32, (BW, N_WORD), 1)).astype(f32)
    emb_wd = p32_ref[OFF_EMB_WD:OFF_EMB_WD + N_WORD, :]
    c = jnp.dot(onehot_wd, emb_wd, preferred_element_type=f32)        # (BW, DIM)

    # ---------------- compound vector: GNN ----------------
    # adjacency is passed block-diagonal per tile -> one big MXU matmul per layer.
    adj_bd = adj_ref[...]                                             # (BA, BA)
    for i in range(LAYER_GNN):
        Wg = p32_ref[OFF_WGNN + i * DIM:OFF_WGNN + (i + 1) * DIM, :]
        bg = p32_ref[OFF_BGNN + i:OFF_BGNN + i + 1, :]
        hs = jnp.maximum(jnp.dot(xs, Wg, preferred_element_type=f32) + bg, 0.0)
        xs = xs + jnp.dot(adj_bd, hs, preferred_element_type=f32)
    compound = jnp.mean(xs.reshape(B_TILE, N_ATOMS, DIM), axis=1)     # (B_TILE, DIM)

    # ---------------- protein vector: stacked conv as banded matmuls ----------------
    # out[i,j] = sum_di sum_p in[i+di, p] * band_di[p, j]   (band folds the dj taps)
    row = lax.broadcasted_iota(jnp.int32, (BW, 1), 0) % N_WORDS       # row within sample
    masks = {}
    for di in range(-WINDOW, WINDOW + 1):
        if di != 0:
            masks[di] = jnp.logical_and(row + di >= 0, row + di < N_WORDS)

    for l in range(LAYER_CNN):
        acc = jnp.zeros((BW, DIM), f32)
        for t in range(KSIZE):
            di = t - WINDOW
            band = p32_ref[OFF_BAND + (l * KSIZE + t) * DIM:
                           OFF_BAND + (l * KSIZE + t + 1) * DIM, :]   # (DIM, DIM)
            if di == 0:
                shifted = c
            else:
                shifted = jnp.where(masks[di],
                                    pltpu.roll(c, (-di) % BW, axis=0), 0.0)
            acc = acc + jnp.dot(shifted, band, preferred_element_type=f32)
        cb = p32_ref[OFF_CONVB + l:OFF_CONVB + l + 1, :]              # bias broadcast row
        c = jnp.maximum(acc + cb, 0.0)

    # ---------------- attention ----------------
    Watt = p32_ref[OFF_WATT:OFF_WATT + DIM, :]
    batt = p32_ref[OFF_BATT:OFF_BATT + 1, :]
    h = jnp.maximum(jnp.dot(compound, Watt, preferred_element_type=f32) + batt, 0.0)
    hsw = jnp.maximum(jnp.dot(c, Watt, preferred_element_type=f32) + batt, 0.0)
    hs3 = hsw.reshape(B_TILE, N_WORDS, DIM)
    w = jnp.tanh(jnp.sum(h[:, None, :] * hs3, axis=-1, keepdims=True))  # (B,W,1)
    protein = jnp.mean(w * hs3, axis=1)                                 # (B_TILE, DIM)

    # ---------------- output MLP (no lane concat) + interaction head ----------------
    W0a = p64_ref[OFF_WOUT:OFF_WOUT + DIM, :]
    W0b = p64_ref[OFF_WOUT + DIM:OFF_WOUT + 2 * DIM, :]
    b0 = p64_ref[OFF_BOUT:OFF_BOUT + 1, :]
    cat = jnp.maximum(
        jnp.dot(compound, W0a, preferred_element_type=f32)
        + jnp.dot(protein, W0b, preferred_element_type=f32) + b0, 0.0)
    for j in range(1, LAYER_OUT):
        Wj = p64_ref[OFF_WOUT + j * 2 * DIM:OFF_WOUT + (j + 1) * 2 * DIM, :]
        bj = p64_ref[OFF_BOUT + j:OFF_BOUT + j + 1, :]
        cat = jnp.maximum(jnp.dot(cat, Wj, preferred_element_type=f32) + bj, 0.0)

    Wint = p64_ref[OFF_WINT:OFF_WINT + 2 * DIM, :]    # padded to 2*DIM cols (cols 0:2 real)
    bint = p64_ref[OFF_BINT:OFF_BINT + 1, :]
    out = jnp.dot(cat, Wint, preferred_element_type=f32) + bint        # (B_TILE, 2*DIM)
    out_ref[...] = out[:, :2]


# ======================================================================
# Parameter construction / packing
# ======================================================================
def init_params(key):
    ks = jax.random.split(key, 12)

    def u(k, shape, scale=0.1):
        return jax.random.uniform(k, shape, jnp.float32, -scale, scale)

    # Linear weights stored already transposed (x @ W_T == PyTorch x @ W.T).
    return dict(
        embed_fp=u(ks[0], (N_FINGERPRINT, DIM), 1.0),
        embed_word=u(ks[1], (N_WORD, DIM), 1.0),
        W_gnn_T=u(ks[2], (LAYER_GNN, DIM, DIM)),
        b_gnn=u(ks[3], (LAYER_GNN, 1, DIM)),
        conv_w=u(ks[4], (LAYER_CNN, KSIZE, KSIZE)),
        conv_b=u(ks[5], (LAYER_CNN,)),
        W_att_T=u(ks[6], (DIM, DIM)),
        b_att=u(ks[7], (1, DIM)),
        W_out_T=u(ks[8], (LAYER_OUT, 2 * DIM, 2 * DIM)),
        b_out=u(ks[9], (LAYER_OUT, 1, 2 * DIM)),
        W_int_T=u(ks[10], (2 * DIM, 2)),
        b_int=u(ks[11], (1, 2)),
    )


def _band_matrices(conv_w):
    """band[l, t, p, q] = conv_w[l, t, p-q+WINDOW] if |p-q| <= WINDOW else 0."""
    p = jnp.arange(DIM)[:, None]
    q = jnp.arange(DIM)[None, :]
    rel = p - q + WINDOW
    valid = ((rel >= 0) & (rel < KSIZE)).astype(conv_w.dtype)
    rel_c = jnp.clip(rel, 0, KSIZE - 1)
    return conv_w[:, :, rel_c] * valid[None, None, :, :]    # (L, KSIZE, DIM, DIM)


def pack_params(raw):
    f32 = jnp.float32
    p32 = jnp.zeros((P32_ROWS, DIM), f32)
    p32 = p32.at[OFF_EMB_FP:OFF_EMB_FP + N_FINGERPRINT].set(raw["embed_fp"])
    p32 = p32.at[OFF_EMB_WD:OFF_EMB_WD + N_WORD].set(raw["embed_word"])
    p32 = p32.at[OFF_WGNN:OFF_WGNN + LAYER_GNN * DIM].set(
        raw["W_gnn_T"].reshape(LAYER_GNN * DIM, DIM))
    p32 = p32.at[OFF_BGNN:OFF_BGNN + LAYER_GNN].set(raw["b_gnn"].reshape(LAYER_GNN, DIM))
    bands = _band_matrices(raw["conv_w"]).reshape(LAYER_CNN * KSIZE * DIM, DIM)
    p32 = p32.at[OFF_BAND:OFF_BAND + LAYER_CNN * KSIZE * DIM].set(bands)
    p32 = p32.at[OFF_CONVB:OFF_CONVB + LAYER_CNN].set(
        jnp.broadcast_to(raw["conv_b"][:, None], (LAYER_CNN, DIM)))
    p32 = p32.at[OFF_WATT:OFF_WATT + DIM].set(raw["W_att_T"])
    p32 = p32.at[OFF_BATT:OFF_BATT + 1].set(raw["b_att"])

    p64 = jnp.zeros((P64_ROWS, 2 * DIM), f32)
    p64 = p64.at[OFF_WOUT:OFF_WOUT + LAYER_OUT * 2 * DIM].set(
        raw["W_out_T"].reshape(LAYER_OUT * 2 * DIM, 2 * DIM))
    p64 = p64.at[OFF_BOUT:OFF_BOUT + LAYER_OUT].set(raw["b_out"].reshape(LAYER_OUT, 2 * DIM))
    p64 = p64.at[OFF_WINT:OFF_WINT + 2 * DIM, 0:2].set(raw["W_int_T"])
    p64 = p64.at[OFF_BINT:OFF_BINT + 1, 0:2].set(raw["b_int"])
    return p32, p64


# ======================================================================
# Wrapper
# ======================================================================
def _pallas_forward(fp_col, adj_bd, wd_col, pack32, pack64, num_tiles):
    return pl.pallas_call(
        _cpi_kernel,
        out_shape=jax.ShapeDtypeStruct((num_tiles * B_TILE, 2), jnp.float32),
        grid=(num_tiles,),
        in_specs=[
            pl.BlockSpec((BA, 1), lambda i: (i, 0)),        # fingerprint indices
            pl.BlockSpec((BA, BA), lambda i: (i, 0)),       # block-diag adjacency
            pl.BlockSpec((BW, 1), lambda i: (i, 0)),        # word indices
            pl.BlockSpec((P32_ROWS, DIM), lambda i: (0, 0)),       # packed DIM-wide params
            pl.BlockSpec((P64_ROWS, 2 * DIM), lambda i: (0, 0)),   # packed 2*DIM-wide params
        ],
        out_specs=pl.BlockSpec((B_TILE, 2), lambda i: (i, 0)),
        compiler_params=pltpu.CompilerParams(dimension_semantics=("parallel",)),
    )(fp_col, adj_bd, wd_col, pack32, pack64)


@jax.jit
def cpi_forward(fingerprints, adjacency, words, pack32, pack64):
    """fingerprints (B, N_ATOMS) int32, adjacency (B, N_ATOMS, N_ATOMS) f32,
    words (B, N_WORDS) int32  ->  interaction logits (B, 2) f32."""
    B = fingerprints.shape[0]
    pad = (-B) % B_TILE
    if pad:
        fingerprints = jnp.concatenate(
            [fingerprints, jnp.zeros((pad, N_ATOMS), fingerprints.dtype)], axis=0)
        adjacency = jnp.concatenate(
            [adjacency, jnp.zeros((pad, N_ATOMS, N_ATOMS), adjacency.dtype)], axis=0)
        words = jnp.concatenate(
            [words, jnp.zeros((pad, N_WORDS), words.dtype)], axis=0)
    Bp = B + pad
    num_tiles = Bp // B_TILE

    fp_col = fingerprints.reshape(Bp * N_ATOMS, 1)
    wd_col = words.reshape(Bp * N_WORDS, 1)

    # Block-diagonal adjacency per tile: one (BA,BA)@(BA,DIM) MXU matmul per GNN layer.
    adj_t = adjacency.reshape(num_tiles, B_TILE, N_ATOMS, N_ATOMS)
    eye_b = jnp.eye(B_TILE, dtype=adjacency.dtype)
    adj_bd = jnp.einsum("tbij,bc->tbicj", adj_t, eye_b).reshape(num_tiles * BA, BA)

    out = _pallas_forward(fp_col, adj_bd, wd_col, pack32, pack64, num_tiles)
    return out[:B]


# ======================================================================
# Pure-numpy (float64) reference of the PyTorch forward, for validation
# ======================================================================
def _reference_forward_np(fingerprints, adjacency, words, raw):
    p = {k: np.asarray(v, np.float64) for k, v in raw.items()}
    B = fingerprints.shape[0]
    outs = np.zeros((B, 2), np.float64)
    for b in range(B):
        xs = p["embed_fp"][fingerprints[b]]
        A = np.asarray(adjacency[b], np.float64)
        for i in range(LAYER_GNN):
            hs = np.maximum(xs @ p["W_gnn_T"][i] + p["b_gnn"][i], 0.0)
            xs = xs + A @ hs
        compound = xs.mean(0, keepdims=True)

        c = p["embed_word"][words[b]]
        for l in range(LAYER_CNN):
            cp = np.pad(c, ((WINDOW, WINDOW), (WINDOW, WINDOW)))
            out = np.zeros_like(c)
            for di in range(KSIZE):
                for dj in range(KSIZE):
                    out = out + p["conv_w"][l, di, dj] * cp[di:di + N_WORDS, dj:dj + DIM]
            c = np.maximum(out + p["conv_b"][l], 0.0)

        h = np.maximum(compound @ p["W_att_T"] + p["b_att"], 0.0)
        hs = np.maximum(c @ p["W_att_T"] + p["b_att"], 0.0)
        weights = np.tanh(h @ hs.T)
        ys = weights.T * hs
        protein = ys.mean(0, keepdims=True)

        cat = np.concatenate([compound, protein], axis=1)
        for j in range(LAYER_OUT):
            cat = np.maximum(cat @ p["W_out_T"][j] + p["b_out"][j], 0.0)
        outs[b] = (cat @ p["W_int_T"] + p["b_int"])[0]
    return outs


if __name__ == "__main__":
    key = jax.random.PRNGKey(0)
    kp, kf, ka, kw = jax.random.split(key, 4)
    raw = init_params(kp)
    pack32, pack64 = pack_params(raw)

    B = 64
    fingerprints = jax.random.randint(kf, (B, N_ATOMS), 0, N_FINGERPRINT, dtype=jnp.int32)
    words = jax.random.randint(kw, (B, N_WORDS), 0, N_WORD, dtype=jnp.int32)
    adjacency = (jax.random.uniform(ka, (B, N_ATOMS, N_ATOMS)) > 0.5).astype(jnp.float32)
    adjacency = jnp.maximum(adjacency, jnp.transpose(adjacency, (0, 2, 1)))

    interaction = cpi_forward(fingerprints, adjacency, words, pack32, pack64)
    jax.block_until_ready(interaction)
    assert interaction.shape == (B, 2)

    ref = _reference_forward_np(np.asarray(fingerprints), np.asarray(adjacency),
                                np.asarray(words), raw)
    np.testing.assert_allclose(np.asarray(interaction), ref, rtol=3e-2, atol=3e-2)
    print("KERNEL_OK")
</pallas_src>

<mosaic_0001>
module attributes {stable_mosaic.version = 11 : i64} {
  func.func @_cpi_kernel(%arg0: i32, %arg1: memref<128x1xi32, #tpu.memory_space<vmem>>, %arg2: memref<128x128xf32, #tpu.memory_space<vmem>>, %arg3: memref<256x1xi32, #tpu.memory_space<vmem>>, %arg4: memref<496x32xf32, #tpu.memory_space<vmem>>, %arg5: memref<208x64xf32, #tpu.memory_space<vmem>>, %arg6: memref<16x2xf32, #tpu.memory_space<vmem>>) attributes {dimension_semantics = [#tpu.dimension_semantics<parallel>], iteration_bounds = array<i64: 4>, scalar_prefetch = 0 : i64, scratch_operands = 0 : i64, tpu.core_type = #tpu.core_type<tc>, window_params = [{transform_indices = @transform_0, window_bounds = array<i64: 128, 1>}, {transform_indices = @transform_1, window_bounds = array<i64: 128, 128>}, {transform_indices = @transform_2, window_bounds = array<i64: 256, 1>}, {pipeline_mode = #tpu.pipeline_mode<synchronous>, transform_indices = @transform_3, window_bounds = array<i64: 496, 32>}, {pipeline_mode = #tpu.pipeline_mode<synchronous>, transform_indices = @transform_4, window_bounds = array<i64: 208, 64>}, {transform_indices = @transform_5, window_bounds = array<i64: 16, 2>}]} {
    %c0 = arith.constant 0 : index
    %c0_0 = arith.constant 0 : index
    %0 = vector.load %arg1[%c0, %c0_0] : memref<128x1xi32, #tpu.memory_space<vmem>>, vector<128x1xi32>
    %1 = tpu.iota {dimensions = array<i32: 1>} : vector<128x20xi32>
    %2 = vector.broadcast %0 : vector<128x1xi32> to vector<128x20xi32>
    %3 = arith.cmpi eq, %2, %1 : vector<128x20xi32>
    %4 = arith.extui %3 : vector<128x20xi1> to vector<128x20xi32>
    %5 = arith.sitofp %4 : vector<128x20xi32> to vector<128x20xf32>
    %c0_1 = arith.constant 0 : index
    %c0_2 = arith.constant 0 : index
    %6 = vector.load %arg4[%c0_1, %c0_2] : memref<496x32xf32, #tpu.memory_space<vmem>>, vector<20x32xf32>
    %cst = arith.constant dense<0.000000e+00> : vector<128x32xf32>
    %7 = tpu.matmul %5, %6, %cst {dimension_numbers = #tpu.dot_dimension_numbers<[1], [0], [0], [1], [0, 0, 1, 1], [], []>} : vector<128x20xf32>, vector<20x32xf32>, vector<128x32xf32> -> vector<128x32xf32>
    %c0_3 = arith.constant 0 : index
    %c0_4 = arith.constant 0 : index
    %8 = vector.load %arg3[%c0_3, %c0_4] : memref<256x1xi32, #tpu.memory_space<vmem>>, vector<256x1xi32>
    %9 = tpu.iota {dimensions = array<i32: 1>} : vector<256x30xi32>
    %10 = vector.broadcast %8 : vector<256x1xi32> to vector<256x30xi32>
    %11 = arith.cmpi eq, %10, %9 : vector<256x30xi32>
    %12 = arith.extui %11 : vector<256x30xi1> to vector<256x30xi32>
    %13 = arith.sitofp %12 : vector<256x30xi32> to vector<256x30xf32>
    %c24 = arith.constant 24 : index
    %c0_5 = arith.constant 0 : index
    %14 = vector.load %arg4[%c24, %c0_5] : memref<496x32xf32, #tpu.memory_space<vmem>>, vector<30x32xf32>
    %cst_6 = arith.constant dense<0.000000e+00> : vector<256x32xf32>
    %15 = tpu.matmul %13, %14, %cst_6 {dimension_numbers = #tpu.dot_dimension_numbers<[1], [0], [0], [1], [0, 0, 1, 1], [], []>} : vector<256x30xf32>, vector<30x32xf32>, vector<256x32xf32> -> vector<256x32xf32>
    %c0_7 = arith.constant 0 : index
    %c0_8 = arith.constant 0 : index
    %16 = vector.load %arg2[%c0_7, %c0_8] : memref<128x128xf32, #tpu.memory_space<vmem>>, vector<128x128xf32>
    %c56 = arith.constant 56 : index
    %c0_9 = arith.constant 0 : index
    %17 = vector.load %arg4[%c56, %c0_9] : memref<496x32xf32, #tpu.memory_space<vmem>>, vector<32x32xf32>
    %c120 = arith.constant 120 : index
    %c0_10 = arith.constant 0 : index
    %18 = vector.load %arg4[%c120, %c0_10] : memref<496x32xf32, #tpu.memory_space<vmem>>, vector<1x32xf32>
    %cst_11 = arith.constant dense<0.000000e+00> : vector<128x32xf32>
    %19 = tpu.matmul %7, %17, %cst_11 {dimension_numbers = #tpu.dot_dimension_numbers<[1], [0], [0], [1], [0, 0, 1, 1], [], []>} : vector<128x32xf32>, vector<32x32xf32>, vector<128x32xf32> -> vector<128x32xf32>
    %20 = vector.broadcast %18 : vector<1x32xf32> to vector<128x32xf32>
    %21 = arith.addf %19, %20 : vector<128x32xf32>
    %cst_12 = arith.constant 0.000000e+00 : f32
    %22 = vector.broadcast %cst_12 : f32 to vector<128x32xf32>
    %23 = arith.maximumf %21, %22 : vector<128x32xf32>
    %cst_13 = arith.constant dense<0.000000e+00> : vector<128x32xf32>
    %24 = tpu.matmul %16, %23, %cst_13 {dimension_numbers = #tpu.dot_dimension_numbers<[1], [0], [0], [1], [0, 0, 1, 1], [], []>} : vector<128x128xf32>, vector<128x32xf32>, vector<128x32xf32> -> vector<128x32xf32>
    %25 = arith.addf %7, %24 : vector<128x32xf32>
    %c88 = arith.constant 88 : index
    %c0_14 = arith.constant 0 : index
    %26 = vector.load %arg4[%c88, %c0_14] : memref<496x32xf32, #tpu.memory_space<vmem>>, vector<32x32xf32>
    %c121 = arith.constant 121 : index
    %c0_15 = arith.constant 0 : index
    %27 = vector.load %arg4[%c121, %c0_15] : memref<496x32xf32, #tpu.memory_space<vmem>>, vector<1x32xf32>
    %cst_16 = arith.constant dense<0.000000e+00> : vector<128x32xf32>
    %28 = tpu.matmul %25, %26, %cst_16 {dimension_numbers = #tpu.dot_dimension_numbers<[1], [0], [0], [1], [0, 0, 1, 1], [], []>} : vector<128x32xf32>, vector<32x32xf32>, vector<128x32xf32> -> vector<128x32xf32>
    %29 = vector.broadcast %27 : vector<1x32xf32> to vector<128x32xf32>
    %30 = arith.addf %28, %29 : vector<128x32xf32>
    %cst_17 = arith.constant 0.000000e+00 : f32
    %31 = vector.broadcast %cst_17 : f32 to vector<128x32xf32>
    %32 = arith.maximumf %30, %31 : vector<128x32xf32>
    %cst_18 = arith.constant dense<0.000000e+00> : vector<128x32xf32>
    %33 = tpu.matmul %16, %32, %cst_18 {dimension_numbers = #tpu.dot_dimension_numbers<[1], [0], [0], [1], [0, 0, 1, 1], [], []>} : vector<128x128xf32>, vector<128x32xf32>, vector<128x32xf32> -> vector<128x32xf32>
    %34 = arith.addf %25, %33 : vector<128x32xf32>
    %35 = vector.shape_cast %34 : vector<128x32xf32> to vector<16x8x32xf32>
    %cst_19 = arith.constant dense<0.000000e+00> : vector<16x32xf32>
    %36 = vector.multi_reduction <add>, %35, %cst_19 [1] : vector<16x8x32xf32> to vector<16x32xf32>
    %cst_20 = arith.constant 8.000000e+00 : f32
    %37 = vector.broadcast %cst_20 : f32 to vector<16x32xf32>
    %38 = arith.divf %36, %37 : vector<16x32xf32>
    %39 = tpu.iota {dimensions = array<i32: 0>} : vector<256x1xi32>
    %c16_i32 = arith.constant 16 : i32
    %c0_i32 = arith.constant 0 : i32
    %40 = arith.cmpi eq, %c16_i32, %c0_i32 : i32
    %c1_i32 = arith.constant 1 : i32
    %41 = arith.select %40, %c1_i32, %c16_i32 : i32
    %42 = vector.broadcast %41 : i32 to vector<256x1xi32>
    %43 = arith.remsi %39, %42 : vector<256x1xi32>
    %c0_i32_21 = arith.constant 0 : i32
    %44 = vector.broadcast %c0_i32_21 : i32 to vector<256x1xi32>
    %45 = arith.cmpi ne, %43, %44 : vector<256x1xi32>
    %c0_i32_22 = arith.constant 0 : i32
    %46 = vector.broadcast %c0_i32_22 : i32 to vector<256x1xi32>
    %47 = arith.cmpi slt, %43, %46 : vector<256x1xi32>
    %c0_i32_23 = arith.constant 0 : i32
    %48 = arith.cmpi slt, %41, %c0_i32_23 : i32
    %49 = vector.broadcast %48 : i1 to vector<256x1xi1>
    %50 = vector.broadcast %49 : vector<256x1xi1> to vector<256x1xi1>
    %51 = arith.xori %47, %50 : vector<256x1xi1>
    %52 = arith.andi %51, %45 : vector<256x1xi1>
    %53 = vector.broadcast %41 : i32 to vector<256x1xi32>
    %54 = arith.addi %43, %53 : vector<256x1xi32>
    %55 = arith.select %52, %54, %43 : vector<256x1xi1>, vector<256x1xi32>
    %c-2_i32 = arith.constant -2 : i32
    %56 = vector.broadcast %c-2_i32 : i32 to vector<256x1xi32>
    %57 = arith.addi %55, %56 : vector<256x1xi32>
    %c0_i32_24 = arith.constant 0 : i32
    %58 = vector.broadcast %c0_i32_24 : i32 to vector<256x1xi32>
    %59 = arith.cmpi sge, %57, %58 : vector<256x1xi32>
    %c-2_i32_25 = arith.constant -2 : i32
    %60 = vector.broadcast %c-2_i32_25 : i32 to vector<256x1xi32>
    %61 = arith.addi %55, %60 : vector<256x1xi32>
    %c16_i32_26 = arith.constant 16 : i32
    %62 = vector.broadcast %c16_i32_26 : i32 to vector<256x1xi32>
    %63 = arith.cmpi slt, %61, %62 : vector<256x1xi32>
    %64 = arith.andi %59, %63 : vector<256x1xi1>
    %c-1_i32 = arith.constant -1 : i32
    %65 = vector.broadcast %c-1_i32 : i32 to vector<256x1xi32>
    %66 = arith.addi %55, %65 : vector<256x1xi32>
    %c0_i32_27 = arith.constant 0 : i32
    %67 = vector.broadcast %c0_i32_27 : i32 to vector<256x1xi32>
    %68 = arith.cmpi sge, %66, %67 : vector<256x1xi32>
    %c-1_i32_28 = arith.constant -1 : i32
    %69 = vector.broadcast %c-1_i32_28 : i32 to vector<256x1xi32>
    %70 = arith.addi %55, %69 : vector<256x1xi32>
    %c16_i32_29 = arith.constant 16 : i32
    %71 = vector.broadcast %c16_i32_29 : i32 to vector<256x1xi32>
    %72 = arith.cmpi slt, %70, %71 : vector<256x1xi32>
    %73 = arith.andi %68, %72 : vector<256x1xi1>
    %c1_i32_30 = arith.constant 1 : i32
    %74 = vector.broadcast %c1_i32_30 : i32 to vector<256x1xi32>
    %75 = arith.addi %55, %74 : vector<256x1xi32>
    %c0_i32_31 = arith.constant 0 : i32
    %76 = vector.broadcast %c0_i32_31 : i32 to vector<256x1xi32>
    %77 = arith.cmpi sge, %75, %76 : vector<256x1xi32>
    %c1_i32_32 = arith.constant 1 : i32
    %78 = vector.broadcast %c1_i32_32 : i32 to vector<256x1xi32>
    %79 = arith.addi %55, %78 : vector<256x1xi32>
    %c16_i32_33 = arith.constant 16 : i32
    %80 = vector.broadcast %c16_i32_33 : i32 to vector<256x1xi32>
    %81 = arith.cmpi slt, %79, %80 : vector<256x1xi32>
    %82 = arith.andi %77, %81 : vector<256x1xi1>
    %c2_i32 = arith.constant 2 : i32
    %83 = vector.broadcast %c2_i32 : i32 to vector<256x1xi32>
    %84 = arith.addi %55, %83 : vector<256x1xi32>
    %c0_i32_34 = arith.constant 0 : i32
    %85 = vector.broadcast %c0_i32_34 : i32 to vector<256x1xi32>
    %86 = arith.cmpi sge, %84, %85 : vector<256x1xi32>
    %c2_i32_35 = arith.constant 2 : i32
    %87 = vector.broadcast %c2_i32_35 : i32 to vector<256x1xi32>
    %88 = arith.addi %55, %87 : vector<256x1xi32>
    %c16_i32_36 = arith.constant 16 : i32
    %89 = vector.broadcast %c16_i32_36 : i32 to vector<256x1xi32>
    %90 = arith.cmpi slt, %88, %89 : vector<256x1xi32>
    %91 = arith.andi %86, %90 : vector<256x1xi1>
    %cst_37 = arith.constant 0.000000e+00 : f32
    %92 = vector.broadcast %cst_37 : f32 to vector<256x32xf32>
    %c128 = arith.constant 128 : index
    %c0_38 = arith.constant 0 : index
    %93 = vector.load %arg4[%c128, %c0_38] : memref<496x32xf32, #tpu.memory_space<vmem>>, vector<32x32xf32>
    %c2_i32_39 = arith.constant 2 : i32
    %94 = tpu.dynamic_rotate %15 by %c2_i32_39 dim 0 : vector<256x32xf32>, i32 -> vector<256x32xf32>
    %cst_40 = arith.constant 0.000000e+00 : f32
    %95 = vector.shape_cast %64 : vector<256x1xi1> to vector<256x1xi1>
    %96 = vector.broadcast %95 : vector<256x1xi1> to vector<256x32xi1>
    %97 = vector.broadcast %cst_40 : f32 to vector<256x32xf32>
    %98 = arith.select %96, %94, %97 : vector<256x32xi1>, vector<256x32xf32>
    %cst_41 = arith.constant dense<0.000000e+00> : vector<256x32xf32>
    %99 = tpu.matmul %98, %93, %cst_41 {dimension_numbers = #tpu.dot_dimension_numbers<[1], [0], [0], [1], [0, 0, 1, 1], [], []>} : vector<256x32xf32>, vector<32x32xf32>, vector<256x32xf32> -> vector<256x32xf32>
    %100 = arith.addf %92, %99 : vector<256x32xf32>
    %c160 = arith.constant 160 : index
    %c0_42 = arith.constant 0 : index
    %101 = vector.load %arg4[%c160, %c0_42] : memref<496x32xf32, #tpu.memory_space<vmem>>, vector<32x32xf32>
    %c1_i32_43 = arith.constant 1 : i32
    %102 = tpu.dynamic_rotate %15 by %c1_i32_43 dim 0 : vector<256x32xf32>, i32 -> vector<256x32xf32>
    %cst_44 = arith.constant 0.000000e+00 : f32
    %103 = vector.shape_cast %73 : vector<256x1xi1> to vector<256x1xi1>
    %104 = vector.broadcast %103 : vector<256x1xi1> to vector<256x32xi1>
    %105 = vector.broadcast %cst_44 : f32 to vector<256x32xf32>
    %106 = arith.select %104, %102, %105 : vector<256x32xi1>, vector<256x32xf32>
    %cst_45 = arith.constant dense<0.000000e+00> : vector<256x32xf32>
    %107 = tpu.matmul %106, %101, %cst_45 {dimension_numbers = #tpu.dot_dimension_numbers<[1], [0], [0], [1], [0, 0, 1, 1], [], []>} : vector<256x32xf32>, vector<32x32xf32>, vector<256x32xf32> -> vector<256x32xf32>
    %108 = arith.addf %100, %107 : vector<256x32xf32>
    %c192 = arith.constant 192 : index
    %c0_46 = arith.constant 0 : index
    %109 = vector.load %arg4[%c192, %c0_46] : memref<496x32xf32, #tpu.memory_space<vmem>>, vector<32x32xf32>
    %cst_47 = arith.constant dense<0.000000e+00> : vector<256x32xf32>
    %110 = tpu.matmul %15, %109, %cst_47 {dimension_numbers = #tpu.dot_dimension_numbers<[1], [0], [0], [1], [0, 0, 1, 1], [], []>} : vector<256x32xf32>, vector<32x32xf32>, vector<256x32xf32> -> vector<256x32xf32>
    %111 = arith.addf %108, %110 : vector<256x32xf32>
    %c224 = arith.constant 224 : index
    %c0_48 = arith.constant 0 : index
    %112 = vector.load %arg4[%c224, %c0_48] : memref<496x32xf32, #tpu.memory_space<vmem>>, vector<32x32xf32>
    %c255_i32 = arith.constant 255 : i32
    %113 = tpu.dynamic_rotate %15 by %c255_i32 dim 0 : vector<256x32xf32>, i32 -> vector<256x32xf32>
    %cst_49 = arith.constant 0.000000e+00 : f32
    %114 = vector.shape_cast %82 : vector<256x1xi1> to vector<256x1xi1>
    %115 = vector.broadcast %114 : vector<256x1xi1> to vector<256x32xi1>
    %116 = vector.broadcast %cst_49 : f32 to vector<256x32xf32>
    %117 = arith.select %115, %113, %116 : vector<256x32xi1>, vector<256x32xf32>
    %cst_50 = arith.constant dense<0.000000e+00> : vector<256x32xf32>
    %118 = tpu.matmul %117, %112, %cst_50 {dimension_numbers = #tpu.dot_dimension_numbers<[1], [0], [0], [1], [0, 0, 1, 1], [], []>} : vector<256x32xf32>, vector<32x32xf32>, vector<256x32xf32> -> vector<256x32xf32>
    %119 = arith.addf %111, %118 : vector<256x32xf32>
    %c256 = arith.constant 256 : index
    %c0_51 = arith.constant 0 : index
    %120 = vector.load %arg4[%c256, %c0_51] : memref<496x32xf32, #tpu.memory_space<vmem>>, vector<32x32xf32>
    %c254_i32 = arith.constant 254 : i32
    %121 = tpu.dynamic_rotate %15 by %c254_i32 dim 0 : vector<256x32xf32>, i32 -> vector<256x32xf32>
    %cst_52 = arith.constant 0.000000e+00 : f32
    %122 = vector.shape_cast %91 : vector<256x1xi1> to vector<256x1xi1>
    %123 = vector.broadcast %122 : vector<256x1xi1> to vector<256x32xi1>
    %124 = vector.broadcast %cst_52 : f32 to vector<256x32xf32>
    %125 = arith.select %123, %121, %124 : vector<256x32xi1>, vector<256x32xf32>
    %cst_53 = arith.constant dense<0.000000e+00> : vector<256x32xf32>
    %126 = tpu.matmul %125, %120, %cst_53 {dimension_numbers = #tpu.dot_dimension_numbers<[1], [0], [0], [1], [0, 0, 1, 1], [], []>} : vector<256x32xf32>, vector<32x32xf32>, vector<256x32xf32> -> vector<256x32xf32>
    %127 = arith.addf %119, %126 : vector<256x32xf32>
    %c448 = arith.constant 448 : index
    %c0_54 = arith.constant 0 : index
    %128 = vector.load %arg4[%c448, %c0_54] : memref<496x32xf32, #tpu.memory_space<vmem>>, vector<1x32xf32>
    %129 = vector.broadcast %128 : vector<1x32xf32> to vector<256x32xf32>
    %130 = arith.addf %127, %129 : vector<256x32xf32>
    %cst_55 = arith.constant 0.000000e+00 : f32
    %131 = vector.broadcast %cst_55 : f32 to vector<256x32xf32>
    %132 = arith.maximumf %130, %131 : vector<256x32xf32>
    %cst_56 = arith.constant 0.000000e+00 : f32
    %133 = vector.broadcast %cst_56 : f32 to vector<256x32xf32>
    %c288 = arith.constant 288 : index
    %c0_57 = arith.constant 0 : index
    %134 = vector.load %arg4[%c288, %c0_57] : memref<496x32xf32, #tpu.memory_space<vmem>>, vector<32x32xf32>
    %c2_i32_58 = arith.constant 2 : i32
    %135 = tpu.dynamic_rotate %132 by %c2_i32_58 dim 0 : vector<256x32xf32>, i32 -> vector<256x32xf32>
    %cst_59 = arith.constant 0.000000e+00 : f32
    %136 = vector.shape_cast %64 : vector<256x1xi1> to vector<256x1xi1>
    %137 = vector.broadcast %136 : vector<256x1xi1> to vector<256x32xi1>
    %138 = vector.broadcast %cst_59 : f32 to vector<256x32xf32>
    %139 = arith.select %137, %135, %138 : vector<256x32xi1>, vector<256x32xf32>
    %cst_60 = arith.constant dense<0.000000e+00> : vector<256x32xf32>
    %140 = tpu.matmul %139, %134, %cst_60 {dimension_numbers = #tpu.dot_dimension_numbers<[1], [0], [0], [1], [0, 0, 1, 1], [], []>} : vector<256x32xf32>, vector<32x32xf32>, vector<256x32xf32> -> vector<256x32xf32>
    %141 = arith.addf %133, %140 : vector<256x32xf32>
    %c320 = arith.constant 320 : index
    %c0_61 = arith.constant 0 : index
    %142 = vector.load %arg4[%c320, %c0_61] : memref<496x32xf32, #tpu.memory_space<vmem>>, vector<32x32xf32>
    %c1_i32_62 = arith.constant 1 : i32
    %143 = tpu.dynamic_rotate %132 by %c1_i32_62 dim 0 : vector<256x32xf32>, i32 -> vector<256x32xf32>
    %cst_63 = arith.constant 0.000000e+00 : f32
    %144 = vector.shape_cast %73 : vector<256x1xi1> to vector<256x1xi1>
    %145 = vector.broadcast %144 : vector<256x1xi1> to vector<256x32xi1>
    %146 = vector.broadcast %cst_63 : f32 to vector<256x32xf32>
    %147 = arith.select %145, %143, %146 : vector<256x32xi1>, vector<256x32xf32>
    %cst_64 = arith.constant dense<0.000000e+00> : vector<256x32xf32>
    %148 = tpu.matmul %147, %142, %cst_64 {dimension_numbers = #tpu.dot_dimension_numbers<[1], [0], [0], [1], [0, 0, 1, 1], [], []>} : vector<256x32xf32>, vector<32x32xf32>, vector<256x32xf32> -> vector<256x32xf32>
    %149 = arith.addf %141, %148 : vector<256x32xf32>
    %c352 = arith.constant 352 : index
    %c0_65 = arith.constant 0 : index
    %150 = vector.load %arg4[%c352, %c0_65] : memref<496x32xf32, #tpu.memory_space<vmem>>, vector<32x32xf32>
    %cst_66 = arith.constant dense<0.000000e+00> : vector<256x32xf32>
    %151 = tpu.matmul %132, %150, %cst_66 {dimension_numbers = #tpu.dot_dimension_numbers<[1], [0], [0], [1], [0, 0, 1, 1], [], []>} : vector<256x32xf32>, vector<32x32xf32>, vector<256x32xf32> -> vector<256x32xf32>
    %152 = arith.addf %149, %151 : vector<256x32xf32>
    %c384 = arith.constant 384 : index
    %c0_67 = arith.constant 0 : index
    %153 = vector.load %arg4[%c384, %c0_67] : memref<496x32xf32, #tpu.memory_space<vmem>>, vector<32x32xf32>
    %c255_i32_68 = arith.constant 255 : i32
    %154 = tpu.dynamic_rotate %132 by %c255_i32_68 dim 0 : vector<256x32xf32>, i32 -> vector<256x32xf32>
    %cst_69 = arith.constant 0.000000e+00 : f32
    %155 = vector.shape_cast %82 : vector<256x1xi1> to vector<256x1xi1>
    %156 = vector.broadcast %155 : vector<256x1xi1> to vector<256x32xi1>
    %157 = vector.broadcast %cst_69 : f32 to vector<256x32xf32>
    %158 = arith.select %156, %154, %157 : vector<256x32xi1>, vector<256x32xf32>
    %cst_70 = arith.constant dense<0.000000e+00> : vector<256x32xf32>
    %159 = tpu.matmul %158, %153, %cst_70 {dimension_numbers = #tpu.dot_dimension_numbers<[1], [0], [0], [1], [0, 0, 1, 1], [], []>} : vector<256x32xf32>, vector<32x32xf32>, vector<256x32xf32> -> vector<256x32xf32>
    %160 = arith.addf %152, %159 : vector<256x32xf32>
    %c416 = arith.constant 416 : index
    %c0_71 = arith.constant 0 : index
    %161 = vector.load %arg4[%c416, %c0_71] : memref<496x32xf32, #tpu.memory_space<vmem>>, vector<32x32xf32>
    %c254_i32_72 = arith.constant 254 : i32
    %162 = tpu.dynamic_rotate %132 by %c254_i32_72 dim 0 : vector<256x32xf32>, i32 -> vector<256x32xf32>
    %cst_73 = arith.constant 0.000000e+00 : f32
    %163 = vector.shape_cast %91 : vector<256x1xi1> to vector<256x1xi1>
    %164 = vector.broadcast %163 : vector<256x1xi1> to vector<256x32xi1>
    %165 = vector.broadcast %cst_73 : f32 to vector<256x32xf32>
    %166 = arith.select %164, %162, %165 : vector<256x32xi1>, vector<256x32xf32>
    %cst_74 = arith.constant dense<0.000000e+00> : vector<256x32xf32>
    %167 = tpu.matmul %166, %161, %cst_74 {dimension_numbers = #tpu.dot_dimension_numbers<[1], [0], [0], [1], [0, 0, 1, 1], [], []>} : vector<256x32xf32>, vector<32x32xf32>, vector<256x32xf32> -> vector<256x32xf32>
    %168 = arith.addf %160, %167 : vector<256x32xf32>
    %c449 = arith.constant 449 : index
    %c0_75 = arith.constant 0 : index
    %169 = vector.load %arg4[%c449, %c0_75] : memref<496x32xf32, #tpu.memory_space<vmem>>, vector<1x32xf32>
    %170 = vector.broadcast %169 : vector<1x32xf32> to vector<256x32xf32>
    %171 = arith.addf %168, %170 : vector<256x32xf32>
    %cst_76 = arith.constant 0.000000e+00 : f32
    %172 = vector.broadcast %cst_76 : f32 to vector<256x32xf32>
    %173 = arith.maximumf %171, %172 : vector<256x32xf32>
    %c456 = arith.constant 456 : index
    %c0_77 = arith.constant 0 : index
    %174 = vector.load %arg4[%c456, %c0_77] : memref<496x32xf32, #tpu.memory_space<vmem>>, vector<32x32xf32>
    %c488 = arith.constant 488 : index
    %c0_78 = arith.constant 0 : index
    %175 = vector.load %arg4[%c488, %c0_78] : memref<496x32xf32, #tpu.memory_space<vmem>>, vector<1x32xf32>
    %cst_79 = arith.constant dense<0.000000e+00> : vector<16x32xf32>
    %176 = tpu.matmul %38, %174, %cst_79 {dimension_numbers = #tpu.dot_dimension_numbers<[1], [0], [0], [1], [0, 0, 1, 1], [], []>} : vector<16x32xf32>, vector<32x32xf32>, vector<16x32xf32> -> vector<16x32xf32>
    %177 = vector.broadcast %175 : vector<1x32xf32> to vector<16x32xf32>
    %178 = arith.addf %176, %177 : vector<16x32xf32>
    %cst_80 = arith.constant 0.000000e+00 : f32
    %179 = vector.broadcast %cst_80 : f32 to vector<16x32xf32>
    %180 = arith.maximumf %178, %179 : vector<16x32xf32>
    %cst_81 = arith.constant dense<0.000000e+00> : vector<256x32xf32>
    %181 = tpu.matmul %173, %174, %cst_81 {dimension_numbers = #tpu.dot_dimension_numbers<[1], [0], [0], [1], [0, 0, 1, 1], [], []>} : vector<256x32xf32>, vector<32x32xf32>, vector<256x32xf32> -> vector<256x32xf32>
    %182 = vector.broadcast %175 : vector<1x32xf32> to vector<256x32xf32>
    %183 = arith.addf %181, %182 : vector<256x32xf32>
    %cst_82 = arith.constant 0.000000e+00 : f32
    %184 = vector.broadcast %cst_82 : f32 to vector<256x32xf32>
    %185 = arith.maximumf %183, %184 : vector<256x32xf32>
    %186 = vector.shape_cast %185 : vector<256x32xf32> to vector<16x16x32xf32>
    %187 = vector.shape_cast %180 : vector<16x32xf32> to vector<16x1x32xf32>
    %188 = vector.broadcast %187 : vector<16x1x32xf32> to vector<16x16x32xf32>
    %189 = arith.mulf %188, %186 : vector<16x16x32xf32>
    %cst_83 = arith.constant dense<0.000000e+00> : vector<16x16xf32>
    %190 = vector.multi_reduction <add>, %189, %cst_83 [2] : vector<16x16x32xf32> to vector<16x16xf32>
    %191 = vector.shape_cast %190 : vector<16x16xf32> to vector<16x16x1xf32>
    %192 = math.tanh %191 : vector<16x16x1xf32>
    %193 = vector.broadcast %192 : vector<16x16x1xf32> to vector<16x16x32xf32>
    %194 = arith.mulf %193, %186 : vector<16x16x32xf32>
    %cst_84 = arith.constant dense<0.000000e+00> : vector<16x32xf32>
    %195 = vector.multi_reduction <add>, %194, %cst_84 [1] : vector<16x16x32xf32> to vector<16x32xf32>
    %cst_85 = arith.constant 1.600000e+01 : f32
    %196 = vector.broadcast %cst_85 : f32 to vector<16x32xf32>
    %197 = arith.divf %195, %196 : vector<16x32xf32>
    %c0_86 = arith.constant 0 : index
    %c0_87 = arith.constant 0 : index
    %198 = vector.load %arg5[%c0_86, %c0_87] : memref<208x64xf32, #tpu.memory_space<vmem>>, vector<32x64xf32>
    %c32 = arith.constant 32 : index
    %c0_88 = arith.constant 0 : index
    %199 = vector.load %arg5[%c32, %c0_88] : memref<208x64xf32, #tpu.memory_space<vmem>>, vector<32x64xf32>
    %c128_89 = arith.constant 128 : index
    %c0_90 = arith.constant 0 : index
    %200 = vector.load %arg5[%c128_89, %c0_90] : memref<208x64xf32, #tpu.memory_space<vmem>>, vector<1x64xf32>
    %cst_91 = arith.constant dense<0.000000e+00> : vector<16x64xf32>
    %201 = tpu.matmul %38, %198, %cst_91 {dimension_numbers = #tpu.dot_dimension_numbers<[1], [0], [0], [1], [0, 0, 1, 1], [], []>} : vector<16x32xf32>, vector<32x64xf32>, vector<16x64xf32> -> vector<16x64xf32>
    %cst_92 = arith.constant dense<0.000000e+00> : vector<16x64xf32>
    %202 = tpu.matmul %197, %199, %cst_92 {dimension_numbers = #tpu.dot_dimension_numbers<[1], [0], [0], [1], [0, 0, 1, 1], [], []>} : vector<16x32xf32>, vector<32x64xf32>, vector<16x64xf32> -> vector<16x64xf32>
    %203 = arith.addf %201, %202 : vector<16x64xf32>
    %204 = vector.broadcast %200 : vector<1x64xf32> to vector<16x64xf32>
    %205 = arith.addf %203, %204 : vector<16x64xf32>
    %cst_93 = arith.constant 0.000000e+00 : f32
    %206 = vector.broadcast %cst_93 : f32 to vector<16x64xf32>
    %207 = arith.maximumf %205, %206 : vector<16x64xf32>
    %c64 = arith.constant 64 : index
    %c0_94 = arith.constant 0 : index
    %208 = vector.load %arg5[%c64, %c0_94] : memref<208x64xf32, #tpu.memory_space<vmem>>, vector<64x64xf32>
    %c129 = arith.constant 129 : index
    %c0_95 = arith.constant 0 : index
    %209 = vector.load %arg5[%c129, %c0_95] : memref<208x64xf32, #tpu.memory_space<vmem>>, vector<1x64xf32>
    %cst_96 = arith.constant dense<0.000000e+00> : vector<16x64xf32>
    %210 = tpu.matmul %207, %208, %cst_96 {dimension_numbers = #tpu.dot_dimension_numbers<[1], [0], [0], [1], [0, 0, 1, 1], [], []>} : vector<16x64xf32>, vector<64x64xf32>, vector<16x64xf32> -> vector<16x64xf32>
    %211 = vector.broadcast %209 : vector<1x64xf32> to vector<16x64xf32>
    %212 = arith.addf %210, %211 : vector<16x64xf32>
    %cst_97 = arith.constant 0.000000e+00 : f32
    %213 = vector.broadcast %cst_97 : f32 to vector<16x64xf32>
    %214 = arith.maximumf %212, %213 : vector<16x64xf32>
    %c136 = arith.constant 136 : index
    %c0_98 = arith.constant 0 : index
    %215 = vector.load %arg5[%c136, %c0_98] : memref<208x64xf32, #tpu.memory_space<vmem>>, vector<64x64xf32>
    %c200 = arith.constant 200 : index
    %c0_99 = arith.constant 0 : index
    %216 = vector.load %arg5[%c200, %c0_99] : memref<208x64xf32, #tpu.memory_space<vmem>>, vector<1x64xf32>
    %cst_100 = arith.constant dense<0.000000e+00> : vector<16x64xf32>
    %217 = tpu.matmul %214, %215, %cst_100 {dimension_numbers = #tpu.dot_dimension_numbers<[1], [0], [0], [1], [0, 0, 1, 1], [], []>} : vector<16x64xf32>, vector<64x64xf32>, vector<16x64xf32> -> vector<16x64xf32>
    %218 = vector.broadcast %216 : vector<1x64xf32> to vector<16x64xf32>
    %219 = arith.addf %217, %218 : vector<16x64xf32>
    %220 = vector.extract_strided_slice %219 {offsets = [0, 0], sizes = [16, 2], strides = [1, 1]} : vector<16x64xf32> to vector<16x2xf32>
    %c0_101 = arith.constant 0 : index
    %c0_102 = arith.constant 0 : index
    %221 = vector.load %arg6[%c0_101, %c0_102] : memref<16x2xf32, #tpu.memory_space<vmem>>, vector<16x2xf32>
    tpu.vector_store %arg6[%c0_101, %c0_102], %220 {strides = array<i32>} : memref<16x2xf32, #tpu.memory_space<vmem>>, vector<16x2xf32>,
    return
  }
  func.func @transform_0(%arg0: i32) -> (i32, i32) {
    %c0_i32 = arith.constant 0 : i32
    %c0_i32_0 = arith.constant 0 : i32
    return %arg0, %c0_i32 : i32, i32
  }
  func.func @transform_1(%arg0: i32) -> (i32, i32) {
    %c0_i32 = arith.constant 0 : i32
    %c0_i32_0 = arith.constant 0 : i32
    return %arg0, %c0_i32 : i32, i32
  }
  func.func @transform_2(%arg0: i32) -> (i32, i32) {
    %c0_i32 = arith.constant 0 : i32
    %c0_i32_0 = arith.constant 0 : i32
    return %arg0, %c0_i32 : i32, i32
  }
  func.func @transform_3(%arg0: i32) -> (i32, i32) {
    %c0_i32 = arith.constant 0 : i32
    %c0_i32_0 = arith.constant 0 : i32
    %c0_i32_1 = arith.constant 0 : i32
    return %c0_i32, %c0_i32_0 : i32, i32
  }
  func.func @transform_4(%arg0: i32) -> (i32, i32) {
    %c0_i32 = arith.constant 0 : i32
    %c0_i32_0 = arith.constant 0 : i32
    %c0_i32_1 = arith.constant 0 : i32
    return %c0_i32, %c0_i32_0 : i32, i32
  }
  func.func @transform_5(%arg0: i32) -> (i32, i32) {
    %c0_i32 = arith.constant 0 : i32
    %c0_i32_0 = arith.constant 0 : i32
    return %arg0, %c0_i32 : i32, i32
  }
}

</mosaic_0001>

<bundles_post_ra>
// kernel: cpi_forward.1
= control target key start
LH: loop header
LB: loop body
LE: loop exit
PB: predicated region body
PF: predicated region fallthrough
CT: control target
= control target key end

     0   :  { %s11260_s18 = smov 0   ;;  %s15462_s0 = inlined_call_operand.vmem [shape: s32[512,1], index: 0, kind: input, shape index: {}]   ;;  %s15463_s1 = inlined_call_operand.vmem [shape: f32[512,128], index: 1, kind: input, shape index: {}]   ;;  %s15464_s2 = inlined_call_operand.vmem [shape: s32[1024,1], index: 2, kind: input, shape index: {}]   ;;  %s15465_s3 = inlined_call_operand.vmem [shape: f32[496,32], index: 3, kind: input, shape index: {}]   ;;  %s15466_s4 = inlined_call_operand.vmem [shape: f32[208,64], index: 4, kind: input, shape index: {}]   ;;  %s15467_s5 = inlined_call_operand.vmem [shape: f32[64,2], index: 5, kind: output, shape index: {}]  }
   0x1 LB: > { %s11266_s19 = sadd.s32 4294967295, %s11225_s18   ;;  %p9074_p0 = scmp.ge.s32.totalorder %s11225_s18, 1  ;;  %s11225_s18 = sphi %s11260_s18, %s15_s18  }
   0x2   : > { %p210_p1 = scmp.lt.s32.totalorder %s11225_s18, 5 }
   0x4   : > { %p211_p2 = pnand %p9074_p0, %p210_p1 }
   0x6   : > { %214 = sbr.rel (%p211_p2) target bundleno = 2794 (0xaea), region = 40 }
   0xb   : > { %s9075_s20 = sshll.u32 %s11266_s19, 4  ;;  %v11227_v0 = vmov 0   ;;  %v388_v1 = vld [vmem:[%s15465_s3 + $0x10] sm:$0xf]  ;;  %vm438_vm0 = vcmask 1043456   ;;  %v387_v2 = vld [vmem:[%s15465_s3 + $0x8] sm:$0xff]  ;;  %v288_v57 = vlaneseq }
   0xc   : > { %11139 = vset.pattern.permute.xlu1 %v11227_v0  ;;  %11138 = vset.pattern.permute.xlu0 %v11227_v0  ;;  %p249_p3 = scmp.lt.s32.totalorder %s9075_s20, 63  ;;  %s9079_s29 = sshll.u32 %s11266_s19, 5  ;;  %v386_v13 = vld [vmem:[%s15465_s3] sm:$0xff]  ;;  %v814_v18 = vld [vmem:[%s15465_s3 + $0x30] sm:$0x3f]  ;;  %vm912_vm1 = vcmask 1045504  }
   0xd   : > { %10178 = vmatprep.subr.msk.mxu0 %vm438_vm0, %v388_v1  ;;  %p261_p4 = scmp.lt.s32.totalorder %s9079_s29, 127  ;;  %10208 = vmatprep.subr.msk.mxu1 %vm912_vm1, %v814_v18  ;;  %v813_v19 = vld [vmem:[%s15465_s3 + $0x28] sm:$0xff]  ;;  %v812_v22 = vld [vmem:[%s15465_s3 + $0x20] sm:$0xff]  ;;  %v811_v23 = vld [vmem:[%s15465_s3 + $0x18] sm:$0xff]  ;;  %v11360_v58 = vand.u32 127, %v288_v57  ;;  %vm389_vm2 = vcmask 162816  }
   0xe   : > { %s16369_s20 = smov (!%p249_p3, %s9075_s20), 63  ;;  %10179 = vmatpush3.msk.msra.mxu0 %vm438_vm0, %v388_v1  ;;  %10209 = vmatpush3.msk.msra.mxu1 %vm912_vm1, %v814_v18  ;;  %v1160_v56 = vld [vmem:[%s15465_s3 + $0x50] sm:$0xff]  ;;  %v11228_v61 = vmov 0.0   ;;  %s9081_s7 = sshll.u32 %s11266_s19, 1 }
   0xf   : > { %s9076_s23 = sshll.u32 %s16369_s20, 3  ;;  %10180 = vmatprep.subr.mxu0 %v387_v2  ;;  %s16371_s29 = smov (!%p261_p4, %s9079_s29), 127  ;;  %10210 = vmatprep.subr.mxu1 %v813_v19 }
  0x10   : > { %s11285_s28 = scalar_lea.vmem %s15462_s0, %s9076_s23  ;;  %10181 = vmatpush3.msra.mxu0 %v387_v2  ;;  %s9080_s9 = sshll.u32 %s16371_s29, 3  ;;  %10211 = vmatpush3.msra.mxu1 %v813_v19 }
  0x11   : > { %v274_v3 = vld [vmem:[%s11285_s28 + $0x10] sm:$0xff]  ;;  %v272_v4 = vld [vmem:[%s11285_s28] sm:$0xff]  ;;  %v275_v5 = vld [vmem:[%s11285_s28 + $0x18] sm:$0xff]  ;;  %10182 = vmatprep.subr.mxu0 %v386_v13  ;;  %s11316_s14 = scalar_lea.vmem %s15464_s2, %s9080_s9  ;;  %10212 = vmatprep.subr.mxu1 %v812_v22  ;;  %s11584_s8 = scalar_lea.vmem %s15463_s1, %s9076_s23 }
  0x12   : > { %297 = vperm.xlu1 %11139, %v274_v3   ;;  %291 = vperm.xlu0 %11138, %v272_v4   ;;  %v273_v6 = vld [vmem:[%s11285_s28 + $0x8] sm:$0xff]  ;;  %v276_v8 = vld [vmem:[%s11285_s28 + $0x20] sm:$0xff]  ;;  %v279_v9 = vld [vmem:[%s11285_s28 + $0x38] sm:$0xff]  ;;  %p267_p5 = scmp.lt.s32.totalorder %s9081_s7, 7 }
  0x13   : > { %v277_v7 = vld [vmem:[%s11285_s28 + $0x28] sm:$0xff]  ;;  %v278_v10 = vld [vmem:[%s11285_s28 + $0x30] sm:$0xff]  ;;  %v280_v12 = vld [vmem:[%s11285_s28 + $0x40] sm:$0xff]  ;;  %10183 = vmatpush3.msra.mxu0 %v386_v13  ;;  %10213 = vmatpush3.msra.mxu1 %v812_v22 }
  0x14   : > { %v281_v11 = vld [vmem:[%s11285_s28 + $0x48] sm:$0xff]  ;;  %v283_v14 = vld [vmem:[%s11285_s28 + $0x58] sm:$0xff]  ;;  %v282_v15 = vld [vmem:[%s11285_s28 + $0x50] sm:$0xff]  ;;  %10214 = vmatprep.subr.mxu1 %v811_v23  ;;  %10264 = vmatprep.subr.mxu0 %v1160_v56  ;;  %s16373_s7 = smov (!%p267_p5, %s9081_s7), 7 }
  0x15   : > { %v285_v16 = vld [vmem:[%s11285_s28 + $0x68] sm:$0xff]  ;;  %v284_v17 = vld [vmem:[%s11285_s28 + $0x60] sm:$0xff]  ;;  %v287_v20 = vld [vmem:[%s11285_s28 + $0x78] sm:$0xff]  ;;  %10215 = vmatpush3.msra.mxu1 %v811_v23  ;;  %s9082_s9 = sshll.u32 %s16373_s7, 3 }
  0x16   : > { %300 = vperm.xlu1 %11139, %v275_v5   ;;  %294 = vperm.xlu0 %11138, %v273_v6   ;;  %v286_v21 = vld [vmem:[%s11285_s28 + $0x70] sm:$0xff]  ;;  %v588_v24 = vld [vmem:[%s11316_s14 + $0x8] sm:$0xff]  ;;  %v587_v25 = vld [vmem:[%s11316_s14] sm:$0xff]  ;;  %s270_s20 = scalar_lea.vmem %s15467_s5, %s9082_s9 }
  0x17   : > { %v590_v26 = vld [vmem:[%s11316_s14 + $0x18] sm:$0xff]  ;;  %v589_v27 = vld [vmem:[%s11316_s14 + $0x10] sm:$0xff]  ;;  %v592_v28 = vld [vmem:[%s11316_s14 + $0x28] sm:$0xff] }
  0x18   : > { %v591_v29 = vld [vmem:[%s11316_s14 + $0x20] sm:$0xff]  ;;  %v594_v30 = vld [vmem:[%s11316_s14 + $0x38] sm:$0xff]  ;;  %v593_v31 = vld [vmem:[%s11316_s14 + $0x30] sm:$0xff] }
  0x19   : > { %v596_v32 = vld [vmem:[%s11316_s14 + $0x48] sm:$0xff]  ;;  %v595_v33 = vld [vmem:[%s11316_s14 + $0x40] sm:$0xff]  ;;  %v598_v34 = vld [vmem:[%s11316_s14 + $0x58] sm:$0xff] }
  0x1a   : > { %306 = vperm.xlu1 %11139, %v277_v7   ;;  %303 = vperm.xlu0 %11138, %v276_v8   ;;  %v597_v35 = vld [vmem:[%s11316_s14 + $0x50] sm:$0xff]  ;;  %v600_v36 = vld [vmem:[%s11316_s14 + $0x68] sm:$0xff]  ;;  %v599_v37 = vld [vmem:[%s11316_s14 + $0x60] sm:$0xff] }
  0x1b   : > { %v602_v38 = vld [vmem:[%s11316_s14 + $0x78] sm:$0xff]  ;;  %v601_v39 = vld [vmem:[%s11316_s14 + $0x70] sm:$0xff]  ;;  %v604_v40 = vld [vmem:[%s11316_s14 + $0x88] sm:$0xff] }
  0x1c   : > { %v603_v41 = vld [vmem:[%s11316_s14 + $0x80] sm:$0xff]  ;;  %v606_v42 = vld [vmem:[%s11316_s14 + $0x98] sm:$0xff]  ;;  %v605_v43 = vld [vmem:[%s11316_s14 + $0x90] sm:$0xff] }
  0x1d   : > { %v608_v44 = vld [vmem:[%s11316_s14 + $0xa8] sm:$0xff]  ;;  %v607_v45 = vld [vmem:[%s11316_s14 + $0xa0] sm:$0xff]  ;;  %v610_v46 = vld [vmem:[%s11316_s14 + $0xb8] sm:$0xff] }
  0x1e   : > { %312 = vperm.xlu1 %11139, %v279_v9   ;;  %309 = vperm.xlu0 %11138, %v278_v10   ;;  %v609_v47 = vld [vmem:[%s11316_s14 + $0xb0] sm:$0xff]  ;;  %v612_v48 = vld [vmem:[%s11316_s14 + $0xc8] sm:$0xff]  ;;  %v611_v49 = vld [vmem:[%s11316_s14 + $0xc0] sm:$0xff] }
  0x1f   : > { %v614_v50 = vld [vmem:[%s11316_s14 + $0xd8] sm:$0xff]  ;;  %v613_v51 = vld [vmem:[%s11316_s14 + $0xd0] sm:$0xff]  ;;  %v616_v52 = vld [vmem:[%s11316_s14 + $0xe8] sm:$0xff] }
  0x20   : > { %v615_v53 = vld [vmem:[%s11316_s14 + $0xe0] sm:$0xff]  ;;  %v618_v54 = vld [vmem:[%s11316_s14 + $0xf8] sm:$0xff]  ;;  %v617_v55 = vld [vmem:[%s11316_s14 + $0xf0] sm:$0xff] }
  0x21   : > { %v1159_v3 = vld [vmem:[%s15465_s3 + $0x48] sm:$0xff]  ;;  %v1158_v6 = vld [vmem:[%s15465_s3 + $0x40] sm:$0xff]  ;;  %v1157_v9 = vld [vmem:[%s15465_s3 + $0x38] sm:$0xff] }
  0x22   : > { %318 = vperm.xlu1 %11139, %v281_v11   ;;  %315 = vperm.xlu0 %11138, %v280_v12  }
  0x26   : > { %324 = vperm.xlu1 %11139, %v283_v14   ;;  %321 = vperm.xlu0 %11138, %v282_v15  }
  0x2a   : > { %330 = vperm.xlu1 %11139, %v285_v16   ;;  %327 = vperm.xlu0 %11138, %v284_v17  }
  0x2e   : > { %336 = vperm.xlu1 %11139, %v287_v20   ;;  %333 = vperm.xlu0 %11138, %v286_v21  }
  0x32   : > { %623 = vperm.xlu1 %11139, %v588_v24   ;;  %620 = vperm.xlu0 %11138, %v587_v25  }
  0x36   : > { %629 = vperm.xlu1 %11139, %v590_v26   ;;  %626 = vperm.xlu0 %11138, %v589_v27  }
  0x3a   : > { %635 = vperm.xlu1 %11139, %v592_v28   ;;  %632 = vperm.xlu0 %11138, %v591_v29  }
  0x3e   : > { %641 = vperm.xlu1 %11139, %v594_v30   ;;  %638 = vperm.xlu0 %11138, %v593_v31  }
  0x42   : > { %647 = vperm.xlu1 %11139, %v596_v32   ;;  %644 = vperm.xlu0 %11138, %v595_v33  }
  0x46   : > { %653 = vperm.xlu1 %11139, %v598_v34   ;;  %650 = vperm.xlu0 %11138, %v597_v35  }
  0x4a   : > { %659 = vperm.xlu1 %11139, %v600_v36   ;;  %656 = vperm.xlu0 %11138, %v599_v37  }
  0x4e   : > { %665 = vperm.xlu1 %11139, %v602_v38   ;;  %662 = vperm.xlu0 %11138, %v601_v39  }
  0x52   : > { %671 = vperm.xlu1 %11139, %v604_v40   ;;  %668 = vperm.xlu0 %11138, %v603_v41  }
  0x56   : > { %677 = vperm.xlu1 %11139, %v606_v42   ;;  %674 = vperm.xlu0 %11138, %v605_v43  }
  0x5a   : > { %683 = vperm.xlu1 %11139, %v608_v44   ;;  %680 = vperm.xlu0 %11138, %v607_v45  }
  0x5e   : > { %689 = vperm.xlu1 %11139, %v610_v46   ;;  %686 = vperm.xlu0 %11138, %v609_v47  }
  0x62   : > { %695 = vperm.xlu1 %11139, %v612_v48   ;;  %692 = vperm.xlu0 %11138, %v611_v49  }
  0x66   : > { %701 = vperm.xlu1 %11139, %v614_v50   ;;  %698 = vperm.xlu0 %11138, %v613_v51  }
  0x6a   : > { %707 = vperm.xlu1 %11139, %v616_v52   ;;  %704 = vperm.xlu0 %11138, %v615_v53  }
  0x6e   : > { %713 = vperm.xlu1 %11139, %v618_v54   ;;  %710 = vperm.xlu0 %11138, %v617_v55  }
  0x8d   : > { %v298_v59 = vpop.permute.xlu1 %297  ;;  %v292_v60 = vpop.permute.xlu0 %291 }
  0x8e   : > { %vm338_vm3 = vcmp.eq.s32.totalorder %v292_v60, %v11360_v58  ;;  %vm340_vm4 = vcmp.eq.s32.totalorder %v298_v59, %v11360_v58 }
  0x8f   : > { %v9083_v62 = vsel %vm338_vm3, 1.0, %v11228_v61  ;;  %v9085_v1 = vsel %vm340_vm4, 1.0, %v11228_v61  ;;  %vm815_vm4 = vcmask 244736  }
  0x90   : > { %10184 = vmatprep.mubr.msk.f32.mxu0 %vm389_vm2, %v9083_v62 }
  0x91   : > { %v301_v63 = vpop.permute.xlu1 %300  ;;  %v295_v0 = vpop.permute.xlu0 %294 }
  0x92   : > { %vm339_vm5 = vcmp.eq.s32.totalorder %v295_v0, %v11360_v58  ;;  %vm341_vm6 = vcmp.eq.s32.totalorder %v301_v63, %v11360_v58 }
  0x93   : > { %v9084_v2 = vsel %vm339_vm5, 1.0, %v11228_v61  ;;  %v9086_v7 = vsel %vm341_vm6, 1.0, %v11228_v61 }
  0x94   : > { %10185 = vmatmul.mubr.msk.f32.vlgmr.msra.gmra.mxu0 %vm389_vm2, %v9084_v2 }
  0x95   : > { %v307_v4 = vpop.permute.xlu1 %306  ;;  %10187 = vmatprep.mubr.msk.f32.mxu0 %vm389_vm2, %v9085_v1  ;;  %v304_v5 = vpop.permute.xlu0 %303  ;;  %10265 = vmatpush3.msra.mxu0 %v1160_v56 }
  0x96   : > { %vm342_vm7 = vcmp.eq.s32.totalorder %v304_v5, %v11360_v58  ;;  %10266 = vmatprep.subr.mxu0 %v1159_v3  ;;  %vm343_vm8 = vcmp.eq.s32.totalorder %v307_v4, %v11360_v58 }
  0x97   : > { %v9087_v8 = vsel %vm342_vm7, 1.0, %v11228_v61  ;;  %10267 = vmatpush3.msra.mxu0 %v1159_v3  ;;  %v9088_v12 = vsel %vm343_vm8, 1.0, %v11228_v61 }
  0x98   : > { %10188 = vmatmul.mubr.msk.f32.gmra.mxu0 %vm389_vm2, %v9086_v7  ;;  %10268 = vmatprep.subr.mxu0 %v1158_v6 }
  0x99   : > { %v313_v10 = vpop.permute.xlu1 %312  ;;  %10190 = vmatprep.mubr.msk.f32.mxu0 %vm389_vm2, %v9087_v8  ;;  %v310_v11 = vpop.permute.xlu0 %309  ;;  %10269 = vmatpush3.msra.mxu0 %v1158_v6 }
  0x9a   : > { %vm344_vm9 = vcmp.eq.s32.totalorder %v310_v11, %v11360_v58  ;;  %10270 = vmatprep.subr.mxu0 %v1157_v9  ;;  %vm345_vm10 = vcmp.eq.s32.totalorder %v313_v10, %v11360_v58 }
  0x9b   : > { %v9089_v13 = vsel %vm344_vm9, 1.0, %v11228_v61  ;;  %10271 = vmatpush3.msra.mxu0 %v1157_v9  ;;  %v9090_v16 = vsel %vm345_vm10, 1.0, %v11228_v61 }
  0x9c   : > { %10191 = vmatmul.mubr.msk.f32.gmra.mxu0 %vm389_vm2, %v9088_v12 }
  0x9d   : > { %v319_v14 = vpop.permute.xlu1 %318  ;;  %10193 = vmatprep.mubr.msk.f32.mxu0 %vm389_vm2, %v9089_v13  ;;  %v316_v15 = vpop.permute.xlu0 %315 }
  0x9e   : > { %vm346_vm11 = vcmp.eq.s32.totalorder %v316_v15, %v11360_v58  ;;  %vm347_vm12 = vcmp.eq.s32.totalorder %v319_v14, %v11360_v58 }
  0x9f   : > { %v9091_v17 = vsel %vm346_vm11, 1.0, %v11228_v61  ;;  %v9092_v20 = vsel %vm347_vm12, 1.0, %v11228_v61 }
  0xa0   : > { %10194 = vmatmul.mubr.msk.f32.gmra.mxu0 %vm389_vm2, %v9090_v16 }
  0xa1   : > { %v325_v18 = vpop.permute.xlu1 %324  ;;  %10196 = vmatprep.mubr.msk.f32.mxu0 %vm389_vm2, %v9091_v17  ;;  %v322_v19 = vpop.permute.xlu0 %321 }
  0xa2   : > { %vm348_vm13 = vcmp.eq.s32.totalorder %v322_v19, %v11360_v58  ;;  %vm349_vm14 = vcmp.eq.s32.totalorder %v325_v18, %v11360_v58 }
  0xa3   : > { %v9093_v21 = vsel %vm348_vm13, 1.0, %v11228_v61  ;;  %v9094_v24 = vsel %vm349_vm14, 1.0, %v11228_v61 }
  0xa4   : > { %10197 = vmatmul.mubr.msk.f32.gmra.mxu0 %vm389_vm2, %v9092_v20 }
  0xa5   : > { %v331_v22 = vpop.permute.xlu1 %330  ;;  %10199 = vmatprep.mubr.msk.f32.mxu0 %vm389_vm2, %v9093_v21  ;;  %v328_v23 = vpop.permute.xlu0 %327 }
  0xa6   : > { %vm350_vm15 = vcmp.eq.s32.totalorder %v328_v23, %v11360_v58  ;;  %vm351_vm0 = vcmp.eq.s32.totalorder %v331_v22, %v11360_v58 }
  0xa7   : > { %v9095_v25 = vsel %vm350_vm15, 1.0, %v11228_v61  ;;  %v9096_v28 = vsel %vm351_vm0, 1.0, %v11228_v61 }
  0xa8   : > { %10200 = vmatmul.mubr.msk.f32.gmra.mxu0 %vm389_vm2, %v9094_v24 }
  0xa9   : > { %v337_v26 = vpop.permute.xlu1 %336  ;;  %10202 = vmatprep.mubr.msk.f32.mxu0 %vm389_vm2, %v9095_v25  ;;  %v334_v27 = vpop.permute.xlu0 %333 }
  0xaa   : > { %vm352_vm1 = vcmp.eq.s32.totalorder %v334_v27, %v11360_v58  ;;  %vm353_vm3 = vcmp.eq.s32.totalorder %v337_v26, %v11360_v58 }
  0xab   : > { %v9097_v29 = vsel %vm352_vm1, 1.0, %v11228_v61  ;;  %v9098_v32 = vsel %vm353_vm3, 1.0, %v11228_v61 }
  0xac   : > { %10203 = vmatmul.mubr.msk.f32.gmra.mxu0 %vm389_vm2, %v9096_v28 }
  0xad   : > { %v624_v30 = vpop.permute.xlu1 %623  ;;  %10205 = vmatprep.mubr.msk.f32.mxu0 %vm389_vm2, %v9097_v29  ;;  %v621_v31 = vpop.permute.xlu0 %620 }
  0xae   : > { %vm716_vm5 = vcmp.eq.s32.totalorder %v624_v30, %v11360_v58  ;;  %vm715_vm6 = vcmp.eq.s32.totalorder %v621_v31, %v11360_v58 }
  0xaf   : > { %v9117_v33 = vsel %vm716_vm5, 1.0, %v11228_v61  ;;  %v9116_v34 = vsel %vm715_vm6, 1.0, %v11228_v61 }
  0xb0   : > { %10206 = vmatmul.mubr.msk.f32.gmra.mxu0 %vm389_vm2, %v9098_v32  ;;  %10216 = vmatprep.mubr.msk.f32.mxu1 %vm815_vm4, %v9116_v34 }
  0xb1   : > { %v630_v35 = vpop.permute.xlu1 %629  ;;  %10217 = vmatmul.mubr.msk.f32.vlgmr.msra.gmra.mxu1 %vm815_vm4, %v9117_v33  ;;  %v627_v36 = vpop.permute.xlu0 %626 }
  0xb2   : > { %vm718_vm7 = vcmp.eq.s32.totalorder %v630_v35, %v11360_v58  ;;  %vm717_vm8 = vcmp.eq.s32.totalorder %v627_v36, %v11360_v58 }
  0xb3   : > { %v9119_v37 = vsel %vm718_vm7, 1.0, %v11228_v61  ;;  %v9118_v38 = vsel %vm717_vm8, 1.0, %v11228_v61 }
  0xb4   : > { %10219 = vmatprep.mubr.msk.f32.mxu1 %vm815_vm4, %v9118_v38 }
  0xb5   : > { %v636_v39 = vpop.permute.xlu1 %635  ;;  %10220 = vmatmul.mubr.msk.f32.gmra.mxu1 %vm815_vm4, %v9119_v37  ;;  %v633_v40 = vpop.permute.xlu0 %632 }
  0xb6   : > { %vm720_vm2 = vcmp.eq.s32.totalorder %v636_v39, %v11360_v58  ;;  %vm719_vm9 = vcmp.eq.s32.totalorder %v633_v40, %v11360_v58 }
  0xb7   : > { %v9121_v41 = vsel %vm720_vm2, 1.0, %v11228_v61  ;;  %v9120_v42 = vsel %vm719_vm9, 1.0, %v11228_v61 }
  0xb8   : > { %10222 = vmatprep.mubr.msk.f32.mxu1 %vm815_vm4, %v9120_v42 }
  0xb9   : > { %v642_v43 = vpop.permute.xlu1 %641  ;;  %10223 = vmatmul.mubr.msk.f32.gmra.mxu1 %vm815_vm4, %v9121_v41  ;;  %v639_v44 = vpop.permute.xlu0 %638 }
  0xba   : > { %vm722_vm10 = vcmp.eq.s32.totalorder %v642_v43, %v11360_v58  ;;  %vm721_vm11 = vcmp.eq.s32.totalorder %v639_v44, %v11360_v58 }
  0xbb   : > { %v9123_v45 = vsel %vm722_vm10, 1.0, %v11228_v61  ;;  %v9122_v46 = vsel %vm721_vm11, 1.0, %v11228_v61 }
  0xbc   : > { %10225 = vmatprep.mubr.msk.f32.mxu1 %vm815_vm4, %v9122_v46 }
  0xbd   : > { %v648_v47 = vpop.permute.xlu1 %647  ;;  %10226 = vmatmul.mubr.msk.f32.gmra.mxu1 %vm815_vm4, %v9123_v45  ;;  %v645_v48 = vpop.permute.xlu0 %644 }
  0xbe   : > { %vm724_vm12 = vcmp.eq.s32.totalorder %v648_v47, %v11360_v58  ;;  %vm723_vm13 = vcmp.eq.s32.totalorder %v645_v48, %v11360_v58  ;;  %v11587_v48 = vld [vmem:[%s11584_s8] sm:$0xff] }
  0xbf   : > { %v9125_v49 = vsel %vm724_vm12, 1.0, %v11228_v61  ;;  %v9124_v50 = vsel %vm723_vm13, 1.0, %v11228_v61 }
  0xc0   : > { %10228 = vmatprep.mubr.msk.f32.mxu1 %vm815_vm4, %v9124_v50  ;;  %v1539_v50 = vld [vmem:[%s15465_s3 + $0x68] sm:$0xff] }
  0xc1   : > { %v654_v51 = vpop.permute.xlu1 %653  ;;  %10229 = vmatmul.mubr.msk.f32.gmra.mxu1 %vm815_vm4, %v9125_v49  ;;  %v651_v52 = vpop.permute.xlu0 %650  ;;  %v1540_v49 = vld [vmem:[%s15465_s3 + $0x70] sm:$0xff] }
  0xc2   : > { %vm726_vm14 = vcmp.eq.s32.totalorder %v654_v51, %v11360_v58  ;;  %vm725_vm15 = vcmp.eq.s32.totalorder %v651_v52, %v11360_v58  ;;  %10352 = vmatprep.subr.mxu1 %v1540_v49  ;;  %v1538_v51 = vld [vmem:[%s15465_s3 + $0x60] sm:$0xff]  ;;  %v1537_v52 = vld [vmem:[%s15465_s3 + $0x58] sm:$0xff] }
  0xc3   : > { %v9127_v53 = vsel %vm726_vm14, 1.0, %v11228_v61  ;;  %v9126_v54 = vsel %vm725_vm15, 1.0, %v11228_v61  ;;  %10353 = vmatpush3.msra.mxu1 %v1540_v49 }
  0xc4   : > { %10231 = vmatprep.mubr.msk.f32.mxu1 %vm815_vm4, %v9126_v54  ;;  %10354 = vmatprep.subr.mxu1 %v1539_v50 }
  0xc5   : > { %v660_v55 = vpop.permute.xlu1 %659  ;;  %10232 = vmatmul.mubr.msk.f32.gmra.mxu1 %vm815_vm4, %v9127_v53  ;;  %v657_v56 = vpop.permute.xlu0 %656 }
  0xc6   : > { %vm728_vm0 = vcmp.eq.s32.totalorder %v660_v55, %v11360_v58  ;;  %vm727_vm1 = vcmp.eq.s32.totalorder %v657_v56, %v11360_v58  ;;  %10355 = vmatpush3.msra.mxu1 %v1539_v50 }
  0xc7   : > { %v9129_v59 = vsel %vm728_vm0, 1.0, %v11228_v61  ;;  %v9128_v60 = vsel %vm727_vm1, 1.0, %v11228_v61  ;;  %10356 = vmatprep.subr.mxu1 %v1538_v51 }
  0xc8   : > { %10234 = vmatprep.mubr.msk.f32.mxu1 %vm815_vm4, %v9128_v60  ;;  %10357 = vmatpush3.msra.mxu1 %v1538_v51 }
  0xc9   : > { %v666_v62 = vpop.permute.xlu1 %665  ;;  %10235 = vmatmul.mubr.msk.f32.gmra.mxu1 %vm815_vm4, %v9129_v59  ;;  %v663_v63 = vpop.permute.xlu0 %662  ;;  %10358 = vmatprep.subr.mxu1 %v1537_v52 }
  0xca   : > { %vm730_vm3 = vcmp.eq.s32.totalorder %v666_v62, %v11360_v58  ;;  %vm729_vm5 = vcmp.eq.s32.totalorder %v663_v63, %v11360_v58  ;;  %10359 = vmatpush3.msra.mxu1 %v1537_v52 }
  0xcb   : > { %v9131_v0 = vsel %vm730_vm3, 1.0, %v11228_v61  ;;  %v9130_v1 = vsel %vm729_vm5, 1.0, %v11228_v61 }
  0xcc   : > { %10237 = vmatprep.mubr.msk.f32.mxu1 %vm815_vm4, %v9130_v1 }
  0xcd   : > { %v672_v2 = vpop.permute.xlu1 %671  ;;  %10238 = vmatmul.mubr.msk.f32.gmra.mxu1 %vm815_vm4, %v9131_v0  ;;  %v669_v3 = vpop.permute.xlu0 %668 }
  0xce   : > { %vm732_vm6 = vcmp.eq.s32.totalorder %v672_v2, %v11360_v58  ;;  %vm731_vm7 = vcmp.eq.s32.totalorder %v669_v3, %v11360_v58 }
  0xcf   : > { %v9133_v4 = vsel %vm732_vm6, 1.0, %v11228_v61  ;;  %v9132_v5 = vsel %vm731_vm7, 1.0, %v11228_v61  ;;  %vm1166_vm7 = vcmask 261120  }
  0xd0   : > { %10240 = vmatprep.mubr.msk.f32.mxu1 %vm815_vm4, %v9132_v5 }
  0xd1   : > { %v678_v6 = vpop.permute.xlu1 %677  ;;  %10241 = vmatmul.mubr.msk.f32.gmra.mxu1 %vm815_vm4, %v9133_v4  ;;  %v675_v7 = vpop.permute.xlu0 %674 }
  0xd2   : > { %vm734_vm8 = vcmp.eq.s32.totalorder %v678_v6, %v11360_v58  ;;  %vm733_vm2 = vcmp.eq.s32.totalorder %v675_v7, %v11360_v58  ;;  %v9181_v6 = vld [vmem:[%s15465_s3 + $0x78] ss:$0 sm:$0xff] }
  0xd3   : > { %v9135_v8 = vsel %vm734_vm8, 1.0, %v11228_v61  ;;  %v9134_v9 = vsel %vm733_vm2, 1.0, %v11228_v61 }
  0xd4   : > { %10243 = vmatprep.mubr.msk.f32.mxu1 %vm815_vm4, %v9134_v9 }
  0xd5   : > { %v684_v10 = vpop.permute.xlu1 %683  ;;  %10244 = vmatmul.mubr.msk.f32.gmra.mxu1 %vm815_vm4, %v9135_v8  ;;  %v681_v11 = vpop.permute.xlu0 %680 }
  0xd6   : > { %vm736_vm9 = vcmp.eq.s32.totalorder %v684_v10, %v11360_v58  ;;  %vm735_vm10 = vcmp.eq.s32.totalorder %v681_v11, %v11360_v58 }
  0xd7   : > { %v9137_v12 = vsel %vm736_vm9, 1.0, %v11228_v61  ;;  %v9136_v13 = vsel %vm735_vm10, 1.0, %v11228_v61 }
  0xd8   : > { %10246 = vmatprep.mubr.msk.f32.mxu1 %vm815_vm4, %v9136_v13 }
  0xd9   : > { %v690_v14 = vpop.permute.xlu1 %689  ;;  %10247 = vmatmul.mubr.msk.f32.gmra.mxu1 %vm815_vm4, %v9137_v12  ;;  %v687_v15 = vpop.permute.xlu0 %686 }
  0xda   : > { %vm738_vm11 = vcmp.eq.s32.totalorder %v690_v14, %v11360_v58  ;;  %vm737_vm12 = vcmp.eq.s32.totalorder %v687_v15, %v11360_v58 }
  0xdb   : > { %v9139_v16 = vsel %vm738_vm11, 1.0, %v11228_v61  ;;  %v9138_v17 = vsel %vm737_vm12, 1.0, %v11228_v61 }
  0xdc   : > { %10249 = vmatprep.mubr.msk.f32.mxu1 %vm815_vm4, %v9138_v17 }
  0xdd   : > { %v696_v18 = vpop.permute.xlu1 %695  ;;  %10250 = vmatmul.mubr.msk.f32.gmra.mxu1 %vm815_vm4, %v9139_v16  ;;  %v693_v19 = vpop.permute.xlu0 %692 }
  0xde   : > { %vm740_vm13 = vcmp.eq.s32.totalorder %v696_v18, %v11360_v58  ;;  %vm739_vm14 = vcmp.eq.s32.totalorder %v693_v19, %v11360_v58 }
  0xdf   : > { %v9141_v20 = vsel %vm740_vm13, 1.0, %v11228_v61  ;;  %v9140_v21 = vsel %vm739_vm14, 1.0, %v11228_v61 }
  0xe0   : > { %10252 = vmatprep.mubr.msk.f32.mxu1 %vm815_vm4, %v9140_v21 }
  0xe1   : > { %v702_v22 = vpop.permute.xlu1 %701  ;;  %10253 = vmatmul.mubr.msk.f32.gmra.mxu1 %vm815_vm4, %v9141_v20  ;;  %v699_v23 = vpop.permute.xlu0 %698 }
  0xe2   : > { %vm742_vm15 = vcmp.eq.s32.totalorder %v702_v22, %v11360_v58  ;;  %vm741_vm0 = vcmp.eq.s32.totalorder %v699_v23, %v11360_v58 }
  0xe3   : > { %v9143_v24 = vsel %vm742_vm15, 1.0, %v11228_v61  ;;  %v9142_v25 = vsel %vm741_vm0, 1.0, %v11228_v61 }
  0xe4   : > { %10255 = vmatprep.mubr.msk.f32.mxu1 %vm815_vm4, %v9142_v25 }
  0xe5   : > { %v708_v26 = vpop.permute.xlu1 %707  ;;  %10256 = vmatmul.mubr.msk.f32.gmra.mxu1 %vm815_vm4, %v9143_v24  ;;  %v705_v27 = vpop.permute.xlu0 %704 }
  0xe6   : > { %vm744_vm1 = vcmp.eq.s32.totalorder %v708_v26, %v11360_v58  ;;  %vm743_vm3 = vcmp.eq.s32.totalorder %v705_v27, %v11360_v58 }
  0xe7   : > { %v9145_v28 = vsel %vm744_vm1, 1.0, %v11228_v61  ;;  %v9144_v29 = vsel %vm743_vm3, 1.0, %v11228_v61 }
  0xe8   : > { %10258 = vmatprep.mubr.msk.f32.mxu1 %vm815_vm4, %v9144_v29 }
  0xe9   : > { %v714_v30 = vpop.permute.xlu1 %713  ;;  %10259 = vmatmul.mubr.msk.f32.gmra.mxu1 %vm815_vm4, %v9145_v28  ;;  %v711_v31 = vpop.permute.xlu0 %710 }
  0xea   : > { %vm746_vm5 = vcmp.eq.s32.totalorder %v714_v30, %v11360_v58  ;;  %vm745_vm6 = vcmp.eq.s32.totalorder %v711_v31, %v11360_v58 }
  0xeb   : > { %v9147_v32 = vsel %vm746_vm5, 1.0, %v11228_v61  ;;  %v9146_v33 = vsel %vm745_vm6, 1.0, %v11228_v61 }
  0xec   : > { %10261 = vmatprep.mubr.msk.f32.mxu1 %vm815_vm4, %v9146_v33 }
  0xed   : > { %10262 = vmatmul.mubr.msk.f32.gmra.mxu1 %vm815_vm4, %v9147_v32 }
 0x154   : > { %v11515_v34 = vpop.f32.mrf.mxu0 }
 0x156   : > { %v11517_v35 = vpop.f32.mrf.mxu0 }
 0x157   : > { %10272 = vmatprep.mubr.msk.f32.mxu0 %vm1166_vm7, %v11517_v35 }
 0x158   : > { %v11521_v36 = vpop.f32.mrf.mxu0  ;;  %10273 = vmatmul.mubr.msk.f32.vlgmr.msra.gmra.mxu0 %vm1166_vm7, %v11515_v34 }
 0x15a   : > { %v11525_v58 = vpop.f32.mrf.mxu0 }
 0x15b   : > { %10275 = vmatprep.mubr.msk.f32.mxu0 %vm1166_vm7, %v11525_v58 }
 0x15c   : > { %v11529_v61 = vpop.f32.mrf.mxu0  ;;  %10276 = vmatmul.mubr.msk.f32.gmra.mxu0 %vm1166_vm7, %v11521_v36 }
 0x15e   : > { %v11533_v37 = vpop.f32.mrf.mxu0 }
 0x15f   : > { %10278 = vmatprep.mubr.msk.f32.mxu0 %vm1166_vm7, %v11533_v37 }
 0x160   : > { %v11537_v38 = vpop.f32.mrf.mxu0  ;;  %10279 = vmatmul.mubr.msk.f32.gmra.mxu0 %vm1166_vm7, %v11529_v61 }
 0x162   : > { %v11541_v39 = vpop.f32.mrf.mxu0 }
 0x163   : > { %10281 = vmatprep.mubr.msk.f32.mxu0 %vm1166_vm7, %v11541_v39 }
 0x164   : > { %v11545_v40 = vpop.f32.mrf.mxu0  ;;  %10282 = vmatmul.mubr.msk.f32.gmra.mxu0 %vm1166_vm7, %v11537_v38 }
 0x166   : > { %v11549_v41 = vpop.f32.mrf.mxu0 }
 0x167   : > { %10284 = vmatprep.mubr.msk.f32.mxu0 %vm1166_vm7, %v11549_v41 }
 0x168   : > { %v11553_v42 = vpop.f32.mrf.mxu0  ;;  %10285 = vmatmul.mubr.msk.f32.gmra.mxu0 %vm1166_vm7, %v11545_v40 }
 0x16a   : > { %v11557_v43 = vpop.f32.mrf.mxu0 }
 0x16b   : > { %10287 = vmatprep.mubr.msk.f32.mxu0 %vm1166_vm7, %v11557_v43 }
 0x16c   : > { %v11561_v44 = vpop.f32.mrf.mxu0  ;;  %10288 = vmatmul.mubr.msk.f32.gmra.mxu0 %vm1166_vm7, %v11553_v42 }
 0x16e   : > { %v11565_v45 = vpop.f32.mrf.mxu0 }
 0x16f   : > { %10290 = vmatprep.mubr.msk.f32.mxu0 %vm1166_vm7, %v11565_v45 }
 0x170   : > { %v11569_v46 = vpop.f32.mrf.mxu0  ;;  %10291 = vmatmul.mubr.msk.f32.gmra.mxu0 %vm1166_vm7, %v11561_v44 }
 0x172   : > { %v11573_v47 = vpop.f32.mrf.mxu0 }
 0x173   : > { %10293 = vmatprep.mubr.msk.f32.mxu0 %vm1166_vm7, %v11573_v47 }
 0x174   : > { %10294 = vmatmul.mubr.msk.f32.gmra.mxu0 %vm1166_vm7, %v11569_v46 }
 0x175   : > { %10328 = vmatprep.mubr.f32.mxu0 %v11587_v48 }
 0x218   : > { %v11602_v53 = vpop.f32.mrf.mxu0 }
 0x219   : > { %v1287_v50 = vadd.f32 %v11602_v53, %v9181_v6  ;;  %v1142_v53 = vld [vmem:[%s11584_s8 + $0x8] sm:$0xff] }
 0x21a   : > { %v11604_v54 = vpop.f32.mrf.mxu0 }
 0x21b   : > { %v1282_v52 = vadd.f32 %v9181_v6, %v11604_v54  ;;  %v1144_v54 = vld [vmem:[%s11584_s8 + $0x18] sm:$0xff] }
 0x21c   : > { %v10277_v55 = vpop.f32.mrf.mxu0 }
 0x21d   : > { %v1297_v31 = vadd.f32 %v10277_v55, %v9181_v6  ;;  %v1361_v55 = vmax.f32 %v1287_v50, 0.0 }
 0x21e   : > { %v1291_v56 = vpop.f32.mrf.mxu0 }
 0x21f   : > { %v1292_v33 = vadd.f32 %v9181_v6, %v1291_v56  ;;  %v1363_v51 = vmax.f32 %v1297_v31, 0.0  ;;  %v1360_v56 = vmax.f32 %v1282_v52, 0.0 }
 0x220   : > { %v10280_v59 = vpop.f32.mrf.mxu0 }
 0x221   : > { %v1307_v27 = vadd.f32 %v10280_v59, %v9181_v6  ;;  %v1362_v59 = vmax.f32 %v1292_v33, 0.0 }
 0x222   : > { %v1301_v60 = vpop.f32.mrf.mxu0 }
 0x223   : > { %v1302_v29 = vadd.f32 %v9181_v6, %v1301_v60  ;;  %v1365_v32 = vmax.f32 %v1307_v27, 0.0  ;;  %v1143_v60 = vld [vmem:[%s11584_s8 + $0x10] sm:$0xff] }
 0x224   : > { %v10283_v62 = vpop.f32.mrf.mxu0 }
 0x225   : > { %v1317_v23 = vadd.f32 %v10283_v62, %v9181_v6  ;;  %v1364_v49 = vmax.f32 %v1302_v29, 0.0  ;;  %v1145_v62 = vld [vmem:[%s11584_s8 + $0x20] sm:$0xff] }
 0x226   : > { %v1311_v63 = vpop.f32.mrf.mxu0 }
 0x227   : > { %v1312_v25 = vadd.f32 %v9181_v6, %v1311_v63  ;;  %v1367_v28 = vmax.f32 %v1317_v23, 0.0  ;;  %v1146_v63 = vld [vmem:[%s11584_s8 + $0x28] sm:$0xff] }
 0x228   : > { %v10286_v0 = vpop.f32.mrf.mxu0 }
 0x229   : > { %v1327_v19 = vadd.f32 %v10286_v0, %v9181_v6  ;;  %v1366_v30 = vmax.f32 %v1312_v25, 0.0  ;;  %v1147_v0 = vld [vmem:[%s11584_s8 + $0x30] sm:$0xff] }
 0x22a   : > { %v1321_v1 = vpop.f32.mrf.mxu0 }
 0x22b   : > { %v1322_v21 = vadd.f32 %v9181_v6, %v1321_v1  ;;  %v1369_v24 = vmax.f32 %v1327_v19, 0.0  ;;  %v1148_v1 = vld [vmem:[%s11584_s8 + $0x38] sm:$0xff] }
 0x22c   : > { %v10289_v2 = vpop.f32.mrf.mxu0 }
 0x22d   : > { %v1337_v15 = vadd.f32 %v10289_v2, %v9181_v6  ;;  %v1368_v26 = vmax.f32 %v1322_v21, 0.0  ;;  %v1149_v2 = vld [vmem:[%s11584_s8 + $0x40] sm:$0xff] }
 0x22e   : > { %v1331_v3 = vpop.f32.mrf.mxu0 }
 0x22f   : > { %v1332_v17 = vadd.f32 %v9181_v6, %v1331_v3  ;;  %v1371_v20 = vmax.f32 %v1337_v15, 0.0  ;;  %v1150_v3 = vld [vmem:[%s11584_s8 + $0x48] sm:$0xff] }
 0x230   : > { %v10292_v4 = vpop.f32.mrf.mxu0 }
 0x231   : > { %v1347_v10 = vadd.f32 %v10292_v4, %v9181_v6  ;;  %v1370_v22 = vmax.f32 %v1332_v17, 0.0  ;;  %v1151_v4 = vld [vmem:[%s11584_s8 + $0x50] sm:$0xff] }
 0x232   : > { %v1341_v5 = vpop.f32.mrf.mxu0 }
 0x233   : > { %v1342_v13 = vadd.f32 %v9181_v6, %v1341_v5  ;;  %v1373_v16 = vmax.f32 %v1347_v10, 0.0  ;;  %v1152_v5 = vld [vmem:[%s11584_s8 + $0x58] sm:$0xff] }
 0x234   : > { %v10295_v7 = vpop.f32.mrf.mxu0  ;;  %v3142_v10 = vld [vmem:[%s15465_s3 + $0xb8] sm:$0xff] }
 0x235   : > { %v1357_v8 = vadd.f32 %v10295_v7, %v9181_v6  ;;  %v1372_v18 = vmax.f32 %v1342_v13, 0.0  ;;  %v1154_v7 = vld [vmem:[%s11584_s8 + $0x68] sm:$0xff]  ;;  %10440 = vmatprep.subr.mxu1 %v3142_v10 }
 0x236   : > { %v1351_v9 = vpop.f32.mrf.mxu0 }
 0x237   : > { %v1375_v11 = vmax.f32 %v1357_v8, 0.0  ;;  %v1352_v12 = vadd.f32 %v9181_v6, %v1351_v9  ;;  %v1153_v6 = vld [vmem:[%s11584_s8 + $0x60] sm:$0xff]  ;;  %v1155_v8 = vld [vmem:[%s11584_s8 + $0x70] sm:$0xff]  ;;  %v1156_v9 = vld [vmem:[%s11584_s8 + $0x78] sm:$0xff] }
 0x239   : > { %v1374_v14 = vmax.f32 %v1352_v12, 0.0  ;;  %10296 = vmatprep.subr.mxu0 %v1375_v11 }
 0x23a   : > { %10297 = vmatpush3.msra.mxu0 %v1375_v11  ;;  %v11630_v11 = vpop.f32.mrf.mxu1 }
 0x23b   : > { %10298 = vmatprep.subr.mxu0 %v1374_v14 }
 0x23c   : > { %10299 = vmatpush3.msra.mxu0 %v1374_v14  ;;  %v11632_v12 = vpop.f32.mrf.mxu1 }
 0x23d   : > { %10300 = vmatprep.subr.mxu0 %v1373_v16 }
 0x23e   : > { %10301 = vmatpush3.msra.mxu0 %v1373_v16  ;;  %v11634_v13 = vpop.f32.mrf.mxu1 }
 0x23f   : > { %10302 = vmatprep.subr.mxu0 %v1372_v18 }
 0x240   : > { %10303 = vmatpush3.msra.mxu0 %v1372_v18  ;;  %v11636_v14 = vpop.f32.mrf.mxu1 }
 0x241   : > { %10304 = vmatprep.subr.mxu0 %v1371_v20 }
 0x242   : > { %10305 = vmatpush3.msra.mxu0 %v1371_v20  ;;  %v11638_v15 = vpop.f32.mrf.mxu1 }
 0x243   : > { %10306 = vmatprep.subr.mxu0 %v1370_v22 }
 0x244   : > { %10307 = vmatpush3.msra.mxu0 %v1370_v22  ;;  %v11640_v16 = vpop.f32.mrf.mxu1 }
 0x245   : > { %10308 = vmatprep.subr.mxu0 %v1369_v24 }
 0x246   : > { %10309 = vmatpush3.msra.mxu0 %v1369_v24  ;;  %v11642_v17 = vpop.f32.mrf.mxu1 }
 0x247   : > { %10310 = vmatprep.subr.mxu0 %v1368_v26 }
 0x248   : > { %10311 = vmatpush3.msra.mxu0 %v1368_v26 }
 0x249   : > { %10312 = vmatprep.subr.mxu0 %v1367_v28 }
 0x24a   : > { %10313 = vmatpush3.msra.mxu0 %v1367_v28 }
 0x24b   : > { %10314 = vmatprep.subr.mxu0 %v1366_v30 }
 0x24c   : > { %10315 = vmatpush3.msra.mxu0 %v1366_v30 }
 0x24d   : > { %10316 = vmatprep.subr.mxu0 %v1365_v32 }
 0x24e   : > { %10317 = vmatpush3.msra.mxu0 %v1365_v32 }
 0x24f   : > { %10318 = vmatprep.subr.mxu0 %v1364_v49 }
 0x250   : > { %10319 = vmatpush3.msra.mxu0 %v1364_v49 }
 0x251   : > { %10320 = vmatprep.subr.mxu0 %v1363_v51 }
 0x252   : > { %10321 = vmatpush3.msra.mxu0 %v1363_v51 }
 0x253   : > { %10322 = vmatprep.subr.mxu0 %v1362_v59 }
 0x254   : > { %10323 = vmatpush3.msra.mxu0 %v1362_v59 }
 0x255   : > { %10324 = vmatprep.subr.mxu0 %v1361_v55 }
 0x256   : > { %10325 = vmatpush3.msra.mxu0 %v1361_v55 }
 0x257   : > { %10326 = vmatprep.subr.mxu0 %v1360_v56 }
 0x258   : > { %10327 = vmatpush3.msra.mxu0 %v1360_v56 }
 0x259   : > { %10329 = vmatmul.mubr.f32.vlgmr.msra.gmra.mxu0 %v1142_v53  ;;  %v3141_v53 = vld [vmem:[%s15465_s3 + $0xb0] sm:$0xff] }
 0x25a   : > { %10331 = vmatprep.mubr.f32.mxu0 %v1143_v60 }
 0x25d   : > { %10332 = vmatmul.mubr.f32.gmra.mxu0 %v1144_v54 }
 0x25e   : > { %10334 = vmatprep.mubr.f32.mxu0 %v1145_v62 }
 0x261   : > { %10335 = vmatmul.mubr.f32.gmra.mxu0 %v1146_v63 }
 0x262   : > { %10337 = vmatprep.mubr.f32.mxu0 %v1147_v0 }
 0x265   : > { %10338 = vmatmul.mubr.f32.gmra.mxu0 %v1148_v1 }
 0x266   : > { %10340 = vmatprep.mubr.f32.mxu0 %v1149_v2 }
 0x269   : > { %10341 = vmatmul.mubr.f32.gmra.mxu0 %v1150_v3 }
 0x26a   : > { %10343 = vmatprep.mubr.f32.mxu0 %v1151_v4 }
 0x26d   : > { %10344 = vmatmul.mubr.f32.gmra.mxu0 %v1152_v5 }
 0x26e   : > { %10346 = vmatprep.mubr.f32.mxu0 %v1153_v6 }
 0x271   : > { %10347 = vmatmul.mubr.f32.gmra.mxu0 %v1154_v7 }
 0x272   : > { %10349 = vmatprep.mubr.f32.mxu0 %v1155_v8 }
 0x275   : > { %10350 = vmatmul.mubr.f32.gmra.mxu0 %v1156_v9  ;;  %v11744_v9 = vshrl.u32 %v288_v57, 7 }
 0x276   : > { %10416 = vmatprep.mubr.f32.mxu0 %v11587_v48  ;;  %v11644_v48 = vpop.f32.mrf.mxu1 }
 0x277   : > { %15717 = vst [vmem:[#allocation18_spill] sm:$0xff] %v11744_v9  ;;  %vm3175_vm4 = vcmp.lt.s32.totalorder %v11744_v9, 1 }
 0x278   : > { %v11646_v18 = vpop.f32.mrf.mxu1 }
 0x27a   : > { %v11648_v19 = vpop.f32.mrf.mxu1 }
 0x27c   : > { %v11650_v20 = vpop.f32.mrf.mxu1 }
 0x27e   : > { %v11652_v21 = vpop.f32.mrf.mxu1 }
 0x280   : > { %v11654_v22 = vpop.f32.mrf.mxu1 }
 0x282   : > { %v11656_v23 = vpop.f32.mrf.mxu1 }
 0x284   : > { %v11658_v24 = vpop.f32.mrf.mxu1 }
 0x286   : > { %v11660_v25 = vpop.f32.mrf.mxu1 }
 0x288   : > { %v11662_v26 = vpop.f32.mrf.mxu1 }
 0x28a   : > { %v11664_v27 = vpop.f32.mrf.mxu1 }
 0x28c   : > { %v11666_v28 = vpop.f32.mrf.mxu1 }
 0x28e   : > { %v11668_v29 = vpop.f32.mrf.mxu1 }
 0x290   : > { %v11670_v30 = vpop.f32.mrf.mxu1 }
 0x291   : > { %15701 = vst [vmem:[#allocation2_spill] sm:$0xff] %v11670_v30 }
 0x292   : > { %v11672_v31 = vpop.f32.mrf.mxu1 }
 0x294   : > { %v11674_v32 = vpop.f32.mrf.mxu1 }
 0x295   : > { %15702 = vst [vmem:[#allocation3_spill] sm:$0xff] %v11674_v32 }
 0x296   : > { %v11676_v33 = vpop.f32.mrf.mxu1 }
 0x297   : > { %15703 = vst [vmem:[#allocation4_spill] sm:$0xff] %v11676_v33 }
 0x298   : > { %v11678_v49 = vpop.f32.mrf.mxu1 }
 0x299   : > { %15704 = vst [vmem:[#allocation5_spill] sm:$0xff] %v11678_v49 }
 0x29a   : > { %v11683_v59 = vpop.f32.mrf.mxu1 }
 0x29b   : > { %15706 = vst [vmem:[#allocation7_spill] sm:$0xff] %v11683_v59 }
 0x29c   : > { %v11701_v54 = vpop.f32.mrf.mxu1 }
 0x29d   : > { %15709 = vst [vmem:[#allocation10_spill] sm:$0xff] %v11701_v54 }
 0x29e   : > { %v11721_v2 = vpop.f32.mrf.mxu1 }
 0x29f   : > { %15712 = vst [vmem:[#allocation13_spill] sm:$0xff] %v11721_v2 }
 0x2a0   : > { %v11734_v6 = vpop.f32.mrf.mxu1 }
 0x2a1   : > { %15715 = vst [vmem:[#allocation16_spill] sm:$0xff] %v11734_v6 }
 0x319   : > { %v10330_v50 = vpop.f32.mrf.mxu0 }
 0x31a   : > { %v11686_v55 = vadd.f32 %v10330_v50, %v11515_v34  ;;  %v3140_v34 = vld [vmem:[%s15465_s3 + $0xa8] sm:$0xff] }
 0x31b   : > { %v1442_v51 = vpop.f32.mrf.mxu0 }
 0x31c   : > { %v11681_v52 = vadd.f32 %v1442_v51, %v11517_v35  ;;  %15707 = vst [vmem:[#allocation8_spill] sm:$0xff] %v11686_v55 }
 0x31d   : > { %v10333_v56 = vpop.f32.mrf.mxu0 }
 0x31e   : > { %15705 = vst [vmem:[#allocation6_spill] sm:$0xff] %v11681_v52  ;;  %10360 = vmatprep.mubr.msk.f32.mxu1 %vm1166_vm7, %v11681_v52  ;;  %v11704_v62 = vadd.f32 %v10333_v56, %v11521_v36  ;;  %v11719_v36 = vld [vmem:[%s15465_s3 + $0xd8] sm:$0xff]  ;;  %v11759_v56 = vadd.s32 16, %v11744_v9 }
 0x31f   : > { %v1452_v60 = vpop.f32.mrf.mxu0  ;;  %10361 = vmatmul.mubr.msk.f32.vlgmr.msra.gmra.mxu1 %vm1166_vm7, %v11686_v55  ;;  %v4830_v55 = vrot.slane %v11638_v15, 2 }
 0x320   : > { %v11696_v35 = vadd.f32 %v1452_v60, %v11525_v58  ;;  %10441 = vmatpush3.msra.mxu1 %v3142_v10  ;;  %15710 = vst [vmem:[#allocation11_spill] sm:$0xff] %v11704_v62  ;;  %v3139_v58 = vld [vmem:[%s15465_s3 + $0xa0] sm:$0xff] }
 0x321   : > { %v10336_v63 = vpop.f32.mrf.mxu0  ;;  %10442 = vmatprep.subr.mxu1 %v3141_v53 }
 0x322   : > { %15708 = vst [vmem:[#allocation9_spill] sm:$0xff] %v11696_v35  ;;  %10363 = vmatprep.mubr.msk.f32.mxu1 %vm1166_vm7, %v11696_v35  ;;  %10443 = vmatpush3.msra.mxu1 %v3141_v53  ;;  %v11724_v3 = vadd.f32 %v10336_v63, %v11529_v61  ;;  %v15468_v63 = vand.u32 15, %v11759_v56 }
 0x323   : > { %v1462_v0 = vpop.f32.mrf.mxu0  ;;  %10364 = vmatmul.mubr.msk.f32.gmra.mxu1 %vm1166_vm7, %v11704_v62  ;;  %10444 = vmatprep.subr.mxu1 %v3140_v34 }
 0x324   : > { %v11714_v1 = vadd.f32 %v1462_v0, %v11533_v37  ;;  %10445 = vmatpush3.msra.mxu1 %v3140_v34  ;;  %15713 = vst [vmem:[#allocation14_spill] sm:$0xff] %v11724_v3 }
 0x325   : > { %v10339_v4 = vpop.f32.mrf.mxu0  ;;  %10446 = vmatprep.subr.mxu1 %v3139_v58 }
 0x326   : > { %15711 = vst [vmem:[#allocation12_spill] sm:$0xff] %v11714_v1  ;;  %10366 = vmatprep.mubr.msk.f32.mxu1 %vm1166_vm7, %v11714_v1  ;;  %10447 = vmatpush3.msra.mxu1 %v3139_v58  ;;  %v11737_v61 = vadd.f32 %v10339_v4, %v11537_v38  ;;  %v12011_v1 = vadd.s32 208, %v11744_v9 }
 0x327   : > { %v1472_v5 = vpop.f32.mrf.mxu0  ;;  %10367 = vmatmul.mubr.msk.f32.gmra.mxu1 %vm1166_vm7, %v11724_v3  ;;  %10552 = vmatprep.subr.mxu1 %v11719_v36 }
 0x328   : > { %v11732_v37 = vadd.f32 %v1472_v5, %v11541_v39  ;;  %15716 = vst [vmem:[#allocation17_spill] sm:$0xff] %v11737_v61  ;;  %v11749_v39 = vpop.f32.mrf.mxu1  ;;  %15742 = vst [vmem:[#allocation40_spill] sm:$0xff] %v12011_v1  ;;  %v15503_v3 = vand.u32 15, %v12011_v1 }
 0x329   : > { %v10342_v7 = vpop.f32.mrf.mxu0  ;;  %15719 = vst [vmem:[#allocation20_spill] sm:$0xff] %v11749_v39 }
 0x32a   : > { %15714 = vst [vmem:[#allocation15_spill] sm:$0xff] %v11732_v37  ;;  %10369 = vmatprep.mubr.msk.f32.mxu1 %vm1166_vm7, %v11732_v37  ;;  %v11752_v50 = vadd.f32 %v10342_v7, %v11545_v40  ;;  %v11765_v53 = vpop.f32.mrf.mxu1  ;;  %v3143_v7 = vrot.slane %v11632_v12, 7 }
 0x32b   : > { %v1482_v8 = vpop.f32.mrf.mxu0  ;;  %10370 = vmatmul.mubr.msk.f32.gmra.mxu1 %vm1166_vm7, %v11737_v61  ;;  %v15470_v58 = vrot.slane %v11765_v53, 7 }
 0x32c   : > { %v11747_v10 = vadd.f32 %v1482_v8, %v11549_v41  ;;  %15720 = vst [vmem:[#allocation21_spill] sm:$0xff] %v11752_v50  ;;  %v15469_v41 = vand.u32 15, %v11744_v9  ;;  %v12076_v62 = vpop.f32.mrf.mxu1 }
 0x32d   : > { %v10345_v38 = vpop.f32.mrf.mxu0  ;;  %15749 = vst [vmem:[#allocation47_spill] sm:$0xff] %v12076_v62 }
 0x32e   : > { %15718 = vst [vmem:[#allocation19_spill] sm:$0xff] %v11747_v10  ;;  %10372 = vmatprep.mubr.msk.f32.mxu1 %vm1166_vm7, %v11747_v10  ;;  %v11768_v40 = vadd.f32 %v10345_v38, %v11553_v42  ;;  %v11784_v42 = vadd.s32 4294967295, %v15469_v41  ;;  %v3144_v41 = vrot.slane %v11630_v11, 7  ;;  %v11935_v10 = vadd.s32 144, %v11744_v9 }
 0x32f   : > { %v1492_v51 = vpop.f32.mrf.mxu0  ;;  %10373 = vmatmul.mubr.msk.f32.gmra.mxu1 %vm1166_vm7, %v11752_v50 }
 0x330   : > { %v11762_v57 = vadd.f32 %v1492_v51, %v11557_v43  ;;  %15722 = vst [vmem:[#allocation23_spill] sm:$0xff] %v11768_v40  ;;  %v11776_v43 = vadd.s32 32, %v11744_v9  ;;  %15724 = vst [vmem:[#allocation25_spill] sm:$0xff] %v11784_v42  ;;  %vm2622_vm8 = vcmp.ge.s32.totalorder %v11784_v42, 0  ;;  %v3146_v42 = vrot.slane %v11634_v13, 7 }
 0x331   : > { %v10348_v60 = vpop.f32.mrf.mxu0  ;;  %v15492_v50 = vand.u32 15, %v11935_v10 }
 0x332   : > { %15721 = vst [vmem:[#allocation22_spill] sm:$0xff] %v11762_v57  ;;  %10375 = vmatprep.mubr.msk.f32.mxu1 %vm1166_vm7, %v11762_v57  ;;  %v11787_v4 = vadd.f32 %v10348_v60, %v11561_v44  ;;  %v15474_v38 = vand.u32 15, %v11776_v43  ;;  %v11801_v44 = vadd.s32 48, %v11744_v9  ;;  %v3207_v60 = vsel %vm3175_vm4, %v15470_v58, %v3143_v7 }
 0x333   : > { %v1502_v34 = vpop.f32.mrf.mxu0  ;;  %10376 = vmatmul.mubr.msk.f32.gmra.mxu1 %vm1166_vm7, %v11768_v40  ;;  %v3147_v58 = vrot.slane %v11640_v16, 7 }
 0x334   : > { %v11780_v0 = vadd.f32 %v1502_v34, %v11565_v45  ;;  %15725 = vst [vmem:[#allocation26_spill] sm:$0xff] %v11787_v4  ;;  %v11797_v45 = vadd.s32 4294967295, %v15468_v63  ;;  %v3145_v34 = vrot.slane %v11636_v14, 7 }
 0x335   : > { %v10351_v5 = vpop.f32.mrf.mxu0 }
 0x336   : > { %15723 = vst [vmem:[#allocation24_spill] sm:$0xff] %v11780_v0  ;;  %10378 = vmatprep.mubr.msk.f32.mxu1 %vm1166_vm7, %v11780_v0  ;;  %15726 = vst [vmem:[#allocation27_spill] sm:$0xff] %v11797_v45  ;;  %v11813_v63 = vadd.f32 %v10351_v5, %v11569_v46  ;;  %vm2624_vm2 = vcmp.ge.s32.totalorder %v11797_v45, 0  ;;  %v3205_v46 = vsel %vm3175_vm4, %v3144_v41, %v3145_v34  ;;  %v11831_v5 = vadd.s32 4294967295, %v15474_v38 }
 0x337   : > { %v1512_v8 = vpop.f32.mrf.mxu0  ;;  %10379 = vmatmul.mubr.msk.f32.gmra.mxu1 %vm1166_vm7, %v11787_v4  ;;  %v11846_v0 = vadd.s32 80, %v11744_v9  ;;  %v3148_v38 = vrot.slane %v11638_v15, 7 }
 0x338   : > { %v11804_v51 = vadd.f32 %v1512_v8, %v11573_v47  ;;  %15728 = vst [vmem:[#allocation29_spill] sm:$0xff] %v11813_v63  ;;  %v3272_v47 = vsel %vm2622_vm8, %v3207_v60, 0.0  ;;  %v11824_v8 = vadd.s32 64, %v11744_v9  ;;  %15729 = vst [vmem:[#allocation30_spill] sm:$0xff] %v11831_v5  ;;  %v3206_v60 = vsel %vm3175_vm4, %v3143_v7, %v3144_v41 }
 0x339   : > { %vm2626_vm9 = vcmp.ge.s32.totalorder %v11831_v5, 0  ;;  %v3203_v41 = vsel %vm3175_vm4, %v3146_v42, %v3147_v58  ;;  %v15480_v57 = vand.u32 15, %v11846_v0 }
 0x33a   : > { %15727 = vst [vmem:[#allocation28_spill] sm:$0xff] %v11804_v51  ;;  %10381 = vmatprep.mubr.msk.f32.mxu1 %vm1166_vm7, %v11804_v51  ;;  %v15476_v51 = vand.u32 15, %v11801_v44  ;;  %v15731_v45 = vand.u32 15, %v11824_v8 }
 0x33b   : > { %10382 = vmatmul.mubr.msk.f32.gmra.mxu1 %vm1166_vm7, %v11813_v63  ;;  %v3274_v63 = vsel %vm2624_vm2, %v3205_v46, 0.0  ;;  %v3947_v46 = vld [vmem:[%s15465_s3 + $0xc8] sm:$0xff] }
 0x33c   : > { %10448 = vmatprep.mubr.msk.f32.mxu1 %vm1166_vm7, %v3272_v47  ;;  %v3948_v47 = vld [vmem:[%s15465_s3 + $0xd0] sm:$0xff]  ;;  %v11854_v7 = vadd.s32 4294967295, %v15476_v51  ;;  %v3946_v51 = vld [vmem:[%s15465_s3 + $0xc0] sm:$0xff]  ;;  %v11872_v4 = vadd.s32 4294967295, %v15731_v45  ;;  %v11886_v45 = vld [vmem:[%s15465_s3 + $0x118] sm:$0xff] }
 0x33e   : > { %15730 = vst [vmem:[#allocation31_spill] sm:$0xff] %v11854_v7  ;;  %15732 = vst [vmem:[#allocation32_spill] sm:$0xff] %v11872_v4  ;;  %vm2628_vm10 = vcmp.ge.s32.totalorder %v11854_v7, 0  ;;  %vm15671_vm11 = vcmp.ge.s32.totalorder %v11872_v4, 0  ;;  %v11916_v7 = vadd.s32 128, %v11744_v9  ;;  %v3154_v4 = vrot.slane %v11650_v20, 7 }
 0x33f   : > { %10449 = vmatmul.mubr.msk.f32.vlgmr.msra.gmra.mxu1 %vm1166_vm7, %v3206_v60  ;;  %v3149_v60 = vrot.slane %v11644_v48, 7 }
 0x340   : > { %10451 = vmatprep.mubr.msk.f32.mxu1 %vm1166_vm7, %v3274_v63  ;;  %10553 = vmatpush3.msra.mxu1 %v11719_v36  ;;  %v3204_v63 = vsel %vm3175_vm4, %v3145_v34, %v3146_v42  ;;  %v3276_v36 = vsel %vm2626_vm9, %v3203_v41, 0.0  ;;  %v3151_v34 = vrot.slane %v11648_v19, 7  ;;  %v3202_v41 = vsel %vm3175_vm4, %v3147_v58, %v3148_v38 }
 0x341   : > { %10554 = vmatprep.subr.mxu1 %v3948_v47  ;;  %v3201_v42 = vsel %vm3175_vm4, %v3148_v38, %v3149_v60  ;;  %v3153_v38 = vrot.slane %v11652_v21, 7  ;;  %v15488_v40 = vand.u32 15, %v11916_v7 }
 0x342   : > { %10555 = vmatpush3.msra.mxu1 %v3948_v47  ;;  %v11881_v47 = vadd.s32 96, %v11744_v9 }
 0x343   : > { %10452 = vmatmul.mubr.msk.f32.gmra.mxu1 %vm1166_vm7, %v3204_v63  ;;  %10556 = vmatprep.subr.mxu1 %v3947_v46  ;;  %v3150_v63 = vrot.slane %v11642_v17, 7 }
 0x344   : > { %10454 = vmatprep.mubr.msk.f32.mxu1 %vm1166_vm7, %v3276_v36  ;;  %10557 = vmatpush3.msra.mxu1 %v3947_v46  ;;  %v3278_v36 = vsel %vm2628_vm10, %v3201_v42, 0.0  ;;  %v11897_v46 = vadd.s32 4294967295, %v15480_v57  ;;  %v3152_v57 = vrot.slane %v11646_v18, 7  ;;  %v15734_v5 = vand.u32 15, %v11881_v47 }
 0x345   : > { %10558 = vmatprep.subr.mxu1 %v3946_v51  ;;  %v3199_v58 = vsel %vm3175_vm4, %v3150_v63, %v3151_v34  ;;  %v3200_v42 = vsel %vm3175_vm4, %v3149_v60, %v3150_v63  ;;  %v3155_v63 = vrot.slane %v11656_v23, 7 }
 0x346   : > { %10559 = vmatpush3.msra.mxu1 %v3946_v51  ;;  %15733 = vst [vmem:[#allocation33_spill] sm:$0xff] %v11897_v46  ;;  %vm15631_vm12 = vcmp.ge.s32.totalorder %v11897_v46, 0  ;;  %v3197_v51 = vsel %vm3175_vm4, %v3152_v57, %v3153_v38  ;;  %v11923_v60 = vadd.s32 4294967295, %v15734_v5  ;;  %v11954_v46 = vadd.s32 4294967295, %v15488_v40 }
 0x347   : > { %10455 = vmatmul.mubr.msk.f32.gmra.mxu1 %vm1166_vm7, %v3202_v41  ;;  %10664 = vmatprep.subr.mxu1 %v11886_v45  ;;  %v11906_v41 = vadd.s32 112, %v11744_v9  ;;  %v3195_v5 = vsel %vm3175_vm4, %v3154_v4, %v3155_v63  ;;  %v3158_v40 = vrot.slane %v11658_v24, 7 }
 0x348   : > { %10457 = vmatprep.mubr.msk.f32.mxu1 %vm1166_vm7, %v3278_v36  ;;  %v3280_v36 = vsel %vm15671_vm11, %v3199_v58, 0.0  ;;  %15735 = vst [vmem:[#allocation34_spill] sm:$0xff] %v11923_v60  ;;  %v3198_v58 = vsel %vm3175_vm4, %v3151_v34, %v3152_v57  ;;  %vm15604_vm13 = vcmp.ge.s32.totalorder %v11923_v60, 0  ;;  %v3157_v34 = vrot.slane %v11660_v25, 7  ;;  %15737 = vst [vmem:[#allocation36_spill] sm:$0xff] %v11954_v46 }
 0x349   : > { %vm15602_vm15 = vcmp.ge.s32.totalorder %v11954_v46, 0  ;;  %v3162_v46 = vrot.slane %v11666_v28, 7  ;;  %vm7619_vm11 = vcmask 1047559  }
 0x34b   : > { %10458 = vmatmul.mubr.msk.f32.gmra.mxu1 %vm1166_vm7, %v3200_v42  ;;  %v15489_v42 = vand.u32 15, %v11906_v41 }
 0x34c   : > { %10460 = vmatprep.mubr.msk.f32.mxu1 %vm1166_vm7, %v3280_v36  ;;  %v3282_v36 = vsel %vm15631_vm12, %v3197_v51, 0.0  ;;  %v3196_v51 = vsel %vm3175_vm4, %v3153_v38, %v3154_v4  ;;  %v3159_v38 = vrot.slane %v11664_v27, 7 }
 0x34d   : > { %v11943_v57 = vadd.s32 4294967295, %v15489_v42  ;;  %v11974_v42 = vadd.s32 4294967295, %v15492_v50  ;;  %v11992_v50 = vadd.s32 192, %v11744_v9 }
 0x34e   : > { %v3191_v60 = vsel %vm3175_vm4, %v3158_v40, %v3159_v38 }
 0x34f   : > { %10461 = vmatmul.mubr.msk.f32.gmra.mxu1 %vm1166_vm7, %v3198_v58  ;;  %15736 = vst [vmem:[#allocation35_spill] sm:$0xff] %v11943_v57  ;;  %v3156_v58 = vrot.slane %v11654_v22, 7  ;;  %vm15603_vm14 = vcmp.ge.s32.totalorder %v11943_v57, 0  ;;  %15738 = vst [vmem:[#allocation37_spill] sm:$0xff] %v11974_v42  ;;  %v3160_v57 = vrot.slane %v11662_v26, 7  ;;  %vm15600_vm0 = vcmp.ge.s32.totalorder %v11974_v42, 0 }
 0x350   : > { %10463 = vmatprep.mubr.msk.f32.mxu1 %vm1166_vm7, %v3282_v36  ;;  %v3284_v36 = vsel %vm15604_vm13, %v3195_v5, 0.0  ;;  %15739 = vst [vmem:[#allocation38_spill] sm:$0xff] %v11992_v50  ;;  %v15499_v61 = vand.u32 15, %v11992_v50 }
 0x351   : > { %v3193_v4 = vsel %vm3175_vm4, %v3156_v58, %v3157_v34  ;;  %v3194_v5 = vsel %vm3175_vm4, %v3155_v63, %v3156_v58  ;;  %v3161_v63 = vrot.slane %v11668_v29, 7 }
 0x352   : > { %v12030_v42 = vadd.s32 4294967295, %v15499_v61  ;;  %v3166_v61 = vrot.slane %v11674_v32, 7 }
 0x353   : > { %10464 = vmatmul.mubr.msk.f32.gmra.mxu1 %vm1166_vm7, %v3196_v51  ;;  %v11963_v51 = vadd.s32 160, %v11744_v9  ;;  %v3189_v58 = vsel %vm3175_vm4, %v3160_v57, %v3161_v63 }
 0x354   : > { %10466 = vmatprep.mubr.msk.f32.mxu1 %vm1166_vm7, %v3284_v36  ;;  %v3286_v36 = vsel %vm15603_vm14, %v3193_v4, 0.0  ;;  %v3192_v4 = vsel %vm3175_vm4, %v3157_v34, %v3158_v40  ;;  %v3163_v34 = vrot.slane %v11672_v31, 7  ;;  %15744 = vst [vmem:[#allocation42_spill] sm:$0xff] %v12030_v42  ;;  %vm15506_vm5 = vcmp.ge.s32.totalorder %v12030_v42, 0 }
 0x355   : > { %v15740_v37 = vand.u32 15, %v11963_v51 }
 0x357   : > { %10467 = vmatmul.mubr.msk.f32.gmra.mxu1 %vm1166_vm7, %v3194_v5  ;;  %v11982_v5 = vadd.s32 176, %v11744_v9  ;;  %v11999_v40 = vadd.s32 4294967295, %v15740_v37  ;;  %v3187_v37 = vsel %vm3175_vm4, %v3162_v46, %v3163_v34 }
 0x358   : > { %10469 = vmatprep.mubr.msk.f32.mxu1 %vm1166_vm7, %v3286_v36  ;;  %v3288_v36 = vsel %vm15602_vm15, %v3191_v60, 0.0  ;;  %v3190_v60 = vsel %vm3175_vm4, %v3159_v38, %v3160_v57  ;;  %v3165_v38 = vrot.slane %v11676_v33, 7 }
 0x359   : > { %15741 = vst [vmem:[#allocation39_spill] sm:$0xff] %v11999_v40  ;;  %vm15599_vm1 = vcmp.ge.s32.totalorder %v11999_v40, 0 }
 0x35b   : > { %10470 = vmatmul.mubr.msk.f32.gmra.mxu1 %vm1166_vm7, %v3192_v4  ;;  %v15500_v4 = vand.u32 15, %v11982_v5 }
 0x35c   : > { %10472 = vmatprep.mubr.msk.f32.mxu1 %vm1166_vm7, %v3288_v36  ;;  %v3290_v36 = vsel %vm15600_vm0, %v3189_v58, 0.0  ;;  %v3188_v58 = vsel %vm3175_vm4, %v3161_v63, %v3162_v46  ;;  %v3167_v63 = vrot.slane %v11683_v59, 7 }
 0x35d   : > { %v12019_v57 = vadd.s32 4294967295, %v15500_v4  ;;  %v12050_v4 = vadd.s32 4294967295, %v15503_v3 }
 0x35e   : > { %v3183_v40 = vsel %vm3175_vm4, %v3166_v61, %v3167_v63 }
 0x35f   : > { %10473 = vmatmul.mubr.msk.f32.gmra.mxu1 %vm1166_vm7, %v3190_v60  ;;  %15743 = vst [vmem:[#allocation41_spill] sm:$0xff] %v12019_v57  ;;  %v3164_v60 = vrot.slane %v11670_v30, 7  ;;  %vm15519_vm3 = vcmp.ge.s32.totalorder %v12019_v57, 0  ;;  %15746 = vst [vmem:[#allocation44_spill] sm:$0xff] %v12050_v4  ;;  %v3168_v57 = vrot.slane %v11678_v49, 7  ;;  %vm15509_vm6 = vcmp.ge.s32.totalorder %v12050_v4, 0 }
 0x360   : > { %10475 = vmatprep.mubr.msk.f32.mxu1 %vm1166_vm7, %v3290_v36  ;;  %v3292_v36 = vsel %vm15599_vm1, %v3187_v37, 0.0 }
 0x361   : > { %v3185_v46 = vsel %vm3175_vm4, %v3164_v60, %v3165_v38  ;;  %v3186_v37 = vsel %vm3175_vm4, %v3163_v34, %v3164_v60  ;;  %v3169_v34 = vrot.slane %v11721_v2, 7 }
 0x363   : > { %10476 = vmatmul.mubr.msk.f32.gmra.mxu1 %vm1166_vm7, %v3188_v58  ;;  %v12039_v58 = vadd.s32 224, %v11744_v9  ;;  %v3181_v3 = vsel %vm3175_vm4, %v3168_v57, %v3169_v34 }
 0x364   : > { %10478 = vmatprep.mubr.msk.f32.mxu1 %vm1166_vm7, %v3292_v36  ;;  %v3294_v36 = vsel %vm15519_vm3, %v3185_v46, 0.0  ;;  %v3184_v46 = vsel %vm3175_vm4, %v3165_v38, %v3166_v61  ;;  %v3171_v61 = vrot.slane %v11749_v39, 7 }
 0x365   : > { %15745 = vst [vmem:[#allocation43_spill] sm:$0xff] %v12039_v58  ;;  %v15507_v60 = vand.u32 15, %v12039_v58  ;;  %v4850_v58 = vrot.slane %v11678_v49, 2 }
 0x367   : > { %10479 = vmatmul.mubr.msk.f32.gmra.mxu1 %vm1166_vm7, %v3186_v37  ;;  %v12058_v37 = vadd.s32 240, %v11744_v9  ;;  %v12072_v35 = vadd.s32 4294967295, %v15507_v60 }
 0x368   : > { %10481 = vmatprep.mubr.msk.f32.mxu1 %vm1166_vm7, %v3294_v36  ;;  %v3296_v36 = vsel %vm15506_vm5, %v3183_v40, 0.0  ;;  %v3182_v40 = vsel %vm3175_vm4, %v3167_v63, %v3168_v57  ;;  %v3173_v57 = vrot.slane %v12076_v62, 7 }
 0x369   : > { %15747 = vst [vmem:[#allocation45_spill] sm:$0xff] %v12058_v37  ;;  %15748 = vst [vmem:[#allocation46_spill] sm:$0xff] %v12072_v35  ;;  %v15510_v38 = vand.u32 15, %v12058_v37  ;;  %vm15512_vm5 = vcmp.ge.s32.totalorder %v12072_v35, 0  ;;  %v4829_v35 = vrot.slane %v11640_v16, 2 }
 0x36b   : > { %10482 = vmatmul.mubr.msk.f32.gmra.mxu1 %vm1166_vm7, %v3184_v46  ;;  %v3170_v46 = vrot.slane %v11701_v54, 7  ;;  %v12090_v42 = vadd.s32 4294967295, %v15510_v38 }
 0x36c   : > { %10484 = vmatprep.mubr.msk.f32.mxu1 %vm1166_vm7, %v3296_v36  ;;  %v3298_v36 = vsel %vm15509_vm6, %v3181_v3, 0.0 }
 0x36d   : > { %v3179_v60 = vsel %vm3175_vm4, %v3170_v46, %v3171_v61  ;;  %15750 = vst [vmem:[#allocation48_spill] sm:$0xff] %v12090_v42  ;;  %v3180_v63 = vsel %vm3175_vm4, %v3169_v34, %v3170_v46  ;;  %vm15511_vm6 = vcmp.ge.s32.totalorder %v12090_v42, 0  ;;  %v15751_v46 = vrot.slane %v11765_v53, 7 }
 0x36e   : > { %v3300_v3 = vsel %vm15512_vm5, %v3179_v60, 0.0 }
 0x36f   : > { %10485 = vmatmul.mubr.msk.f32.gmra.mxu1 %vm1166_vm7, %v3182_v40  ;;  %v3172_v40 = vrot.slane %v11734_v6, 7  ;;  %v3176_v60 = vsel %vm3175_vm4, %v3173_v57, %v15751_v46  ;;  %v15522_v46 = vrot.slane %v11632_v12, 2 }
 0x370   : > { %10487 = vmatprep.mubr.msk.f32.mxu1 %vm1166_vm7, %v3298_v36 }
 0x371   : > { %v3177_v36 = vsel %vm3175_vm4, %v3172_v40, %v3173_v57  ;;  %v3178_v38 = vsel %vm3175_vm4, %v3171_v61, %v3172_v40  ;;  %v4823_v61 = vld [vmem:[%s15465_s3 + $0x110] sm:$0xff]  ;;  %v4821_v57 = vld [vmem:[%s15465_s3 + $0x100] sm:$0xff]  ;;  %v12183_v40 = vadd.s32 24, %v11744_v9 }
 0x372   : > { %v3302_v34 = vsel %vm15511_vm6, %v3177_v36, 0.0  ;;  %vm15598_vm6 = vcmp.lt.s32.totalorder %v11744_v9, 6 }
 0x373   : > { %10488 = vmatmul.mubr.msk.f32.gmra.mxu1 %vm1166_vm7, %v3180_v63  ;;  %15753 = vst [vmem:[#allocation50_spill] sm:$0xff] %v12183_v40  ;;  %v15517_v36 = vand.u32 15, %v12183_v40  ;;  %v12230_v40 = vadd.s32 72, %v11744_v9 }
 0x374   : > { %10490 = vmatprep.mubr.msk.f32.mxu1 %vm1166_vm7, %v3300_v3 }
 0x375   : > { %15758 = vst [vmem:[#allocation55_spill] sm:$0xff] %v12230_v40 }
 0x377   : > { %10491 = vmatmul.mubr.msk.f32.gmra.mxu1 %vm1166_vm7, %v3178_v38  ;;  %v4822_v38 = vld [vmem:[%s15465_s3 + $0x108] sm:$0xff] }
 0x378   : > { %10493 = vmatprep.mubr.msk.f32.mxu1 %vm1166_vm7, %v3302_v34  ;;  %v4827_v34 = vrot.slane %v11636_v14, 2 }
 0x37b   : > { %10494 = vmatmul.mubr.msk.f32.gmra.mxu1 %vm1166_vm7, %v3176_v60  ;;  %v12199_v60 = vadd.s32 40, %v11744_v9 }
 0x37c   : > { %10560 = vmatprep.mubr.msk.f32.mxu1 %vm1166_vm7, %v11632_v12 }
 0x37d   : > { %15755 = vst [vmem:[#allocation52_spill] sm:$0xff] %v12199_v60  ;;  %v15525_v4 = vand.u32 15, %v12199_v60 }
 0x37f   : > { %10561 = vmatmul.mubr.msk.f32.vlgmr.msra.gmra.mxu1 %vm1166_vm7, %v11630_v11 }
 0x380   : > { %10563 = vmatprep.mubr.msk.f32.mxu1 %vm1166_vm7, %v11636_v14  ;;  %10665 = vmatpush3.msra.mxu1 %v11886_v45  ;;  %v12175_v45 = vadd.s32 8, %v11744_v9 }
 0x381   : > { %10666 = vmatprep.subr.mxu1 %v4823_v61 }
 0x382   : > { %10667 = vmatpush3.msra.mxu1 %v4823_v61  ;;  %15752 = vst [vmem:[#allocation49_spill] sm:$0xff] %v12175_v45  ;;  %v15513_v63 = vand.u32 15, %v12175_v45  ;;  %v4826_v61 = vrot.slane %v11630_v11, 2 }
 0x383   : > { %10564 = vmatmul.mubr.msk.f32.gmra.mxu1 %vm1166_vm7, %v11634_v13  ;;  %10668 = vmatprep.subr.mxu1 %v4822_v38 }
 0x384   : > { %10566 = vmatprep.mubr.msk.f32.mxu1 %vm1166_vm7, %v11640_v16  ;;  %10669 = vmatpush3.msra.mxu1 %v4822_v38  ;;  %v12191_v3 = vadd.s32 2, %v15513_v63  ;;  %v12208_v38 = vadd.s32 2, %v15517_v36  ;;  %v4887_v63 = vsel %vm15598_vm6, %v4826_v61, %v4827_v34  ;;  %v4888_v42 = vsel %vm15598_vm6, %v15522_v46, %v4826_v61 }
 0x385   : > { %10670 = vmatprep.subr.mxu1 %v4821_v57  ;;  %v4828_v36 = vrot.slane %v11634_v13, 2  ;;  %v12239_v46 = vadd.s32 2, %v15525_v4  ;;  %v4884_v4 = vsel %vm15598_vm6, %v4829_v35, %v4830_v55 }
 0x386   : > { %10671 = vmatpush3.msra.mxu1 %v4821_v57  ;;  %15754 = vst [vmem:[#allocation51_spill] sm:$0xff] %v12191_v3  ;;  %vm15526_vm5 = vcmp.lt.s32.totalorder %v12191_v3, 16  ;;  %15756 = vst [vmem:[#allocation53_spill] sm:$0xff] %v12208_v38  ;;  %v12211_v57 = vadd.s32 56, %v11744_v9  ;;  %vm15527_vm3 = vcmp.lt.s32.totalorder %v12208_v38, 16 }
 0x387   : > { %10567 = vmatmul.mubr.msk.f32.gmra.mxu1 %vm1166_vm7, %v11638_v15  ;;  %v4955_v52 = vsel %vm15526_vm5, %v4887_v63, 0.0  ;;  %v4886_v61 = vsel %vm15598_vm6, %v4827_v34, %v4828_v36  ;;  %15759 = vst [vmem:[#allocation56_spill] sm:$0xff] %v12239_v46  ;;  %v4831_v63 = vrot.slane %v11644_v48, 2  ;;  %vm15530_vm5 = vcmp.lt.s32.totalorder %v12239_v46, 16 }
 0x388   : > { %10569 = vmatprep.mubr.msk.f32.mxu1 %vm1166_vm7, %v11644_v48  ;;  %15757 = vst [vmem:[#allocation54_spill] sm:$0xff] %v12211_v57 }
 0x38b   : > { %10570 = vmatmul.mubr.msk.f32.gmra.mxu1 %vm1166_vm7, %v11642_v17 }
 0x38c   : > { %10572 = vmatprep.mubr.msk.f32.mxu1 %vm1166_vm7, %v11648_v19 }
 0x38f   : > { %10573 = vmatmul.mubr.msk.f32.gmra.mxu1 %vm1166_vm7, %v11646_v18 }
 0x390   : > { %10575 = vmatprep.mubr.msk.f32.mxu1 %vm1166_vm7, %v11652_v21 }
 0x393   : > { %10576 = vmatmul.mubr.msk.f32.gmra.mxu1 %vm1166_vm7, %v11650_v20 }
 0x394   : > { %10578 = vmatprep.mubr.msk.f32.mxu1 %vm1166_vm7, %v11656_v23 }
 0x397   : > { %10579 = vmatmul.mubr.msk.f32.gmra.mxu1 %vm1166_vm7, %v11654_v22 }
 0x398   : > { %10581 = vmatprep.mubr.msk.f32.mxu1 %vm1166_vm7, %v11660_v25 }
 0x39b   : > { %10582 = vmatmul.mubr.msk.f32.gmra.mxu1 %vm1166_vm7, %v11658_v24 }
 0x39c   : > { %10584 = vmatprep.mubr.msk.f32.mxu1 %vm1166_vm7, %v11664_v27 }
 0x39f   : > { %10585 = vmatmul.mubr.msk.f32.gmra.mxu1 %vm1166_vm7, %v11662_v26 }
 0x3a0   : > { %10587 = vmatprep.mubr.msk.f32.mxu1 %vm1166_vm7, %v11668_v29 }
 0x3a3   : > { %10588 = vmatmul.mubr.msk.f32.gmra.mxu1 %vm1166_vm7, %v11666_v28 }
 0x3a4   : > { %10590 = vmatprep.mubr.msk.f32.mxu1 %vm1166_vm7, %v11672_v31 }
 0x3a7   : > { %10591 = vmatmul.mubr.msk.f32.gmra.mxu1 %vm1166_vm7, %v11670_v30 }
 0x3a8   : > { %10593 = vmatprep.mubr.msk.f32.mxu1 %vm1166_vm7, %v11676_v33 }
 0x3ab   : > { %10594 = vmatmul.mubr.msk.f32.gmra.mxu1 %vm1166_vm7, %v11674_v32 }
 0x3ac   : > { %10596 = vmatprep.mubr.msk.f32.mxu1 %vm1166_vm7, %v11683_v59 }
 0x3af   : > { %10597 = vmatmul.mubr.msk.f32.gmra.mxu1 %vm1166_vm7, %v11678_v49 }
 0x3b0   : > { %10599 = vmatprep.mubr.msk.f32.mxu1 %vm1166_vm7, %v11721_v2 }
 0x3b3   : > { %10600 = vmatmul.mubr.msk.f32.gmra.mxu1 %vm1166_vm7, %v11701_v54 }
 0x3b4   : > { %10602 = vmatprep.mubr.msk.f32.mxu1 %vm1166_vm7, %v11749_v39 }
 0x3b7   : > { %10603 = vmatmul.mubr.msk.f32.gmra.mxu1 %vm1166_vm7, %v11734_v6 }
 0x3b8   : > { %10605 = vmatprep.mubr.msk.f32.mxu1 %vm1166_vm7, %v12076_v62 }
 0x3bb   : > { %10606 = vmatmul.mubr.msk.f32.gmra.mxu1 %vm1166_vm7, %v11765_v53 }
 0x3bc   : > { %10672 = vmatprep.mubr.msk.f32.mxu1 %vm1166_vm7, %v4888_v42  ;;  %v4885_v42 = vsel %vm15598_vm6, %v4828_v36, %v4829_v35  ;;  %v12252_v36 = vadd.s32 88, %v11744_v9 }
 0x3bd   : > { %v4957_v3 = vsel %vm15527_vm3, %v4885_v42, 0.0  ;;  %v4833_v42 = vrot.slane %v11648_v19, 2 }
 0x3be   : > { %15762 = vst [vmem:[#allocation58_spill] sm:$0xff] %v12252_v36 }
 0x3bf   : > { %10673 = vmatmul.mubr.msk.f32.vlgmr.msra.gmra.mxu1 %vm1166_vm7, %v4955_v52  ;;  %v15760_v52 = vand.u32 15, %v12211_v57  ;;  %v4835_v57 = vrot.slane %v11652_v21, 2 }
 0x3c0   : > { %10675 = vmatprep.mubr.msk.f32.mxu1 %vm1166_vm7, %v4886_v61  ;;  %v4883_v61 = vsel %vm15598_vm6, %v4830_v55, %v4831_v63 }
 0x3c1   : > { %v12248_v45 = vadd.s32 2, %v15760_v52  ;;  %v4832_v52 = vrot.slane %v11642_v17, 2  ;;  %v4959_v34 = vsel %vm15530_vm5, %v4883_v61, 0.0  ;;  %v12278_v61 = vadd.s32 104, %v11744_v9 }
 0x3c3   : > { %15761 = vst [vmem:[#allocation57_spill] sm:$0xff] %v12248_v45  ;;  %10676 = vmatmul.mubr.msk.f32.gmra.mxu1 %vm1166_vm7, %v4957_v3  ;;  %vm15534_vm3 = vcmp.lt.s32.totalorder %v12248_v45, 16  ;;  %v15763_v3 = vand.u32 15, %v12230_v40  ;;  %v4882_v55 = vsel %vm15598_vm6, %v4831_v63, %v4832_v52  ;;  %15765 = vst [vmem:[#allocation60_spill] sm:$0xff] %v12278_v61  ;;  %v4837_v45 = vrot.slane %v11656_v23, 2 }
 0x3c4   : > { %10678 = vmatprep.mubr.msk.f32.mxu1 %vm1166_vm7, %v4884_v4  ;;  %v4881_v4 = vsel %vm15598_vm6, %v4832_v52, %v4833_v42  ;;  %v12290_v52 = vadd.s32 120, %v11744_v9 }
 0x3c5   : > { %v12268_v38 = vadd.s32 2, %v15763_v3  ;;  %v4834_v3 = vrot.slane %v11646_v18, 2  ;;  %v4961_v35 = vsel %vm15534_vm3, %v4881_v4, 0.0  ;;  %v15538_v4 = vand.u32 15, %v12278_v61 }
 0x3c6   : > { %15768 = vst [vmem:[#allocation62_spill] sm:$0xff] %v12290_v52  ;;  %v4846_v61 = vrot.slane %v11670_v30, 2 }
 0x3c7   : > { %15764 = vst [vmem:[#allocation59_spill] sm:$0xff] %v12268_v38  ;;  %10679 = vmatmul.mubr.msk.f32.gmra.mxu1 %vm1166_vm7, %v4959_v34  ;;  %vm15539_vm5 = vcmp.lt.s32.totalorder %v12268_v38, 16  ;;  %v15766_v34 = vand.u32 15, %v12252_v36  ;;  %v4880_v46 = vsel %vm15598_vm6, %v4833_v42, %v4834_v3  ;;  %v12306_v42 = vadd.s32 136, %v11744_v9 }
 0x3c8   : > { %10681 = vmatprep.mubr.msk.f32.mxu1 %vm1166_vm7, %v4882_v55  ;;  %v4879_v55 = vsel %vm15598_vm6, %v4834_v3, %v4835_v57  ;;  %v12315_v40 = vadd.s32 2, %v15538_v4 }
 0x3c9   : > { %v12287_v63 = vadd.s32 2, %v15766_v34  ;;  %v4836_v34 = vrot.slane %v11650_v20, 2  ;;  %v4963_v36 = vsel %vm15539_vm5, %v4879_v55, 0.0  ;;  %15769 = vst [vmem:[#allocation63_spill] sm:$0xff] %v12306_v42  ;;  %v4839_v55 = vrot.slane %v11660_v25, 2 }
 0x3ca   : > { %15770 = vst [vmem:[#allocation64_spill] sm:$0xff] %v12315_v40  ;;  %vm15543_vm5 = vcmp.lt.s32.totalorder %v12315_v40, 16 }
 0x3cb   : > { %15767 = vst [vmem:[#allocation61_spill] sm:$0xff] %v12287_v63  ;;  %10682 = vmatmul.mubr.msk.f32.gmra.mxu1 %vm1166_vm7, %v4961_v35  ;;  %vm15540_vm3 = vcmp.lt.s32.totalorder %v12287_v63, 16  ;;  %v4878_v3 = vsel %vm15598_vm6, %v4835_v57, %v4836_v34  ;;  %v4838_v35 = vrot.slane %v11654_v22, 2 }
 0x3cc   : > { %10684 = vmatprep.mubr.msk.f32.mxu1 %vm1166_vm7, %v4880_v46  ;;  %v4877_v46 = vsel %vm15598_vm6, %v4836_v34, %v4837_v45  ;;  %v12328_v34 = vadd.s32 152, %v11744_v9 }
 0x3cd   : > { %v4965_v38 = vsel %vm15540_vm3, %v4877_v46, 0.0  ;;  %v4876_v4 = vsel %vm15598_vm6, %v4837_v45, %v4838_v35  ;;  %v4841_v46 = vrot.slane %v11664_v27, 2 }
 0x3ce   : > { %15773 = vst [vmem:[#allocation66_spill] sm:$0xff] %v12328_v34 }
 0x3cf   : > { %10685 = vmatmul.mubr.msk.f32.gmra.mxu1 %vm1166_vm7, %v4963_v36  ;;  %v15771_v36 = vand.u32 15, %v12290_v52  ;;  %v4843_v52 = vrot.slane %v11668_v29, 2 }
 0x3d0   : > { %10687 = vmatprep.mubr.msk.f32.mxu1 %vm1166_vm7, %v4878_v3  ;;  %v4875_v3 = vsel %vm15598_vm6, %v4838_v35, %v4839_v55 }
 0x3d1   : > { %v12324_v60 = vadd.s32 2, %v15771_v36  ;;  %v4840_v36 = vrot.slane %v11658_v24, 2  ;;  %v4967_v57 = vsel %vm15543_vm5, %v4875_v3, 0.0  ;;  %v12354_v3 = vadd.s32 168, %v11744_v9 }
 0x3d3   : > { %15772 = vst [vmem:[#allocation65_spill] sm:$0xff] %v12324_v60  ;;  %10688 = vmatmul.mubr.msk.f32.gmra.mxu1 %vm1166_vm7, %v4965_v38  ;;  %vm15547_vm3 = vcmp.lt.s32.totalorder %v12324_v60, 16  ;;  %v15774_v38 = vand.u32 15, %v12306_v42  ;;  %v4874_v35 = vsel %vm15598_vm6, %v4839_v55, %v4840_v36  ;;  %15776 = vst [vmem:[#allocation68_spill] sm:$0xff] %v12354_v3  ;;  %v4845_v60 = vrot.slane %v11672_v31, 2 }
 0x3d4   : > { %10690 = vmatprep.mubr.msk.f32.mxu1 %vm1166_vm7, %v4876_v4  ;;  %v4873_v4 = vsel %vm15598_vm6, %v4840_v36, %v4841_v46  ;;  %v12366_v36 = vadd.s32 184, %v11744_v9 }
 0x3d5   : > { %v12344_v63 = vadd.s32 2, %v15774_v38  ;;  %v4842_v38 = vrot.slane %v11662_v26, 2  ;;  %v4969_v45 = vsel %vm15547_vm3, %v4873_v4, 0.0  ;;  %v15552_v4 = vand.u32 15, %v12354_v3 }
 0x3d6   : > { %15779 = vst [vmem:[#allocation70_spill] sm:$0xff] %v12366_v36 }
 0x3d7   : > { %15775 = vst [vmem:[#allocation67_spill] sm:$0xff] %v12344_v63  ;;  %10691 = vmatmul.mubr.msk.f32.gmra.mxu1 %vm1166_vm7, %v4967_v57  ;;  %vm15554_vm5 = vcmp.lt.s32.totalorder %v12344_v63, 16  ;;  %v15777_v57 = vand.u32 15, %v12328_v34  ;;  %v4872_v40 = vsel %vm15598_vm6, %v4841_v46, %v4842_v38  ;;  %v12382_v46 = vadd.s32 200, %v11744_v9 }
 0x3d8   : > { %10693 = vmatprep.mubr.msk.f32.mxu1 %vm1166_vm7, %v4874_v35  ;;  %v4871_v35 = vsel %vm15598_vm6, %v4842_v38, %v4843_v52  ;;  %v4847_v63 = vrot.slane %v11676_v33, 2 }
 0x3d9   : > { %v12363_v55 = vadd.s32 2, %v15777_v57  ;;  %v4844_v57 = vrot.slane %v11666_v28, 2  ;;  %v4971_v34 = vsel %vm15554_vm5, %v4871_v35, 0.0  ;;  %15780 = vst [vmem:[#allocation71_spill] sm:$0xff] %v12382_v46  ;;  %v12393_v35 = vadd.s32 2, %v15552_v4 }
 0x3da   : > { %v12408_v4 = vadd.s32 216, %v11744_v9 }
 0x3db   : > { %15778 = vst [vmem:[#allocation69_spill] sm:$0xff] %v12363_v55  ;;  %10694 = vmatmul.mubr.msk.f32.gmra.mxu1 %vm1166_vm7, %v4969_v45  ;;  %vm15557_vm3 = vcmp.lt.s32.totalorder %v12363_v55, 16  ;;  %v4870_v38 = vsel %vm15598_vm6, %v4843_v52, %v4844_v57  ;;  %15781 = vst [vmem:[#allocation72_spill] sm:$0xff] %v12393_v35  ;;  %v15782_v52 = vand.u32 15, %v12366_v36  ;;  %vm15561_vm5 = vcmp.lt.s32.totalorder %v12393_v35, 16 }
 0x3dc   : > { %10696 = vmatprep.mubr.msk.f32.mxu1 %vm1166_vm7, %v4872_v40  ;;  %v4869_v40 = vsel %vm15598_vm6, %v4844_v57, %v4845_v60  ;;  %15784 = vst [vmem:[#allocation74_spill] sm:$0xff] %v12408_v4  ;;  %v4848_v55 = vrot.slane %v11674_v32, 2  ;;  %v12440_v35 = vadd.s32 232, %v11744_v9 }
 0x3dd   : > { %v12404_v37 = vadd.s32 2, %v15782_v52  ;;  %v4849_v52 = vrot.slane %v11683_v59, 2 }
 0x3de   : > { %15787 = vst [vmem:[#allocation76_spill] sm:$0xff] %v12440_v35  ;;  %v15580_v49 = vand.u32 15, %v12440_v35 }
 0x3df   : > { %v12384_v42 = vpop.f32.mrf.mxu1  ;;  %10697 = vmatmul.mubr.msk.f32.gmra.mxu1 %vm1166_vm7, %v4971_v34  ;;  %v4973_v34 = vsel %vm15557_vm3, %v4869_v40, 0.0  ;;  %15783 = vst [vmem:[#allocation73_spill] sm:$0xff] %v12404_v37  ;;  %v4867_v40 = vsel %vm15598_vm6, %v4846_v61, %v4847_v63  ;;  %vm15571_vm3 = vcmp.lt.s32.totalorder %v12404_v37, 16  ;;  %v4865_v1 = vsel %vm15598_vm6, %v4848_v55, %v4849_v52 }
 0x3e0   : > { %10699 = vmatprep.mubr.msk.f32.mxu1 %vm1166_vm7, %v4870_v38  ;;  %v4868_v38 = vsel %vm15598_vm6, %v4845_v60, %v4846_v61  ;;  %v4975_v36 = vsel %vm15561_vm5, %v4867_v40, 0.0  ;;  %v15785_v60 = vand.u32 15, %v12382_v46  ;;  %v4851_v40 = vrot.slane %v11721_v2, 2 }
 0x3e1   : > { %v12397_v45 = vpop.f32.mrf.mxu1 }
 0x3e2   : > { %v4863_v37 = vsel %vm15598_vm6, %v4850_v58, %v4851_v40 }
 0x3e3   : > { %v12410_v3 = vpop.f32.mrf.mxu1  ;;  %10700 = vmatmul.mubr.msk.f32.gmra.mxu1 %vm1166_vm7, %v4973_v34  ;;  %v12428_v34 = vadd.s32 2, %v15785_v60 }
 0x3e4   : > { %10702 = vmatprep.mubr.msk.f32.mxu1 %vm1166_vm7, %v4868_v38  ;;  %v4866_v38 = vsel %vm15598_vm6, %v4847_v63, %v4848_v55  ;;  %v15788_v63 = vand.u32 15, %v12408_v4  ;;  %v12454_v55 = vadd.s32 248, %v11744_v9  ;;  %v4852_v4 = vrot.slane %v11701_v54, 2 }
 0x3e5   : > { %v12420_v57 = vpop.f32.mrf.mxu1  ;;  %15786 = vst [vmem:[#allocation75_spill] sm:$0xff] %v12428_v34  ;;  %vm15579_vm5 = vcmp.lt.s32.totalorder %v12428_v34, 16  ;;  %v4855_v34 = vrot.slane %v12076_v62, 2 }
 0x3e6   : > { %v12451_v46 = vadd.s32 2, %v15788_v63  ;;  %15790 = vst [vmem:[#allocation78_spill] sm:$0xff] %v12454_v55  ;;  %v4979_v32 = vsel %vm15579_vm5, %v4863_v37, 0.0  ;;  %v15792_v54 = vand.u32 15, %v12454_v55 }
 0x3e7   : > { %v12431_v61 = vpop.f32.mrf.mxu1  ;;  %10703 = vmatmul.mubr.msk.f32.gmra.mxu1 %vm1166_vm7, %v4975_v36  ;;  %v4977_v36 = vsel %vm15571_vm3, %v4865_v1, 0.0  ;;  %v4853_v1 = vrot.slane %v11749_v39, 2  ;;  %v12480_v39 = vadd.s32 2, %v15580_v49  ;;  %v4856_v49 = vrot.slane %v11765_v53, 2 }
 0x3e8   : > { %10705 = vmatprep.mubr.msk.f32.mxu1 %vm1166_vm7, %v4866_v38  ;;  %15789 = vst [vmem:[#allocation77_spill] sm:$0xff] %v12451_v46  ;;  %v4864_v38 = vsel %vm15598_vm6, %v4849_v52, %v4850_v58  ;;  %vm15582_vm3 = vcmp.lt.s32.totalorder %v12451_v46, 16  ;;  %v4862_v58 = vsel %vm15598_vm6, %v4851_v40, %v4852_v4  ;;  %v4854_v52 = vrot.slane %v11734_v6, 2 }
 0x3e9   : > { %v12443_v60 = vpop.f32.mrf.mxu1  ;;  %15791 = vst [vmem:[#allocation79_spill] sm:$0xff] %v12480_v39  ;;  %v12489_v40 = vadd.s32 2, %v15792_v54  ;;  %vm15597_vm5 = vcmp.lt.s32.totalorder %v12480_v39, 16 }
 0x3eb   : > { %v12456_v2 = vpop.f32.mrf.mxu1  ;;  %10706 = vmatmul.mubr.msk.f32.gmra.mxu1 %vm1166_vm7, %v4977_v36  ;;  %15793 = vst [vmem:[#allocation80_spill] sm:$0xff] %v12489_v40 }
 0x3ec   : > { %10708 = vmatprep.mubr.msk.f32.mxu1 %vm1166_vm7, %v4864_v38  ;;  %v4861_v38 = vsel %vm15598_vm6, %v4852_v4, %v4853_v1  ;;  %v4860_v4 = vsel %vm15598_vm6, %v4853_v1, %v4854_v52  ;;  %v15794_v1 = vrot.slane %v11632_v12, 2 }
 0x3ed   : > { %v12466_v63 = vpop.f32.mrf.mxu1 }
 0x3ef   : > { %v10374_v36 = vpop.f32.mrf.mxu1  ;;  %10709 = vmatmul.mubr.msk.f32.gmra.mxu1 %vm1166_vm7, %v4979_v32  ;;  %v4981_v32 = vsel %vm15582_vm3, %v4861_v38, 0.0  ;;  %vm15596_vm3 = vcmp.lt.s32.totalorder %v12489_v40, 16 }
 0x3f0   : > { %10711 = vmatprep.mubr.msk.f32.mxu1 %vm1166_vm7, %v4862_v58  ;;  %v4859_v58 = vsel %vm15598_vm6, %v4854_v52, %v4855_v34  ;;  %v4889_v52 = vsel %vm15598_vm6, %v4856_v49, %v15794_v1 }
 0x3f1   : > { %v1700_v37 = vpop.f32.mrf.mxu1  ;;  %v4983_v54 = vsel %vm15597_vm5, %v4859_v58, 0.0  ;;  %v4985_v39 = vsel %vm15596_vm3, %v4889_v52, 0.0  ;;  %v9198_v58 = vld [vmem:[%s15465_s3 + $0x79] ss:$0 sm:$0xff]  ;;  %vm3010_vm3 = vcmp.lt.s32.totalorder %v11744_v9, 2 }
 0x3f2   : > { %v1706_v30 = vadd.f32 %v10374_v36, %v9198_v58  ;;  %v1686_v36 = vadd.f32 %v12431_v61, %v9198_v58 }
 0x3f3   : > { %v10377_v59 = vpop.f32.mrf.mxu1  ;;  %10712 = vmatmul.mubr.msk.f32.gmra.mxu1 %vm1166_vm7, %v4981_v32  ;;  %v4858_v32 = vsel %vm15598_vm6, %v4855_v34, %v4856_v49 }
 0x3f4   : > { %10714 = vmatprep.mubr.msk.f32.mxu1 %vm1166_vm7, %v4860_v4 }
 0x3f5   : > { %v1710_v38 = vpop.f32.mrf.mxu1 }
 0x3f6   : > { %v1711_v52 = vadd.f32 %v9198_v58, %v1710_v38 }
 0x3f7   : > { %v10380_v46 = vpop.f32.mrf.mxu1  ;;  %10715 = vmatmul.mubr.msk.f32.gmra.mxu1 %vm1166_vm7, %v4983_v54 }
 0x3f8   : > { %10717 = vmatprep.mubr.msk.f32.mxu1 %vm1166_vm7, %v4858_v32  ;;  %v1726_v35 = vadd.f32 %v10380_v46, %v9198_v58  ;;  %v1716_v32 = vadd.f32 %v10377_v59, %v9198_v58  ;;  %v1701_v46 = vadd.f32 %v9198_v58, %v1700_v37  ;;  %v1748_v59 = vmax.f32 %v1706_v30, 0.0 }
 0x3f9   : > { %v1720_v4 = vpop.f32.mrf.mxu1  ;;  %v1676_v30 = vadd.f32 %v12410_v3, %v9198_v58  ;;  %v1744_v37 = vmax.f32 %v1686_v36, 0.0  ;;  %v4306_v36 = vld [vmem:[%s15465_s3 + $0xf8] sm:$0xff] }
 0x3fa   : > { %v1721_v50 = vadd.f32 %v9198_v58, %v1720_v4  ;;  %v1752_v1 = vmax.f32 %v1726_v35, 0.0  ;;  %v1750_v33 = vmax.f32 %v1716_v32, 0.0  ;;  %v1747_v35 = vmax.f32 %v1701_v46, 0.0  ;;  %v11205_v46 = vld [vmem:[%s11584_s8 + $0x10] sm:$0xff] }
 0x3fb   : > { %v10383_v54 = vpop.f32.mrf.mxu1  ;;  %10718 = vmatmul.mubr.msk.f32.gmra.mxu1 %vm1166_vm7, %v4985_v39 }
 0x3fc   : > { %v1736_v34 = vadd.f32 %v10383_v54, %v9198_v58  ;;  %v1751_v40 = vmax.f32 %v1721_v50, 0.0  ;;  %v1691_v50 = vadd.f32 %v9198_v58, %v12466_v63  ;;  %v1671_v63 = vadd.f32 %v9198_v58, %v12420_v57 }
 0x3fd   : > { %v1730_v55 = vpop.f32.mrf.mxu1  ;;  %v1666_v54 = vadd.f32 %v12384_v42, %v9198_v58  ;;  %v2977_v42 = vld [vmem:[%s15465_s3 + $0x98] sm:$0xff] }
 0x3fe   : > { %v1754_v6 = vmax.f32 %v1736_v34, 0.0  ;;  %v1731_v62 = vadd.f32 %v9198_v58, %v1730_v55  ;;  %v1749_v55 = vmax.f32 %v1711_v52, 0.0  ;;  %v1742_v34 = vmax.f32 %v1676_v30, 0.0 }
 0x3ff   : > { %v12516_v39 = vpop.f32.mrf.mxu1  ;;  %v1741_v3 = vmax.f32 %v1671_v63, 0.0  ;;  %v1740_v32 = vmax.f32 %v1666_v54, 0.0  ;;  %v11211_v63 = vld [vmem:[%s11584_s8 + $0x40] sm:$0xff]  ;;  %v11212_v54 = vld [vmem:[%s11584_s8 + $0x48] sm:$0xff] }
 0x400   : > { %v1753_v49 = vmax.f32 %v1731_v62, 0.0  ;;  %10384 = vmatprep.subr.mxu0 %v1754_v6  ;;  %v1696_v62 = vadd.f32 %v12456_v2, %v9198_v58  ;;  %v1745_v2 = vmax.f32 %v1691_v50, 0.0  ;;  %v11206_v50 = vld [vmem:[%s11584_s8 + $0x18] sm:$0xff] }
 0x401   : > { %10385 = vmatpush3.msra.mxu0 %v1754_v6  ;;  %v12519_v6 = vpop.f32.mrf.mxu1 }
 0x402   : > { %10386 = vmatprep.subr.mxu0 %v1753_v49  ;;  %v1746_v38 = vmax.f32 %v1696_v62, 0.0 }
 0x403   : > { %10387 = vmatpush3.msra.mxu0 %v1753_v49 }
 0x404   : > { %10388 = vmatprep.subr.mxu0 %v1752_v1 }
 0x405   : > { %10389 = vmatpush3.msra.mxu0 %v1752_v1 }
 0x406   : > { %10390 = vmatprep.subr.mxu0 %v1751_v40 }
 0x407   : > { %10391 = vmatpush3.msra.mxu0 %v1751_v40  ;;  %v12523_v40 = vpop.f32.mrf.mxu1 }
 0x408   : > { %10392 = vmatprep.subr.mxu0 %v1750_v33 }
 0x409   : > { %10393 = vmatpush3.msra.mxu0 %v1750_v33  ;;  %v1681_v33 = vadd.f32 %v9198_v58, %v12443_v60  ;;  %v12527_v4 = vpop.f32.mrf.mxu1  ;;  %v1661_v60 = vadd.f32 %v9198_v58, %v12397_v45  ;;  %v2976_v45 = vld [vmem:[%s15465_s3 + $0x90] sm:$0xff]  ;;  %v11204_v58 = vld [vmem:[%s11584_s8 + $0x8] sm:$0xff] }
 0x40a   : > { %10394 = vmatprep.subr.mxu0 %v1749_v55 }
 0x40b   : > { %10395 = vmatpush3.msra.mxu0 %v1749_v55  ;;  %v1743_v61 = vmax.f32 %v1681_v33, 0.0  ;;  %v12531_v49 = vpop.f32.mrf.mxu1  ;;  %v1739_v57 = vmax.f32 %v1661_v60, 0.0  ;;  %v2975_v55 = vld [vmem:[%s15465_s3 + $0x88] sm:$0xff] }
 0x40c   : > { %10396 = vmatprep.subr.mxu0 %v1748_v59  ;;  %v11208_v33 = vld [vmem:[%s11584_s8 + $0x28] sm:$0xff] }
 0x40d   : > { %10397 = vmatpush3.msra.mxu0 %v1748_v59  ;;  %v12534_v1 = vpop.f32.mrf.mxu1  ;;  %v2974_v59 = vld [vmem:[%s15465_s3 + $0x80] sm:$0xff] }
 0x40e   : > { %10398 = vmatprep.subr.mxu0 %v1747_v35 }
 0x40f   : > { %10399 = vmatpush3.msra.mxu0 %v1747_v35  ;;  %v12539_v52 = vpop.f32.mrf.mxu1  ;;  %v11207_v35 = vld [vmem:[%s11584_s8 + $0x20] sm:$0xff] }
 0x410   : > { %10400 = vmatprep.subr.mxu0 %v1746_v38 }
 0x411   : > { %10401 = vmatpush3.msra.mxu0 %v1746_v38  ;;  %v12549_v62 = vpop.f32.mrf.mxu1 }
 0x412   : > { %10402 = vmatprep.subr.mxu0 %v1745_v2 }
 0x413   : > { %10403 = vmatpush3.msra.mxu0 %v1745_v2  ;;  %v12559_v38 = vpop.f32.mrf.mxu1  ;;  %v11209_v2 = vld [vmem:[%s11584_s8 + $0x30] sm:$0xff] }
 0x414   : > { %10404 = vmatprep.subr.mxu0 %v1744_v37 }
 0x415   : > { %10405 = vmatpush3.msra.mxu0 %v1744_v37  ;;  %v12563_v30 = vpop.f32.mrf.mxu1  ;;  %v11210_v37 = vld [vmem:[%s11584_s8 + $0x38] sm:$0xff] }
 0x416   : > { %10406 = vmatprep.subr.mxu0 %v1743_v61 }
 0x417   : > { %10407 = vmatpush3.msra.mxu0 %v1743_v61  ;;  %v12567_v61 = vpop.f32.mrf.mxu1 }
 0x418   : > { %10408 = vmatprep.subr.mxu0 %v1742_v34 }
 0x419   : > { %10409 = vmatpush3.msra.mxu0 %v1742_v34  ;;  %v11213_v34 = vld [vmem:[%s11584_s8 + $0x50] sm:$0xff]  ;;  %v12571_v60 = vpop.f32.mrf.mxu1 }
 0x41a   : > { %10410 = vmatprep.subr.mxu0 %v1741_v3 }
 0x41b   : > { %10411 = vmatpush3.msra.mxu0 %v1741_v3  ;;  %v11214_v3 = vld [vmem:[%s11584_s8 + $0x58] sm:$0xff] }
 0x41c   : > { %10412 = vmatprep.subr.mxu0 %v1740_v32 }
 0x41d   : > { %10413 = vmatpush3.msra.mxu0 %v1740_v32  ;;  %v15601_v32 = vrot.slane %v11765_v53, 6 }
 0x41e   : > { %10414 = vmatprep.subr.mxu0 %v1739_v57 }
 0x41f   : > { %10415 = vmatpush3.msra.mxu0 %v1739_v57  ;;  %v11215_v57 = vld [vmem:[%s11584_s8 + $0x60] sm:$0xff] }
 0x420   : > { %10417 = vmatmul.mubr.f32.vlgmr.msra.gmra.mxu0 %v11204_v58  ;;  %10496 = vmatprep.subr.mxu0 %v2977_v42  ;;  %v12580_v58 = vpop.f32.mrf.mxu1 }
 0x421   : > { %10497 = vmatpush3.msra.mxu0 %v2977_v42  ;;  %10419 = vmatprep.mubr.f32.mxu0 %v11205_v46  ;;  %v15795_v42 = vand.u32 15, %v11744_v9  ;;  %v2978_v46 = vrot.slane %v11632_v12, 6 }
 0x422   : > { %10498 = vmatprep.subr.mxu0 %v2976_v45 }
 0x423   : > { %10499 = vmatpush3.msra.mxu0 %v2976_v45  ;;  %v12578_v45 = vadd.s32 4294967294, %v15795_v42  ;;  %v2982_v42 = vrot.slane %v11640_v16, 6 }
 0x424   : > { %10420 = vmatmul.mubr.f32.gmra.mxu0 %v11206_v50  ;;  %10500 = vmatprep.subr.mxu0 %v2975_v55  ;;  %v3042_v50 = vsel %vm3010_vm3, %v15601_v32, %v2978_v46 }
 0x425   : > { %10422 = vmatprep.mubr.f32.mxu0 %v11207_v35  ;;  %10501 = vmatpush3.msra.mxu0 %v2975_v55  ;;  %15796 = vst [vmem:[#allocation81_spill] sm:$0xff] %v12578_v45  ;;  %v11216_v55 = vld [vmem:[%s11584_s8 + $0x68] sm:$0xff]  ;;  %vm2494_vm5 = vcmp.ge.s32.totalorder %v12578_v45, 0  ;;  %v15797_v35 = vand.u32 15, %v11759_v56 }
 0x426   : > { %10502 = vmatprep.subr.mxu0 %v2974_v59 }
 0x427   : > { %10503 = vmatpush3.msra.mxu0 %v2974_v59  ;;  %v11217_v59 = vld [vmem:[%s11584_s8 + $0x70] sm:$0xff] }
 0x428   : > { %10423 = vmatmul.mubr.f32.gmra.mxu0 %v11208_v33  ;;  %10608 = vmatprep.subr.mxu0 %v4306_v36  ;;  %v12593_v33 = vadd.s32 4294967294, %v15797_v35  ;;  %v4305_v35 = vld [vmem:[%s15465_s3 + $0xf0] sm:$0xff] }
 0x429   : > { %10425 = vmatprep.mubr.f32.mxu0 %v11209_v2  ;;  %v2980_v2 = vrot.slane %v11636_v14, 6 }
 0x42a   : > { %15798 = vst [vmem:[#allocation82_spill] sm:$0xff] %v12593_v33  ;;  %vm2496_vm6 = vcmp.ge.s32.totalorder %v12593_v33, 0  ;;  %v15832_v33 = vld [vmem:[#allocation7_spill] sm:$0xff] }
 0x42c   : > { %10426 = vmatmul.mubr.f32.gmra.mxu0 %v11210_v37  ;;  %v12596_v37 = vpop.f32.mrf.mxu1 }
 0x42d   : > { %10428 = vmatprep.mubr.f32.mxu0 %v11211_v63  ;;  %v2979_v63 = vrot.slane %v11630_v11, 6 }
 0x42f   : > { %v3040_v56 = vsel %vm3010_vm3, %v2979_v63, %v2980_v2 }
 0x430   : > { %10429 = vmatmul.mubr.f32.gmra.mxu0 %v11212_v54  ;;  %v11218_v54 = vld [vmem:[%s11584_s8 + $0x78] sm:$0xff] }
 0x431   : > { %10431 = vmatprep.mubr.f32.mxu0 %v11213_v34  ;;  %v3107_v34 = vsel %vm2494_vm5, %v3042_v50, 0.0  ;;  %v2981_v50 = vrot.slane %v11634_v13, 6 }
 0x434   : > { %10432 = vmatmul.mubr.f32.gmra.mxu0 %v11214_v3  ;;  %v15799_v3 = vand.u32 15, %v11776_v43  ;;  %v3109_v43 = vsel %vm2496_vm6, %v3040_v56, 0.0  ;;  %v2983_v56 = vrot.slane %v11638_v15, 6 }
 0x435   : > { %10434 = vmatprep.mubr.f32.mxu0 %v11215_v57 }
 0x436   : > { %v12608_v57 = vadd.s32 4294967294, %v15799_v3  ;;  %v4304_v3 = vld [vmem:[%s15465_s3 + $0xe8] sm:$0xff] }
 0x438   : > { %10435 = vmatmul.mubr.f32.gmra.mxu0 %v11216_v55  ;;  %15800 = vst [vmem:[#allocation83_spill] sm:$0xff] %v12608_v57  ;;  %v12611_v55 = vpop.f32.mrf.mxu1  ;;  %vm2498_vm1 = vcmp.ge.s32.totalorder %v12608_v57, 0 }
 0x439   : > { %10437 = vmatprep.mubr.f32.mxu0 %v11217_v59  ;;  %v3041_v59 = vsel %vm3010_vm3, %v2978_v46, %v2979_v63  ;;  %v15801_v46 = vand.u32 15, %v11801_v44  ;;  %v4303_v44 = vld [vmem:[%s15465_s3 + $0xe0] sm:$0xff] }
 0x43b   : > { %v12628_v63 = vadd.s32 4294967294, %v15801_v46  ;;  %v2986_v46 = vrot.slane %v11648_v19, 6 }
 0x43c   : > { %10438 = vmatmul.mubr.f32.gmra.mxu0 %v11218_v54  ;;  %v3038_v54 = vsel %vm3010_vm3, %v2981_v50, %v2982_v42 }
 0x43d   : > { %10504 = vmatprep.mubr.msk.f32.mxu0 %vm1166_vm7, %v3107_v34  ;;  %15802 = vst [vmem:[#allocation84_spill] sm:$0xff] %v12628_v63  ;;  %v2984_v34 = vrot.slane %v11644_v48, 6  ;;  %vm2500_vm0 = vcmp.ge.s32.totalorder %v12628_v63, 0  ;;  %v15826_v63 = vld [vmem:[#allocation4_spill] sm:$0xff] }
 0x440   : > { %10505 = vmatmul.mubr.msk.f32.vlgmr.msra.gmra.mxu0 %vm1166_vm7, %v3041_v59  ;;  %v12634_v59 = vpop.f32.mrf.mxu1 }
 0x441   : > { %10507 = vmatprep.mubr.msk.f32.mxu0 %vm1166_vm7, %v3109_v43  ;;  %10609 = vmatpush3.msra.mxu0 %v4306_v36  ;;  %v3039_v36 = vsel %vm3010_vm3, %v2980_v2, %v2981_v50  ;;  %v3111_v43 = vsel %vm2498_vm1, %v3038_v54, 0.0  ;;  %v3036_v2 = vsel %vm3010_vm3, %v2983_v56, %v2984_v34  ;;  %v15803_v50 = vand.u32 15, %v11824_v8 }
 0x442   : > { %10610 = vmatprep.subr.mxu0 %v4305_v35  ;;  %v12654_v32 = vpop.f32.mrf.mxu1  ;;  %v3037_v54 = vsel %vm3010_vm3, %v2982_v42, %v2983_v56  ;;  %v2988_v42 = vrot.slane %v11652_v21, 6 }
 0x443   : > { %10611 = vmatpush3.msra.mxu0 %v4305_v35  ;;  %v12651_v35 = vadd.s32 4294967294, %v15803_v50  ;;  %15805 = vst [vmem:[#allocation86_spill] sm:$0xff] %v12654_v32 }
 0x444   : > { %10508 = vmatmul.mubr.msk.f32.gmra.mxu0 %vm1166_vm7, %v3039_v36  ;;  %10612 = vmatprep.subr.mxu0 %v4304_v3  ;;  %v2985_v36 = vrot.slane %v11642_v17, 6  ;;  %v12671_v56 = vpop.f32.mrf.mxu1 }
 0x445   : > { %10510 = vmatprep.mubr.msk.f32.mxu0 %vm1166_vm7, %v3111_v43  ;;  %15804 = vst [vmem:[#allocation85_spill] sm:$0xff] %v12651_v35  ;;  %10613 = vmatpush3.msra.mxu0 %v4304_v3  ;;  %v3113_v43 = vsel %vm2500_vm0, %v3036_v2, 0.0  ;;  %vm15670_vm15 = vcmp.ge.s32.totalorder %v12651_v35, 0  ;;  %v15806_v3 = vand.u32 15, %v11846_v0  ;;  %15808 = vst [vmem:[#allocation88_spill] sm:$0xff] %v12671_v56  ;;  %v2987_v2 = vrot.slane %v11646_v18, 6 }
 0x446   : > { %10614 = vmatprep.subr.mxu0 %v4303_v44  ;;  %v3034_v8 = vsel %vm3010_vm3, %v2985_v36, %v2986_v46 }
 0x447   : > { %10615 = vmatpush3.msra.mxu0 %v4303_v44  ;;  %v12668_v50 = vadd.s32 4294967294, %v15806_v3  ;;  %v3035_v44 = vsel %vm3010_vm3, %v2984_v34, %v2985_v36  ;;  %v3032_v0 = vsel %vm3010_vm3, %v2987_v2, %v2988_v42  ;;  %v2990_v34 = vrot.slane %v11656_v23, 6  ;;  %v12688_v36 = vpop.f32.mrf.mxu1 }
 0x448   : > { %10511 = vmatmul.mubr.msk.f32.gmra.mxu0 %vm1166_vm7, %v3037_v54  ;;  %v3115_v54 = vsel %vm15670_vm15, %v3034_v8, 0.0  ;;  %15811 = vst [vmem:[#allocation90_spill] sm:$0xff] %v12688_v36  ;;  %v2989_v8 = vrot.slane %v11650_v20, 6  ;;  %v15850_v36 = vld [vmem:[#allocation47_spill] sm:$0xff]  ;;  %vm7617_vm15 = vcmask 1046534  }
 0x449   : > { %10513 = vmatprep.mubr.msk.f32.mxu0 %vm1166_vm7, %v3113_v43  ;;  %15807 = vst [vmem:[#allocation87_spill] sm:$0xff] %v12668_v50  ;;  %vm15606_vm14 = vcmp.ge.s32.totalorder %v12668_v50, 0  ;;  %v15809_v43 = vand.u32 15, %v11881_v47 }
 0x44a   : > { %v3030_v47 = vsel %vm3010_vm3, %v2989_v8, %v2990_v34 }
 0x44b   : > { %v12685_v3 = vadd.s32 4294967294, %v15809_v43  ;;  %v15812_v43 = vand.u32 15, %v11906_v41 }
 0x44c   : > { %10514 = vmatmul.mubr.msk.f32.gmra.mxu0 %vm1166_vm7, %v3035_v44  ;;  %v3033_v44 = vsel %vm3010_vm3, %v2986_v46, %v2987_v2  ;;  %v2992_v46 = vrot.slane %v11660_v25, 6  ;;  %v12705_v2 = vpop.f32.mrf.mxu1 }
 0x44d   : > { %10516 = vmatprep.mubr.msk.f32.mxu0 %vm1166_vm7, %v3115_v54  ;;  %15810 = vst [vmem:[#allocation89_spill] sm:$0xff] %v12685_v3  ;;  %v3117_v54 = vsel %vm15606_vm14, %v3032_v0, 0.0  ;;  %vm15608_vm13 = vcmp.ge.s32.totalorder %v12685_v3, 0  ;;  %v12702_v35 = vadd.s32 4294967294, %v15812_v43  ;;  %15814 = vst [vmem:[#allocation92_spill] sm:$0xff] %v12705_v2  ;;  %v2991_v0 = vrot.slane %v11654_v22, 6 }
 0x44e   : > { %v15815_v43 = vand.u32 15, %v11916_v7 }
 0x44f   : > { %15813 = vst [vmem:[#allocation91_spill] sm:$0xff] %v12702_v35  ;;  %vm15610_vm14 = vcmp.ge.s32.totalorder %v12702_v35, 0  ;;  %v3028_v41 = vsel %vm3010_vm3, %v2991_v0, %v2992_v46 }
 0x450   : > { %10517 = vmatmul.mubr.msk.f32.gmra.mxu0 %vm1166_vm7, %v3033_v44  ;;  %v3031_v44 = vsel %vm3010_vm3, %v2988_v42, %v2989_v8  ;;  %v12719_v50 = vadd.s32 4294967294, %v15815_v43  ;;  %v2994_v42 = vrot.slane %v11664_v27, 6  ;;  %v12722_v8 = vpop.f32.mrf.mxu1  ;;  %v15818_v43 = vand.u32 15, %v11935_v10 }
 0x451   : > { %10519 = vmatprep.mubr.msk.f32.mxu0 %vm1166_vm7, %v3117_v54  ;;  %v3119_v54 = vsel %vm15608_vm13, %v3030_v47, 0.0  ;;  %15817 = vst [vmem:[#allocation94_spill] sm:$0xff] %v12722_v8  ;;  %v2993_v47 = vrot.slane %v11658_v24, 6  ;;  %v15844_v8 = vld [vmem:[#allocation20_spill] sm:$0xff] }
 0x452   : > { %15816 = vst [vmem:[#allocation93_spill] sm:$0xff] %v12719_v50  ;;  %vm15612_vm13 = vcmp.ge.s32.totalorder %v12719_v50, 0  ;;  %v12736_v3 = vadd.s32 4294967294, %v15818_v43  ;;  %v15821_v43 = vand.u32 15, %v11963_v51 }
 0x453   : > { %v3026_v7 = vsel %vm3010_vm3, %v2993_v47, %v2994_v42 }
 0x454   : > { %10520 = vmatmul.mubr.msk.f32.gmra.mxu0 %vm1166_vm7, %v3031_v44  ;;  %v3029_v44 = vsel %vm3010_vm3, %v2990_v34, %v2991_v0  ;;  %15819 = vst [vmem:[#allocation95_spill] sm:$0xff] %v12736_v3  ;;  %v2996_v34 = vrot.slane %v11668_v29, 6  ;;  %v12739_v0 = vpop.f32.mrf.mxu1  ;;  %v12753_v35 = vadd.s32 4294967294, %v15821_v43  ;;  %v15824_v43 = vand.u32 15, %v11982_v5 }
 0x455   : > { %10522 = vmatprep.mubr.msk.f32.mxu0 %vm1166_vm7, %v3119_v54  ;;  %v3121_v54 = vsel %vm15610_vm14, %v3028_v41, 0.0  ;;  %15820 = vst [vmem:[#allocation96_spill] sm:$0xff] %v12739_v0  ;;  %v2995_v41 = vrot.slane %v11662_v26, 6  ;;  %vm15616_vm14 = vcmp.ge.s32.totalorder %v12736_v3, 0  ;;  %v15828_v3 = vld [vmem:[#allocation2_spill] sm:$0xff] }
 0x456   : > { %15822 = vst [vmem:[#allocation97_spill] sm:$0xff] %v12753_v35  ;;  %v12770_v50 = vadd.s32 4294967294, %v15824_v43  ;;  %v15829_v43 = vld [vmem:[#allocation38_spill] sm:$0xff] }
 0x457   : > { %v3024_v10 = vsel %vm3010_vm3, %v2995_v41, %v2996_v34  ;;  %v15830_v57 = vand.u32 15, %v15829_v43  ;;  %v15835_v43 = vld [vmem:[#allocation40_spill] sm:$0xff] }
 0x458   : > { %10523 = vmatmul.mubr.msk.f32.gmra.mxu0 %vm1166_vm7, %v3029_v44  ;;  %v3027_v44 = vsel %vm3010_vm3, %v2992_v46, %v2993_v47  ;;  %v2998_v46 = vrot.slane %v11672_v31, 6  ;;  %v12756_v47 = vpop.f32.mrf.mxu1  ;;  %15825 = vst [vmem:[#allocation99_spill] sm:$0xff] %v12770_v50 }
 0x459   : > { %10525 = vmatprep.mubr.msk.f32.mxu0 %vm1166_vm7, %v3121_v54  ;;  %v3123_v54 = vsel %vm15612_vm13, %v3026_v7, 0.0  ;;  %15823 = vst [vmem:[#allocation98_spill] sm:$0xff] %v12756_v47  ;;  %v2997_v7 = vrot.slane %v11666_v28, 6  ;;  %vm15621_vm13 = vcmp.ge.s32.totalorder %v12753_v35, 0  ;;  %v12787_v45 = vadd.s32 4294967294, %v15830_v57  ;;  %v15834_v35 = vld [vmem:[#allocation3_spill] sm:$0xff] }
 0x45a   : > { %v15838_v47 = vld [vmem:[#allocation13_spill] sm:$0xff] }
 0x45b   : > { %v3022_v51 = vsel %vm3010_vm3, %v2997_v7, %v2998_v46  ;;  %15831 = vst [vmem:[#allocation2_spill] sm:$0xff] %v12787_v45 }
 0x45c   : > { %10526 = vmatmul.mubr.msk.f32.gmra.mxu0 %vm1166_vm7, %v3027_v44  ;;  %v3025_v44 = vsel %vm3010_vm3, %v2994_v42, %v2995_v41  ;;  %v3000_v42 = vrot.slane %v15826_v63, 6  ;;  %v12773_v41 = vpop.f32.mrf.mxu1 }
 0x45d   : > { %10528 = vmatprep.mubr.msk.f32.mxu0 %vm1166_vm7, %v3123_v54  ;;  %v3125_v54 = vsel %vm15616_vm14, %v3024_v10, 0.0  ;;  %15827 = vst [vmem:[#allocation4_spill] sm:$0xff] %v12773_v41  ;;  %v2999_v10 = vrot.slane %v15828_v3, 6  ;;  %vm15623_vm14 = vcmp.ge.s32.totalorder %v12770_v50, 0  ;;  %v15836_v41 = vand.u32 15, %v15835_v43  ;;  %v15840_v50 = vld [vmem:[#allocation5_spill] sm:$0xff] }
 0x45e   : > { %v15841_v43 = vld [vmem:[#allocation43_spill] sm:$0xff] }
 0x45f   : > { %v3020_v5 = vsel %vm3010_vm3, %v2999_v10, %v3000_v42  ;;  %v15842_v0 = vand.u32 15, %v15841_v43  ;;  %v15847_v43 = vld [vmem:[#allocation45_spill] sm:$0xff] }
 0x460   : > { %10529 = vmatmul.mubr.msk.f32.gmra.mxu0 %vm1166_vm7, %v3025_v44  ;;  %v3023_v44 = vsel %vm3010_vm3, %v2996_v34, %v2997_v7  ;;  %v3002_v34 = vrot.slane %v15832_v33, 6  ;;  %v12790_v7 = vpop.f32.mrf.mxu1  ;;  %v15848_v2 = vand.u32 15, %v15847_v43 }
 0x461   : > { %10531 = vmatprep.mubr.msk.f32.mxu0 %vm1166_vm7, %v3125_v54  ;;  %v3127_v54 = vsel %vm15621_vm13, %v3022_v51, 0.0  ;;  %15833 = vst [vmem:[#allocation38_spill] sm:$0xff] %v12790_v7  ;;  %v3001_v51 = vrot.slane %v15834_v35, 6  ;;  %vm15625_vm13 = vcmp.ge.s32.totalorder %v12787_v45, 0  ;;  %v12804_v7 = vadd.s32 4294967294, %v15836_v41  ;;  %v15846_v45 = vld [vmem:[#allocation10_spill] sm:$0xff] }
 0x463   : > { %v3018_v57 = vsel %vm3010_vm3, %v3001_v51, %v3002_v34  ;;  %15837 = vst [vmem:[#allocation7_spill] sm:$0xff] %v12804_v7 }
 0x464   : > { %10532 = vmatmul.mubr.msk.f32.gmra.mxu0 %vm1166_vm7, %v3023_v44  ;;  %v3021_v44 = vsel %vm3010_vm3, %v2998_v46, %v2999_v10  ;;  %v3004_v46 = vrot.slane %v15838_v47, 6  ;;  %v12807_v10 = vpop.f32.mrf.mxu1 }
 0x465   : > { %10534 = vmatprep.mubr.msk.f32.mxu0 %vm1166_vm7, %v3127_v54  ;;  %v3129_v54 = vsel %vm15623_vm14, %v3020_v5, 0.0  ;;  %15839 = vst [vmem:[#allocation3_spill] sm:$0xff] %v12807_v10  ;;  %v3003_v5 = vrot.slane %v15840_v50, 6  ;;  %vm15627_vm14 = vcmp.ge.s32.totalorder %v12804_v7, 0  ;;  %v12821_v10 = vadd.s32 4294967294, %v15842_v0  ;;  %v15852_v7 = vld [vmem:[#allocation16_spill] sm:$0xff] }
 0x467   : > { %v3016_v41 = vsel %vm3010_vm3, %v3003_v5, %v3004_v46  ;;  %15843 = vst [vmem:[#allocation40_spill] sm:$0xff] %v12821_v10 }
 0x468   : > { %10535 = vmatmul.mubr.msk.f32.gmra.mxu0 %vm1166_vm7, %v3021_v44  ;;  %v3019_v44 = vsel %vm3010_vm3, %v3000_v42, %v3001_v51  ;;  %v3006_v42 = vrot.slane %v15844_v8, 6  ;;  %v12824_v51 = vpop.f32.mrf.mxu1 }
 0x469   : > { %10537 = vmatprep.mubr.msk.f32.mxu0 %vm1166_vm7, %v3129_v54  ;;  %v3131_v54 = vsel %vm15625_vm13, %v3018_v57, 0.0  ;;  %15845 = vst [vmem:[#allocation13_spill] sm:$0xff] %v12824_v51  ;;  %v3005_v57 = vrot.slane %v15846_v45, 6  ;;  %vm15629_vm13 = vcmp.ge.s32.totalorder %v12821_v10, 0  ;;  %v12838_v51 = vadd.s32 4294967294, %v15848_v2 }
 0x46b   : > { %v3014_v0 = vsel %vm3010_vm3, %v3005_v57, %v3006_v42  ;;  %15849 = vst [vmem:[#allocation5_spill] sm:$0xff] %v12838_v51 }
 0x46c   : > { %10538 = vmatmul.mubr.msk.f32.gmra.mxu0 %vm1166_vm7, %v3019_v44  ;;  %v3017_v44 = vsel %vm3010_vm3, %v3002_v34, %v3003_v5  ;;  %v3008_v34 = vrot.slane %v15850_v36, 6  ;;  %v12841_v5 = vpop.f32.mrf.mxu1 }
 0x46d   : > { %10540 = vmatprep.mubr.msk.f32.mxu0 %vm1166_vm7, %v3131_v54  ;;  %v3133_v54 = vsel %vm15627_vm14, %v3016_v41, 0.0  ;;  %15851 = vst [vmem:[#allocation43_spill] sm:$0xff] %v12841_v5  ;;  %v3007_v41 = vrot.slane %v15852_v7, 6  ;;  %vm15630_vm14 = vcmp.ge.s32.totalorder %v12838_v51, 0 }
 0x46e   : > { %v12853_v43 = vpop.f32.mrf.mxu1 }
 0x46f   : > { %v3012_v2 = vsel %vm3010_vm3, %v3007_v41, %v3008_v34  ;;  %15853 = vst [vmem:[#allocation20_spill] sm:$0xff] %v12853_v43  ;;  %v3013_v5 = vsel %vm3010_vm3, %v3006_v42, %v3007_v41  ;;  %v4308_v42 = vrot.slane %v11630_v11, 1  ;;  %v15859_v41 = vld [vmem:[#allocation50_spill] sm:$0xff] }
 0x470   : > { %10541 = vmatmul.mubr.msk.f32.gmra.mxu0 %vm1166_vm7, %v3017_v44  ;;  %v3015_v44 = vsel %vm3010_vm3, %v3004_v46, %v3005_v57  ;;  %v4309_v46 = vrot.slane %v11636_v14, 1  ;;  %v3137_v57 = vsel %vm15630_vm14, %v3012_v2, 0.0  ;;  %v12868_v43 = vpop.f32.mrf.mxu1  ;;  %v15858_v14 = vrot.slane %v11765_v53, 6 }
 0x471   : > { %10543 = vmatprep.mubr.msk.f32.mxu0 %vm1166_vm7, %v3133_v54  ;;  %v3135_v54 = vsel %vm15629_vm13, %v3014_v0, 0.0  ;;  %vm15668_vm13 = vcmp.lt.s32.totalorder %v11744_v9, 7  ;;  %15857 = vst [vmem:[#allocation45_spill] sm:$0xff] %v12868_v43  ;;  %v15860_v2 = vand.u32 15, %v15859_v41 }
 0x472   : > { %v4369_v11 = vsel %vm15668_vm13, %v4308_v42, %v4309_v46 }
 0x473   : > { %v12877_v0 = vadd.s32 1, %v15860_v2 }
 0x474   : > { %10544 = vmatmul.mubr.msk.f32.gmra.mxu0 %vm1166_vm7, %v3015_v44  ;;  %v15854_v44 = vld [vmem:[#allocation49_spill] sm:$0xff] }
 0x475   : > { %10546 = vmatprep.mubr.msk.f32.mxu0 %vm1166_vm7, %v3135_v54  ;;  %v15855_v54 = vand.u32 15, %v15854_v44  ;;  %15861 = vst [vmem:[#allocation47_spill] sm:$0xff] %v12877_v0  ;;  %v15862_v44 = vrot.slane %v11632_v12, 1  ;;  %vm15635_vm12 = vcmp.lt.s32.totalorder %v12877_v0, 16 }
 0x477   : > { %v12864_v10 = vadd.s32 1, %v15855_v54  ;;  %v4311_v54 = vrot.slane %v11640_v16, 1  ;;  %v15864_v16 = vld [vmem:[#allocation52_spill] sm:$0xff] }
 0x478   : > { %10547 = vmatmul.mubr.msk.f32.gmra.mxu0 %vm1166_vm7, %v3013_v5  ;;  %v3011_v5 = vsel %vm3010_vm3, %v3008_v34, %v15858_v14  ;;  %v12889_v34 = vpop.f32.mrf.mxu1  ;;  %v4310_v14 = vrot.slane %v11634_v13, 1  ;;  %v15865_v2 = vand.u32 15, %v15864_v16 }
 0x479   : > { %15856 = vst [vmem:[#allocation10_spill] sm:$0xff] %v12864_v10  ;;  %10549 = vmatprep.mubr.msk.f32.mxu0 %vm1166_vm7, %v3137_v57  ;;  %v4370_v57 = vsel %vm15668_vm13, %v15862_v44, %v4308_v42  ;;  %vm15634_vm14 = vcmp.lt.s32.totalorder %v12864_v10, 16  ;;  %15863 = vst [vmem:[#allocation16_spill] sm:$0xff] %v12889_v34  ;;  %v15868_v10 = vld [vmem:[#allocation54_spill] sm:$0xff] }
 0x47a   : > { %v4368_v41 = vsel %vm15668_vm13, %v4309_v46, %v4310_v14  ;;  %v4367_v42 = vsel %vm15668_vm13, %v4310_v14, %v4311_v54  ;;  %v12902_v44 = vadd.s32 1, %v15865_v2  ;;  %v12906_v13 = vpop.f32.mrf.mxu1  ;;  %v15869_v46 = vand.u32 15, %v15868_v10 }
 0x47b   : > { %15867 = vst [vmem:[#allocation50_spill] sm:$0xff] %v12906_v13  ;;  %v4314_v10 = vrot.slane %v11642_v17, 1 }
 0x47c   : > { %10550 = vmatmul.mubr.msk.f32.gmra.mxu0 %vm1166_vm7, %v3011_v5  ;;  %v4437_v5 = vsel %vm15634_vm14, %v4369_v11, 0.0  ;;  %15866 = vst [vmem:[#allocation49_spill] sm:$0xff] %v12902_v44  ;;  %v4312_v11 = vrot.slane %v11638_v15, 1  ;;  %v12913_v51 = vadd.s32 1, %v15869_v46  ;;  %vm15636_vm14 = vcmp.lt.s32.totalorder %v12902_v44, 16  ;;  %v12923_v15 = vpop.f32.mrf.mxu1  ;;  %v15927_v44 = vld [vmem:[#allocation9_spill] sm:$0xff] }
 0x47d   : > { %10616 = vmatprep.mubr.msk.f32.mxu0 %vm1166_vm7, %v4370_v57  ;;  %v4313_v57 = vrot.slane %v11644_v48, 1  ;;  %v4316_v46 = vrot.slane %v11646_v18, 1 }
 0x47e   : > { %15870 = vst [vmem:[#allocation52_spill] sm:$0xff] %v12913_v51  ;;  %v4366_v14 = vsel %vm15668_vm13, %v4311_v54, %v4312_v11  ;;  %v12940_v17 = vpop.f32.mrf.mxu1 }
 0x47f   : > { %v4365_v48 = vsel %vm15668_vm13, %v4312_v11, %v4313_v57  ;;  %v4364_v54 = vsel %vm15668_vm13, %v4313_v57, %v4314_v10 }
 0x480   : > { %10617 = vmatmul.mubr.msk.f32.vlgmr.msra.gmra.mxu0 %vm1166_vm7, %v4437_v5  ;;  %v4439_v5 = vsel %vm15635_vm12, %v4367_v42, 0.0  ;;  %v4441_v42 = vsel %vm15636_vm14, %v4365_v48, 0.0  ;;  %vm15637_vm12 = vcmp.lt.s32.totalorder %v12913_v51, 16  ;;  %v15874_v48 = vld [vmem:[#allocation58_spill] sm:$0xff]  ;;  %v12957_v18 = vpop.f32.mrf.mxu1 }
 0x481   : > { %10619 = vmatprep.mubr.msk.f32.mxu0 %vm1166_vm7, %v4368_v41  ;;  %v4315_v41 = vrot.slane %v11648_v19, 1  ;;  %v15871_v19 = vld [vmem:[#allocation55_spill] sm:$0xff]  ;;  %v15875_v57 = vand.u32 15, %v15874_v48  ;;  %v4321_v48 = vrot.slane %v11660_v25, 1 }
 0x482   : > { %v15872_v2 = vand.u32 15, %v15871_v19 }
 0x483   : > { %v4363_v16 = vsel %vm15668_vm13, %v4314_v10, %v4315_v41  ;;  %v4362_v10 = vsel %vm15668_vm13, %v4315_v41, %v4316_v46 }
 0x484   : > { %10620 = vmatmul.mubr.msk.f32.gmra.mxu0 %vm1166_vm7, %v4439_v5  ;;  %v12936_v11 = vadd.s32 1, %v15872_v2  ;;  %v4317_v5 = vrot.slane %v11652_v21, 1 }
 0x485   : > { %10622 = vmatprep.mubr.msk.f32.mxu0 %vm1166_vm7, %v4366_v14  ;;  %v4443_v14 = vsel %vm15637_vm12, %v4363_v16, 0.0  ;;  %v4318_v16 = vrot.slane %v11650_v20, 1  ;;  %v12974_v20 = vpop.f32.mrf.mxu1 }
 0x486   : > { %15873 = vst [vmem:[#allocation54_spill] sm:$0xff] %v12936_v11  ;;  %vm15638_vm14 = vcmp.lt.s32.totalorder %v12936_v11, 16  ;;  %v4361_v21 = vsel %vm15668_vm13, %v4316_v46, %v4317_v5 }
 0x487   : > { %v4445_v19 = vsel %vm15638_vm14, %v4361_v21, 0.0  ;;  %v4360_v41 = vsel %vm15668_vm13, %v4317_v5, %v4318_v16  ;;  %v15880_v21 = vld [vmem:[#allocation62_spill] sm:$0xff] }
 0x488   : > { %10623 = vmatmul.mubr.msk.f32.gmra.mxu0 %vm1166_vm7, %v4441_v42  ;;  %v12947_v42 = vadd.s32 1, %v15875_v57  ;;  %v4320_v57 = vrot.slane %v11654_v22, 1  ;;  %v15881_v5 = vand.u32 15, %v15880_v21  ;;  %v12991_v22 = vpop.f32.mrf.mxu1  ;;  %v4325_v21 = vrot.slane %v11668_v29, 1 }
 0x489   : > { %10625 = vmatprep.mubr.msk.f32.mxu0 %vm1166_vm7, %v4364_v54  ;;  %v4319_v54 = vrot.slane %v11656_v23, 1  ;;  %v15877_v23 = vld [vmem:[#allocation60_spill] sm:$0xff] }
 0x48a   : > { %15876 = vst [vmem:[#allocation55_spill] sm:$0xff] %v12947_v42  ;;  %vm15639_vm12 = vcmp.lt.s32.totalorder %v12947_v42, 16  ;;  %v15878_v46 = vand.u32 15, %v15877_v23  ;;  %v4357_v25 = vsel %vm15668_vm13, %v4320_v57, %v4321_v48 }
 0x48b   : > { %v4359_v2 = vsel %vm15668_vm13, %v4318_v16, %v4319_v54  ;;  %v4358_v16 = vsel %vm15668_vm13, %v4319_v54, %v4320_v57 }
 0x48c   : > { %10626 = vmatmul.mubr.msk.f32.gmra.mxu0 %vm1166_vm7, %v4443_v14  ;;  %v12970_v14 = vadd.s32 1, %v15878_v46 }
 0x48d   : > { %10628 = vmatprep.mubr.msk.f32.mxu0 %vm1166_vm7, %v4362_v10  ;;  %v4447_v10 = vsel %vm15639_vm12, %v4359_v2, 0.0  ;;  %v4322_v2 = vrot.slane %v11658_v24, 1  ;;  %v13008_v24 = vpop.f32.mrf.mxu1 }
 0x48e   : > { %15879 = vst [vmem:[#allocation58_spill] sm:$0xff] %v12970_v14  ;;  %vm15640_vm14 = vcmp.lt.s32.totalorder %v12970_v14, 16 }
 0x48f   : > { %v4449_v23 = vsel %vm15640_vm14, %v4357_v25, 0.0  ;;  %v4356_v54 = vsel %vm15668_vm13, %v4321_v48, %v4322_v2  ;;  %v15886_v25 = vld [vmem:[#allocation66_spill] sm:$0xff] }
 0x490   : > { %10629 = vmatmul.mubr.msk.f32.gmra.mxu0 %vm1166_vm7, %v4445_v19  ;;  %v12981_v19 = vadd.s32 1, %v15881_v5  ;;  %v4324_v5 = vrot.slane %v11662_v26, 1  ;;  %v15887_v48 = vand.u32 15, %v15886_v25  ;;  %v13025_v26 = vpop.f32.mrf.mxu1  ;;  %v4329_v25 = vrot.slane %v15826_v63, 1 }
 0x491   : > { %10631 = vmatprep.mubr.msk.f32.mxu0 %vm1166_vm7, %v4360_v41  ;;  %v4323_v41 = vrot.slane %v11664_v27, 1  ;;  %v15883_v27 = vld [vmem:[#allocation63_spill] sm:$0xff] }
 0x492   : > { %15882 = vst [vmem:[#allocation60_spill] sm:$0xff] %v12981_v19  ;;  %vm15641_vm12 = vcmp.lt.s32.totalorder %v12981_v19, 16  ;;  %v15884_v57 = vand.u32 15, %v15883_v27  ;;  %v4353_v29 = vsel %vm15668_vm13, %v4324_v5, %v4325_v21  ;;  %v15925_v19 = vld [vmem:[#allocation11_spill] sm:$0xff] }
 0x493   : > { %v4355_v46 = vsel %vm15668_vm13, %v4322_v2, %v4323_v41  ;;  %v4354_v2 = vsel %vm15668_vm13, %v4323_v41, %v4324_v5 }
 0x494   : > { %10632 = vmatmul.mubr.msk.f32.gmra.mxu0 %vm1166_vm7, %v4447_v10  ;;  %v13004_v10 = vadd.s32 1, %v15884_v57 }
 0x495   : > { %10634 = vmatprep.mubr.msk.f32.mxu0 %vm1166_vm7, %v4358_v16  ;;  %v4451_v16 = vsel %vm15641_vm12, %v4355_v46, 0.0  ;;  %v4326_v46 = vrot.slane %v11666_v28, 1  ;;  %v13042_v28 = vpop.f32.mrf.mxu1 }
 0x496   : > { %15885 = vst [vmem:[#allocation62_spill] sm:$0xff] %v13004_v10  ;;  %vm15642_vm14 = vcmp.lt.s32.totalorder %v13004_v10, 16 }
 0x497   : > { %v4453_v27 = vsel %vm15642_vm14, %v4353_v29, 0.0  ;;  %v4352_v41 = vsel %vm15668_vm13, %v4325_v21, %v4326_v46  ;;  %v15892_v29 = vld [vmem:[#allocation70_spill] sm:$0xff] }
 0x498   : > { %10635 = vmatmul.mubr.msk.f32.gmra.mxu0 %vm1166_vm7, %v4449_v23  ;;  %v13015_v23 = vadd.s32 1, %v15887_v48  ;;  %v4328_v48 = vrot.slane %v15828_v3, 1  ;;  %v15893_v21 = vand.u32 15, %v15892_v29  ;;  %v13059_v3 = vpop.f32.mrf.mxu1  ;;  %v4333_v29 = vrot.slane %v15838_v47, 1 }
 0x499   : > { %10637 = vmatprep.mubr.msk.f32.mxu0 %vm1166_vm7, %v4356_v54  ;;  %v4327_v54 = vrot.slane %v11672_v31, 1  ;;  %v15889_v31 = vld [vmem:[#allocation68_spill] sm:$0xff] }
 0x49a   : > { %15888 = vst [vmem:[#allocation63_spill] sm:$0xff] %v13015_v23  ;;  %vm15643_vm12 = vcmp.lt.s32.totalorder %v13015_v23, 16  ;;  %v15890_v5 = vand.u32 15, %v15889_v31  ;;  %v4349_v63 = vsel %vm15668_vm13, %v4328_v48, %v4329_v25 }
 0x49b   : > { %v4351_v57 = vsel %vm15668_vm13, %v4326_v46, %v4327_v54  ;;  %v4350_v46 = vsel %vm15668_vm13, %v4327_v54, %v4328_v48 }
 0x49c   : > { %10638 = vmatmul.mubr.msk.f32.gmra.mxu0 %vm1166_vm7, %v4451_v16  ;;  %v13038_v16 = vadd.s32 1, %v15890_v5 }
 0x49d   : > { %10640 = vmatprep.mubr.msk.f32.mxu0 %vm1166_vm7, %v4354_v2  ;;  %v4455_v2 = vsel %vm15643_vm12, %v4351_v57, 0.0  ;;  %v4330_v57 = vrot.slane %v15834_v35, 1  ;;  %v13076_v35 = vpop.f32.mrf.mxu1 }
 0x49e   : > { %15891 = vst [vmem:[#allocation66_spill] sm:$0xff] %v13038_v16  ;;  %vm15644_vm14 = vcmp.lt.s32.totalorder %v13038_v16, 16 }
 0x49f   : > { %v4457_v31 = vsel %vm15644_vm14, %v4349_v63, 0.0  ;;  %v4348_v54 = vsel %vm15668_vm13, %v4329_v25, %v4330_v57  ;;  %v15899_v63 = vld [vmem:[#allocation74_spill] sm:$0xff] }
 0x4a0   : > { %10641 = vmatmul.mubr.msk.f32.gmra.mxu0 %vm1166_vm7, %v4453_v27  ;;  %v13049_v27 = vadd.s32 1, %v15893_v21  ;;  %v4332_v21 = vrot.slane %v15840_v50, 1  ;;  %v15900_v25 = vand.u32 15, %v15899_v63  ;;  %v13093_v50 = vpop.f32.mrf.mxu1  ;;  %v4337_v63 = vrot.slane %v15850_v36, 1 }
 0x4a1   : > { %10643 = vmatprep.mubr.msk.f32.mxu0 %vm1166_vm7, %v4352_v41  ;;  %v4331_v41 = vrot.slane %v15832_v33, 1  ;;  %v15895_v33 = vld [vmem:[#allocation71_spill] sm:$0xff]  ;;  %15902 = vst [vmem:[#allocation100_spill] sm:$0xff] %v13093_v50 }
 0x4a2   : > { %15894 = vst [vmem:[#allocation68_spill] sm:$0xff] %v13049_v27  ;;  %vm15645_vm12 = vcmp.lt.s32.totalorder %v13049_v27, 16  ;;  %v15896_v48 = vand.u32 15, %v15895_v33  ;;  %15898 = vst [vmem:[#allocation71_spill] sm:$0xff] %v13076_v35  ;;  %v4345_v47 = vsel %vm15668_vm13, %v4332_v21, %v4333_v29 }
 0x4a3   : > { %v4347_v5 = vsel %vm15668_vm13, %v4330_v57, %v4331_v41  ;;  %v4346_v57 = vsel %vm15668_vm13, %v4331_v41, %v4332_v21 }
 0x4a4   : > { %10644 = vmatmul.mubr.msk.f32.gmra.mxu0 %vm1166_vm7, %v4455_v2  ;;  %v13072_v2 = vadd.s32 1, %v15896_v48 }
 0x4a5   : > { %10646 = vmatprep.mubr.msk.f32.mxu0 %vm1166_vm7, %v4350_v46  ;;  %v4459_v46 = vsel %vm15645_vm12, %v4347_v5, 0.0  ;;  %v4334_v5 = vrot.slane %v15846_v45, 1  ;;  %v13110_v45 = vpop.f32.mrf.mxu1 }
 0x4a6   : > { %15897 = vst [vmem:[#allocation70_spill] sm:$0xff] %v13072_v2  ;;  %vm15646_vm14 = vcmp.lt.s32.totalorder %v13072_v2, 16  ;;  %15906 = vst [vmem:[#allocation101_spill] sm:$0xff] %v13110_v45 }
 0x4a7   : > { %v4461_v33 = vsel %vm15646_vm14, %v4345_v47, 0.0  ;;  %v4344_v41 = vsel %vm15668_vm13, %v4333_v29, %v4334_v5  ;;  %v15907_v47 = vld [vmem:[#allocation78_spill] sm:$0xff] }
 0x4a8   : > { %10647 = vmatmul.mubr.msk.f32.gmra.mxu0 %vm1166_vm7, %v4457_v31  ;;  %v13083_v31 = vadd.s32 1, %v15900_v25  ;;  %v4336_v25 = vrot.slane %v15852_v7, 1  ;;  %v15908_v29 = vand.u32 15, %v15907_v47  ;;  %v13127_v7 = vpop.f32.mrf.mxu1 }
 0x4a9   : > { %10649 = vmatprep.mubr.msk.f32.mxu0 %vm1166_vm7, %v4348_v54  ;;  %v4335_v54 = vrot.slane %v15844_v8, 1  ;;  %v15903_v8 = vld [vmem:[#allocation76_spill] sm:$0xff]  ;;  %15910 = vst [vmem:[#allocation102_spill] sm:$0xff] %v13127_v7 }
 0x4aa   : > { %15901 = vst [vmem:[#allocation74_spill] sm:$0xff] %v13083_v31  ;;  %vm15647_vm12 = vcmp.lt.s32.totalorder %v13083_v31, 16  ;;  %v15904_v21 = vand.u32 15, %v15903_v8  ;;  %v4341_v36 = vsel %vm15668_vm13, %v4336_v25, %v4337_v63 }
 0x4ab   : > { %v4343_v48 = vsel %vm15668_vm13, %v4334_v5, %v4335_v54  ;;  %v4342_v5 = vsel %vm15668_vm13, %v4335_v54, %v4336_v25  ;;  %v15911_v54 = vrot.slane %v11632_v12, 1 }
 0x4ac   : > { %10650 = vmatmul.mubr.msk.f32.gmra.mxu0 %vm1166_vm7, %v4459_v46  ;;  %v13106_v46 = vadd.s32 1, %v15904_v21 }
 0x4ad   : > { %10652 = vmatprep.mubr.msk.f32.mxu0 %vm1166_vm7, %v4346_v57  ;;  %v4463_v57 = vsel %vm15647_vm12, %v4343_v48, 0.0 }
 0x4ae   : > { %15905 = vst [vmem:[#allocation76_spill] sm:$0xff] %v13106_v46  ;;  %vm15666_vm14 = vcmp.lt.s32.totalorder %v13106_v46, 16 }
 0x4af   : > { %v4465_v48 = vsel %vm15666_vm14, %v4341_v36, 0.0  ;;  %vm15669_vm14 = vcmask 1042434  }
 0x4b0   : > { %10653 = vmatmul.mubr.msk.f32.gmra.mxu0 %vm1166_vm7, %v4461_v33  ;;  %v13117_v33 = vadd.s32 1, %v15908_v29 }
 0x4b1   : > { %10655 = vmatprep.mubr.msk.f32.mxu0 %vm1166_vm7, %v4344_v41  ;;  %v4338_v41 = vrot.slane %v11765_v53, 1  ;;  %v13140_v53 = vpop.f32.mrf.mxu1 }
 0x4b2   : > { %15909 = vst [vmem:[#allocation78_spill] sm:$0xff] %v13117_v33  ;;  %vm15665_vm12 = vcmp.lt.s32.totalorder %v13117_v33, 16  ;;  %15912 = vst [vmem:[#allocation103_spill] sm:$0xff] %v13140_v53  ;;  %v5510_v33 = vld [vmem:[%s15465_s3 + $0x150] sm:$0xff] }
 0x4b3   : > { %v4340_v8 = vsel %vm15668_vm13, %v4337_v63, %v4338_v41  ;;  %v4371_v21 = vsel %vm15668_vm13, %v4338_v41, %v15911_v54  ;;  %vm7613_vm13 = vcmask 1044484  }
 0x4b4   : > { %10656 = vmatmul.mubr.msk.f32.gmra.mxu0 %vm1166_vm7, %v4463_v57  ;;  %v4467_v25 = vsel %vm15665_vm12, %v4371_v21, 0.0  ;;  %v13145_v57 = vpop.f32.mrf.mxu1  ;;  %v15922_v21 = vld [vmem:[#allocation8_spill] sm:$0xff]  ;;  %vm15667_vm12 = vcmask 1041409  }
 0x4b5   : > { %10658 = vmatprep.mubr.msk.f32.mxu0 %vm1166_vm7, %v4342_v5  ;;  %15913 = vst [vmem:[#allocation104_spill] sm:$0xff] %v13145_v57  ;;  %v5511_v5 = vld [vmem:[%s15465_s3 + $0x158] sm:$0xff]  ;;  %v15942_v57 = vld [vmem:[#allocation24_spill] sm:$0xff] }
 0x4b6   : > { %v13147_v47 = vpop.f32.mrf.mxu1  ;;  %10720 = vmatprep.subr.mxu0 %v5511_v5 }
 0x4b7   : > { %15914 = vst [vmem:[#allocation105_spill] sm:$0xff] %v13147_v47  ;;  %10721 = vmatpush3.msra.mxu0 %v5511_v5  ;;  %v15924_v5 = vld [vmem:[#allocation6_spill] sm:$0xff] }
 0x4b8   : > { %10659 = vmatmul.mubr.msk.f32.gmra.mxu0 %vm1166_vm7, %v4465_v48  ;;  %v13149_v63 = vpop.f32.mrf.mxu1  ;;  %10722 = vmatprep.subr.mxu0 %v5510_v33 }
 0x4b9   : > { %10661 = vmatprep.mubr.msk.f32.mxu0 %vm1166_vm7, %v4340_v8  ;;  %15915 = vst [vmem:[#allocation106_spill] sm:$0xff] %v13149_v63  ;;  %10723 = vmatpush3.msra.mxu0 %v5510_v33 }
 0x4ba   : > { %v13151_v29 = vpop.f32.mrf.mxu1 }
 0x4bb   : > { %15916 = vst [vmem:[#allocation107_spill] sm:$0xff] %v13151_v29 }
 0x4bc   : > { %10662 = vmatmul.mubr.msk.f32.gmra.mxu0 %vm1166_vm7, %v4467_v25  ;;  %v13153_v12 = vpop.f32.mrf.mxu1 }
 0x4bd   : > { %15917 = vst [vmem:[#allocation108_spill] sm:$0xff] %v13153_v12 }
 0x4be   : > { %v13158_v36 = vpop.f32.mrf.mxu1 }
 0x4bf   : > { %15918 = vst [vmem:[#allocation109_spill] sm:$0xff] %v13158_v36 }
 0x4c0   : > { %v13160_v41 = vpop.f32.mrf.mxu1 }
 0x4c1   : > { %15919 = vst [vmem:[#allocation110_spill] sm:$0xff] %v13160_v41 }
 0x4c2   : > { %v13162_v48 = vpop.f32.mrf.mxu1 }
 0x4c3   : > { %15920 = vst [vmem:[#allocation111_spill] sm:$0xff] %v13162_v48  ;;  %v15931_v48 = vld [vmem:[#allocation17_spill] sm:$0xff] }
 0x4c4   : > { %v13164_v8 = vpop.f32.mrf.mxu1 }
 0x4c5   : > { %15921 = vst [vmem:[#allocation112_spill] sm:$0xff] %v13164_v8 }
 0x4c6   : > { %v13170_v46 = vpop.f32.mrf.mxu1 }
 0x4c7   : > { %15923 = vst [vmem:[#allocation8_spill] sm:$0xff] %v13170_v46 }
 0x4e0   : > { %v10418_v54 = vpop.f32.mrf.mxu0 }
 0x4e1   : > { %v1901_v25 = vadd.f32 %v10418_v54, %v15922_v21  ;;  %v13176_v54 = vpop.f32.mrf.mxu1 }
 0x4e2   : > { %v1821_v31 = vpop.f32.mrf.mxu0  ;;  %15926 = vst [vmem:[#allocation6_spill] sm:$0xff] %v13176_v54 }
 0x4e3   : > { %v1923_v2 = vsel %vm1166_vm7, %v1901_v25, 0.0  ;;  %v1900_v27 = vadd.f32 %v1821_v31, %v15924_v5  ;;  %v15928_v5 = vld [vmem:[#allocation14_spill] sm:$0xff] }
 0x4e4   : > { %v1924_v16 = vrot.slane %v1923_v2, 4  ;;  %v10421_v23 = vpop.f32.mrf.mxu0 }
 0x4e5   : > { %v1916_v10 = vsel %vm1166_vm7, %v1900_v27, 0.0  ;;  %v1903_v14 = vadd.f32 %v10421_v23, %v15925_v19  ;;  %v13182_v27 = vpop.f32.mrf.mxu1 }
 0x4e6   : > { %v1925_v21 = vadd.f32 %v1924_v16, %v1923_v2  ;;  %v1917_v42 = vrot.slane %v1916_v10, 4  ;;  %v1831_v11 = vpop.f32.mrf.mxu0  ;;  %15929 = vst [vmem:[#allocation11_spill] sm:$0xff] %v13182_v27 }
 0x4e7   : > { %v1937_v51 = vsel %vm1166_vm7, %v1903_v14, 0.0  ;;  %v1902_v0 = vadd.f32 %v1831_v11, %v15927_v44  ;;  %v15930_v14 = vld [vmem:[#allocation12_spill] sm:$0xff] }
 0x4e8   : > { %v1926_v9 = vrot.slane %v1925_v21, 2  ;;  %v1918_v25 = vadd.f32 %v1917_v42, %v1916_v10  ;;  %v1938_v13 = vrot.slane %v1937_v51, 4  ;;  %v10424_v31 = vpop.f32.mrf.mxu0 }
 0x4e9   : > { %v1930_v33 = vsel %vm1166_vm7, %v1902_v0, 0.0  ;;  %v1905_v43 = vadd.f32 %v10424_v31, %v15928_v5  ;;  %v13188_v5 = vpop.f32.mrf.mxu1 }
 0x4ea   : > { %v1919_v19 = vrot.slane %v1918_v25, 2  ;;  %v1939_v23 = vadd.f32 %v1938_v13, %v1937_v51  ;;  %v1931_v54 = vrot.slane %v1930_v33, 4  ;;  %v1841_v16 = vpop.f32.mrf.mxu0  ;;  %v1927_v2 = vadd.f32 %v1926_v9, %v1925_v21  ;;  %15932 = vst [vmem:[#allocation9_spill] sm:$0xff] %v13188_v5 }
 0x4eb   : > { %v1951_v46 = vsel %vm1166_vm7, %v1905_v43, 0.0  ;;  %v1904_v8 = vadd.f32 %v1841_v16, %v15930_v14  ;;  %v15933_v43 = vld [vmem:[#allocation15_spill] sm:$0xff] }
 0x4ec   : > { %v1920_v44 = vadd.f32 %v1919_v19, %v1918_v25  ;;  %v1932_v11 = vadd.f32 %v1931_v54, %v1930_v33  ;;  %v10427_v42 = vpop.f32.mrf.mxu0  ;;  %v1940_v10 = vrot.slane %v1939_v23, 2  ;;  %v1952_v34 = vrot.slane %v1951_v46, 4 }
 0x4ed   : > { %v1944_v0 = vsel %vm1166_vm7, %v1904_v8, 0.0  ;;  %v1907_v31 = vadd.f32 %v10427_v42, %v15931_v48  ;;  %v1928_v41 = vrot.slane %v1927_v2, 1  ;;  %v5509_v48 = vld [vmem:[%s15465_s3 + $0x148] sm:$0xff]  ;;  %v13196_v42 = vpop.f32.mrf.mxu1 }
 0x4ee   : > { %v1921_v27 = vrot.slane %v1920_v44, 1  ;;  %v1933_v51 = vrot.slane %v1932_v11, 2  ;;  %v1851_v13 = vpop.f32.mrf.mxu0  ;;  %v1953_v9 = vadd.f32 %v1952_v34, %v1951_v46  ;;  %v1945_v21 = vrot.slane %v1944_v0, 4  ;;  %15934 = vst [vmem:[#allocation14_spill] sm:$0xff] %v13196_v42  ;;  %10724 = vmatprep.subr.mxu0 %v5509_v48  ;;  %v15937_v42 = vld [vmem:[#allocation19_spill] sm:$0xff] }
 0x4ef   : > { %v1906_v36 = vadd.f32 %v1851_v13, %v15933_v43  ;;  %v1965_v54 = vsel %vm1166_vm7, %v1907_v31, 0.0  ;;  %v1941_v19 = vadd.f32 %v1940_v10, %v1939_v23  ;;  %v1929_v46 = vadd.f32 %v1928_v41, %v1927_v2  ;;  %10725 = vmatpush3.msra.mxu0 %v5509_v48  ;;  %v13202_v12 = vpop.f32.mrf.mxu1  ;;  %v15938_v48 = vld [vmem:[#allocation23_spill] sm:$0xff] }
 0x4f0   : > { %v1934_v16 = vadd.f32 %v1933_v51, %v1932_v11  ;;  %v10430_v25 = vpop.f32.mrf.mxu0  ;;  %v1922_v33 = vadd.f32 %v1921_v27, %v1920_v44  ;;  %v1954_v14 = vrot.slane %v1953_v9, 2  ;;  %v1946_v5 = vadd.f32 %v1945_v21, %v1944_v0  ;;  %v15935_v51 = vld [vmem:[#allocation21_spill] sm:$0xff]  ;;  %15936 = vst [vmem:[#allocation12_spill] sm:$0xff] %v13202_v12 }
 0x4f1   : > { %v1958_v8 = vsel %vm1166_vm7, %v1906_v36, 0.0  ;;  %v1966_v11 = vrot.slane %v1965_v54, 4  ;;  %v1909_v31 = vadd.f32 %v10430_v25, %v15935_v51  ;;  %v1942_v10 = vrot.slane %v1941_v19, 1 }
 0x4f2   : > { %v1861_v34 = vpop.f32.mrf.mxu0  ;;  %v1935_v13 = vrot.slane %v1934_v16, 1  ;;  %v1959_v27 = vrot.slane %v1958_v8, 4  ;;  %v2029_v44 = vmul.f32 0.125, %v1922_v33  ;;  %v13199_v36 = vadd.f32 %v1954_v14, %v1953_v9 }
 0x4f3   : > { %v1979_v43 = vsel %vm1166_vm7, %v1909_v31, 0.0  ;;  %v1947_v0 = vrot.slane %v1946_v5, 2  ;;  %v1908_v41 = vadd.f32 %v1861_v34, %v15937_v42  ;;  %v2030_v29 = vmul.f32 0.125, %v1929_v46  ;;  %v13213_v42 = vpop.f32.mrf.mxu1 }
 0x4f4   : > { %v10433_v23 = vpop.f32.mrf.mxu0  ;;  %v1980_v21 = vrot.slane %v1979_v43, 4  ;;  %v1936_v63 = vadd.f32 %v1935_v13, %v1934_v16  ;;  %v1967_v25 = vadd.f32 %v1966_v11, %v1965_v54  ;;  %v1960_v47 = vadd.f32 %v1959_v27, %v1958_v8  ;;  %15939 = vst [vmem:[#allocation17_spill] sm:$0xff] %v13213_v42  ;;  %v15940_v8 = vld [vmem:[#allocation22_spill] sm:$0xff] }
 0x4f5   : > { %v1911_v51 = vadd.f32 %v10433_v23, %v15938_v48  ;;  %v1972_v9 = vsel %vm1166_vm7, %v1908_v41, 0.0  ;;  %v13208_v31 = vsel %vm15667_vm12, %v2030_v29, %v2029_v44  ;;  %v13210_v12 = vadd.f32 %v1942_v10, %v1941_v19  ;;  %v13224_v42 = vpop.f32.mrf.mxu1 }
 0x4f6   : > { %v1871_v2 = vpop.f32.mrf.mxu0  ;;  %v1981_v33 = vadd.f32 %v1980_v21, %v1979_v43  ;;  %v1973_v53 = vrot.slane %v1972_v9, 4  ;;  %v13215_v34 = vadd.f32 %v1947_v0, %v1946_v5  ;;  %v13219_v11 = vmul.f32 0.125, %v1936_v63  ;;  %v15941_v43 = vld [vmem:[#allocation26_spill] sm:$0xff]  ;;  %15943 = vst [vmem:[#allocation15_spill] sm:$0xff] %v13224_v42 }
 0x4f7   : > { %v1993_v54 = vsel %vm1166_vm7, %v1911_v51, 0.0  ;;  %v1910_v46 = vadd.f32 %v1871_v2, %v15940_v8  ;;  %v1968_v27 = vrot.slane %v1967_v25, 2  ;;  %v1961_v19 = vrot.slane %v1960_v47, 2 }
 0x4f8   : > { %v10436_v14 = vpop.f32.mrf.mxu0  ;;  %v1982_v16 = vrot.slane %v1981_v33, 2  ;;  %v1974_v29 = vadd.f32 %v1973_v53, %v1972_v9  ;;  %v1994_v23 = vrot.slane %v1993_v54, 4  ;;  %v1949_v63 = vrot.slane %v13215_v34, 1  ;;  %v15944_v9 = vld [vmem:[#allocation29_spill] sm:$0xff] }
 0x4f9   : > { %v1986_v10 = vsel %vm1166_vm7, %v1910_v46, 0.0  ;;  %v1913_v21 = vadd.f32 %v10436_v14, %v15941_v43  ;;  %v1962_v43 = vadd.f32 %v1961_v19, %v1960_v47 }
 0x4fa   : > { %v1881_v13 = vpop.f32.mrf.mxu0  ;;  %v1983_v44 = vadd.f32 %v1982_v16, %v1981_v33  ;;  %v1975_v5 = vrot.slane %v1974_v29, 2  ;;  %v1995_v0 = vadd.f32 %v1994_v23, %v1993_v54  ;;  %v1987_v48 = vrot.slane %v1986_v10, 4 }
 0x4fb   : > { %v1912_v51 = vadd.f32 %v1881_v13, %v15942_v57  ;;  %v2007_v53 = vsel %vm1166_vm7, %v1913_v21, 0.0  ;;  %v15945_v13 = vld [vmem:[#allocation28_spill] sm:$0xff] }
 0x4fc   : > { %v10439_v41 = vpop.f32.mrf.mxu0  ;;  %v1984_v2 = vrot.slane %v1983_v44, 1  ;;  %v1976_v16 = vadd.f32 %v1975_v5, %v1974_v29  ;;  %v1996_v46 = vrot.slane %v1995_v0, 2  ;;  %v1988_v7 = vadd.f32 %v1987_v48, %v1986_v10  ;;  %v5508_v29 = vld [vmem:[%s15465_s3 + $0x140] sm:$0xff]  ;;  %v13237_v10 = vpop.f32.mrf.mxu1 }
 0x4fd   : > { %v1915_v8 = vadd.f32 %v10439_v41, %v15944_v9  ;;  %v2008_v14 = vrot.slane %v2007_v53, 4  ;;  %v2000_v54 = vsel %vm1166_vm7, %v1912_v51, 0.0  ;;  %15946 = vst [vmem:[#allocation21_spill] sm:$0xff] %v13237_v10  ;;  %10726 = vmatprep.subr.mxu0 %v5508_v29  ;;  %v1963_v10 = vrot.slane %v1962_v43, 1 }
 0x4fe   : > { %v1891_v33 = vpop.f32.mrf.mxu0  ;;  %v1977_v45 = vrot.slane %v1976_v16, 1  ;;  %v1997_v50 = vadd.f32 %v1996_v46, %v1995_v0  ;;  %v1989_v21 = vrot.slane %v1988_v7, 2  ;;  %v1985_v41 = vadd.f32 %v1984_v2, %v1983_v44  ;;  %10727 = vmatpush3.msra.mxu0 %v5508_v29 }
 0x4ff   : > { %v2021_v57 = vsel %vm1166_vm7, %v1915_v8, 0.0  ;;  %v1914_v23 = vadd.f32 %v1891_v33, %v15945_v13  ;;  %v2009_v35 = vadd.f32 %v2008_v14, %v2007_v53  ;;  %v2001_v47 = vrot.slane %v2000_v54, 4 }
 0x500   : > { %v13232_v42 = vpop.f32.mrf.mxu0  ;;  %v2022_v19 = vrot.slane %v2021_v57, 4  ;;  %v1978_v51 = vadd.f32 %v1977_v45, %v1976_v16  ;;  %v1998_v9 = vrot.slane %v1997_v50, 1  ;;  %v1990_v8 = vadd.f32 %v1989_v21, %v1988_v7  ;;  %v5410_v45 = vld [vmem:[%s15465_s3 + $0x130] sm:$0xff]  ;;  %v13250_v7 = vpop.f32.mrf.mxu1 }
 0x501   : > { %v2014_v5 = vsel %vm1166_vm7, %v1914_v23, 0.0  ;;  %v2010_v0 = vrot.slane %v2009_v35, 2  ;;  %v1969_v53 = vadd.f32 %v1968_v27, %v1967_v25  ;;  %v2002_v33 = vadd.f32 %v2001_v47, %v2000_v54  ;;  %v5411_v23 = vld [vmem:[%s15465_s3 + $0x138] sm:$0xff]  ;;  %15947 = vst [vmem:[#allocation19_spill] sm:$0xff] %v13250_v7 }
 0x502   : > { %v13240_v48 = vpop.f32.mrf.mxu0  ;;  %v2023_v46 = vadd.f32 %v2022_v19, %v2021_v57  ;;  %v2015_v14 = vrot.slane %v2014_v5, 4  ;;  %v2037_v44 = vmul.f32 0.125, %v1978_v51  ;;  %v1991_v2 = vrot.slane %v1990_v8, 1  ;;  %10776 = vmatprep.subr.mxu1 %v5411_v23  ;;  %v5409_v51 = vld [vmem:[%s15465_s3 + $0x128] sm:$0xff] }
 0x503   : > { %v2011_v56 = vadd.f32 %v2010_v0, %v2009_v35  ;;  %v1999_v25 = vadd.f32 %v1998_v9, %v1997_v50  ;;  %v2003_v27 = vrot.slane %v2002_v33, 2  ;;  %v15948_v35 = vrot.slane %v13199_v36, 1  ;;  %10777 = vmatpush3.msra.mxu1 %v5411_v23 }
 0x504   : > { %v13242_v13 = vpop.f32.mrf.mxu0  ;;  %v2024_v16 = vrot.slane %v2023_v46, 2  ;;  %v2016_v54 = vadd.f32 %v2015_v14, %v2014_v5  ;;  %v2038_v29 = vmul.f32 0.125, %v1985_v41  ;;  %v1992_v47 = vadd.f32 %v1991_v2, %v1990_v8  ;;  %10778 = vmatprep.subr.mxu1 %v5410_v45  ;;  %v5408_v8 = vld [vmem:[%s15465_s3 + $0x120] sm:$0xff]  ;;  %v13267_v2 = vpop.f32.mrf.mxu1 }
 0x505   : > { %v1957_v21 = vadd.f32 %v15948_v35, %v13199_v36  ;;  %v2012_v19 = vrot.slane %v2011_v56, 1  ;;  %v1950_v50 = vadd.f32 %v1949_v63, %v13215_v34  ;;  %v2004_v9 = vadd.f32 %v2003_v27, %v2002_v33  ;;  %10779 = vmatpush3.msra.mxu1 %v5410_v45 }
 0x506   : > { %v13252_v57 = vpop.f32.mrf.mxu0  ;;  %v2025_v0 = vadd.f32 %v2024_v16, %v2023_v46  ;;  %v2017_v5 = vrot.slane %v2016_v54, 2  ;;  %v1970_v7 = vrot.slane %v1969_v53, 1  ;;  %v1964_v32 = vadd.f32 %v1963_v10, %v1962_v43  ;;  %10780 = vmatprep.subr.mxu1 %v5409_v51  ;;  %v13274_v43 = vld [vmem:[%s15465_s3 + $0x178] sm:$0xff] }
 0x507   : > { %v7621_v36 = vsel %vm15667_vm12, %v2038_v29, %v2037_v44  ;;  %v2039_v41 = vmul.f32 0.125, %v1992_v47  ;;  %v2040_v23 = vmul.f32 0.125, %v1999_v25  ;;  %v2005_v34 = vrot.slane %v2004_v9, 1  ;;  %15949 = vst [vmem:[#allocation23_spill] sm:$0xff] %v13274_v43  ;;  %10781 = vmatpush3.msra.mxu1 %v5409_v51  ;;  %10832 = vmatprep.subr.mxu0 %v13274_v43 }
 0x508   : > { %v13261_v14 = vpop.f32.mrf.mxu0  ;;  %v2026_v63 = vrot.slane %v2025_v0, 1  ;;  %v2018_v33 = vadd.f32 %v2017_v5, %v2016_v54  ;;  %v7610_v10 = vsel %vm15669_vm14, %v13219_v11, %v13208_v31  ;;  %v2013_v45 = vadd.f32 %v2012_v19, %v2011_v56  ;;  %10782 = vmatprep.subr.mxu1 %v5408_v8  ;;  %v13285_v11 = vpop.f32.mrf.mxu1 }
 0x509   : > { %v7622_v44 = vsel %vm15669_vm14, %v2039_v41, %v7621_v36  ;;  %vm7611_vm12 = vcmask 1043459   ;;  %v2033_v25 = vmul.f32 0.125, %v1950_v50  ;;  %v2006_v27 = vadd.f32 %v2005_v34, %v2004_v9  ;;  %10783 = vmatpush3.msra.mxu1 %v5408_v8  ;;  %15950 = vst [vmem:[#allocation22_spill] sm:$0xff] %v13285_v11 }
 0x50a   : > { %v13269_v46 = vpop.f32.mrf.mxu0  ;;  %v7623_v16 = vsel %vm7611_vm12, %v2040_v23, %v7622_v44  ;;  %v2019_v54 = vrot.slane %v2018_v33, 1  ;;  %v2032_v29 = vmul.f32 0.125, %v13210_v12  ;;  %v1971_v47 = vadd.f32 %v1970_v7, %v1969_v53  ;;  %v13296_v34 = vpop.f32.mrf.mxu1 }
 0x50b   : > { %v2027_v31 = vadd.f32 %v2026_v63, %v2025_v0  ;;  %v2035_v56 = vmul.f32 0.125, %v1964_v32  ;;  %v2041_v19 = vmul.f32 0.125, %v2006_v27  ;;  %vm7615_vm14 = vcmask 1045509  }
 0x50c   : > { %v13282_v35 = vpop.f32.mrf.mxu0  ;;  %v2020_v51 = vadd.f32 %v2019_v54, %v2018_v33  ;;  %v2034_v50 = vmul.f32 0.125, %v1957_v21  ;;  %v2042_v9 = vmul.f32 0.125, %v2013_v45  ;;  %v7612_v36 = vsel %vm7611_vm12, %v2032_v29, %v7610_v10 }
 0x50d   : > { %v7624_v41 = vsel %vm7613_vm13, %v2041_v19, %v7623_v16  ;;  %v7614_v7 = vsel %vm7613_vm13, %v2033_v25, %v7612_v36  ;;  %v2044_v0 = vmul.f32 0.125, %v2027_v31  ;;  %v2036_v32 = vmul.f32 0.125, %v1971_v47  ;;  %v13310_v25 = vpop.f32.mrf.mxu1 }
 0x50e   : > { %v13287_v5 = vpop.f32.mrf.mxu0  ;;  %v2043_v12 = vmul.f32 0.125, %v2020_v51  ;;  %v7616_v8 = vsel %vm7615_vm14, %v2034_v50, %v7614_v7  ;;  %v7625_v23 = vsel %vm7615_vm14, %v2042_v9, %v7624_v41  ;;  %15953 = vst [vmem:[#allocation29_spill] sm:$0xff] %v13310_v25 }
 0x50f   : > { %v7618_v63 = vsel %vm7617_vm15, %v2035_v56, %v7616_v8  ;;  %v13316_v54 = vpop.f32.mrf.mxu1 }
 0x510   : > { %v13291_v53 = vpop.f32.mrf.mxu0  ;;  %v7626_v33 = vsel %vm7617_vm15, %v2043_v12, %v7625_v23  ;;  %v13303_v10 = vsel %vm7619_vm11, %v2036_v32, %v7618_v63  ;;  %15954 = vst [vmem:[#allocation28_spill] sm:$0xff] %v13316_v54 }
 0x511   : > { %15951 = vst [vmem:[#allocation26_spill] sm:$0xff] %v13303_v10  ;;  %v13306_v44 = vsel %vm7619_vm11, %v2044_v0, %v7626_v33  ;;  %v13322_v31 = vpop.f32.mrf.mxu1 }
 0x512   : > { %v13298_v21 = vpop.f32.mrf.mxu0  ;;  %15952 = vst [vmem:[#allocation24_spill] sm:$0xff] %v13306_v44  ;;  %15955 = vst [vmem:[#allocation113_spill] sm:$0xff] %v13322_v31 }
 0x513   : > { %v13328_v51 = vpop.f32.mrf.mxu1 }
 0x514   : > { %v13308_v45 = vpop.f32.mrf.mxu0  ;;  %15956 = vst [vmem:[#allocation114_spill] sm:$0xff] %v13328_v51 }
 0x515   : > { %v13334_v36 = vpop.f32.mrf.mxu1 }
 0x516   : > { %v13312_v27 = vpop.f32.mrf.mxu0  ;;  %15957 = vst [vmem:[#allocation115_spill] sm:$0xff] %v13334_v36 }
 0x517   : > { %v13340_v7 = vpop.f32.mrf.mxu1 }
 0x518   : > { %v13314_v16 = vpop.f32.mrf.mxu0  ;;  %15958 = vst [vmem:[#allocation116_spill] sm:$0xff] %v13340_v7 }
 0x519   : > { %v13346_v8 = vpop.f32.mrf.mxu1 }
 0x51a   : > { %v13318_v29 = vpop.f32.mrf.mxu0  ;;  %15960 = vst [vmem:[#allocation118_spill] sm:$0xff] %v13346_v8 }
 0x51b   : > { %v13352_v33 = vpop.f32.mrf.mxu1 }
 0x51c   : > { %v13320_v47 = vpop.f32.mrf.mxu0  ;;  %15963 = vst [vmem:[#allocation121_spill] sm:$0xff] %v13352_v33 }
 0x51d   : > { %v13358_v43 = vpop.f32.mrf.mxu1 }
 0x51e   : > { %v13324_v56 = vpop.f32.mrf.mxu0  ;;  %15966 = vst [vmem:[#allocation124_spill] sm:$0xff] %v13358_v43  ;;  %v13379_v43 = vld [vmem:[%s15465_s3 + $0x198] sm:$0xff] }
 0x51f   : > { %v13364_v51 = vpop.f32.mrf.mxu1  ;;  %15975 = vst [vmem:[#allocation133_spill] sm:$0xff] %v13379_v43  ;;  %10888 = vmatprep.subr.mxu1 %v13379_v43 }
 0x520   : > { %v13326_v19 = vpop.f32.mrf.mxu0  ;;  %15969 = vst [vmem:[#allocation127_spill] sm:$0xff] %v13364_v51 }
 0x521   : > { %v13370_v25 = vpop.f32.mrf.mxu1 }
 0x522   : > { %v13330_v50 = vpop.f32.mrf.mxu0  ;;  %15972 = vst [vmem:[#allocation130_spill] sm:$0xff] %v13370_v25 }
 0x524   : > { %v13332_v9 = vpop.f32.mrf.mxu0 }
 0x526   : > { %v13336_v41 = vpop.f32.mrf.mxu0 }
 0x528   : > { %v13338_v12 = vpop.f32.mrf.mxu0 }
 0x52a   : > { %v13342_v0 = vpop.f32.mrf.mxu0 }
 0x52c   : > { %v13344_v32 = vpop.f32.mrf.mxu0 }
 0x52d   : > { %15959 = vst [vmem:[#allocation117_spill] sm:$0xff] %v13344_v32 }
 0x52e   : > { %v13348_v23 = vpop.f32.mrf.mxu0 }
 0x52f   : > { %15961 = vst [vmem:[#allocation119_spill] sm:$0xff] %v13348_v23 }
 0x530   : > { %v13350_v63 = vpop.f32.mrf.mxu0 }
 0x531   : > { %15962 = vst [vmem:[#allocation120_spill] sm:$0xff] %v13350_v63 }
 0x532   : > { %v13354_v44 = vpop.f32.mrf.mxu0 }
 0x533   : > { %15964 = vst [vmem:[#allocation122_spill] sm:$0xff] %v13354_v44  ;;  %v13374_v44 = vpop.f32.mrf.mxu1 }
 0x534   : > { %v13356_v10 = vpop.f32.mrf.mxu0  ;;  %15974 = vst [vmem:[#allocation132_spill] sm:$0xff] %v13374_v44 }
 0x535   : > { %15965 = vst [vmem:[#allocation123_spill] sm:$0xff] %v13356_v10 }
 0x536   : > { %v13360_v36 = vpop.f32.mrf.mxu0 }
 0x537   : > { %15967 = vst [vmem:[#allocation125_spill] sm:$0xff] %v13360_v36 }
 0x538   : > { %v13362_v7 = vpop.f32.mrf.mxu0 }
 0x539   : > { %15968 = vst [vmem:[#allocation126_spill] sm:$0xff] %v13362_v7 }
 0x53a   : > { %v13366_v31 = vpop.f32.mrf.mxu0 }
 0x53b   : > { %15970 = vst [vmem:[#allocation128_spill] sm:$0xff] %v13366_v31  ;;  %v13384_v31 = vpop.f32.mrf.mxu1 }
 0x53c   : > { %v13368_v8 = vpop.f32.mrf.mxu0  ;;  %15976 = vst [vmem:[#allocation134_spill] sm:$0xff] %v13384_v31 }
 0x53d   : > { %15971 = vst [vmem:[#allocation129_spill] sm:$0xff] %v13368_v8  ;;  %v13388_v25 = vpop.f32.mrf.mxu1 }
 0x53e   : > { %v13372_v54 = vpop.f32.mrf.mxu0  ;;  %15978 = vst [vmem:[#allocation136_spill] sm:$0xff] %v13388_v25 }
 0x53f   : > { %15973 = vst [vmem:[#allocation131_spill] sm:$0xff] %v13372_v54  ;;  %v13394_v36 = vpop.f32.mrf.mxu1 }
 0x540   : > { %v10618_v33 = vpop.f32.mrf.mxu0  ;;  %15981 = vst [vmem:[#allocation139_spill] sm:$0xff] %v13394_v36 }
 0x541   : > { %v13400_v43 = vpop.f32.mrf.mxu1 }
 0x542   : > { %v4630_v10 = vpop.f32.mrf.mxu0  ;;  %15984 = vst [vmem:[#allocation142_spill] sm:$0xff] %v13400_v43 }
 0x543   : > { %v13406_v32 = vpop.f32.mrf.mxu1 }
 0x544   : > { %v13382_v51 = vpop.f32.mrf.mxu0  ;;  %15987 = vst [vmem:[#allocation145_spill] sm:$0xff] %v13406_v32  ;;  %v3793_v32 = vadd.f32 %v13232_v42, %v12516_v39  ;;  %v3823_v39 = vadd.f32 %v13282_v35, %v12539_v52 }
 0x546   : > { %v4640_v8 = vpop.f32.mrf.mxu0 }
 0x548   : > { %v13386_v7 = vpop.f32.mrf.mxu0 }
 0x549   : > { %15977 = vst [vmem:[#allocation135_spill] sm:$0xff] %v13386_v7 }
 0x54a   : > { %v13390_v54 = vpop.f32.mrf.mxu0 }
 0x54b   : > { %15979 = vst [vmem:[#allocation137_spill] sm:$0xff] %v13390_v54  ;;  %v13412_v54 = vpop.f32.mrf.mxu1 }
 0x54c   : > { %v13392_v44 = vpop.f32.mrf.mxu0  ;;  %15988 = vst [vmem:[#allocation146_spill] sm:$0xff] %v13412_v54  ;;  %v3788_v54 = vadd.f32 %v13240_v48, %v12519_v6  ;;  %v3818_v6 = vadd.f32 %v13287_v5, %v12549_v62  ;;  %v3843_v62 = vadd.f32 %v13308_v45, %v12567_v61 }
 0x54d   : > { %15980 = vst [vmem:[#allocation138_spill] sm:$0xff] %v13392_v44 }
 0x54e   : > { %v13396_v11 = vpop.f32.mrf.mxu0  ;;  %v4271_v48 = vadd.f32 %v12940_v17, %v3788_v54  ;;  %v13467_v17 = vadd.f32 %v13025_v26, %v3823_v39  ;;  %v16007_v39 = vld [vmem:[#allocation104_spill] sm:$0xff] }
 0x54f   : > { %15982 = vst [vmem:[#allocation140_spill] sm:$0xff] %v13396_v11  ;;  %v13418_v11 = vpop.f32.mrf.mxu1 }
 0x550   : > { %v13398_v63 = vpop.f32.mrf.mxu0  ;;  %15990 = vst [vmem:[#allocation148_spill] sm:$0xff] %v13418_v11  ;;  %v3798_v11 = vadd.f32 %v13252_v57, %v12527_v4  ;;  %v3833_v4 = vadd.f32 %v13291_v53, %v12559_v38  ;;  %v3838_v38 = vadd.f32 %v13312_v27, %v12571_v60  ;;  %v3863_v60 = vadd.f32 %v13320_v47, %v12611_v55  ;;  %v15997_v53 = vld [vmem:[#allocation71_spill] sm:$0xff]  ;;  %v15998_v55 = vld [vmem:[#allocation90_spill] sm:$0xff] }
 0x551   : > { %15983 = vst [vmem:[#allocation141_spill] sm:$0xff] %v13398_v63 }
 0x552   : > { %v13402_v23 = vpop.f32.mrf.mxu0  ;;  %v4273_v52 = vadd.f32 %v12974_v20, %v3798_v11  ;;  %v3848_v20 = vadd.f32 %v13318_v29, %v12596_v37  ;;  %v13485_v35 = vadd.f32 %v13059_v3, %v3833_v4  ;;  %v15996_v37 = vld [vmem:[#allocation88_spill] sm:$0xff]  ;;  %v16008_v4 = vld [vmem:[#allocation105_spill] sm:$0xff] }
 0x553   : > { %15985 = vst [vmem:[#allocation143_spill] sm:$0xff] %v13402_v23  ;;  %v13424_v23 = vpop.f32.mrf.mxu1  ;;  %v3868_v5 = vadd.f32 %v13330_v50, %v15996_v37  ;;  %v16000_v3 = vld [vmem:[#allocation100_spill] sm:$0xff]  ;;  %v16017_v37 = vld [vmem:[#allocation109_spill] sm:$0xff] }
 0x554   : > { %v13404_v31 = vpop.f32.mrf.mxu0  ;;  %15993 = vst [vmem:[#allocation151_spill] sm:$0xff] %v13424_v23  ;;  %v3808_v23 = vadd.f32 %v13269_v46, %v12534_v1  ;;  %v3828_v1 = vadd.f32 %v13298_v21, %v12563_v30  ;;  %v13476_v46 = vadd.f32 %v13042_v28, %v3818_v6  ;;  %v4791_v28 = vadd.f32 %v4640_v8, %v4273_v52  ;;  %v16011_v52 = vld [vmem:[#allocation107_spill] sm:$0xff] }
 0x555   : > { %15986 = vst [vmem:[#allocation144_spill] sm:$0xff] %v13404_v31  ;;  %v13444_v42 = vpop.f32.mrf.mxu1  ;;  %v13501_v27 = vadd.f32 %v16000_v3, %v3843_v62  ;;  %v13522_v6 = vadd.f32 %v16007_v39, %v3863_v60  ;;  %v13539_v62 = vadd.f32 %v16011_v52, %v3868_v5  ;;  %v16014_v60 = vld [vmem:[#allocation4_spill] sm:$0xff]  ;;  %v16025_v39 = vld [vmem:[#allocation13_spill] sm:$0xff] }
 0x556   : > { %v13408_v7 = vpop.f32.mrf.mxu0  ;;  %15994 = vst [vmem:[#allocation152_spill] sm:$0xff] %v13444_v42  ;;  %v13492_v21 = vadd.f32 %v15997_v53, %v3828_v1  ;;  %v5309_v1 = vadd.f32 %v13296_v34, %v4791_v28  ;;  %v16020_v28 = vld [vmem:[#allocation120_spill] sm:$0xff] }
 0x557   : > { %v13469_v30 = vpop.f32.mrf.mxu1 }
 0x558   : > { %v13410_v25 = vpop.f32.mrf.mxu0 }
 0x559   : > { %v13506_v29 = vpop.f32.mrf.mxu1 }
 0x55a   : > { %v13414_v44 = vpop.f32.mrf.mxu0 }
 0x55b   : > { %15989 = vst [vmem:[#allocation147_spill] sm:$0xff] %v13414_v44  ;;  %v3803_v44 = vadd.f32 %v13242_v13, %v12523_v40  ;;  %v13553_v34 = vpop.f32.mrf.mxu1 }
 0x55c   : > { %v13416_v36 = vpop.f32.mrf.mxu0  ;;  %16018 = vst [vmem:[#allocation88_spill] sm:$0xff] %v13553_v34 }
 0x55d   : > { %v4274_v13 = vadd.f32 %v12957_v18, %v3803_v44  ;;  %v3853_v18 = vadd.f32 %v13314_v16, %v12580_v58  ;;  %v15995_v58 = vld [vmem:[#allocation86_spill] sm:$0xff]  ;;  %v3883_v44 = vadd.f32 %v13332_v9, %v15998_v55  ;;  %v16001_v16 = vld [vmem:[#allocation101_spill] sm:$0xff] }
 0x55e   : > { %v13420_v63 = vpop.f32.mrf.mxu0  ;;  %v3873_v11 = vadd.f32 %v13326_v19, %v15995_v58  ;;  %v13504_v54 = vadd.f32 %v16001_v16, %v3838_v38  ;;  %16002 = vst [vmem:[#allocation86_spill] sm:$0xff] %v13506_v29  ;;  %v16003_v19 = vld [vmem:[#allocation102_spill] sm:$0xff]  ;;  %v16022_v16 = vld [vmem:[#allocation137_spill] sm:$0xff] }
 0x55f   : > { %15991 = vst [vmem:[#allocation149_spill] sm:$0xff] %v13420_v63  ;;  %v3813_v63 = vadd.f32 %v13261_v14, %v12531_v49  ;;  %v4272_v49 = vadd.f32 %v12923_v15, %v3793_v32  ;;  %v4275_v15 = vadd.f32 %v13008_v24, %v3808_v23  ;;  %v3858_v24 = vadd.f32 %v13324_v56, %v12634_v59  ;;  %v15999_v59 = vld [vmem:[#allocation92_spill] sm:$0xff]  ;;  %v16004_v32 = vld [vmem:[#allocation103_spill] sm:$0xff] }
 0x560   : > { %v13422_v43 = vpop.f32.mrf.mxu0  ;;  %v3878_v45 = vadd.f32 %v13336_v41, %v15999_v59  ;;  %v4792_v56 = vadd.f32 %v13382_v51, %v4274_v13  ;;  %v13511_v50 = vadd.f32 %v16003_v19, %v3853_v18  ;;  %v13514_v9 = vadd.f32 %v16004_v32, %v3848_v20  ;;  %v16005_v41 = vld [vmem:[#allocation94_spill] sm:$0xff]  ;;  %v16009_v51 = vld [vmem:[#allocation96_spill] sm:$0xff]  ;;  %v16013_v20 = vld [vmem:[#allocation117_spill] sm:$0xff] }
 0x561   : > { %15992 = vst [vmem:[#allocation150_spill] sm:$0xff] %v13422_v43  ;;  %v4276_v57 = vadd.f32 %v12991_v22, %v3813_v63  ;;  %v4789_v22 = vadd.f32 %v4630_v10, %v4271_v48  ;;  %v4790_v26 = vadd.f32 %v10618_v33, %v4272_v49  ;;  %v3893_v23 = vadd.f32 %v13338_v12, %v16005_v41  ;;  %v16006_v63 = vld [vmem:[#allocation19_spill] sm:$0xff]  ;;  %v13532_v48 = vld [vmem:[%s15465_s3 + $0x1c0] ss:$0 sm:$0xff] }
 0x562   : > { %v13426_v31 = vpop.f32.mrf.mxu0  ;;  %v3888_v49 = vadd.f32 %v13342_v0, %v16009_v51  ;;  %v16010_v13 = vld [vmem:[#allocation106_spill] sm:$0xff]  ;;  %v16015_v0 = vld [vmem:[#allocation119_spill] sm:$0xff]  ;;  %v13551_v53 = vadd.f32 %v16017_v37, %v3878_v45  ;;  %v4793_v19 = vadd.f32 %v16022_v16, %v4275_v15  ;;  %v16035_v16 = vld [vmem:[#allocation16_spill] sm:$0xff] }
 0x563   : > { %v5307_v47 = vadd.f32 %v13267_v2, %v4789_v22  ;;  %v5308_v33 = vadd.f32 %v16006_v63, %v4790_v26  ;;  %v13525_v2 = vadd.f32 %v16008_v4, %v3858_v24  ;;  %v13536_v12 = vadd.f32 %v16010_v13, %v3873_v11  ;;  %v16012_v18 = vld [vmem:[#allocation98_spill] sm:$0xff]  ;;  %v16016_v26 = vld [vmem:[#allocation108_spill] sm:$0xff]  ;;  %v16023_v41 = vld [vmem:[#allocation3_spill] sm:$0xff] }
 0x564   : > { %v13438_v43 = vpop.f32.mrf.mxu0  ;;  %v3903_v22 = vadd.f32 %v16013_v20, %v16012_v18  ;;  %v3898_v24 = vadd.f32 %v16015_v0, %v16014_v60  ;;  %v13548_v58 = vadd.f32 %v16016_v26, %v3883_v44  ;;  %v16019_v11 = vld [vmem:[#allocation38_spill] sm:$0xff]  ;;  %v16026_v4 = vld [vmem:[#allocation123_spill] sm:$0xff]  ;;  %v16029_v20 = vld [vmem:[#allocation125_spill] sm:$0xff] }
 0x565   : > { %v3913_v5 = vadd.f32 %v16020_v28, %v16019_v11  ;;  %v5344_v55 = vadd.f32 %v13532_v48, %v5307_v47  ;;  %v16021_v59 = vld [vmem:[#allocation22_spill] sm:$0xff]  ;;  %v3923_v45 = vadd.f32 %v16026_v4, %v16025_v39  ;;  %v5345_v51 = vadd.f32 %v13532_v48, %v5308_v33  ;;  %v16028_v18 = vld [vmem:[#allocation43_spill] sm:$0xff]  ;;  %v16033_v11 = vld [vmem:[#allocation20_spill] sm:$0xff] }
 0x566   : > { %v13448_v40 = vpop.f32.mrf.mxu0  ;;  %v5310_v3 = vadd.f32 %v16021_v59, %v4792_v56  ;;  %v16024_v63 = vld [vmem:[#allocation122_spill] sm:$0xff]  ;;  %v3918_v47 = vadd.f32 %v16029_v20, %v16028_v18  ;;  %v5346_v56 = vadd.f32 %v13532_v48, %v5309_v1  ;;  %v16030_v60 = vld [vmem:[#allocation135_spill] sm:$0xff]  ;;  %v16036_v33 = vld [vmem:[#allocation129_spill] sm:$0xff]  ;;  %v13589_v1 = vpop.f32.mrf.mxu1 }
 0x567   : > { %v3908_v44 = vadd.f32 %v16024_v63, %v16023_v41  ;;  %v16027_v13 = vld [vmem:[#allocation110_spill] sm:$0xff]  ;;  %v4794_v15 = vadd.f32 %v16030_v60, %v4276_v57  ;;  %v16031_v0 = vld [vmem:[#allocation111_spill] sm:$0xff]  ;;  %v3943_v41 = vadd.f32 %v16036_v33, %v16035_v16  ;;  %v16038_v39 = vld [vmem:[#allocation8_spill] sm:$0xff]  ;;  %16039 = vst [vmem:[#allocation90_spill] sm:$0xff] %v13589_v1  ;;  %v13591_v57 = vmax.f32 %v5344_v55, 0.0 }
 0x568   : > { %v13459_v14 = vpop.f32.mrf.mxu0  ;;  %v13568_v52 = vadd.f32 %v16027_v13, %v3893_v23  ;;  %v13575_v26 = vadd.f32 %v16031_v0, %v3888_v49  ;;  %v16034_v28 = vld [vmem:[#allocation126_spill] sm:$0xff]  ;;  %v16037_v23 = vld [vmem:[#allocation112_spill] sm:$0xff]  ;;  %v13587_v4 = vadd.f32 %v16038_v39, %v3898_v24  ;;  %v5347_v49 = vadd.f32 %v13532_v48, %v5310_v3  ;;  %v16045_v24 = vld [vmem:[#allocation11_spill] sm:$0xff] }
 0x569   : > { %v3933_v59 = vadd.f32 %v16034_v28, %v16033_v11  ;;  %v13584_v63 = vadd.f32 %v16037_v23, %v3903_v22  ;;  %16040 = vst [vmem:[#allocation92_spill] sm:$0xff] %v13591_v57  ;;  %v16041_v13 = vld [vmem:[#allocation28_spill] sm:$0xff]  ;;  %v16042_v20 = vld [vmem:[#allocation6_spill] sm:$0xff]  ;;  %v13600_v11 = vmax.f32 %v5345_v51, 0.0  ;;  %v13605_v16 = vadd.f32 %v16045_v24, %v3908_v44  ;;  %v16046_v33 = vld [vmem:[#allocation9_spill] sm:$0xff] }
 0x56a   : > { %v13478_v61 = vpop.f32.mrf.mxu0  ;;  %v5311_v18 = vadd.f32 %v16041_v13, %v4793_v19  ;;  %v13596_v60 = vadd.f32 %v16042_v20, %v3913_v5  ;;  %v16044_v22 = vld [vmem:[#allocation138_spill] sm:$0xff]  ;;  %v13608_v55 = vadd.f32 %v16046_v33, %v3923_v45  ;;  %v13610_v23 = vmax.f32 %v5346_v56, 0.0  ;;  %v16049_v3 = vld [vmem:[#allocation29_spill] sm:$0xff]  ;;  %v16050_v5 = vld [vmem:[#allocation140_spill] sm:$0xff] }
 0x56b   : > { %16043 = vst [vmem:[#allocation100_spill] sm:$0xff] %v13600_v11  ;;  %v4796_v28 = vadd.f32 %v16044_v22, %v13467_v17  ;;  %v5312_v19 = vadd.f32 %v16049_v3, %v4794_v15  ;;  %v4795_v39 = vadd.f32 %v16050_v5, %v13476_v46  ;;  %v16051_v13 = vld [vmem:[#allocation14_spill] sm:$0xff]  ;;  %v16053_v1 = vld [vmem:[#allocation45_spill] sm:$0xff]  ;;  %v16054_v17 = vld [vmem:[#allocation128_spill] sm:$0xff]  ;;  %v13628_v15 = vpop.f32.mrf.mxu1  ;;  %v13630_v3 = vmax.f32 %v5347_v49, 0.0 }
 0x56c   : > { %v13494_v10 = vpop.f32.mrf.mxu0  ;;  %16047 = vst [vmem:[#allocation101_spill] sm:$0xff] %v13608_v55  ;;  %16048 = vst [vmem:[#allocation102_spill] sm:$0xff] %v13610_v23  ;;  %v13616_v20 = vadd.f32 %v16051_v13, %v3918_v47  ;;  %v3928_v22 = vadd.f32 %v16054_v17, %v16053_v1  ;;  %v16055_v44 = vld [vmem:[#allocation50_spill] sm:$0xff]  ;;  %v16056_v24 = vld [vmem:[#allocation131_spill] sm:$0xff]  ;;  %v5348_v46 = vadd.f32 %v13532_v48, %v5311_v18  ;;  %v5512_v5 = vrot.slane %v13591_v57, 7 }
 0x56d   : > { %v3938_v29 = vadd.f32 %v16056_v24, %v16055_v44  ;;  %v16057_v45 = vld [vmem:[#allocation12_spill] sm:$0xff]  ;;  %v16059_v56 = vld [vmem:[#allocation15_spill] sm:$0xff]  ;;  %16060 = vst [vmem:[#allocation19_spill] sm:$0xff] %v13628_v15  ;;  %16061 = vst [vmem:[#allocation104_spill] sm:$0xff] %v13630_v3  ;;  %v5412_v1 = vrot.slane %v13591_v57, 6  ;;  %v5513_v24 = vrot.slane %v13600_v11, 7  ;;  %v5349_v49 = vadd.f32 %v13532_v48, %v5312_v19 }
 0x56e   : > { %v13516_v8 = vpop.f32.mrf.mxu0  ;;  %v13625_v33 = vadd.f32 %v16057_v45, %v3933_v59  ;;  %v16063_v13 = vld [vmem:[#allocation113_spill] sm:$0xff]  ;;  %v16064_v44 = vld [vmem:[#allocation143_spill] sm:$0xff]  ;;  %v16065_v45 = vld [vmem:[#allocation114_spill] sm:$0xff]  ;;  %v5514_v15 = vrot.slane %v13610_v23, 7  ;;  %v13654_v42 = vmax.f32 %v5348_v46, 0.0 }
 0x56f   : > { %v5314_v17 = vadd.f32 %v16063_v13, %v4796_v28  ;;  %v4797_v59 = vadd.f32 %v16064_v44, %v13492_v21  ;;  %v16066_v18 = vld [vmem:[#allocation141_spill] sm:$0xff]  ;;  %v5414_v44 = vrot.slane %v13610_v23, 6  ;;  %v16072_v19 = vld [vmem:[#allocation18_spill] sm:$0xff] }
 0x570   : > { %v13541_v38 = vpop.f32.mrf.mxu0  ;;  %16058 = vst [vmem:[#allocation94_spill] sm:$0xff] %v13625_v33  ;;  %v16067_v57 = vld [vmem:[#allocation17_spill] sm:$0xff]  ;;  %16071 = vst [vmem:[#allocation107_spill] sm:$0xff] %v13654_v42 }
 0x571   : > { %v13648_v55 = vadd.f32 %v16067_v57, %v3928_v22  ;;  %v16069_v13 = vld [vmem:[#allocation21_spill] sm:$0xff]  ;;  %v5351_v57 = vadd.f32 %v13532_v48, %v5314_v17  ;;  %v16073_v22 = vld [vmem:[#allocation116_spill] sm:$0xff] }
 0x572   : > { %v13560_v32 = vpop.f32.mrf.mxu0  ;;  %v13651_v21 = vadd.f32 %v16069_v13, %v3938_v29  ;;  %v5415_v29 = vrot.slane %v13630_v3, 6  ;;  %v16074_v13 = vld [vmem:[#allocation115_spill] sm:$0xff] }
 0x573   : > { %16068 = vst [vmem:[#allocation96_spill] sm:$0xff] %v13648_v55 }
 0x574   : > { %v13577_v37 = vpop.f32.mrf.mxu0  ;;  %16070 = vst [vmem:[#allocation106_spill] sm:$0xff] %v13651_v21  ;;  %v5573_v21 = vsel %vm3175_vm4, %v5513_v24, %v5514_v15 }
 0x575   : > { %16032 = vst [vmem:[#allocation71_spill] sm:$0xff] %v13577_v37  ;;  %v4302_v37 = vadd.f32 %v16059_v56, %v3943_v41  ;;  %v5413_v41 = vrot.slane %v13600_v11, 6  ;;  %v5313_v56 = vadd.f32 %v16065_v45, %v4795_v39  ;;  %v10719_v11 = vpop.f32.mrf.mxu1  ;;  %v5574_v39 = vsel %vm3175_vm4, %v5512_v5, %v5513_v24 }
 0x576   : > { %v13598_v0 = vpop.f32.mrf.mxu0  ;;  %v5515_v45 = vrot.slane %v13630_v3, 7  ;;  %v5516_v24 = vrot.slane %v13654_v42, 7 }
 0x577   : > { %v5350_v46 = vadd.f32 %v13532_v48, %v5313_v56  ;;  %v5473_v17 = vsel %vm3010_vm3, %v5413_v41, %v5414_v44 }
 0x578   : > { %v13618_v51 = vpop.f32.mrf.mxu0 }
 0x579   : > { %16052 = vst [vmem:[#allocation103_spill] sm:$0xff] %v13618_v51  ;;  %v4798_v51 = vadd.f32 %v16066_v18, %v13485_v35  ;;  %v5474_v35 = vsel %vm3010_vm3, %v5412_v1, %v5413_v41  ;;  %v13664_v18 = vmax.f32 %v5349_v49, 0.0 }
 0x57a   : > { %v13633_v47 = vpop.f32.mrf.mxu0 }
 0x57b   : > { %16062 = vst [vmem:[#allocation105_spill] sm:$0xff] %v13633_v47  ;;  %v5316_v23 = vadd.f32 %v16074_v13, %v4798_v51  ;;  %v16075_v47 = vld [vmem:[#allocation144_spill] sm:$0xff]  ;;  %v13683_v51 = vsel %vm3010_vm3, %v5414_v44, %v5415_v29  ;;  %v16079_v13 = vld [vmem:[#allocation147_spill] sm:$0xff] }
 0x57c   : > { %v10663_v33 = vpop.f32.mrf.mxu0  ;;  %v4800_v55 = vadd.f32 %v16075_v47, %v13501_v27  ;;  %v5416_v27 = vrot.slane %v13654_v42, 6  ;;  %v13687_v47 = vmax.f32 %v5351_v57, 0.0 }
 0x57d   : > { %v4820_v28 = vadd.f32 %v10663_v33, %v4302_v37  ;;  %v5315_v37 = vadd.f32 %v16073_v22, %v4797_v59  ;;  %v4799_v59 = vadd.f32 %v13408_v7, %v13504_v54  ;;  %v5353_v7 = vadd.f32 %v13532_v48, %v5316_v23 }
 0x57e   : > { %v4802_v54 = vadd.f32 %v13410_v25, %v13511_v50  ;;  %v5478_v22 = vsel %vm2496_vm6, %v5473_v17, 0.0  ;;  %v5571_v23 = vsel %vm3175_vm4, %v5515_v45, %v5516_v24  ;;  %v5471_v25 = vsel %vm3010_vm3, %v5415_v29, %v5416_v27 }
 0x57f   : > { %v5338_v33 = vadd.f32 %v10719_v11, %v4820_v28  ;;  %v13677_v11 = vsel %vm3175_vm4, %v5514_v15, %v5515_v45  ;;  %v5352_v49 = vadd.f32 %v13532_v48, %v5315_v37  ;;  %v5578_v15 = vsel %vm2624_vm2, %v5573_v21, 0.0  ;;  %v16080_v21 = vld [vmem:[#allocation121_spill] sm:$0xff]  ;;  %v16081_v45 = vld [vmem:[#allocation124_spill] sm:$0xff] }
 0x580   : > { %v13694_v28 = vmax.f32 %v5350_v46, 0.0  ;;  %v4801_v37 = vadd.f32 %v16079_v13, %v13514_v9  ;;  %v5317_v46 = vadd.f32 %v16080_v21, %v4799_v59  ;;  %v5517_v50 = vrot.slane %v13664_v18, 7 }
 0x581   : > { %v5375_v34 = vadd.f32 %v13532_v48, %v5338_v33  ;;  %v16078_v33 = vld [vmem:[#allocation118_spill] sm:$0xff]  ;;  %v13712_v17 = vmax.f32 %v5352_v49, 0.0  ;;  %v5417_v59 = vrot.slane %v13664_v18, 6  ;;  %v5320_v44 = vadd.f32 %v16081_v45, %v4802_v54 }
 0x582   : > { %v5318_v57 = vadd.f32 %v16078_v33, %v4800_v55  ;;  %v5518_v21 = vrot.slane %v13694_v28, 7  ;;  %v13729_v3 = vmax.f32 %v5353_v7, 0.0  ;;  %v5354_v54 = vadd.f32 %v13532_v48, %v5317_v46 }
 0x583   : > { %v13690_v41 = vmax.f32 %v5375_v34, 0.0  ;;  %v5357_v46 = vadd.f32 %v13532_v48, %v5320_v44  ;;  %v5420_v33 = vrot.slane %v13712_v17, 6  ;;  %v5419_v44 = vrot.slane %v13687_v47, 6 }
 0x584   : > { %v13773_v13 = vmax.f32 %v5354_v54, 0.0  ;;  %v16092_v54 = vld [vmem:[#allocation150_spill] sm:$0xff] }
 0x585   : > { %v15684_v34 = vrot.slane %v13690_v41, 7  ;;  %v5443_v56 = vrot.slane %v13690_v41, 6 }
 0x587   : > { %v5575_v9 = vsel %vm3175_vm4, %v15684_v34, %v5512_v5  ;;  %v5475_v55 = vsel %vm3010_vm3, %v5443_v56, %v5412_v1  ;;  %v5355_v5 = vadd.f32 %v13532_v48, %v5318_v57  ;;  %v16084_v34 = vld [vmem:[#allocation127_spill] sm:$0xff]  ;;  %v5418_v1 = vrot.slane %v13694_v28, 6 }
 0x588   : > { %v5576_v29 = vsel %vm2622_vm8, %v5575_v9, 0.0  ;;  %v5476_v49 = vsel %vm2494_vm5, %v5475_v55, 0.0  ;;  %v5319_v42 = vadd.f32 %v16084_v34, %v4801_v37  ;;  %v4804_v9 = vadd.f32 %v13416_v36, %v13522_v6  ;;  %v16085_v55 = vld [vmem:[#allocation149_spill] sm:$0xff]  ;;  %v6252_v37 = vld [vmem:[%s15465_s3 + $0x170] sm:$0xff] }
 0x589   : > { %10728 = vmatprep.mubr.msk.f32.mxu0 %vm1166_vm7, %v5576_v29  ;;  %10784 = vmatprep.mubr.msk.f32.mxu1 %vm1166_vm7, %v5476_v49  ;;  %v4803_v45 = vadd.f32 %v16085_v55, %v13525_v2  ;;  %v5580_v57 = vsel %vm2626_vm9, %v5571_v23, 0.0  ;;  %v6609_v34 = vld [vmem:[%s15465_s3 + $0x190] sm:$0xff]  ;;  %v5480_v6 = vsel %vm2498_vm1, %v5471_v25, 0.0  ;;  %v5570_v2 = vsel %vm3175_vm4, %v5516_v24, %v5517_v50  ;;  %v16088_v23 = vld [vmem:[#allocation23_spill] sm:$0xff]  ;;  %v16089_v25 = vld [vmem:[#allocation133_spill] sm:$0xff] }
 0x58a   : > { %10729 = vmatmul.mubr.msk.f32.vlgmr.msra.gmra.mxu0 %vm1166_vm7, %v5574_v39  ;;  %10785 = vmatmul.mubr.msk.f32.vlgmr.msra.gmra.mxu1 %vm1166_vm7, %v5474_v35  ;;  %v5470_v39 = vsel %vm3010_vm3, %v5416_v27, %v5417_v59  ;;  %v5519_v35 = vrot.slane %v13687_v47, 7  ;;  %v13767_v29 = vmax.f32 %v5355_v5, 0.0  ;;  %v5356_v24 = vadd.f32 %v13532_v48, %v5319_v42  ;;  %v16091_v55 = vld [vmem:[#allocation132_spill] sm:$0xff]  ;;  %v6608_v5 = vld [vmem:[%s15465_s3 + $0x188] sm:$0xff] }
 0x58b   : > { %10731 = vmatprep.mubr.msk.f32.mxu0 %vm1166_vm7, %v5578_v15  ;;  %10787 = vmatprep.mubr.msk.f32.mxu1 %vm1166_vm7, %v5478_v22  ;;  %v5569_v15 = vsel %vm3175_vm4, %v5517_v50, %v5518_v21  ;;  %v5520_v22 = vrot.slane %v13712_v17, 7  ;;  %v5469_v27 = vsel %vm3010_vm3, %v5417_v59, %v5418_v1  ;;  %v16090_v50 = vld [vmem:[#allocation130_spill] sm:$0xff]  ;;  %v5321_v7 = vadd.f32 %v16091_v55, %v4803_v45  ;;  %v6251_v59 = vld [vmem:[%s15465_s3 + $0x168] sm:$0xff] }
 0x58c   : > { %10833 = vmatpush3.msra.mxu0 %v16088_v23  ;;  %10889 = vmatpush3.msra.mxu1 %v16089_v25  ;;  %v5322_v49 = vadd.f32 %v16090_v50, %v4804_v9  ;;  %v5568_v42 = vsel %vm3175_vm4, %v5518_v21, %v5519_v35  ;;  %v4806_v9 = vadd.f32 %v16092_v54, %v13536_v12  ;;  %v5582_v21 = vsel %vm2628_vm10, %v5569_v15, 0.0  ;;  %v16101_v54 = vld [vmem:[#allocation139_spill] sm:$0xff] }
 0x58d   : > { %10834 = vmatprep.subr.mxu0 %v6252_v37  ;;  %10890 = vmatprep.subr.mxu1 %v6609_v34  ;;  %v5468_v45 = vsel %vm3010_vm3, %v5418_v1, %v5419_v44  ;;  %v13799_v36 = vmax.f32 %v5357_v46, 0.0  ;;  %v5482_v25 = vsel %vm2500_vm0, %v5469_v27, 0.0  ;;  %v5567_v12 = vsel %vm3175_vm4, %v5519_v35, %v5520_v22  ;;  %v16096_v27 = vld [vmem:[#allocation136_spill] sm:$0xff] }
 0x58e   : > { %10732 = vmatmul.mubr.msk.f32.gmra.mxu0 %vm1166_vm7, %v13677_v11  ;;  %10788 = vmatmul.mubr.msk.f32.gmra.mxu1 %vm1166_vm7, %v13683_v51  ;;  %v4805_v11 = vadd.f32 %v13426_v31, %v13539_v62  ;;  %v5467_v31 = vsel %vm3010_vm3, %v5419_v44, %v5420_v33  ;;  %v13807_v62 = vmax.f32 %v5356_v24, 0.0  ;;  %v5521_v1 = vrot.slane %v13729_v3, 7 }
 0x58f   : > { %10734 = vmatprep.mubr.msk.f32.mxu0 %vm1166_vm7, %v5580_v57  ;;  %10790 = vmatprep.mubr.msk.f32.mxu1 %vm1166_vm7, %v5480_v6  ;;  %v4808_v57 = vadd.f32 %v13438_v43, %v13548_v58  ;;  %v5421_v6 = vrot.slane %v13729_v3, 6  ;;  %v5359_v46 = vadd.f32 %v13532_v48, %v5322_v49  ;;  %v5358_v35 = vadd.f32 %v13532_v48, %v5321_v7  ;;  %v6250_v43 = vld [vmem:[%s15465_s3 + $0x160] sm:$0xff] }
 0x590   : > { %10835 = vmatpush3.msra.mxu0 %v6252_v37  ;;  %10891 = vmatpush3.msra.mxu1 %v6609_v34  ;;  %v4807_v15 = vadd.f32 %v13448_v40, %v13551_v53  ;;  %v5522_v37 = vrot.slane %v13773_v13, 7  ;;  %v6607_v58 = vld [vmem:[%s15465_s3 + $0x180] sm:$0xff]  ;;  %v5323_v44 = vadd.f32 %v16096_v27, %v4805_v11  ;;  %v16097_v40 = vld [vmem:[#allocation32_spill] sm:$0xff]  ;;  %v5566_v49 = vsel %vm3175_vm4, %v5520_v22, %v5521_v1 }
 0x591   : > { %10836 = vmatprep.subr.mxu0 %v6251_v59  ;;  %10892 = vmatprep.subr.mxu1 %v6608_v5  ;;  %v16095_v34 = vld [vmem:[#allocation134_spill] sm:$0xff]  ;;  %vm16098_vm8 = vcmp.ge.s32.totalorder %v16097_v40, 0  ;;  %v5466_v55 = vsel %vm3010_vm3, %v5420_v33, %v5421_v6  ;;  %v5523_v7 = vrot.slane %v13767_v29, 7  ;;  %v4810_v11 = vadd.f32 %v13459_v14, %v13568_v52  ;;  %v13857_v52 = vld [vmem:[%s15465_s3 + $0x1b8] sm:$0xff] }
 0x592   : > { %10735 = vmatmul.mubr.msk.f32.gmra.mxu0 %vm1166_vm7, %v5570_v2  ;;  %10791 = vmatmul.mubr.msk.f32.gmra.mxu1 %vm1166_vm7, %v5470_v39  ;;  %v5324_v24 = vadd.f32 %v16095_v34, %v4806_v9  ;;  %v5584_v53 = vsel %vm16098_vm8, %v5567_v12, 0.0  ;;  %v5422_v2 = vrot.slane %v13773_v13, 6  ;;  %v16099_v39 = vld [vmem:[#allocation85_spill] sm:$0xff]  ;;  %v5326_v9 = vadd.f32 %v16101_v54, %v4808_v57  ;;  %v16102_v22 = vld [vmem:[#allocation142_spill] sm:$0xff] }
 0x593   : > { %10737 = vmatprep.mubr.msk.f32.mxu0 %vm1166_vm7, %v5582_v21  ;;  %10793 = vmatprep.mubr.msk.f32.mxu1 %vm1166_vm7, %v5482_v25  ;;  %vm16100_vm2 = vcmp.ge.s32.totalorder %v16099_v39, 0  ;;  %v5423_v51 = vrot.slane %v13767_v29, 6  ;;  %v5524_v21 = vrot.slane %v13807_v62, 7  ;;  %v13845_v23 = vmax.f32 %v5358_v35, 0.0  ;;  %v16103_v35 = vld [vmem:[#allocation145_spill] sm:$0xff]  ;;  %v16110_v54 = vld [vmem:[#allocation34_spill] sm:$0xff] }
 0x594   : > { %v5484_v50 = vsel %vm16100_vm2, %v5467_v31, 0.0  ;;  %10837 = vmatpush3.msra.mxu0 %v6251_v59  ;;  %10893 = vmatpush3.msra.mxu1 %v6608_v5  ;;  %v5325_v25 = vadd.f32 %v16102_v22, %v4807_v15  ;;  %v4809_v33 = vadd.f32 %v13478_v61, %v13575_v26  ;;  %v5565_v14 = vsel %vm3175_vm4, %v5521_v1, %v5522_v37  ;;  %v13862_v59 = vld [vmem:[%s15465_s3 + $0x1e0] sm:$0xff]  ;;  %v16112_v22 = vld [vmem:[#allocation151_spill] sm:$0xff] }
 0x595   : > { %10838 = vmatprep.subr.mxu0 %v6250_v43  ;;  %10894 = vmatprep.subr.mxu1 %v6607_v58  ;;  %v5361_v5 = vadd.f32 %v13532_v48, %v5324_v24  ;;  %v5360_v61 = vadd.f32 %v13532_v48, %v5323_v44  ;;  %v5465_v26 = vsel %vm3010_vm3, %v5421_v6, %v5422_v2  ;;  %v16104_v6 = vld [vmem:[#allocation33_spill] sm:$0xff]  ;;  %v5526_v40 = vrot.slane %v13845_v23, 7 }
 0x596   : > { %10738 = vmatmul.mubr.msk.f32.gmra.mxu0 %vm1166_vm7, %v5568_v42  ;;  %10794 = vmatmul.mubr.msk.f32.gmra.mxu1 %vm1166_vm7, %v5468_v45  ;;  %v5424_v42 = vrot.slane %v13807_v62, 6  ;;  %v13871_v45 = vmax.f32 %v5359_v46, 0.0  ;;  %v4812_v12 = vadd.f32 %v13494_v10, %v13584_v63  ;;  %v5564_v31 = vsel %vm3175_vm4, %v5522_v37, %v5523_v7  ;;  %v16106_v46 = vld [vmem:[#allocation146_spill] sm:$0xff] }
 0x597   : > { %10740 = vmatprep.mubr.msk.f32.mxu0 %vm1166_vm7, %v5584_v53  ;;  %10796 = vmatprep.mubr.msk.f32.mxu1 %vm1166_vm7, %v5484_v50  ;;  %v5464_v57 = vsel %vm3010_vm3, %v5422_v2, %v5423_v51  ;;  %v5363_v1 = vadd.f32 %v13532_v48, %v5326_v9  ;;  %v5328_v15 = vadd.f32 %v16103_v35, %v4810_v11  ;;  %vm16105_vm9 = vcmp.ge.s32.totalorder %v16104_v6, 0  ;;  %v16109_v53 = vld [vmem:[#allocation148_spill] sm:$0xff] }
 0x598   : > { %10839 = vmatpush3.msra.mxu0 %v6250_v43  ;;  %10895 = vmatpush3.msra.mxu1 %v6607_v58  ;;  %v5586_v34 = vsel %vm16105_vm9, %v5565_v14, 0.0  ;;  %v5563_v10 = vsel %vm3175_vm4, %v5523_v7, %v5524_v21  ;;  %v5362_v63 = vadd.f32 %v13532_v48, %v5325_v25  ;;  %v5327_v37 = vadd.f32 %v16106_v46, %v4809_v33  ;;  %v16107_v58 = vld [vmem:[#allocation87_spill] sm:$0xff]  ;;  %v16113_v33 = vld [vmem:[#allocation89_spill] sm:$0xff] }
 0x599   : > { %10944 = vmatprep.subr.mxu0 %v13857_v52  ;;  %11000 = vmatprep.subr.mxu1 %v13862_v59  ;;  %v4811_v43 = vadd.f32 %v13516_v8, %v13587_v4  ;;  %vm16108_vm10 = vcmp.ge.s32.totalorder %v16107_v58, 0  ;;  %v13897_v27 = vmax.f32 %v5360_v61, 0.0  ;;  %v5463_v44 = vsel %vm3010_vm3, %v5423_v51, %v5424_v42 }
 0x59a   : > { %10741 = vmatmul.mubr.msk.f32.gmra.mxu0 %vm1166_vm7, %v5566_v49  ;;  %10797 = vmatmul.mubr.msk.f32.gmra.mxu1 %vm1166_vm7, %v5466_v55  ;;  %v5486_v24 = vsel %vm16108_vm10, %v5465_v26, 0.0  ;;  %v5426_v8 = vrot.slane %v13845_v23, 6  ;;  %v13905_v4 = vmax.f32 %v5361_v5, 0.0  ;;  %v5330_v2 = vadd.f32 %v16109_v53, %v4812_v12 }
 0x59b   : > { %10743 = vmatprep.mubr.msk.f32.mxu0 %vm1166_vm7, %v5586_v34  ;;  %10799 = vmatprep.mubr.msk.f32.mxu1 %vm1166_vm7, %v5486_v24  ;;  %v5525_v39 = vrot.slane %v13799_v36, 7  ;;  %v5425_v50 = vrot.slane %v13799_v36, 6  ;;  %v13910_v49 = vmax.f32 %v5363_v1, 0.0  ;;  %v5365_v55 = vadd.f32 %v13532_v48, %v5328_v15 }
 0x59c   : > { %v4813_v7 = vadd.f32 %v13560_v32, %v13605_v16  ;;  %vm16111_vm0 = vcmp.ge.s32.totalorder %v16110_v54, 0  ;;  %v13917_v11 = vmax.f32 %v5362_v63, 0.0  ;;  %v5364_v51 = vadd.f32 %v13532_v48, %v5327_v37  ;;  %v16117_v63 = vld [vmem:[#allocation91_spill] sm:$0xff]  ;;  %v16120_v54 = vld [vmem:[#allocation96_spill] sm:$0xff] }
 0x59d   : > { %v5588_v9 = vsel %vm16111_vm0, %v5563_v10, 0.0  ;;  %v5329_v25 = vadd.f32 %v16112_v22, %v4811_v43  ;;  %vm16114_vm1 = vcmp.ge.s32.totalorder %v16113_v33, 0  ;;  %v5561_v32 = vsel %vm3175_vm4, %v5525_v39, %v5526_v40  ;;  %v4780_v22 = vpop.f32.mrf.mxu0 }
 0x59e   : > { %10744 = vmatmul.mubr.msk.f32.gmra.mxu0 %vm1166_vm7, %v5564_v31  ;;  %10800 = vmatmul.mubr.msk.f32.gmra.mxu1 %vm1166_vm7, %v5464_v57  ;;  %v5488_v14 = vsel %vm16114_vm1, %v5463_v44, 0.0  ;;  %v5461_v16 = vsel %vm3010_vm3, %v5425_v50, %v5426_v8  ;;  %v5528_v5 = vrot.slane %v13897_v27, 7  ;;  %v5428_v61 = vrot.slane %v13897_v27, 6 }
 0x59f   : > { %10746 = vmatprep.mubr.msk.f32.mxu0 %vm1166_vm7, %v5588_v9  ;;  %10802 = vmatprep.mubr.msk.f32.mxu1 %vm1166_vm7, %v5488_v14  ;;  %v5367_v26 = vadd.f32 %v13532_v48, %v5330_v2  ;;  %v5562_v12 = vsel %vm3175_vm4, %v5524_v21, %v5525_v39  ;;  %v5462_v31 = vsel %vm3010_vm3, %v5424_v42, %v5425_v50  ;;  %v5527_v57 = vrot.slane %v13871_v45, 7  ;;  %v16115_v21 = vld [vmem:[#allocation35_spill] sm:$0xff]  ;;  %v16119_v2 = vld [vmem:[#allocation88_spill] sm:$0xff]  ;;  %v16121_v9 = vld [vmem:[#allocation105_spill] sm:$0xff] }
 0x5a0   : > { %v13941_v1 = vmax.f32 %v5365_v55, 0.0  ;;  %v5331_v35 = vadd.f32 %v13469_v30, %v4813_v7  ;;  %v4815_v15 = vadd.f32 %v13598_v0, %v13616_v20  ;;  %v5427_v6 = vrot.slane %v13871_v45, 6 }
 0x5a1   : > { %v13947_v34 = vmax.f32 %v5364_v51, 0.0  ;;  %v5366_v10 = vadd.f32 %v13532_v48, %v5329_v25  ;;  %vm16116_vm5 = vcmp.ge.s32.totalorder %v16115_v21, 0  ;;  %vm16118_vm6 = vcmp.ge.s32.totalorder %v16117_v63, 0  ;;  %v16129_v63 = vld [vmem:[#allocation19_spill] sm:$0xff] }
 0x5a2   : > { %10747 = vmatmul.mubr.msk.f32.gmra.mxu0 %vm1166_vm7, %v5562_v12  ;;  %10803 = vmatmul.mubr.msk.f32.gmra.mxu1 %vm1166_vm7, %v5462_v31  ;;  %v5590_v42 = vsel %vm16116_vm5, %v5561_v32, 0.0  ;;  %v5490_v46 = vsel %vm16118_vm6, %v5461_v16, 0.0  ;;  %v5559_v30 = vsel %vm3175_vm4, %v5527_v57, %v5528_v5  ;;  %v5459_v0 = vsel %vm3010_vm3, %v5427_v6, %v5428_v61  ;;  %v16126_v16 = vld [vmem:[#allocation152_spill] sm:$0xff]  ;;  %v16127_v12 = vld [vmem:[#allocation101_spill] sm:$0xff]  ;;  %v16128_v31 = vld [vmem:[#allocation71_spill] sm:$0xff] }
 0x5a3   : > { %10749 = vmatprep.mubr.msk.f32.mxu0 %vm1166_vm7, %v5590_v42  ;;  %10805 = vmatprep.mubr.msk.f32.mxu1 %vm1166_vm7, %v5490_v46  ;;  %v5530_v20 = vrot.slane %v13917_v11, 7  ;;  %v5430_v37 = vrot.slane %v13917_v11, 6  ;;  %v13964_v43 = vmax.f32 %v5367_v26, 0.0  ;;  %v4814_v58 = vadd.f32 %v13541_v38, %v13596_v60  ;;  %v16122_v38 = vld [vmem:[#allocation36_spill] sm:$0xff] }
 0x5a4   : > { %v5560_v24 = vsel %vm3175_vm4, %v5526_v40, %v5527_v57  ;;  %v5460_v44 = vsel %vm3010_vm3, %v5426_v8, %v5427_v6  ;;  %v5368_v53 = vadd.f32 %v13532_v48, %v5331_v35  ;;  %v5333_v39 = vadd.f32 %v16119_v2, %v4815_v15  ;;  %v16124_v40 = vld [vmem:[#allocation93_spill] sm:$0xff] }
 0x5a5   : > { %v5529_v50 = vrot.slane %v13905_v4, 7  ;;  %v5429_v55 = vrot.slane %v13905_v4, 6  ;;  %v13976_v7 = vmax.f32 %v5366_v10, 0.0  ;;  %v4817_v51 = vadd.f32 %v16121_v9, %v16120_v54  ;;  %v16136_v9 = vld [vmem:[#allocation94_spill] sm:$0xff] }
 0x5a6   : > { %10750 = vmatmul.mubr.msk.f32.gmra.mxu0 %vm1166_vm7, %v5560_v24  ;;  %10806 = vmatmul.mubr.msk.f32.gmra.mxu1 %vm1166_vm7, %v5460_v44  ;;  %vm16123_vm8 = vcmp.ge.s32.totalorder %v16122_v38, 0  ;;  %vm16125_vm2 = vcmp.ge.s32.totalorder %v16124_v40, 0  ;;  %v5532_v14 = vrot.slane %v13947_v34, 7  ;;  %v5432_v32 = vrot.slane %v13947_v34, 6  ;;  %v5298_v40 = vpop.f32.mrf.mxu1 }
 0x5a7   : > { %v5592_v60 = vsel %vm16123_vm8, %v5559_v30, 0.0  ;;  %v5492_v8 = vsel %vm16125_vm2, %v5459_v0, 0.0  ;;  %v5557_v25 = vsel %vm3175_vm4, %v5529_v50, %v5530_v20  ;;  %v5457_v33 = vsel %vm3010_vm3, %v5429_v55, %v5430_v37  ;;  %v16130_v30 = vld [vmem:[#allocation106_spill] sm:$0xff] }
 0x5a8   : > { %10752 = vmatprep.mubr.msk.f32.mxu0 %vm1166_vm7, %v5592_v60  ;;  %10808 = vmatprep.mubr.msk.f32.mxu1 %vm1166_vm7, %v5492_v8  ;;  %v5332_v26 = vadd.f32 %v16126_v16, %v4814_v58  ;;  %v4816_v57 = vadd.f32 %v16128_v31, %v16127_v12  ;;  %v5558_v35 = vsel %vm3175_vm4, %v5528_v5, %v5529_v50  ;;  %v14001_v6 = vmax.f32 %v5368_v53, 0.0  ;;  %v16131_v5 = vld [vmem:[#allocation37_spill] sm:$0xff]  ;;  %v16138_v12 = vld [vmem:[#allocation39_spill] sm:$0xff] }
 0x5a9   : > { %v5458_v15 = vsel %vm3010_vm3, %v5428_v61, %v5429_v55  ;;  %v5370_v10 = vadd.f32 %v13532_v48, %v5333_v39  ;;  %v5531_v21 = vrot.slane %v13910_v49, 7  ;;  %v5431_v42 = vrot.slane %v13910_v49, 6  ;;  %v16133_v61 = vld [vmem:[#allocation95_spill] sm:$0xff]  ;;  %v16135_v55 = vld [vmem:[#allocation86_spill] sm:$0xff]  ;;  %v16140_v31 = vld [vmem:[#allocation97_spill] sm:$0xff] }
 0x5aa   : > { %v5335_v46 = vadd.f32 %v16129_v63, %v4817_v51  ;;  %v4819_v0 = vadd.f32 %v4780_v22, %v16130_v30  ;;  %10753 = vmatmul.mubr.msk.f32.gmra.mxu0 %vm1166_vm7, %v5558_v35  ;;  %10809 = vmatmul.mubr.msk.f32.gmra.mxu1 %vm1166_vm7, %v5458_v15  ;;  %vm16132_vm9 = vcmp.ge.s32.totalorder %v16131_v5, 0  ;;  %vm16134_vm10 = vcmp.ge.s32.totalorder %v16133_v61, 0  ;;  %v16137_v51 = vld [vmem:[#allocation103_spill] sm:$0xff]  ;;  %v16142_v63 = vld [vmem:[#allocation90_spill] sm:$0xff] }
 0x5ab   : > { %v5594_v58 = vsel %vm16132_vm9, %v5557_v25, 0.0  ;;  %v5494_v24 = vsel %vm16134_vm10, %v5457_v33, 0.0  ;;  %v5555_v44 = vsel %vm3175_vm4, %v5531_v21, %v5532_v14  ;;  %v5455_v53 = vsel %vm3010_vm3, %v5431_v42, %v5432_v32 }
 0x5ac   : > { %10755 = vmatprep.mubr.msk.f32.mxu0 %vm1166_vm7, %v5594_v58  ;;  %10811 = vmatprep.mubr.msk.f32.mxu1 %vm1166_vm7, %v5494_v24  ;;  %v5534_v2 = vrot.slane %v13976_v7, 7  ;;  %v5434_v39 = vrot.slane %v13976_v7, 6  ;;  %v5369_v50 = vadd.f32 %v13532_v48, %v5332_v26  ;;  %v5334_v54 = vadd.f32 %v16135_v55, %v4816_v57 }
 0x5ad   : > { %v4818_v38 = vadd.f32 %v16137_v51, %v16136_v9  ;;  %v5556_v60 = vsel %vm3175_vm4, %v5530_v20, %v5531_v21  ;;  %v14028_v8 = vmax.f32 %v5370_v10, 0.0  ;;  %v5456_v22 = vsel %vm3010_vm3, %v5430_v37, %v5431_v42 }
 0x5ae   : > { %v5533_v25 = vrot.slane %v13941_v1, 7  ;;  %v5433_v33 = vrot.slane %v13941_v1, 6  ;;  %v5372_v16 = vadd.f32 %v13532_v48, %v5335_v46  ;;  %v5337_v26 = vadd.f32 %v5298_v40, %v4819_v0  ;;  %10756 = vmatmul.mubr.msk.f32.gmra.mxu0 %vm1166_vm7, %v5556_v60  ;;  %10812 = vmatmul.mubr.msk.f32.gmra.mxu1 %vm1166_vm7, %v5456_v22 }
 0x5af   : > { %vm16139_vm0 = vcmp.ge.s32.totalorder %v16138_v12, 0  ;;  %vm16141_vm1 = vcmp.ge.s32.totalorder %v16140_v31, 0  ;;  %v5536_v15 = vrot.slane %v14001_v6, 7  ;;  %v5436_v10 = vrot.slane %v14001_v6, 6 }
 0x5b0   : > { %v5596_v20 = vsel %vm16139_vm0, %v5555_v44, 0.0  ;;  %v5496_v57 = vsel %vm16141_vm1, %v5455_v53, 0.0  ;;  %v5553_v37 = vsel %vm3175_vm4, %v5533_v25, %v5534_v2  ;;  %v5453_v35 = vsel %vm3010_vm3, %v5433_v33, %v5434_v39  ;;  %v16143_v44 = vld [vmem:[#allocation41_spill] sm:$0xff] }
 0x5b1   : > { %10758 = vmatprep.mubr.msk.f32.mxu0 %vm1166_vm7, %v5596_v20  ;;  %10814 = vmatprep.mubr.msk.f32.mxu1 %vm1166_vm7, %v5496_v57  ;;  %v14049_v21 = vmax.f32 %v5369_v50, 0.0  ;;  %v5371_v42 = vadd.f32 %v13532_v48, %v5334_v54  ;;  %v5336_v46 = vadd.f32 %v16142_v63, %v4818_v38  ;;  %v5554_v30 = vsel %vm3175_vm4, %v5532_v14, %v5533_v25  ;;  %v16145_v50 = vld [vmem:[#allocation99_spill] sm:$0xff] }
 0x5b2   : > { %v5454_v0 = vsel %vm3010_vm3, %v5432_v32, %v5433_v33  ;;  %v5535_v5 = vrot.slane %v13964_v43, 7  ;;  %v5435_v58 = vrot.slane %v13964_v43, 6  ;;  %v14059_v61 = vmax.f32 %v5372_v16, 0.0  ;;  %10759 = vmatmul.mubr.msk.f32.gmra.mxu0 %vm1166_vm7, %v5554_v30  ;;  %v16147_v16 = vld [vmem:[#allocation42_spill] sm:$0xff] }
 0x5b3   : > { %v5374_v24 = vadd.f32 %v13532_v48, %v5337_v26  ;;  %10815 = vmatmul.mubr.msk.f32.gmra.mxu1 %vm1166_vm7, %v5454_v0  ;;  %vm16144_vm5 = vcmp.ge.s32.totalorder %v16143_v44, 0  ;;  %vm16146_vm6 = vcmp.ge.s32.totalorder %v16145_v50, 0  ;;  %v5538_v54 = vrot.slane %v14028_v8, 7  ;;  %v16153_v0 = vld [vmem:[#allocation7_spill] sm:$0xff] }
 0x5b4   : > { %v5598_v53 = vsel %vm16144_vm5, %v5553_v37, 0.0  ;;  %v5498_v14 = vsel %vm16146_vm6, %v5453_v35, 0.0  ;;  %v5551_v32 = vsel %vm3175_vm4, %v5535_v5, %v5536_v15  ;;  %v5451_v55 = vsel %vm3010_vm3, %v5435_v58, %v5436_v10 }
 0x5b5   : > { %10761 = vmatprep.mubr.msk.f32.mxu0 %vm1166_vm7, %v5598_v53  ;;  %10817 = vmatprep.mubr.msk.f32.mxu1 %vm1166_vm7, %v5498_v14  ;;  %v5438_v9 = vrot.slane %v14028_v8, 6  ;;  %v14076_v51 = vmax.f32 %v5371_v42, 0.0  ;;  %v5373_v38 = vadd.f32 %v13532_v48, %v5336_v46  ;;  %v5552_v60 = vsel %vm3175_vm4, %v5534_v2, %v5535_v5  ;;  %v16149_v48 = vld [vmem:[#allocation2_spill] sm:$0xff]  ;;  %v16151_v46 = vld [vmem:[#allocation44_spill] sm:$0xff] }
 0x5b6   : > { %v5452_v40 = vsel %vm3010_vm3, %v5434_v39, %v5435_v58  ;;  %v5537_v22 = vrot.slane %v14049_v21, 7  ;;  %v5437_v25 = vrot.slane %v14049_v21, 6  ;;  %v14085_v33 = vmax.f32 %v5374_v24, 0.0  ;;  %10762 = vmatmul.mubr.msk.f32.gmra.mxu0 %vm1166_vm7, %v5552_v60 }
 0x5b7   : > { %10818 = vmatmul.mubr.msk.f32.gmra.mxu1 %vm1166_vm7, %v5452_v40  ;;  %vm16148_vm8 = vcmp.ge.s32.totalorder %v16147_v16, 0  ;;  %vm16150_vm2 = vcmp.ge.s32.totalorder %v16149_v48, 0  ;;  %v5540_v20 = vrot.slane %v14059_v61, 7  ;;  %v5440_v31 = vrot.slane %v14059_v61, 6 }
 0x5b8   : > { %v5600_v26 = vsel %vm16148_vm8, %v5551_v32, 0.0  ;;  %v5500_v12 = vsel %vm16150_vm2, %v5451_v55, 0.0  ;;  %v5549_v2 = vsel %vm3175_vm4, %v5537_v22, %v5538_v54  ;;  %v5449_v39 = vsel %vm3010_vm3, %v5437_v25, %v5438_v9  ;;  %v16155_v32 = vld [vmem:[#allocation46_spill] sm:$0xff] }
 0x5b9   : > { %10764 = vmatprep.mubr.msk.f32.mxu0 %vm1166_vm7, %v5600_v26  ;;  %10820 = vmatprep.mubr.msk.f32.mxu1 %vm1166_vm7, %v5500_v12  ;;  %v14101_v57 = vmax.f32 %v5373_v38, 0.0  ;;  %v5550_v37 = vsel %vm3175_vm4, %v5536_v15, %v5537_v22  ;;  %v5450_v35 = vsel %vm3010_vm3, %v5436_v10, %v5437_v25  ;;  %v5539_v42 = vrot.slane %v14076_v51, 7  ;;  %v16157_v38 = vld [vmem:[#allocation40_spill] sm:$0xff]  ;;  %v16161_v26 = vld [vmem:[#allocation5_spill] sm:$0xff] }
 0x5ba   : > { %v5439_v63 = vrot.slane %v14076_v51, 6  ;;  %10765 = vmatmul.mubr.msk.f32.gmra.mxu0 %vm1166_vm7, %v5550_v37  ;;  %vm16152_vm9 = vcmp.ge.s32.totalorder %v16151_v46, 0  ;;  %vm16154_vm10 = vcmp.ge.s32.totalorder %v16153_v0, 0  ;;  %v5542_v58 = vrot.slane %v14085_v33, 7  ;;  %v16159_v25 = vld [vmem:[#allocation48_spill] sm:$0xff]  ;;  %v16169_v0 = vld [vmem:[#allocation107_spill] sm:$0xff] }
 0x5bb   : > { %10821 = vmatmul.mubr.msk.f32.gmra.mxu1 %vm1166_vm7, %v5450_v35  ;;  %v5602_v30 = vsel %vm16152_vm9, %v5549_v2, 0.0  ;;  %v5502_v5 = vsel %vm16154_vm10, %v5449_v39, 0.0  ;;  %v5547_v15 = vsel %vm3175_vm4, %v5539_v42, %v5540_v20  ;;  %v5442_v24 = vrot.slane %v14085_v33, 6  ;;  %v16163_v12 = vld [vmem:[#allocation92_spill] sm:$0xff]  ;;  %v16164_v39 = vld [vmem:[#allocation102_spill] sm:$0xff] }
 0x5bc   : > { %10767 = vmatprep.mubr.msk.f32.mxu0 %vm1166_vm7, %v5602_v30  ;;  %10823 = vmatprep.mubr.msk.f32.mxu1 %vm1166_vm7, %v5502_v5  ;;  %v5447_v10 = vsel %vm3010_vm3, %v5439_v63, %v5440_v31  ;;  %v5548_v44 = vsel %vm3175_vm4, %v5538_v54, %v5539_v42  ;;  %v5448_v53 = vsel %vm3010_vm3, %v5438_v9, %v5439_v63  ;;  %v5541_v50 = vrot.slane %v14101_v57, 7 }
 0x5bd   : > { %v5441_v14 = vrot.slane %v14101_v57, 6  ;;  %vm16156_vm0 = vcmp.ge.s32.totalorder %v16155_v32, 0  ;;  %vm16158_vm1 = vcmp.ge.s32.totalorder %v16157_v38, 0  ;;  %vm16160_vm5 = vcmp.ge.s32.totalorder %v16159_v25, 0  ;;  %v16179_v25 = vld [vmem:[#allocation49_spill] sm:$0xff] }
 0x5be   : > { %10768 = vmatmul.mubr.msk.f32.gmra.mxu0 %vm1166_vm7, %v5548_v44  ;;  %v5604_v55 = vsel %vm16156_vm0, %v5547_v15, 0.0  ;;  %v5504_v60 = vsel %vm16158_vm1, %v5447_v10, 0.0  ;;  %v5545_v54 = vsel %vm3175_vm4, %v5541_v50, %v5542_v58  ;;  %v5546_v40 = vsel %vm3175_vm4, %v5540_v20, %v5541_v50  ;;  %v16165_v20 = vld [vmem:[#allocation100_spill] sm:$0xff]  ;;  %v16171_v10 = vld [vmem:[#allocation10_spill] sm:$0xff] }
 0x5bf   : > { %10824 = vmatmul.mubr.msk.f32.gmra.mxu1 %vm1166_vm7, %v5448_v53  ;;  %10770 = vmatprep.mubr.msk.f32.mxu0 %vm1166_vm7, %v5604_v55  ;;  %v5445_v9 = vsel %vm3010_vm3, %v5441_v14, %v5442_v24  ;;  %v5446_v22 = vsel %vm3010_vm3, %v5440_v31, %v5441_v14  ;;  %v5606_v16 = vsel %vm16160_vm5, %v5545_v54, 0.0  ;;  %vm16162_vm6 = vcmp.ge.s32.totalorder %v16161_v26, 0  ;;  %v7062_v50 = vld [vmem:[%s15465_s3 + $0x1b0] sm:$0xff]  ;;  %v14193_v14 = vld [vmem:[%s15465_s3 + $0x1d8] sm:$0xff]  ;;  %v16175_v55 = vld [vmem:[#allocation47_spill] sm:$0xff] }
 0x5c0   : > { %10826 = vmatprep.mubr.msk.f32.mxu1 %vm1166_vm7, %v5504_v60  ;;  %v5506_v48 = vsel %vm16162_vm6, %v5445_v9, 0.0  ;;  %v6611_v2 = vrot.slane %v16163_v12, 1  ;;  %v6613_v37 = vrot.slane %v16164_v39, 1  ;;  %v6612_v31 = vrot.slane %v16165_v20, 1  ;;  %v7061_v9 = vld [vmem:[%s15465_s3 + $0x1a8] sm:$0xff] }
 0x5c1   : > { %v16166_v35 = vrot.slane %v13690_v41, 7  ;;  %v5444_v63 = vsel %vm3010_vm3, %v5442_v24, %v5443_v56  ;;  %vm16167_vm8 = vcmp.lt.s32.totalorder %v16072_v19, 7  ;;  %v6615_v5 = vrot.slane %v16169_v0, 1  ;;  %v16170_v56 = vld [vmem:[#allocation104_spill] sm:$0xff] }
 0x5c2   : > { %10771 = vmatmul.mubr.msk.f32.gmra.mxu0 %vm1166_vm7, %v5546_v40  ;;  %v6672_v46 = vsel %vm16167_vm8, %v6612_v31, %v6613_v37  ;;  %vm16168_vm2 = vmmov %vm16167_vm8  ;;  %v6614_v15 = vrot.slane %v16170_v56, 1  ;;  %v6617_v53 = vrot.slane %v13694_v28, 1  ;;  %v6616_v32 = vrot.slane %v13664_v18, 1  ;;  %v14218_v40 = vld [vmem:[%s15465_s3 + $0x1d0] sm:$0xff] }
 0x5c3   : > { %10827 = vmatmul.mubr.msk.f32.gmra.mxu1 %vm1166_vm7, %v5446_v22  ;;  %10773 = vmatprep.mubr.msk.f32.mxu0 %vm1166_vm7, %v5606_v16  ;;  %v5544_v42 = vsel %vm3175_vm4, %v5542_v58, %v16166_v35  ;;  %v6673_v30 = vsel %vm16168_vm2, %v6611_v2, %v6612_v31  ;;  %vm16172_vm4 = vcmp.lt.s32.totalorder %v16171_v10, 16  ;;  %vm16173_vm3 = vmmov %vm16168_vm2  ;;  %vm16176_vm10 = vcmp.lt.s32.totalorder %v16175_v55, 16  ;;  %v7060_v31 = vld [vmem:[%s15465_s3 + $0x1a0] sm:$0xff]  ;;  %v14242_v35 = vld [vmem:[%s15465_s3 + $0x1c8] sm:$0xff] }
 0x5c4   : > { %10829 = vmatprep.mubr.msk.f32.mxu1 %vm1166_vm7, %v5506_v48  ;;  %v6676_v58 = vsel %vm16172_vm4, %v6672_v46, 0.0  ;;  %v6671_v24 = vsel %vm16173_vm3, %v6613_v37, %v6614_v15  ;;  %vm16174_vm9 = vmmov %vm16168_vm2  ;;  %v6619_v54 = vrot.slane %v13712_v17, 1  ;;  %v6618_v22 = vrot.slane %v13687_v47, 1  ;;  %v16190_v55 = vld [vmem:[#allocation55_spill] sm:$0xff] }
 0x5c5   : > { %v6670_v44 = vsel %vm16174_vm9, %v6614_v15, %v6615_v5  ;;  %vm16177_vm0 = vmmov %vm16168_vm2  ;;  %vm16180_vm5 = vcmp.lt.s32.totalorder %v16179_v25, 16  ;;  %v6621_v37 = vrot.slane %v13773_v13, 1  ;;  %v6623_v15 = vrot.slane %v13807_v62, 1 }
 0x5c6   : > { %10774 = vmatmul.mubr.msk.f32.gmra.mxu0 %vm1166_vm7, %v5544_v42  ;;  %v6678_v38 = vsel %vm16176_vm10, %v6670_v44, 0.0  ;;  %v6669_v60 = vsel %vm16177_vm0, %v6615_v5, %v6616_v32  ;;  %vm16178_vm1 = vmmov %vm16177_vm0  ;;  %v6620_v42 = vrot.slane %v13729_v3, 1  ;;  %v6622_v10 = vrot.slane %v13767_v29, 1 }
 0x5c7   : > { %10830 = vmatmul.mubr.msk.f32.gmra.mxu1 %vm1166_vm7, %v5444_v63  ;;  %10840 = vmatprep.mubr.msk.f32.mxu0 %vm1166_vm7, %v16163_v12  ;;  %vm16181_vm6 = vmmov %vm16177_vm0  ;;  %v16183_v63 = vld [vmem:[#allocation52_spill] sm:$0xff] }
 0x5c8   : > { %10896 = vmatprep.mubr.msk.f32.mxu1 %vm1166_vm7, %v6673_v30  ;;  %v6667_v26 = vsel %vm16181_vm6, %v6617_v53, %v6618_v22  ;;  %vm16182_vm8 = vmmov %vm16177_vm0  ;;  %vm16184_vm2 = vcmp.lt.s32.totalorder %v16183_v63, 16 }
 0x5c9   : > { %v6666_v48 = vsel %vm16182_vm8, %v6618_v22, %v6619_v54  ;;  %vm16185_vm4 = vmmov %vm16177_vm0  ;;  %v16194_v22 = vld [vmem:[#allocation58_spill] sm:$0xff] }
 0x5ca   : > { %10841 = vmatmul.mubr.msk.f32.vlgmr.msra.gmra.mxu0 %vm1166_vm7, %v16165_v20  ;;  %v6682_v46 = vsel %vm16184_vm2, %v6666_v48, 0.0  ;;  %v6665_v30 = vsel %vm16185_vm4, %v6619_v54, %v6620_v42  ;;  %vm16186_vm3 = vmmov %vm16177_vm0  ;;  %v6627_v54 = vrot.slane %v13897_v27, 1  ;;  %vm16195_vm8 = vcmp.lt.s32.totalorder %v16194_v22, 16 }
 0x5cb   : > { %10897 = vmatmul.mubr.msk.f32.vlgmr.msra.gmra.mxu1 %vm1166_vm7, %v6676_v58  ;;  %10843 = vmatprep.mubr.msk.f32.mxu0 %vm1166_vm7, %v16164_v39  ;;  %v6664_v5 = vsel %vm16186_vm3, %v6620_v42, %v6621_v37  ;;  %v16187_v58 = vld [vmem:[#allocation54_spill] sm:$0xff]  ;;  %vm16189_vm10 = vmmov %vm16177_vm0  ;;  %v6629_v48 = vrot.slane %v13917_v11, 1 }
 0x5cc   : > { %10899 = vmatprep.mubr.msk.f32.mxu1 %vm1166_vm7, %v6671_v24  ;;  %10945 = vmatpush3.msra.mxu0 %v13857_v52  ;;  %v6668_v52 = vsel %vm16178_vm1, %v6616_v32, %v6617_v53  ;;  %vm16188_vm9 = vcmp.lt.s32.totalorder %v16187_v58, 16  ;;  %v6663_v44 = vsel %vm16189_vm10, %v6621_v37, %v6622_v10  ;;  %v6662_v53 = vsel %vm16177_vm0, %v6622_v10, %v6623_v15  ;;  %vm16193_vm6 = vmmov %vm16177_vm0 }
 0x5cd   : > { %11001 = vmatpush3.msra.mxu1 %v13862_v59  ;;  %10946 = vmatprep.subr.mxu0 %v7062_v50  ;;  %v6680_v16 = vsel %vm16180_vm5, %v6668_v52, 0.0  ;;  %v6684_v24 = vsel %vm16188_vm9, %v6664_v5, 0.0  ;;  %v6624_v32 = vrot.slane %v13799_v36, 1  ;;  %vm16191_vm1 = vcmp.lt.s32.totalorder %v16190_v55, 16  ;;  %vm16192_vm5 = vmmov %vm16177_vm0 }
 0x5ce   : > { %11002 = vmatprep.subr.mxu1 %v14193_v14  ;;  %10844 = vmatmul.mubr.msk.f32.gmra.mxu0 %vm1166_vm7, %v16170_v56  ;;  %vm16196_vm2 = vmmov %vm16177_vm0  ;;  %v6628_v37 = vrot.slane %v13905_v4, 1  ;;  %v6630_v5 = vrot.slane %v13910_v49, 1 }
 0x5cf   : > { %10900 = vmatmul.mubr.msk.f32.gmra.mxu1 %vm1166_vm7, %v6678_v38  ;;  %10846 = vmatprep.mubr.msk.f32.mxu0 %vm1166_vm7, %v16169_v0  ;;  %v6686_v38 = vsel %vm16191_vm1, %v6662_v53, 0.0  ;;  %vm16197_vm4 = vmmov %vm16177_vm0  ;;  %v6632_v53 = vrot.slane %v13941_v1, 1 }
 0x5d0   : > { %10902 = vmatprep.mubr.msk.f32.mxu1 %vm1166_vm7, %v6669_v60  ;;  %10947 = vmatpush3.msra.mxu0 %v7062_v50  ;;  %v6625_v50 = vrot.slane %v13845_v23, 1  ;;  %v6661_v60 = vsel %vm16192_vm5, %v6623_v15, %v6624_v32  ;;  %vm16200_vm9 = vmmov %vm16177_vm0  ;;  %v16202_v15 = vld [vmem:[#allocation62_spill] sm:$0xff] }
 0x5d1   : > { %11003 = vmatpush3.msra.mxu1 %v14193_v14  ;;  %10948 = vmatprep.subr.mxu0 %v7061_v9  ;;  %v6657_v63 = vsel %vm16200_vm9, %v6627_v54, %v6628_v37  ;;  %vm16201_vm10 = vmmov %vm16177_vm0  ;;  %vm16203_vm0 = vcmp.lt.s32.totalorder %v16202_v15, 16 }
 0x5d2   : > { %11004 = vmatprep.subr.mxu1 %v14218_v40  ;;  %10847 = vmatmul.mubr.msk.f32.gmra.mxu0 %vm1166_vm7, %v13664_v18  ;;  %v6660_v52 = vsel %vm16193_vm6, %v6624_v32, %v6625_v50  ;;  %vm16204_vm1 = vmmov %vm16196_vm2 }
 0x5d3   : > { %10903 = vmatmul.mubr.msk.f32.gmra.mxu1 %vm1166_vm7, %v6680_v16  ;;  %10849 = vmatprep.mubr.msk.f32.mxu0 %vm1166_vm7, %v13694_v28  ;;  %v6688_v25 = vsel %vm16195_vm8, %v6660_v52, 0.0  ;;  %v6655_v58 = vsel %vm16204_vm1, %v6629_v48, %v6630_v5  ;;  %vm16205_vm5 = vmmov %vm16204_vm1  ;;  %v6634_v52 = vrot.slane %v13964_v43, 1 }
 0x5d4   : > { %10905 = vmatprep.mubr.msk.f32.mxu1 %vm1166_vm7, %v6667_v26  ;;  %10949 = vmatpush3.msra.mxu0 %v7061_v9  ;;  %v6626_v9 = vrot.slane %v13871_v45, 1  ;;  %vm16208_vm8 = vmmov %vm16204_vm1 }
 0x5d5   : > { %11005 = vmatpush3.msra.mxu1 %v14218_v40  ;;  %10950 = vmatprep.subr.mxu0 %v7060_v31  ;;  %vm16213_vm9 = vmmov %vm16204_vm1 }
 0x5d6   : > { %11006 = vmatprep.subr.mxu1 %v14242_v35  ;;  %10850 = vmatmul.mubr.msk.f32.gmra.mxu0 %vm1166_vm7, %v13687_v47  ;;  %v6659_v16 = vsel %vm16196_vm2, %v6625_v50, %v6626_v9  ;;  %v6658_v26 = vsel %vm16197_vm4, %v6626_v9, %v6627_v54  ;;  %v16206_v50 = vld [vmem:[#allocation63_spill] sm:$0xff]  ;;  %vm16209_vm2 = vmmov %vm16204_vm1  ;;  %v16210_v54 = vld [vmem:[#allocation66_spill] sm:$0xff] }
 0x5d7   : > { %10906 = vmatmul.mubr.msk.f32.gmra.mxu1 %vm1166_vm7, %v6682_v46  ;;  %10852 = vmatprep.mubr.msk.f32.mxu0 %vm1166_vm7, %v13712_v17  ;;  %v6656_v46 = vsel %vm16201_vm10, %v6628_v37, %v6629_v48  ;;  %vm16207_vm6 = vcmp.lt.s32.totalorder %v16206_v50, 16  ;;  %vm16211_vm4 = vcmp.lt.s32.totalorder %v16210_v54, 16  ;;  %v16214_v48 = vld [vmem:[#allocation68_spill] sm:$0xff] }
 0x5d8   : > { %10908 = vmatprep.mubr.msk.f32.mxu1 %vm1166_vm7, %v6665_v30  ;;  %10951 = vmatpush3.msra.mxu0 %v7060_v31  ;;  %v16198_v31 = vld [vmem:[#allocation60_spill] sm:$0xff]  ;;  %v6631_v30 = vrot.slane %v13947_v34, 1  ;;  %v6692_v10 = vsel %vm16203_vm0, %v6656_v46, 0.0  ;;  %vm16215_vm10 = vcmp.lt.s32.totalorder %v16214_v48, 16  ;;  %vm16216_vm0 = vmmov %vm16204_vm1  ;;  %v6638_v46 = vrot.slane %v14076_v51, 1 }
 0x5d9   : > { %11007 = vmatpush3.msra.mxu1 %v14242_v35  ;;  %vm16199_vm3 = vcmp.lt.s32.totalorder %v16198_v31, 16  ;;  %v7068_v48 = vrot.slane %v16169_v0, 2 }
 0x5da   : > { %11011 = vmatprep.subr.mxu1 %v13862_v59  ;;  %10853 = vmatmul.mubr.msk.f32.gmra.mxu0 %vm1166_vm7, %v13729_v3  ;;  %v6690_v42 = vsel %vm16199_vm3, %v6658_v26, 0.0  ;;  %v6653_v55 = vsel %vm16208_vm8, %v6631_v30, %v6632_v53  ;;  %vm16212_vm3 = vmmov %vm16204_vm1  ;;  %v6636_v26 = vrot.slane %v14049_v21, 1 }
 0x5db   : > { %10909 = vmatmul.mubr.msk.f32.gmra.mxu1 %vm1166_vm7, %v6684_v24  ;;  %10855 = vmatprep.mubr.msk.f32.mxu0 %vm1166_vm7, %v13773_v13  ;;  %v6654_v24 = vsel %vm16205_vm5, %v6630_v5, %v6631_v30  ;;  %vm16217_vm1 = vmmov %vm16216_vm0  ;;  %v16218_v30 = vld [vmem:[#allocation70_spill] sm:$0xff] }
 0x5dc   : > { %10911 = vmatprep.mubr.msk.f32.mxu1 %vm1166_vm7, %v6663_v44  ;;  %v6633_v44 = vrot.slane %v13976_v7, 1  ;;  %v6694_v32 = vsel %vm16207_vm6, %v6654_v24, 0.0  ;;  %vm16219_vm5 = vcmp.lt.s32.totalorder %v16218_v30, 16  ;;  %vm16220_vm6 = vmmov %vm16216_vm0  ;;  %v6640_v24 = vrot.slane %v14101_v57, 1 }
 0x5dd   : > { %vm16221_vm8 = vmmov %vm16216_vm0  ;;  %v7070_v30 = vrot.slane %v13694_v28, 2 }
 0x5de   : > { %10856 = vmatmul.mubr.msk.f32.gmra.mxu0 %vm1166_vm7, %v13767_v29  ;;  %v6651_v22 = vsel %vm16212_vm3, %v6633_v44, %v6634_v52  ;;  %vm16225_vm3 = vmmov %vm16216_vm0 }
 0x5df   : > { %10912 = vmatmul.mubr.msk.f32.gmra.mxu1 %vm1166_vm7, %v6686_v38  ;;  %10858 = vmatprep.mubr.msk.f32.mxu0 %vm1166_vm7, %v13807_v62  ;;  %v6652_v38 = vsel %vm16209_vm2, %v6632_v53, %v6633_v44  ;;  %v16222_v44 = vld [vmem:[#allocation74_spill] sm:$0xff] }
 0x5e0   : > { %10914 = vmatprep.mubr.msk.f32.mxu1 %vm1166_vm7, %v6661_v60  ;;  %v6635_v60 = vrot.slane %v14001_v6, 1  ;;  %v6696_v9 = vsel %vm16211_vm4, %v6652_v38, 0.0  ;;  %vm16223_vm2 = vcmp.lt.s32.totalorder %v16222_v44, 16  ;;  %vm16224_vm4 = vmmov %vm16216_vm0  ;;  %v16226_v38 = vld [vmem:[#allocation76_spill] sm:$0xff]  ;;  %v7074_v44 = vrot.slane %v13773_v13, 2 }
 0x5e1   : > { %v7075_v13 = vrot.slane %v13767_v29, 2 }
 0x5e2   : > { %10859 = vmatmul.mubr.msk.f32.gmra.mxu0 %vm1166_vm7, %v13799_v36  ;;  %v6649_v31 = vsel %vm16216_vm0, %v6635_v60, %v6636_v26 }
 0x5e3   : > { %10915 = vmatmul.mubr.msk.f32.gmra.mxu1 %vm1166_vm7, %v6688_v25  ;;  %10861 = vmatprep.mubr.msk.f32.mxu0 %vm1166_vm7, %v13845_v23  ;;  %v6650_v25 = vsel %vm16213_vm9, %v6634_v52, %v6635_v60  ;;  %vm16227_vm9 = vcmp.lt.s32.totalorder %v16226_v38, 16 }
 0x5e4   : > { %10917 = vmatprep.mubr.msk.f32.mxu1 %vm1166_vm7, %v6659_v16  ;;  %v6637_v16 = vrot.slane %v14028_v8, 1  ;;  %v6698_v37 = vsel %vm16215_vm10, %v6650_v25, 0.0  ;;  %vm16228_vm10 = vmmov %vm16216_vm0  ;;  %v7065_v25 = vrot.slane %v16165_v20, 2  ;;  %v16233_v20 = vld [vmem:[#allocation26_spill] sm:$0xff] }
 0x5e6   : > { %10862 = vmatmul.mubr.msk.f32.gmra.mxu0 %vm1166_vm7, %v13871_v45  ;;  %v6647_v15 = vsel %vm16220_vm6, %v6637_v16, %v6638_v46 }
 0x5e7   : > { %10918 = vmatmul.mubr.msk.f32.gmra.mxu1 %vm1166_vm7, %v6690_v42  ;;  %10864 = vmatprep.mubr.msk.f32.mxu0 %vm1166_vm7, %v13897_v27  ;;  %v6648_v42 = vsel %vm16217_vm1, %v6636_v26, %v6637_v16  ;;  %v16229_v16 = vld [vmem:[#allocation78_spill] sm:$0xff] }
 0x5e8   : > { %10920 = vmatprep.mubr.msk.f32.mxu1 %vm1166_vm7, %v6657_v63  ;;  %v6639_v63 = vrot.slane %v14059_v61, 1  ;;  %v6700_v5 = vsel %vm16219_vm5, %v6648_v42, 0.0  ;;  %vm16230_vm1 = vcmp.lt.s32.totalorder %v16229_v16, 16  ;;  %vm16231_vm5 = vcmp.lt.s32.totalorder %v16072_v19, 6 }
 0x5e9   : > { %vm16232_vm6 = vmmov %vm16231_vm5  ;;  %v7080_v16 = vrot.slane %v13897_v27, 2  ;;  %v7081_v27 = vrot.slane %v13905_v4, 2 }
 0x5ea   : > { %10865 = vmatmul.mubr.msk.f32.gmra.mxu0 %vm1166_vm7, %v13905_v4  ;;  %v6645_v50 = vsel %vm16224_vm4, %v6639_v63, %v6640_v24 }
 0x5eb   : > { %10921 = vmatmul.mubr.msk.f32.gmra.mxu1 %vm1166_vm7, %v6692_v10  ;;  %10867 = vmatprep.mubr.msk.f32.mxu0 %vm1166_vm7, %v13917_v11  ;;  %v6646_v10 = vsel %vm16221_vm8, %v6638_v46, %v6639_v63  ;;  %v16236_v63 = vld [vmem:[#allocation24_spill] sm:$0xff] }
 0x5ec   : > { %10923 = vmatprep.mubr.msk.f32.mxu1 %vm1166_vm7, %v6655_v58  ;;  %v6641_v58 = vrot.slane %v14085_v33, 1  ;;  %v6702_v53 = vsel %vm16223_vm2, %v6646_v10, 0.0  ;;  %vm16237_vm2 = vmmov %vm16231_vm5 }
 0x5ed   : > { %vm16238_vm4 = vmmov %vm16237_vm2 }
 0x5ee   : > { %10868 = vmatmul.mubr.msk.f32.gmra.mxu0 %vm1166_vm7, %v13910_v49 }
 0x5ef   : > { %10924 = vmatmul.mubr.msk.f32.gmra.mxu1 %vm1166_vm7, %v6694_v32  ;;  %10870 = vmatprep.mubr.msk.f32.mxu0 %vm1166_vm7, %v13947_v34  ;;  %v6644_v32 = vsel %vm16225_vm3, %v6640_v24, %v6641_v58 }
 0x5f0   : > { %10926 = vmatprep.mubr.msk.f32.mxu1 %vm1166_vm7, %v6653_v55  ;;  %v6642_v55 = vrot.slane %v13690_v41, 1  ;;  %v6704_v60 = vsel %vm16227_vm9, %v6644_v32, 0.0  ;;  %vm16241_vm9 = vmmov %vm16237_vm2  ;;  %v7076_v32 = vrot.slane %v13807_v62, 2  ;;  %v7077_v62 = vrot.slane %v13799_v36, 2 }
 0x5f2   : > { %10871 = vmatmul.mubr.msk.f32.gmra.mxu0 %vm1166_vm7, %v13941_v1  ;;  %v6643_v52 = vsel %vm16228_vm10, %v6641_v58, %v6642_v55  ;;  %v6674_v54 = vsel %vm16216_vm0, %v6642_v55, %v6611_v2  ;;  %vm16242_vm10 = vmmov %vm16237_vm2  ;;  %v7072_v58 = vrot.slane %v13712_v17, 2  ;;  %v16251_v55 = vld [vmem:[#allocation59_spill] sm:$0xff] }
 0x5f3   : > { %10927 = vmatmul.mubr.msk.f32.gmra.mxu1 %vm1166_vm7, %v6696_v9  ;;  %10873 = vmatprep.mubr.msk.f32.mxu0 %vm1166_vm7, %v13976_v7  ;;  %v7064_v9 = vrot.slane %v16163_v12, 2  ;;  %v6706_v26 = vsel %vm16230_vm1, %v6674_v54, 0.0  ;;  %vm16245_vm1 = vmmov %vm16237_vm2  ;;  %v16255_v54 = vld [vmem:[#allocation61_spill] sm:$0xff] }
 0x5f4   : > { %10929 = vmatprep.mubr.msk.f32.mxu1 %vm1166_vm7, %v6651_v22  ;;  %v7066_v22 = vrot.slane %v16164_v39, 2 }
 0x5f5   : > { %v7126_v39 = vsel %vm16232_vm6, %v7064_v9, %v7065_v25 }
 0x5f6   : > { %10874 = vmatmul.mubr.msk.f32.gmra.mxu0 %vm1166_vm7, %v13964_v43  ;;  %v7125_v2 = vsel %vm16231_vm5, %v7065_v25, %v7066_v22  ;;  %vm16246_vm5 = vmmov %vm16245_vm1 }
 0x5f7   : > { %10930 = vmatmul.mubr.msk.f32.gmra.mxu1 %vm1166_vm7, %v6698_v37  ;;  %10876 = vmatprep.mubr.msk.f32.mxu0 %vm1166_vm7, %v14001_v6  ;;  %v7067_v37 = vrot.slane %v16170_v56, 2  ;;  %v7069_v56 = vrot.slane %v13664_v18, 2  ;;  %v7071_v18 = vrot.slane %v13687_v47, 2  ;;  %v7073_v47 = vrot.slane %v13729_v3, 2 }
 0x5f8   : > { %10932 = vmatprep.mubr.msk.f32.mxu1 %vm1166_vm7, %v6649_v31  ;;  %v16234_v31 = vld [vmem:[#allocation51_spill] sm:$0xff] }
 0x5f9   : > { %vm16235_vm8 = vcmp.lt.s32.totalorder %v16234_v31, 16  ;;  %v7124_v46 = vsel %vm16237_vm2, %v7066_v22, %v7067_v37  ;;  %v7123_v0 = vsel %vm16238_vm4, %v7067_v37, %v7068_v48  ;;  %v7122_v10 = vsel %vm16241_vm9, %v7068_v48, %v7069_v56  ;;  %vm16250_vm2 = vmmov %vm16245_vm1  ;;  %v16263_v37 = vld [vmem:[#allocation65_spill] sm:$0xff] }
 0x5fa   : > { %10877 = vmatmul.mubr.msk.f32.gmra.mxu0 %vm1166_vm7, %v14049_v21  ;;  %v7129_v42 = vsel %vm16235_vm8, %v7125_v2, 0.0  ;;  %v7121_v28 = vsel %vm16242_vm10, %v7069_v56, %v7070_v30  ;;  %v7120_v17 = vsel %vm16245_vm1, %v7070_v30, %v7071_v18  ;;  %v7119_v24 = vsel %vm16246_vm5, %v7071_v18, %v7072_v58  ;;  %vm16249_vm8 = vmmov %vm16245_vm1  ;;  %v16274_v18 = vld [vmem:[#allocation72_spill] sm:$0xff] }
 0x5fb   : > { %10933 = vmatmul.mubr.msk.f32.gmra.mxu1 %vm1166_vm7, %v6700_v5  ;;  %10879 = vmatprep.mubr.msk.f32.mxu0 %vm1166_vm7, %v14028_v8  ;;  %v16239_v5 = vld [vmem:[#allocation53_spill] sm:$0xff]  ;;  %vm16252_vm4 = vcmp.lt.s32.totalorder %v16251_v55, 16  ;;  %vm16254_vm9 = vmmov %vm16245_vm1  ;;  %vm16256_vm10 = vcmp.lt.s32.totalorder %v16255_v54, 16  ;;  %v7082_v48 = vrot.slane %v13917_v11, 2  ;;  %v7083_v11 = vrot.slane %v13910_v49, 2 }
 0x5fc   : > { %10935 = vmatprep.mubr.msk.f32.mxu1 %vm1166_vm7, %v6647_v15  ;;  %vm16240_vm3 = vcmp.lt.s32.totalorder %v16239_v5, 16  ;;  %v7086_v5 = vrot.slane %v13976_v7, 2  ;;  %v7087_v7 = vrot.slane %v13964_v43, 2 }
 0x5fd   : > { %v7131_v15 = vsel %vm16240_vm3, %v7123_v0, 0.0  ;;  %vm16253_vm3 = vmmov %vm16245_vm1  ;;  %v16267_v0 = vld [vmem:[#allocation67_spill] sm:$0xff] }
 0x5fe   : > { %10880 = vmatmul.mubr.msk.f32.gmra.mxu0 %vm1166_vm7, %v14076_v51  ;;  %v7116_v38 = vsel %vm16253_vm3, %v7074_v44, %v7075_v13 }
 0x5ff   : > { %10936 = vmatmul.mubr.msk.f32.gmra.mxu1 %vm1166_vm7, %v6702_v53  ;;  %10882 = vmatprep.mubr.msk.f32.mxu0 %vm1166_vm7, %v14059_v61 }
 0x600   : > { %10938 = vmatprep.mubr.msk.f32.mxu1 %vm1166_vm7, %v6645_v50  ;;  %v7117_v50 = vsel %vm16250_vm2, %v7073_v47, %v7074_v44  ;;  %vm16264_vm2 = vcmp.lt.s32.totalorder %v16263_v37, 16 }
 0x601   : > { %v7137_v3 = vsel %vm16252_vm4, %v7117_v50, 0.0 }
 0x602   : > { %10883 = vmatmul.mubr.msk.f32.gmra.mxu0 %vm1166_vm7, %v14101_v57 }
 0x603   : > { %10939 = vmatmul.mubr.msk.f32.gmra.mxu1 %vm1166_vm7, %v6704_v60  ;;  %10885 = vmatprep.mubr.msk.f32.mxu0 %vm1166_vm7, %v14085_v33  ;;  %v7115_v60 = vsel %vm16254_vm9, %v7075_v13, %v7076_v32  ;;  %vm16268_vm9 = vcmp.lt.s32.totalorder %v16267_v0, 16  ;;  %v16286_v13 = vld [vmem:[#allocation77_spill] sm:$0xff] }
 0x604   : > { %10941 = vmatprep.mubr.msk.f32.mxu1 %vm1166_vm7, %v6643_v52  ;;  %v7078_v52 = vrot.slane %v13845_v23, 2  ;;  %v7139_v29 = vsel %vm16256_vm10, %v7115_v60, 0.0  ;;  %v7079_v23 = vrot.slane %v13871_v45, 2 }
 0x606   : > { %10886 = vmatmul.mubr.msk.f32.gmra.mxu0 %vm1166_vm7, %v13690_v41 }
 0x607   : > { %10942 = vmatmul.mubr.msk.f32.gmra.mxu1 %vm1166_vm7, %v6706_v26  ;;  %10952 = vmatprep.mubr.msk.f32.mxu0 %vm1166_vm7, %v7126_v39  ;;  %v16259_v26 = vld [vmem:[#allocation64_spill] sm:$0xff] }
 0x608   : > { %11008 = vmatprep.mubr.msk.f32.mxu1 %vm1166_vm7, %v16233_v20  ;;  %vm16260_vm5 = vcmp.lt.s32.totalorder %v16259_v26, 16 }
 0x60a   : > { %10953 = vmatmul.mubr.msk.f32.vlgmr.msra.gmra.mxu0 %vm1166_vm7, %v7129_v42 }
 0x60b   : > { %11009 = vmatmul.mubr.msk.f32.vlgmr.msra.gmra.mxu1 %vm1166_vm7, %v16236_v63  ;;  %10955 = vmatprep.mubr.msk.f32.mxu0 %vm1166_vm7, %v7124_v46  ;;  %v7084_v46 = vrot.slane %v13947_v34, 2  ;;  %v7085_v34 = vrot.slane %v13941_v1, 2 }
 0x60c   : > { %11012 = vmatpush3.msra.mxu1 %v13862_v59  ;;  %v16243_v59 = vld [vmem:[#allocation56_spill] sm:$0xff] }
 0x60d   : > { %11013 = vmatprep.subr.mxu1 %v14193_v14  ;;  %vm16244_vm0 = vcmp.lt.s32.totalorder %v16243_v59, 16 }
 0x60e   : > { %11014 = vmatpush3.msra.mxu1 %v14193_v14  ;;  %10956 = vmatmul.mubr.msk.f32.gmra.mxu0 %vm1166_vm7, %v7131_v15  ;;  %v7133_v14 = vsel %vm16244_vm0, %v7121_v28, 0.0  ;;  %vm16257_vm0 = vmmov %vm16245_vm1  ;;  %v16270_v15 = vld [vmem:[#allocation69_spill] sm:$0xff] }
 0x60f   : > { %11015 = vmatprep.subr.mxu1 %v14218_v40  ;;  %10958 = vmatprep.mubr.msk.f32.mxu0 %vm1166_vm7, %v7122_v10  ;;  %v7114_v22 = vsel %vm16257_vm0, %v7076_v32, %v7077_v62  ;;  %vm16258_vm1 = vmmov %vm16257_vm0  ;;  %v7107_v56 = vsel %vm16257_vm0, %v7083_v11, %v7084_v46  ;;  %v7094_v32 = vrot.slane %v14085_v33, 2  ;;  %v16290_v33 = vld [vmem:[#allocation79_spill] sm:$0xff] }
 0x610   : > { %11016 = vmatpush3.msra.mxu1 %v14218_v40  ;;  %v16247_v40 = vld [vmem:[#allocation57_spill] sm:$0xff]  ;;  %v7113_v25 = vsel %vm16258_vm1, %v7077_v62, %v7078_v52  ;;  %vm16265_vm4 = vmmov %vm16257_vm0  ;;  %vm16271_vm1 = vcmp.lt.s32.totalorder %v16270_v15, 16  ;;  %v16294_v62 = vld [vmem:[#allocation80_spill] sm:$0xff] }
 0x611   : > { %11017 = vmatprep.subr.mxu1 %v14242_v35  ;;  %vm16248_vm6 = vcmp.lt.s32.totalorder %v16247_v40, 16  ;;  %v7141_v36 = vsel %vm16260_vm5, %v7113_v25, 0.0  ;;  %v7110_v31 = vsel %vm16265_vm4, %v7080_v16, %v7081_v27  ;;  %vm16266_vm3 = vmmov %vm16257_vm0  ;;  %v7147_v49 = vsel %vm16271_vm1, %v7107_v56, 0.0 }
 0x612   : > { %11018 = vmatpush3.msra.mxu1 %v14242_v35  ;;  %10959 = vmatmul.mubr.msk.f32.gmra.mxu0 %vm1166_vm7, %v7133_v14  ;;  %v7135_v53 = vsel %vm16248_vm6, %v7119_v24, 0.0  ;;  %v7118_v35 = vsel %vm16249_vm8, %v7072_v58, %v7073_v47  ;;  %vm16261_vm6 = vmmov %vm16257_vm0  ;;  %v7109_v42 = vsel %vm16266_vm3, %v7081_v27, %v7082_v48  ;;  %v7088_v58 = vrot.slane %v14001_v6, 2  ;;  %v16278_v24 = vld [vmem:[#allocation73_spill] sm:$0xff] }
 0x613   : > { %10961 = vmatprep.mubr.msk.f32.mxu0 %vm1166_vm7, %v7120_v17  ;;  %v7112_v2 = vsel %vm16261_vm6, %v7078_v52, %v7079_v23  ;;  %vm16262_vm8 = vmmov %vm16257_vm0  ;;  %v7145_v4 = vsel %vm16268_vm9, %v7109_v42, 0.0  ;;  %v7090_v17 = vrot.slane %v14028_v8, 2  ;;  %v7089_v6 = vrot.slane %v14049_v21, 2 }
 0x614   : > { %v7111_v39 = vsel %vm16262_vm8, %v7079_v23, %v7080_v16  ;;  %vm16269_vm10 = vmmov %vm16257_vm0  ;;  %vm16275_vm8 = vcmp.lt.s32.totalorder %v16274_v18, 16  ;;  %vm16279_vm3 = vcmp.lt.s32.totalorder %v16278_v24, 16  ;;  %v7092_v40 = vrot.slane %v14059_v61, 2 }
 0x615   : > { %v7143_v45 = vsel %vm16264_vm2, %v7111_v39, 0.0  ;;  %v7108_v30 = vsel %vm16269_vm10, %v7082_v48, %v7083_v11  ;;  %vm16272_vm5 = vmmov %vm16257_vm0  ;;  %v7091_v8 = vrot.slane %v14076_v51, 2  ;;  %v7093_v61 = vrot.slane %v14101_v57, 2 }
 0x616   : > { %10962 = vmatmul.mubr.msk.f32.gmra.mxu0 %vm1166_vm7, %v7135_v53  ;;  %v7106_v10 = vsel %vm16272_vm5, %v7084_v46, %v7085_v34  ;;  %vm16273_vm6 = vmmov %vm16257_vm0  ;;  %v16282_v53 = vld [vmem:[#allocation75_spill] sm:$0xff] }
 0x617   : > { %10964 = vmatprep.mubr.msk.f32.mxu0 %vm1166_vm7, %v7118_v35  ;;  %v7105_v28 = vsel %vm16273_vm6, %v7085_v34, %v7086_v5  ;;  %vm16276_vm2 = vmmov %vm16257_vm0  ;;  %vm16287_vm6 = vcmp.lt.s32.totalorder %v16286_v13, 16 }
 0x618   : > { %v7149_v1 = vsel %vm16275_vm8, %v7105_v28, 0.0  ;;  %v7104_v59 = vsel %vm16276_vm2, %v7086_v5, %v7087_v7  ;;  %vm16277_vm4 = vmmov %vm16257_vm0 }
 0x619   : > { %v7103_v14 = vsel %vm16277_vm4, %v7087_v7, %v7088_v58  ;;  %vm16280_vm9 = vmmov %vm16257_vm0  ;;  %vm16291_vm4 = vcmp.lt.s32.totalorder %v16290_v33, 16 }
 0x61a   : > { %10965 = vmatmul.mubr.msk.f32.gmra.mxu0 %vm1166_vm7, %v7137_v3  ;;  %v7151_v43 = vsel %vm16279_vm3, %v7103_v14, 0.0  ;;  %v7102_v44 = vsel %vm16280_vm9, %v7088_v58, %v7089_v6  ;;  %vm16281_vm10 = vmmov %vm16257_vm0  ;;  %vm16283_vm0 = vcmp.lt.s32.totalorder %v16282_v53, 16 }
 0x61b   : > { %10967 = vmatprep.mubr.msk.f32.mxu0 %vm1166_vm7, %v7116_v38  ;;  %v7101_v47 = vsel %vm16281_vm10, %v7089_v6, %v7090_v17  ;;  %vm16284_vm1 = vmmov %vm16276_vm2  ;;  %v7095_v38 = vrot.slane %v13690_v41, 2  ;;  %vm16295_vm10 = vcmp.lt.s32.totalorder %v16294_v62, 16 }
 0x61c   : > { %v7153_v21 = vsel %vm16283_vm0, %v7101_v47, 0.0  ;;  %v7100_v35 = vsel %vm16284_vm1, %v7090_v17, %v7091_v8  ;;  %vm16285_vm5 = vmmov %vm16284_vm1  ;;  %vm16351_vm0 = vcmask 1041409  }
 0x61d   : > { %v7099_v50 = vsel %vm16285_vm5, %v7091_v8, %v7092_v40  ;;  %vm16288_vm8 = vmmov %vm16284_vm1 }
 0x61e   : > { %10968 = vmatmul.mubr.msk.f32.gmra.mxu0 %vm1166_vm7, %v7139_v29  ;;  %v7155_v51 = vsel %vm16287_vm6, %v7099_v50, 0.0  ;;  %v7098_v55 = vsel %vm16288_vm8, %v7092_v40, %v7093_v61  ;;  %vm16289_vm2 = vmmov %vm16284_vm1 }
 0x61f   : > { %10970 = vmatprep.mubr.msk.f32.mxu0 %vm1166_vm7, %v7114_v22  ;;  %v7097_v3 = vsel %vm16289_vm2, %v7093_v61, %v7094_v32  ;;  %vm16292_vm3 = vmmov %vm16284_vm1 }
 0x620   : > { %v7157_v60 = vsel %vm16291_vm4, %v7097_v3, 0.0  ;;  %v7096_v57 = vsel %vm16292_vm3, %v7094_v32, %v7095_v38  ;;  %vm16293_vm9 = vmmov %vm16284_vm1  ;;  %vm16357_vm1 = vcmask 1042434  }
 0x621   : > { %v7127_v52 = vsel %vm16293_vm9, %v7095_v38, %v7064_v9  ;;  %vm16364_vm5 = vmmov %vm16351_vm0 }
 0x622   : > { %10971 = vmatmul.mubr.msk.f32.gmra.mxu0 %vm1166_vm7, %v7141_v36  ;;  %v7159_v41 = vsel %vm16295_vm10, %v7127_v52, 0.0  ;;  %vm16365_vm6 = vmmov %vm16357_vm1 }
 0x623   : > { %10973 = vmatprep.mubr.msk.f32.mxu0 %vm1166_vm7, %v7112_v2 }
 0x626   : > { %10974 = vmatmul.mubr.msk.f32.gmra.mxu0 %vm1166_vm7, %v7143_v45 }
 0x627   : > { %10976 = vmatprep.mubr.msk.f32.mxu0 %vm1166_vm7, %v7110_v31 }
 0x62a   : > { %10977 = vmatmul.mubr.msk.f32.gmra.mxu0 %vm1166_vm7, %v7145_v4 }
 0x62b   : > { %10979 = vmatprep.mubr.msk.f32.mxu0 %vm1166_vm7, %v7108_v30 }
 0x62e   : > { %10980 = vmatmul.mubr.msk.f32.gmra.mxu0 %vm1166_vm7, %v7147_v49 }
 0x62f   : > { %10982 = vmatprep.mubr.msk.f32.mxu0 %vm1166_vm7, %v7106_v10 }
 0x632   : > { %10983 = vmatmul.mubr.msk.f32.gmra.mxu0 %vm1166_vm7, %v7149_v1 }
 0x633   : > { %10985 = vmatprep.mubr.msk.f32.mxu0 %vm1166_vm7, %v7104_v59 }
 0x636   : > { %10986 = vmatmul.mubr.msk.f32.gmra.mxu0 %vm1166_vm7, %v7151_v43 }
 0x637   : > { %10988 = vmatprep.mubr.msk.f32.mxu0 %vm1166_vm7, %v7102_v44 }
 0x63a   : > { %10989 = vmatmul.mubr.msk.f32.gmra.mxu0 %vm1166_vm7, %v7153_v21 }
 0x63b   : > { %10991 = vmatprep.mubr.msk.f32.mxu0 %vm1166_vm7, %v7100_v35 }
 0x63e   : > { %10992 = vmatmul.mubr.msk.f32.gmra.mxu0 %vm1166_vm7, %v7155_v51 }
 0x63f   : > { %10994 = vmatprep.mubr.msk.f32.mxu0 %vm1166_vm7, %v7098_v55 }
 0x642   : > { %10995 = vmatmul.mubr.msk.f32.gmra.mxu0 %vm1166_vm7, %v7157_v60 }
 0x643   : > { %10997 = vmatprep.mubr.msk.f32.mxu0 %vm1166_vm7, %v7096_v57 }
 0x646   : > { %10998 = vmatmul.mubr.msk.f32.gmra.mxu0 %vm1166_vm7, %v7159_v41 }
 0x64a   : > { %v14599_v54 = vpop.f32.mrf.mxu0  ;;  %v14601_v29 = vpop.f32.mrf.mxu1 }
 0x64c   : > { %v14603_v22 = vpop.f32.mrf.mxu0  ;;  %v14605_v25 = vpop.f32.mrf.mxu1 }
 0x64e   : > { %v10733_v16 = vpop.f32.mrf.mxu0  ;;  %v10789_v12 = vpop.f32.mrf.mxu1 }
 0x64f   : > { %v14607_v23 = vadd.f32 %v10789_v12, %v10733_v16 }
 0x650   : > { %v14609_v9 = vpop.f32.mrf.mxu0  ;;  %v14611_v26 = vpop.f32.mrf.mxu1 }
 0x652   : > { %v10736_v36 = vpop.f32.mrf.mxu0  ;;  %v10792_v2 = vpop.f32.mrf.mxu1 }
 0x653   : > { %v14613_v39 = vadd.f32 %v10792_v2, %v10736_v36 }
 0x654   : > { %v14615_v48 = vpop.f32.mrf.mxu0  ;;  %v14617_v27 = vpop.f32.mrf.mxu1 }
 0x656   : > { %v10739_v37 = vpop.f32.mrf.mxu0  ;;  %v10795_v45 = vpop.f32.mrf.mxu1 }
 0x657   : > { %v14619_v31 = vadd.f32 %v10795_v45, %v10739_v37 }
 0x658   : > { %v14621_v42 = vpop.f32.mrf.mxu0  ;;  %v14623_v46 = vpop.f32.mrf.mxu1 }
 0x65a   : > { %v10742_v11 = vpop.f32.mrf.mxu0  ;;  %v10798_v0 = vpop.f32.mrf.mxu1 }
 0x65b   : > { %v14625_v4 = vadd.f32 %v10798_v0, %v10742_v11 }
 0x65c   : > { %v14627_v30 = vpop.f32.mrf.mxu0  ;;  %v14629_v56 = vpop.f32.mrf.mxu1 }
 0x65e   : > { %v10745_v5 = vpop.f32.mrf.mxu0  ;;  %v10801_v34 = vpop.f32.mrf.mxu1 }
 0x65f   : > { %v14631_v15 = vadd.f32 %v10801_v34, %v10745_v5 }
 0x660   : > { %v14633_v49 = vpop.f32.mrf.mxu0  ;;  %v14635_v10 = vpop.f32.mrf.mxu1 }
 0x662   : > { %v10748_v28 = vpop.f32.mrf.mxu0  ;;  %v10804_v58 = vpop.f32.mrf.mxu1 }
 0x663   : > { %v14637_v7 = vadd.f32 %v10804_v58, %v10748_v28 }
 0x664   : > { %v14639_v18 = vpop.f32.mrf.mxu0  ;;  %v14641_v1 = vpop.f32.mrf.mxu1 }
 0x666   : > { %v10751_v59 = vpop.f32.mrf.mxu0  ;;  %v10807_v14 = vpop.f32.mrf.mxu1 }
 0x667   : > { %v14643_v17 = vadd.f32 %v10807_v14, %v10751_v59 }
 0x668   : > { %v14645_v6 = vpop.f32.mrf.mxu0  ;;  %v14647_v24 = vpop.f32.mrf.mxu1 }
 0x66a   : > { %v10754_v43 = vpop.f32.mrf.mxu0  ;;  %v10810_v44 = vpop.f32.mrf.mxu1 }
 0x66b   : > { %v14649_v47 = vadd.f32 %v10810_v44, %v10754_v43 }
 0x66c   : > { %v14651_v40 = vpop.f32.mrf.mxu0  ;;  %v14653_v8 = vpop.f32.mrf.mxu1 }
 0x66e   : > { %v10757_v53 = vpop.f32.mrf.mxu0  ;;  %v10813_v21 = vpop.f32.mrf.mxu1 }
 0x66f   : > { %v14655_v35 = vadd.f32 %v10813_v21, %v10757_v53 }
 0x670   : > { %v14657_v50 = vpop.f32.mrf.mxu0  ;;  %v14659_v32 = vpop.f32.mrf.mxu1 }
 0x671   : > { %16296 = vst [vmem:[#allocation98_spill] sm:$0xff] %v14657_v50  ;;  %16297 = vst [vmem:[#allocation117_spill] sm:$0xff] %v14659_v32 }
 0x672   : > { %v10760_v61 = vpop.f32.mrf.mxu0 }
 0x673   : > { %v10816_v13 = vpop.f32.mrf.mxu1 }
 0x674   : > { %v14661_v51 = vadd.f32 %v10816_v13, %v10760_v61  ;;  %v14663_v55 = vpop.f32.mrf.mxu0 }
 0x675   : > { %16298 = vst [vmem:[#allocation4_spill] sm:$0xff] %v14663_v55  ;;  %v14665_v3 = vpop.f32.mrf.mxu1 }
 0x676   : > { %16299 = vst [vmem:[#allocation119_spill] sm:$0xff] %v14665_v3  ;;  %v10763_v38 = vpop.f32.mrf.mxu0 }
 0x677   : > { %v10819_v33 = vpop.f32.mrf.mxu1 }
 0x678   : > { %v14667_v60 = vadd.f32 %v10819_v33, %v10763_v38  ;;  %v14669_v57 = vpop.f32.mrf.mxu0 }
 0x679   : > { %16300 = vst [vmem:[#allocation108_spill] sm:$0xff] %v14669_v57  ;;  %v14671_v52 = vpop.f32.mrf.mxu1 }
 0x67a   : > { %16301 = vst [vmem:[#allocation109_spill] sm:$0xff] %v14671_v52  ;;  %v10766_v62 = vpop.f32.mrf.mxu0 }
 0x67b   : > { %v10822_v41 = vpop.f32.mrf.mxu1 }
 0x67c   : > { %v14673_v16 = vadd.f32 %v10822_v41, %v10766_v62  ;;  %v14675_v12 = vpop.f32.mrf.mxu0 }
 0x67d   : > { %16302 = vst [vmem:[#allocation38_spill] sm:$0xff] %v14675_v12  ;;  %v14677_v36 = vpop.f32.mrf.mxu1 }
 0x67e   : > { %16303 = vst [vmem:[#allocation120_spill] sm:$0xff] %v14677_v36  ;;  %v10769_v2 = vpop.f32.mrf.mxu0 }
 0x67f   : > { %v10825_v37 = vpop.f32.mrf.mxu1 }
 0x680   : > { %v14679_v45 = vadd.f32 %v10825_v37, %v10769_v2  ;;  %v14681_v11 = vpop.f32.mrf.mxu0 }
 0x681   : > { %16304 = vst [vmem:[#allocation22_spill] sm:$0xff] %v14681_v11  ;;  %v14683_v0 = vpop.f32.mrf.mxu1 }
 0x682   : > { %16305 = vst [vmem:[#allocation137_spill] sm:$0xff] %v14683_v0  ;;  %v10772_v5 = vpop.f32.mrf.mxu0 }
 0x683   : > { %v10828_v34 = vpop.f32.mrf.mxu1 }
 0x684   : > { %v14685_v28 = vadd.f32 %v10828_v34, %v10772_v5  ;;  %v14687_v58 = vpop.f32.mrf.mxu0 }
 0x685   : > { %16306 = vst [vmem:[#allocation3_spill] sm:$0xff] %v14687_v58  ;;  %v14689_v59 = vpop.f32.mrf.mxu1 }
 0x686   : > { %16307 = vst [vmem:[#allocation122_spill] sm:$0xff] %v14689_v59  ;;  %v10775_v14 = vpop.f32.mrf.mxu0 }
 0x687   : > { %v10831_v43 = vpop.f32.mrf.mxu1 }
 0x688   : > { %v14691_v44 = vadd.f32 %v10831_v43, %v10775_v14  ;;  %v14693_v53 = vpop.f32.mrf.mxu0 }
 0x689   : > { %16308 = vst [vmem:[#allocation13_spill] sm:$0xff] %v14693_v53  ;;  %v14695_v21 = vpop.f32.mrf.mxu1 }
 0x68a   : > { %16309 = vst [vmem:[#allocation123_spill] sm:$0xff] %v14695_v21  ;;  %v10842_v61 = vpop.f32.mrf.mxu0 }
 0x68b   : > { %v14697_v13 = vpop.f32.mrf.mxu1 }
 0x68c   : > { %v6416_v38 = vpop.f32.mrf.mxu0 }
 0x68d   : > { %v14699_v33 = vpop.f32.mrf.mxu1 }
 0x68e   : > { %v10845_v62 = vpop.f32.mrf.mxu0 }
 0x68f   : > { %v14702_v41 = vadd.f32 %v10845_v62, %v14607_v23  ;;  %v14706_v37 = vpop.f32.mrf.mxu1 }
 0x690   : > { %v14704_v2 = vpop.f32.mrf.mxu0 }
 0x691   : > { %v14713_v43 = vpop.f32.mrf.mxu1 }
 0x692   : > { %v10848_v5 = vpop.f32.mrf.mxu0 }
 0x693   : > { %v14709_v34 = vadd.f32 %v10848_v5, %v14613_v39  ;;  %v14720_v23 = vpop.f32.mrf.mxu1 }
 0x694   : > { %v14711_v14 = vpop.f32.mrf.mxu0 }
 0x695   : > { %v14727_v39 = vpop.f32.mrf.mxu1 }
 0x696   : > { %v10851_v63 = vpop.f32.mrf.mxu0 }
 0x697   : > { %v14716_v20 = vadd.f32 %v10851_v63, %v14619_v31  ;;  %v14734_v63 = vpop.f32.mrf.mxu1 }
 0x698   : > { %v14718_v19 = vpop.f32.mrf.mxu0 }
 0x69a   : > { %v10854_v62 = vpop.f32.mrf.mxu0 }
 0x69b   : > { %v14723_v21 = vadd.f32 %v10854_v62, %v14625_v4  ;;  %v14741_v4 = vpop.f32.mrf.mxu1 }
 0x69c   : > { %v14725_v53 = vpop.f32.mrf.mxu0 }
 0x69e   : > { %v10857_v5 = vpop.f32.mrf.mxu0 }
 0x69f   : > { %v14730_v59 = vadd.f32 %v10857_v5, %v14631_v15  ;;  %v14748_v15 = vpop.f32.mrf.mxu1 }
 0x6a0   : > { %v14732_v58 = vpop.f32.mrf.mxu0 }
 0x6a2   : > { %v10860_v31 = vpop.f32.mrf.mxu0 }
 0x6a3   : > { %v14737_v0 = vadd.f32 %v10860_v31, %v14637_v7  ;;  %v14755_v7 = vpop.f32.mrf.mxu1 }
 0x6a4   : > { %v14739_v11 = vpop.f32.mrf.mxu0 }
 0x6a6   : > { %v10863_v62 = vpop.f32.mrf.mxu0 }
 0x6a7   : > { %v14744_v36 = vadd.f32 %v10863_v62, %v14643_v17  ;;  %v14762_v17 = vpop.f32.mrf.mxu1 }
 0x6a8   : > { %v14746_v12 = vpop.f32.mrf.mxu0 }
 0x6aa   : > { %v10866_v5 = vpop.f32.mrf.mxu0 }
 0x6ab   : > { %v14751_v52 = vadd.f32 %v10866_v5, %v14649_v47  ;;  %v14769_v47 = vpop.f32.mrf.mxu1 }
 0x6ac   : > { %v14753_v57 = vpop.f32.mrf.mxu0 }
 0x6ad   : > { %16310 = vst [vmem:[#allocation110_spill] sm:$0xff] %v14751_v52  ;;  %16311 = vst [vmem:[#allocation43_spill] sm:$0xff] %v14753_v57 }
 0x6ae   : > { %v10869_v31 = vpop.f32.mrf.mxu0 }
 0x6af   : > { %v14758_v3 = vadd.f32 %v10869_v31, %v14655_v35  ;;  %v14776_v35 = vpop.f32.mrf.mxu1 }
 0x6b0   : > { %v14760_v55 = vpop.f32.mrf.mxu0 }
 0x6b1   : > { %16312 = vst [vmem:[#allocation125_spill] sm:$0xff] %v14758_v3  ;;  %16313 = vst [vmem:[#allocation135_spill] sm:$0xff] %v14760_v55 }
 0x6b2   : > { %v10872_v62 = vpop.f32.mrf.mxu0 }
 0x6b3   : > { %v14765_v32 = vadd.f32 %v10872_v62, %v14661_v51  ;;  %v14783_v51 = vpop.f32.mrf.mxu1 }
 0x6b4   : > { %v14767_v50 = vpop.f32.mrf.mxu0 }
 0x6b5   : > { %16314 = vst [vmem:[#allocation111_spill] sm:$0xff] %v14765_v32  ;;  %16315 = vst [vmem:[#allocation20_spill] sm:$0xff] %v14767_v50 }
 0x6b6   : > { %v10875_v5 = vpop.f32.mrf.mxu0 }
 0x6b7   : > { %v14772_v52 = vadd.f32 %v10875_v5, %v14667_v60  ;;  %v14790_v60 = vpop.f32.mrf.mxu1 }
 0x6b8   : > { %v14774_v57 = vpop.f32.mrf.mxu0 }
 0x6b9   : > { %16316 = vst [vmem:[#allocation126_spill] sm:$0xff] %v14772_v52  ;;  %16317 = vst [vmem:[#allocation16_spill] sm:$0xff] %v14774_v57  ;;  %v6097_v52 = vadd.f32 %v14601_v29, %v14599_v54  ;;  %v6102_v29 = vadd.f32 %v14611_v26, %v14609_v9  ;;  %v7031_v9 = vadd.f32 %v14706_v37, %v14702_v41 }
 0x6ba   : > { %v10878_v31 = vpop.f32.mrf.mxu0  ;;  %v7033_v41 = vadd.f32 %v14720_v23, %v14709_v34  ;;  %v7035_v23 = vadd.f32 %v14734_v63, %v14716_v20  ;;  %v7037_v63 = vadd.f32 %v14748_v15, %v14723_v21  ;;  %v6152_v21 = vadd.f32 %v14641_v1, %v14639_v18 }
 0x6bb   : > { %v14779_v3 = vadd.f32 %v10878_v31, %v14673_v16  ;;  %v6092_v31 = vadd.f32 %v14605_v25, %v14603_v22 }
 0x6bc   : > { %v14781_v55 = vpop.f32.mrf.mxu0 }
 0x6bd   : > { %16318 = vst [vmem:[#allocation129_spill] sm:$0xff] %v14779_v3  ;;  %16319 = vst [vmem:[#allocation112_spill] sm:$0xff] %v14781_v55  ;;  %v6576_v3 = vadd.f32 %v10842_v61, %v6097_v52  ;;  %v14801_v55 = vpop.f32.mrf.mxu1  ;;  %v14817_v52 = vld [vmem:[%s15465_s3 + $0x1c1] ss:$0 sm:$0xff] }
 0x6be   : > { %v10881_v62 = vpop.f32.mrf.mxu0 }
 0x6bf   : > { %v14786_v32 = vadd.f32 %v10881_v62, %v14679_v45  ;;  %v6575_v62 = vadd.f32 %v6416_v38, %v6092_v31  ;;  %v7029_v54 = vadd.f32 %v14697_v13, %v6576_v3  ;;  %v6112_v3 = vadd.f32 %v14617_v27, %v14615_v48 }
 0x6c0   : > { %v14788_v50 = vpop.f32.mrf.mxu0  ;;  %v6122_v48 = vadd.f32 %v14623_v46, %v14621_v42  ;;  %v6132_v42 = vadd.f32 %v14629_v56, %v14627_v30 }
 0x6c1   : > { %16320 = vst [vmem:[#allocation8_spill] sm:$0xff] %v14786_v32  ;;  %16321 = vst [vmem:[#allocation28_spill] sm:$0xff] %v14788_v50  ;;  %v7028_v22 = vadd.f32 %v14699_v33, %v6575_v62  ;;  %v6579_v31 = vadd.f32 %v14711_v14, %v6112_v3 }
 0x6c2   : > { %v10884_v5 = vpop.f32.mrf.mxu0 }
 0x6c3   : > { %v14795_v57 = vadd.f32 %v10884_v5, %v14685_v28  ;;  %v14811_v28 = vpop.f32.mrf.mxu1  ;;  %v7032_v14 = vadd.f32 %v14727_v39, %v6579_v31 }
 0x6c4   : > { %v14797_v16 = vpop.f32.mrf.mxu0 }
 0x6c5   : > { %v14824_v26 = vpop.f32.mrf.mxu1 }
 0x6c6   : > { %v10887_v45 = vpop.f32.mrf.mxu0 }
 0x6c7   : > { %v14804_v32 = vadd.f32 %v10887_v45, %v14691_v44  ;;  %v6577_v44 = vadd.f32 %v14704_v2, %v6102_v29  ;;  %v14834_v37 = vpop.f32.mrf.mxu1 }
 0x6c8   : > { %v14806_v50 = vpop.f32.mrf.mxu0 }
 0x6c9   : > { %v7030_v62 = vadd.f32 %v14713_v43, %v6577_v44  ;;  %v14846_v39 = vpop.f32.mrf.mxu1 }
 0x6ca   : > { %v10954_v5 = vpop.f32.mrf.mxu0 }
 0x6cb   : > { %v7482_v25 = vadd.f32 %v10954_v5, %v7029_v54 }
 0x6cc   : > { %v7322_v61 = vpop.f32.mrf.mxu0 }
 0x6cd   : > { %v7481_v13 = vadd.f32 %v7322_v61, %v7028_v22  ;;  %v7519_v38 = vadd.f32 %v14817_v52, %v7482_v25  ;;  %v6581_v25 = vadd.f32 %v14718_v19, %v6122_v48 }
 0x6ce   : > { %v10957_v33 = vpop.f32.mrf.mxu0 }
 0x6cf   : > { %v7518_v45 = vadd.f32 %v14817_v52, %v7481_v13  ;;  %v7484_v2 = vadd.f32 %v10957_v33, %v7031_v9  ;;  %v7551_v29 = vmax.f32 %v7519_v38, 0.0  ;;  %v7034_v3 = vadd.f32 %v14741_v4, %v6581_v25  ;;  %v14857_v4 = vpop.f32.mrf.mxu1 }
 0x6d0   : > { %v7332_v54 = vpop.f32.mrf.mxu0  ;;  %v6583_v13 = vadd.f32 %v14725_v53, %v6132_v42  ;;  %v7041_v42 = vadd.f32 %v14776_v35, %v14737_v0  ;;  %v6172_v0 = vadd.f32 %v14653_v8, %v14651_v40 }
 0x6d1   : > { %v7550_v27 = vmax.f32 %v7518_v45, 0.0  ;;  %v7483_v5 = vadd.f32 %v7332_v54, %v7030_v62  ;;  %v7521_v43 = vadd.f32 %v14817_v52, %v7484_v2  ;;  %v6142_v45 = vadd.f32 %v14635_v10, %v14633_v49 }
 0x6d2   : > { %v10960_v22 = vpop.f32.mrf.mxu0  ;;  %v7036_v2 = vadd.f32 %v14755_v7, %v6583_v13  ;;  %v14869_v7 = vpop.f32.mrf.mxu1 }
 0x6d3   : > { %11019 = vmatprep.mubr.msk.f32.mxu1 %vm1166_vm7, %v7550_v27  ;;  %v7486_v44 = vadd.f32 %v10960_v22, %v7033_v41  ;;  %v7520_v46 = vadd.f32 %v14817_v52, %v7483_v5  ;;  %v7553_v33 = vmax.f32 %v7521_v43, 0.0  ;;  %v6585_v54 = vadd.f32 %v14732_v58, %v6142_v45 }
 0x6d4   : > { %v7342_v61 = vpop.f32.mrf.mxu0  ;;  %11020 = vmatmul.mubr.msk.f32.vlgmr.msra.gmra.mxu1 %vm1166_vm7, %v7551_v29  ;;  %v7039_v5 = vadd.f32 %v14762_v17, %v14730_v59  ;;  %v6162_v59 = vadd.f32 %v14647_v24, %v14645_v6 }
 0x6d5   : > { %v7485_v34 = vadd.f32 %v7342_v61, %v7032_v14  ;;  %v7552_v9 = vmax.f32 %v7520_v46, 0.0  ;;  %v7523_v31 = vadd.f32 %v14817_v52, %v7486_v44  ;;  %v7038_v22 = vadd.f32 %v14769_v47, %v6585_v54  ;;  %v14881_v47 = vpop.f32.mrf.mxu1 }
 0x6d6   : > { %v10963_v19 = vpop.f32.mrf.mxu0  ;;  %v6587_v14 = vadd.f32 %v14739_v11, %v6152_v21 }
 0x6d7   : > { %v7522_v38 = vadd.f32 %v14817_v52, %v7485_v34  ;;  %v7488_v30 = vadd.f32 %v10963_v19, %v7035_v23  ;;  %11022 = vmatprep.mubr.msk.f32.mxu1 %vm1166_vm7, %v7552_v9  ;;  %v7555_v49 = vmax.f32 %v7523_v31, 0.0  ;;  %v6589_v34 = vadd.f32 %v14746_v12, %v6162_v59 }
 0x6d8   : > { %v7352_v56 = vpop.f32.mrf.mxu0  ;;  %11023 = vmatmul.mubr.msk.f32.gmra.mxu1 %vm1166_vm7, %v7553_v33  ;;  %v7040_v46 = vadd.f32 %v14783_v51, %v6587_v14  ;;  %v7043_v9 = vadd.f32 %v14790_v60, %v14744_v36  ;;  %v14893_v51 = vpop.f32.mrf.mxu1  ;;  %v16322_v33 = vld [vmem:[#allocation43_spill] sm:$0xff]  ;;  %v16324_v36 = vld [vmem:[#allocation117_spill] sm:$0xff] }
 0x6d9   : > { %v7554_v62 = vmax.f32 %v7522_v38, 0.0  ;;  %v7487_v20 = vadd.f32 %v7352_v56, %v7034_v3  ;;  %v7525_v10 = vadd.f32 %v14817_v52, %v7488_v30  ;;  %v7042_v38 = vadd.f32 %v14801_v55, %v6589_v34  ;;  %v16331_v34 = vld [vmem:[#allocation108_spill] sm:$0xff] }
 0x6da   : > { %v10966_v53 = vpop.f32.mrf.mxu0  ;;  %v6591_v31 = vadd.f32 %v16322_v33, %v6172_v0  ;;  %v10934_v55 = vpop.f32.mrf.mxu1 }
 0x6db   : > { %v7524_v48 = vadd.f32 %v14817_v52, %v7487_v20  ;;  %11025 = vmatprep.mubr.msk.f32.mxu1 %vm1166_vm7, %v7554_v62  ;;  %v7490_v27 = vadd.f32 %v10966_v53, %v7037_v63  ;;  %v7557_v43 = vmax.f32 %v7525_v10, 0.0  ;;  %v16323_v62 = vld [vmem:[#allocation98_spill] sm:$0xff] }
 0x6dc   : > { %v7362_v41 = vpop.f32.mrf.mxu0  ;;  %11026 = vmatmul.mubr.msk.f32.gmra.mxu1 %vm1166_vm7, %v7555_v49  ;;  %v6182_v60 = vadd.f32 %v16324_v36, %v16323_v62  ;;  %v16325_v53 = vld [vmem:[#allocation110_spill] sm:$0xff]  ;;  %v16326_v49 = vld [vmem:[#allocation135_spill] sm:$0xff] }
 0x6dd   : > { %v7556_v15 = vmax.f32 %v7524_v48, 0.0  ;;  %v7489_v29 = vadd.f32 %v7362_v41, %v7036_v2  ;;  %v7527_v18 = vadd.f32 %v14817_v52, %v7490_v27  ;;  %v7045_v2 = vadd.f32 %v14811_v28, %v16325_v53  ;;  %v16337_v62 = vld [vmem:[#allocation126_spill] sm:$0xff] }
 0x6de   : > { %v10969_v58 = vpop.f32.mrf.mxu0  ;;  %v7044_v48 = vadd.f32 %v14824_v26, %v6591_v31  ;;  %v6593_v10 = vadd.f32 %v16326_v49, %v6182_v60  ;;  %v6989_v26 = vpop.f32.mrf.mxu1  ;;  %v7051_v36 = vadd.f32 %v14881_v47, %v16337_v62 }
 0x6df   : > { %v7526_v25 = vadd.f32 %v14817_v52, %v7489_v29  ;;  %11028 = vmatprep.mubr.msk.f32.mxu1 %vm1166_vm7, %v7556_v15  ;;  %v7492_v1 = vadd.f32 %v10969_v58, %v7039_v5  ;;  %v7559_v19 = vmax.f32 %v7527_v18, 0.0  ;;  %v16327_v5 = vld [vmem:[#allocation4_spill] sm:$0xff]  ;;  %v16328_v58 = vld [vmem:[#allocation119_spill] sm:$0xff] }
 0x6e0   : > { %v7372_v44 = vpop.f32.mrf.mxu0  ;;  %11029 = vmatmul.mubr.msk.f32.gmra.mxu1 %vm1166_vm7, %v7557_v43  ;;  %v6192_v28 = vadd.f32 %v16328_v58, %v16327_v5 }
 0x6e1   : > { %v7558_v17 = vmax.f32 %v7526_v25, 0.0  ;;  %v7491_v61 = vadd.f32 %v7372_v44, %v7038_v22  ;;  %v7529_v6 = vadd.f32 %v14817_v52, %v7492_v1  ;;  %v16329_v25 = vld [vmem:[#allocation125_spill] sm:$0xff]  ;;  %v7046_v1 = vadd.f32 %v14846_v39, %v6593_v10  ;;  %v16330_v44 = vld [vmem:[#allocation20_spill] sm:$0xff]  ;;  %v10937_v39 = vpop.f32.mrf.mxu1 }
 0x6e2   : > { %v10972_v11 = vpop.f32.mrf.mxu0  ;;  %v7047_v43 = vadd.f32 %v14834_v37, %v16329_v25  ;;  %v6595_v59 = vadd.f32 %v16330_v44, %v6192_v28 }
 0x6e3   : > { %v7528_v23 = vadd.f32 %v14817_v52, %v7491_v61  ;;  %11031 = vmatprep.mubr.msk.f32.mxu1 %vm1166_vm7, %v7558_v17  ;;  %v7494_v24 = vadd.f32 %v10972_v11, %v7041_v42  ;;  %v7561_v56 = vmax.f32 %v7529_v6, 0.0 }
 0x6e4   : > { %v7382_v3 = vpop.f32.mrf.mxu0  ;;  %11032 = vmatmul.mubr.msk.f32.gmra.mxu1 %vm1166_vm7, %v7559_v19 }
 0x6e5   : > { %v7560_v35 = vmax.f32 %v7528_v23, 0.0  ;;  %v7493_v13 = vadd.f32 %v7382_v3, %v7040_v46  ;;  %v7531_v40 = vadd.f32 %v14817_v52, %v7494_v24  ;;  %v16332_v23 = vld [vmem:[#allocation109_spill] sm:$0xff]  ;;  %v16333_v24 = vld [vmem:[#allocation111_spill] sm:$0xff] }
 0x6e6   : > { %v10975_v12 = vpop.f32.mrf.mxu0  ;;  %v6202_v37 = vadd.f32 %v16332_v23, %v16331_v34  ;;  %v7049_v3 = vadd.f32 %v14857_v4, %v16333_v24 }
 0x6e7   : > { %v7530_v30 = vadd.f32 %v14817_v52, %v7493_v13  ;;  %11034 = vmatprep.mubr.msk.f32.mxu1 %vm1166_vm7, %v7560_v35  ;;  %v7496_v8 = vadd.f32 %v10975_v12, %v7043_v9  ;;  %v7563_v41 = vmax.f32 %v7531_v40, 0.0  ;;  %v7048_v35 = vadd.f32 %v14869_v7, %v6595_v59  ;;  %v16334_v13 = vld [vmem:[#allocation16_spill] sm:$0xff]  ;;  %v6999_v7 = vpop.f32.mrf.mxu1  ;;  %v16343_v59 = vld [vmem:[#allocation3_spill] sm:$0xff] }
 0x6e8   : > { %v7392_v45 = vpop.f32.mrf.mxu0  ;;  %11035 = vmatmul.mubr.msk.f32.gmra.mxu1 %vm1166_vm7, %v7561_v56  ;;  %v6597_v9 = vadd.f32 %v16334_v13, %v6202_v37  ;;  %v16335_v56 = vld [vmem:[#allocation38_spill] sm:$0xff]  ;;  %v16336_v40 = vld [vmem:[#allocation120_spill] sm:$0xff]  ;;  %v16347_v13 = vld [vmem:[#allocation123_spill] sm:$0xff] }
 0x6e9   : > { %v7562_v20 = vmax.f32 %v7530_v30, 0.0  ;;  %v7495_v63 = vadd.f32 %v7392_v45, %v7042_v38  ;;  %v7533_v21 = vadd.f32 %v14817_v52, %v7496_v8  ;;  %v6212_v4 = vadd.f32 %v16336_v40, %v16335_v56  ;;  %v10940_v58 = vpop.f32.mrf.mxu1 }
 0x6ea   : > { %v10978_v54 = vpop.f32.mrf.mxu0 }
 0x6eb   : > { %v7532_v27 = vadd.f32 %v14817_v52, %v7495_v63  ;;  %11037 = vmatprep.mubr.msk.f32.mxu1 %vm1166_vm7, %v7562_v20  ;;  %v7498_v15 = vadd.f32 %v10978_v54, %v7045_v2  ;;  %v7565_v61 = vmax.f32 %v7533_v21, 0.0  ;;  %v7050_v20 = vadd.f32 %v14893_v51, %v6597_v9  ;;  %v16338_v63 = vld [vmem:[#allocation112_spill] sm:$0xff]  ;;  %v7009_v34 = vpop.f32.mrf.mxu1 }
 0x6ec   : > { %v7402_v29 = vpop.f32.mrf.mxu0  ;;  %11038 = vmatmul.mubr.msk.f32.gmra.mxu1 %vm1166_vm7, %v7563_v41  ;;  %v6599_v53 = vadd.f32 %v16338_v63, %v6212_v4  ;;  %v16340_v41 = vld [vmem:[#allocation137_spill] sm:$0xff] }
 0x6ed   : > { %v7564_v22 = vmax.f32 %v7532_v27, 0.0  ;;  %v7497_v14 = vadd.f32 %v7402_v29, %v7044_v48  ;;  %v7535_v42 = vadd.f32 %v14817_v52, %v7498_v15  ;;  %v16339_v27 = vld [vmem:[#allocation22_spill] sm:$0xff]  ;;  %v16341_v29 = vld [vmem:[#allocation129_spill] sm:$0xff] }
 0x6ee   : > { %v10981_v18 = vpop.f32.mrf.mxu0  ;;  %v6222_v47 = vadd.f32 %v16340_v41, %v16339_v27  ;;  %v7053_v5 = vadd.f32 %v10934_v55, %v16341_v29  ;;  %v7052_v28 = vadd.f32 %v6989_v26, %v6599_v53  ;;  %v11229_v29 = vmov 1966171168  }
 0x6ef   : > { %v7534_v17 = vadd.f32 %v14817_v52, %v7497_v14  ;;  %11040 = vmatprep.mubr.msk.f32.mxu1 %vm1166_vm7, %v7564_v22  ;;  %v7500_v11 = vadd.f32 %v10981_v18, %v7047_v43  ;;  %v7567_v38 = vmax.f32 %v7535_v42, 0.0  ;;  %v16342_v22 = vld [vmem:[#allocation28_spill] sm:$0xff] }
 0x6f0   : > { %v7412_v46 = vpop.f32.mrf.mxu0  ;;  %11041 = vmatmul.mubr.msk.f32.gmra.mxu1 %vm1166_vm7, %v7565_v61  ;;  %v6601_v14 = vadd.f32 %v16342_v22, %v6222_v47  ;;  %v16348_v22 = vld [vmem:[#allocation18_spill] sm:$0xff] }
 0x6f1   : > { %v7566_v19 = vmax.f32 %v7534_v17, 0.0  ;;  %v7499_v6 = vadd.f32 %v7412_v46, %v7046_v1  ;;  %v7537_v33 = vadd.f32 %v14817_v52, %v7500_v11  ;;  %v16344_v17 = vld [vmem:[#allocation122_spill] sm:$0xff]  ;;  %v16345_v11 = vld [vmem:[#allocation8_spill] sm:$0xff] }
 0x6f2   : > { %v10984_v0 = vpop.f32.mrf.mxu0  ;;  %v6232_v61 = vadd.f32 %v16344_v17, %v16343_v59  ;;  %v7055_v46 = vadd.f32 %v10937_v39, %v16345_v11  ;;  %v7054_v23 = vadd.f32 %v6999_v7, %v6601_v14  ;;  %v14994_v59 = vsub.s32 0, %v16348_v22 }
 0x6f3   : > { %v7536_v12 = vadd.f32 %v14817_v52, %v7499_v6  ;;  %11043 = vmatprep.mubr.msk.f32.mxu1 %vm1166_vm7, %v7566_v19  ;;  %v7502_v31 = vadd.f32 %v10984_v0, %v7049_v3  ;;  %v7569_v54 = vmax.f32 %v7537_v33, 0.0  ;;  %v10943_v33 = vpop.f32.mrf.mxu1 }
 0x6f4   : > { %v7422_v30 = vpop.f32.mrf.mxu0  ;;  %11044 = vmatmul.mubr.msk.f32.gmra.mxu1 %vm1166_vm7, %v7567_v38  ;;  %v6603_v37 = vadd.f32 %v14797_v16, %v6232_v61  ;;  %v7057_v38 = vadd.f32 %v10940_v58, %v14795_v57  ;;  %v7059_v57 = vadd.f32 %v10943_v33, %v14804_v32  ;;  %v14982_v58 = vld [vmem:[%s15465_s3 + $0x1e8] ss:$0 sm:$0xff] }
 0x6f5   : > { %v7568_v8 = vmax.f32 %v7536_v12, 0.0  ;;  %v7501_v45 = vadd.f32 %v7422_v30, %v7048_v35  ;;  %v7539_v48 = vadd.f32 %v14817_v52, %v7502_v31  ;;  %v16346_v35 = vld [vmem:[#allocation13_spill] sm:$0xff]  ;;  %v7019_v7 = vpop.f32.mrf.mxu1 }
 0x6f6   : > { %v10987_v60 = vpop.f32.mrf.mxu0  ;;  %v6242_v9 = vadd.f32 %v16347_v13, %v16346_v35  ;;  %v7056_v31 = vadd.f32 %v7009_v34, %v6603_v37 }
 0x6f7   : > { %v7538_v2 = vadd.f32 %v14817_v52, %v7501_v45  ;;  %11046 = vmatprep.mubr.msk.f32.mxu1 %vm1166_vm7, %v7568_v8  ;;  %v7504_v49 = vadd.f32 %v10987_v60, %v7051_v36  ;;  %v7571_v43 = vmax.f32 %v7539_v48, 0.0 }
 0x6f8   : > { %v7432_v10 = vpop.f32.mrf.mxu0  ;;  %11047 = vmatmul.mubr.msk.f32.gmra.mxu1 %vm1166_vm7, %v7569_v54  ;;  %v6605_v30 = vadd.f32 %v14806_v50, %v6242_v9 }
 0x6f9   : > { %v7570_v21 = vmax.f32 %v7538_v2, 0.0  ;;  %v7503_v15 = vadd.f32 %v7432_v10, %v7050_v20  ;;  %v7541_v18 = vadd.f32 %v14817_v52, %v7504_v49 }
 0x6fa   : > { %v10990_v51 = vpop.f32.mrf.mxu0  ;;  %v7058_v20 = vadd.f32 %v7019_v7, %v6605_v30 }
 0x6fb   : > { %v7540_v25 = vadd.f32 %v14817_v52, %v7503_v15  ;;  %11049 = vmatprep.mubr.msk.f32.mxu1 %vm1166_vm7, %v7570_v21  ;;  %v7506_v1 = vadd.f32 %v10990_v51, %v7053_v5  ;;  %v7573_v6 = vmax.f32 %v7541_v18, 0.0  ;;  %v14977_v21 = vpop.f32.mrf.mxu1  ;;  %v8066_v5 = vunpack.c.l.s4 %v11229_v29 }
 0x6fc   : > { %v7442_v44 = vpop.f32.mrf.mxu0  ;;  %11050 = vmatmul.mubr.msk.f32.gmra.mxu1 %vm1166_vm7, %v7571_v43 }
 0x6fd   : > { %v7572_v55 = vmax.f32 %v7540_v25, 0.0  ;;  %v7505_v42 = vadd.f32 %v7442_v44, %v7052_v28  ;;  %v7543_v24 = vadd.f32 %v14817_v52, %v7506_v1  ;;  %v7698_v15 = vpop.f32.mrf.mxu1  ;;  %v8067_v51 = vunpack.c.0.s8 %v8066_v5 }
 0x6fe   : > { %v10993_v26 = vpop.f32.mrf.mxu0 }
 0x6ff   : > { %v7542_v19 = vadd.f32 %v14817_v52, %v7505_v42  ;;  %11052 = vmatprep.mubr.msk.f32.mxu1 %vm1166_vm7, %v7572_v55  ;;  %v7508_v3 = vadd.f32 %v10993_v26, %v7055_v46  ;;  %v7575_v40 = vmax.f32 %v7543_v24, 0.0  ;;  %v14986_v14 = vsub.s32 %v8067_v51, %v16348_v22 }
 0x700   : > { %v7452_v0 = vpop.f32.mrf.mxu0  ;;  %11053 = vmatmul.mubr.msk.f32.gmra.mxu1 %vm1166_vm7, %v7573_v6  ;;  %v7704_v51 = vadd.f32 %v14977_v21, %v14982_v58 }
 0x701   : > { %v7574_v39 = vmax.f32 %v7542_v19, 0.0  ;;  %v7507_v12 = vadd.f32 %v7452_v0, %v7054_v23  ;;  %v7545_v4 = vadd.f32 %v14817_v52, %v7508_v3 }
 0x702   : > { %v10996_v16 = vpop.f32.mrf.mxu0 }
 0x703   : > { %v7544_v56 = vadd.f32 %v14817_v52, %v7507_v12  ;;  %11055 = vmatprep.mubr.msk.f32.mxu1 %vm1166_vm7, %v7574_v39  ;;  %v7510_v8 = vadd.f32 %v10996_v16, %v7057_v38  ;;  %v7577_v63 = vmax.f32 %v7545_v4, 0.0 }
 0x704   : > { %v7462_v45 = vpop.f32.mrf.mxu0  ;;  %11056 = vmatmul.mubr.msk.f32.gmra.mxu1 %vm1166_vm7, %v7575_v40 }
 0x705   : > { %v7576_v62 = vmax.f32 %v7544_v56, 0.0  ;;  %v7509_v36 = vadd.f32 %v7462_v45, %v7056_v31  ;;  %v7547_v53 = vadd.f32 %v14817_v52, %v7510_v8 }
 0x706   : > { %v10999_v60 = vpop.f32.mrf.mxu0 }
 0x707   : > { %v7546_v50 = vadd.f32 %v14817_v52, %v7509_v36  ;;  %11058 = vmatprep.mubr.msk.f32.mxu1 %vm1166_vm7, %v7576_v62  ;;  %v7512_v2 = vadd.f32 %v10999_v60, %v7059_v57  ;;  %v7579_v10 = vmax.f32 %v7547_v53, 0.0 }
 0x708   : > { %v7472_v54 = vpop.f32.mrf.mxu0  ;;  %11059 = vmatmul.mubr.msk.f32.gmra.mxu1 %vm1166_vm7, %v7577_v63 }
 0x709   : > { %v7578_v48 = vmax.f32 %v7546_v50, 0.0  ;;  %v7511_v49 = vadd.f32 %v7472_v54, %v7058_v20  ;;  %v7549_v27 = vadd.f32 %v14817_v52, %v7512_v2 }
 0x70b   : > { %v7548_v32 = vadd.f32 %v14817_v52, %v7511_v49  ;;  %11061 = vmatprep.mubr.msk.f32.mxu1 %vm1166_vm7, %v7578_v48  ;;  %v7581_v47 = vmax.f32 %v7549_v27, 0.0  ;;  %v7699_v52 = vadd.f32 %v14982_v58, %v7698_v15 }
 0x70c   : > { %11062 = vmatmul.mubr.msk.f32.gmra.mxu1 %vm1166_vm7, %v7579_v10 }
 0x70d   : > { %v7580_v41 = vmax.f32 %v7548_v32, 0.0  ;;  %v7707_v28 = vmax.f32 %v7699_v52, 0.0 }
 0x70f   : > { %11064 = vmatprep.mubr.msk.f32.mxu1 %vm1166_vm7, %v7580_v41  ;;  %v8071_v25 = vrot.slane %v7707_v28, %v14986_v14  ;;  %v8064_v13 = vcombine.high %v7707_v28, %v7707_v28 }
 0x710   : > { %11065 = vmatmul.mubr.msk.f32.gmra.mxu1 %vm1166_vm7, %v7581_v47 }
 0x711   : > { %v8087_v43 = vrot.slane %v8071_v25, %v14986_v14  ;;  %v8079_v1 = vcombine.high %v8071_v25, %v8071_v25  ;;  %v8078_v4 = vrot.slane %v8064_v13, %v14986_v14 }
 0x713   : > { %v8165_v42 = vrot.slane %v8087_v43, %v14994_v59  ;;  %v8101_v34 = vrot.slane %v8079_v1, %v14986_v14  ;;  %v8109_v33 = vcombine.high %v8087_v43, %v8087_v43  ;;  %v8080_v2 = vcombine.high %v8078_v4, %v8078_v4 }
 0x714   : > { %v8094_v27 = vrot.slane %v8078_v4, %v14986_v14 }
 0x715   : > { %v8169_v35 = vrot.slane %v8101_v34, %v14994_v59  ;;  %v8111_v45 = vcombine.high %v8101_v34, %v8101_v34  ;;  %v8173_v57 = vrot.slane %v8109_v33, %v14994_v59  ;;  %v8108_v22 = vrot.slane %v8080_v2, %v14986_v14 }
 0x716   : > { %v8181_v1 = vrot.slane %v8094_v27, %v14994_v59 }
 0x717   : > { %v8177_v48 = vrot.slane %v8111_v45, %v14994_v59 }
 0x794   : > { %v11021_v18 = vpop.f32.mrf.mxu1 }
 0x795   : > { %v14991_v44 = vadd.f32 %v11021_v18, %v14982_v58 }
 0x796   : > { %v7871_v17 = vpop.f32.mrf.mxu1 }
 0x797   : > { %v8031_v61 = vmax.f32 %v14991_v44, 0.0  ;;  %v14998_v55 = vadd.f32 %v14982_v58, %v7871_v17 }
 0x798   : > { %v11024_v26 = vpop.f32.mrf.mxu1 }
 0x799   : > { %v8030_v11 = vmax.f32 %v14998_v55, 0.0  ;;  %v8243_v46 = vmul.f32 %v8165_v42, %v8031_v61  ;;  %v15006_v23 = vadd.f32 %v11024_v26, %v14982_v58 }
 0x79a   : > { %v7881_v6 = vpop.f32.mrf.mxu1 }
 0x79b   : > { %v8277_v37 = vsel %vm1166_vm7, %v8243_v46, 0.0  ;;  %v8242_v19 = vmul.f32 %v8165_v42, %v8030_v11  ;;  %v8033_v24 = vmax.f32 %v15006_v23, 0.0  ;;  %v15013_v3 = vadd.f32 %v14982_v58, %v7881_v6 }
 0x79c   : > { %8278 = vadd.xlane.f32.xlu1 %v8277_v37  ;;  %v11027_v9 = vpop.f32.mrf.mxu1  ;;  %v15079_v37 = vmax.f32 %v7704_v51, 0.0  ;;  %v8185_v6 = vrot.slane %v8108_v22, %v14994_v59 }
 0x79d   : > { %v8274_v0 = vsel %vm1166_vm7, %v8242_v19, 0.0  ;;  %v8032_v39 = vmax.f32 %v15013_v3, 0.0  ;;  %v15019_v12 = vadd.f32 %v11027_v9, %v14982_v58  ;;  %v8245_v38 = vmul.f32 %v8169_v35, %v8033_v24 }
 0x79e   : > { %8275 = vadd.xlane.f32.xlu0 %v8274_v0  ;;  %v7891_v16 = vpop.f32.mrf.mxu1  ;;  %v8110_v9 = vcombine.high %v8094_v27, %v8094_v27 }
 0x79f   : > { %v8035_v31 = vmax.f32 %v15019_v12, 0.0  ;;  %v15025_v30 = vadd.f32 %v14982_v58, %v7891_v16  ;;  %v8283_v56 = vsel %vm1166_vm7, %v8245_v38, 0.0  ;;  %v8244_v40 = vmul.f32 %v8169_v35, %v8032_v39 }
 0x7a0   : > { %v11030_v8 = vpop.f32.mrf.mxu1 }
 0x7a1   : > { %v8034_v62 = vmax.f32 %v15025_v30, 0.0  ;;  %v15033_v36 = vadd.f32 %v11030_v8, %v14982_v58  ;;  %v8280_v60 = vsel %vm1166_vm7, %v8244_v40, 0.0  ;;  %v8247_v53 = vmul.f32 %v8173_v57, %v8035_v31 }
 0x7a2   : > { %8284 = vadd.xlane.f32.xlu0 %v8283_v56  ;;  %v7901_v7 = vpop.f32.mrf.mxu1  ;;  %v8120_v8 = vrot.slane %v15079_v37, %v14986_v14 }
 0x7a3   : > { %v8037_v20 = vmax.f32 %v15033_v36, 0.0  ;;  %v15039_v50 = vadd.f32 %v14982_v58, %v7901_v7  ;;  %v8246_v63 = vmul.f32 %v8173_v57, %v8034_v62  ;;  %v8289_v5 = vsel %vm1166_vm7, %v8247_v53, 0.0 }
 0x7a4   : > { %v11033_v54 = vpop.f32.mrf.mxu1  ;;  %v8112_v57 = vcombine.high %v8108_v22, %v8108_v22  ;;  %v8189_v53 = vrot.slane %v8110_v9, %v14994_v59  ;;  %v8136_v51 = vrot.slane %v8120_v8, %v14986_v14 }
 0x7a5   : > { %v8036_v49 = vmax.f32 %v15039_v50, 0.0  ;;  %v15048_v32 = vadd.f32 %v11033_v54, %v14982_v58  ;;  %v8286_v10 = vsel %vm1166_vm7, %v8246_v63, 0.0  ;;  %v8249_v47 = vmul.f32 %v8177_v48, %v8037_v20 }
 0x7a6   : > { %8281 = vadd.xlane.f32.xlu0 %v8280_v60  ;;  %v7911_v41 = vpop.f32.mrf.mxu1  ;;  %8287 = vadd.xlane.f32.xlu1 %v8286_v10 }
 0x7a7   : > { %v8039_v15 = vmax.f32 %v15048_v32, 0.0  ;;  %v15056_v29 = vadd.f32 %v14982_v58, %v7911_v41  ;;  %v8248_v52 = vmul.f32 %v8177_v48, %v8036_v49  ;;  %v8295_v42 = vsel %vm1166_vm7, %v8249_v47, 0.0 }
 0x7a8   : > { %v11036_v28 = vpop.f32.mrf.mxu1  ;;  %v8128_v47 = vcombine.high %v8120_v8, %v8120_v8 }
 0x7a9   : > { %v8038_v25 = vmax.f32 %v15056_v29, 0.0  ;;  %v15066_v43 = vadd.f32 %v11036_v28, %v14982_v58  ;;  %v8292_v18 = vsel %vm1166_vm7, %v8248_v52, 0.0  ;;  %v8251_v26 = vmul.f32 %v8181_v1, %v8039_v15 }
 0x7aa   : > { %8290 = vadd.xlane.f32.xlu0 %v8289_v5  ;;  %v7921_v17 = vpop.f32.mrf.mxu1  ;;  %8293 = vadd.xlane.f32.xlu1 %v8292_v18  ;;  %v8193_v52 = vrot.slane %v8112_v57, %v14994_v59 }
 0x7ab   : > { %v8041_v46 = vmax.f32 %v15066_v43, 0.0  ;;  %v15073_v21 = vadd.f32 %v14982_v58, %v7921_v17  ;;  %v8250_v34 = vmul.f32 %v8181_v1, %v8038_v25  ;;  %v8301_v40 = vsel %vm1166_vm7, %v8251_v26, 0.0 }
 0x7ac   : > { %v11039_v19 = vpop.f32.mrf.mxu1 }
 0x7ad   : > { %v8040_v0 = vmax.f32 %v15073_v21, 0.0  ;;  %v15084_v35 = vadd.f32 %v11039_v19, %v14982_v58  ;;  %v8298_v13 = vsel %vm1166_vm7, %v8250_v34, 0.0  ;;  %v8253_v33 = vmul.f32 %v8185_v6, %v8041_v46 }
 0x7ae   : > { %8296 = vadd.xlane.f32.xlu0 %v8295_v42  ;;  %v7931_v38 = vpop.f32.mrf.mxu1  ;;  %8299 = vadd.xlane.f32.xlu1 %v8298_v13  ;;  %v8150_v13 = vrot.slane %v8128_v47, %v14986_v14 }
 0x7af   : > { %v8043_v16 = vmax.f32 %v15084_v35, 0.0  ;;  %v15091_v56 = vadd.f32 %v14982_v58, %v7931_v38  ;;  %v8252_v4 = vmul.f32 %v8185_v6, %v8040_v0  ;;  %v8307_v54 = vsel %vm1166_vm7, %v8253_v33, 0.0 }
 0x7b0   : > { %v11042_v45 = vpop.f32.mrf.mxu1 }
 0x7b1   : > { %v8042_v7 = vmax.f32 %v15091_v56, 0.0  ;;  %v15100_v60 = vadd.f32 %v11042_v45, %v14982_v58  ;;  %v8304_v63 = vsel %vm1166_vm7, %v8252_v4, 0.0  ;;  %v8255_v41 = vmul.f32 %v8189_v53, %v8043_v16 }
 0x7b2   : > { %8302 = vadd.xlane.f32.xlu0 %v8301_v40  ;;  %v7941_v2 = vpop.f32.mrf.mxu1  ;;  %8305 = vadd.xlane.f32.xlu1 %v8304_v63  ;;  %v8197_v40 = vrot.slane %v8136_v51, %v14994_v59 }
 0x7b3   : > { %v15699_v48 = vmax.f32 %v15100_v60, 0.0  ;;  %v15107_v10 = vadd.f32 %v14982_v58, %v7941_v2  ;;  %v8254_v27 = vmul.f32 %v8189_v53, %v8042_v7  ;;  %v8313_v26 = vsel %vm1166_vm7, %v8255_v41, 0.0 }
 0x7b4   : > { %v11045_v5 = vpop.f32.mrf.mxu1  ;;  %v8113_v2 = vcombine.high %v15079_v37, %v15079_v37 }
 0x7b5   : > { %v8044_v28 = vmax.f32 %v15107_v10, 0.0  ;;  %v15117_v22 = vadd.f32 %v11045_v5, %v14982_v58  ;;  %v8310_v18 = vsel %vm1166_vm7, %v8254_v27, 0.0  ;;  %v8257_v17 = vmul.f32 %v8193_v52, %v15699_v48 }
 0x7b6   : > { %8308 = vadd.xlane.f32.xlu0 %v8307_v54  ;;  %v7951_v1 = vpop.f32.mrf.mxu1  ;;  %8311 = vadd.xlane.f32.xlu1 %v8310_v18  ;;  %v8201_v27 = vrot.slane %v8150_v13, %v14994_v59 }
 0x7b7   : > { %v15697_v42 = vmax.f32 %v15117_v22, 0.0  ;;  %v15124_v34 = vadd.f32 %v14982_v58, %v7951_v1  ;;  %v8256_v19 = vmul.f32 %v8193_v52, %v8044_v28  ;;  %v8319_v8 = vsel %vm1166_vm7, %v8257_v17, 0.0 }
 0x7b8   : > { %v11048_v6 = vpop.f32.mrf.mxu1  ;;  %v8158_v52 = vcombine.high %v8136_v51, %v8136_v51  ;;  %v8160_v51 = vcombine.high %v8150_v13, %v8150_v13 }
 0x7b9   : > { %v15695_v9 = vmax.f32 %v15124_v34, 0.0  ;;  %v15132_v38 = vadd.f32 %v11048_v6, %v14982_v58  ;;  %v8316_v33 = vsel %vm1166_vm7, %v8256_v19, 0.0  ;;  %v8259_v53 = vmul.f32 %v8197_v40, %v15697_v42 }
 0x7ba   : > { %8314 = vadd.xlane.f32.xlu0 %v8313_v26  ;;  %v7961_v4 = vpop.f32.mrf.mxu1  ;;  %8317 = vadd.xlane.f32.xlu1 %v8316_v33  ;;  %v8127_v6 = vrot.slane %v8113_v2, %v14986_v14 }
 0x7bb   : > { %v15691_v45 = vmax.f32 %v15132_v38, 0.0  ;;  %v15139_v57 = vadd.f32 %v14982_v58, %v7961_v4  ;;  %v8258_v63 = vmul.f32 %v8197_v40, %v15695_v9  ;;  %v8325_v26 = vsel %vm1166_vm7, %v8259_v53, 0.0 }
 0x7bc   : > { %v11051_v54 = vpop.f32.mrf.mxu1 }
 0x7bd   : > { %v15692_v41 = vmax.f32 %v15139_v57, 0.0  ;;  %v15150_v47 = vadd.f32 %v11051_v54, %v14982_v58  ;;  %v8322_v5 = vsel %vm1166_vm7, %v8258_v63, 0.0  ;;  %v8261_v1 = vmul.f32 %v8201_v27, %v15691_v45 }
 0x7be   : > { %8320 = vadd.xlane.f32.xlu0 %v8319_v8  ;;  %v7971_v18 = vpop.f32.mrf.mxu1  ;;  %8323 = vadd.xlane.f32.xlu1 %v8322_v5  ;;  %v8205_v63 = vrot.slane %v8158_v52, %v14994_v59  ;;  %v8209_v52 = vrot.slane %v8160_v51, %v14994_v59 }
 0x7bf   : > { %v15689_v17 = vmax.f32 %v15150_v47, 0.0  ;;  %v15157_v37 = vadd.f32 %v14982_v58, %v7971_v18  ;;  %v8260_v19 = vmul.f32 %v8201_v27, %v15692_v41  ;;  %v8331_v53 = vsel %vm1166_vm7, %v8261_v1, 0.0 }
 0x7c0   : > { %v11054_v33 = vpop.f32.mrf.mxu1  ;;  %v8129_v18 = vcombine.high %v8127_v6, %v8127_v6 }
 0x7c1   : > { %v15688_v40 = vmax.f32 %v15157_v37, 0.0  ;;  %v15165_v4 = vadd.f32 %v11054_v33, %v14982_v58  ;;  %v8328_v8 = vsel %vm1166_vm7, %v8260_v19, 0.0  ;;  %v8263_v5 = vmul.f32 %v8205_v63, %v15689_v17 }
 0x7c2   : > { %8326 = vadd.xlane.f32.xlu0 %v8325_v26  ;;  %v7981_v54 = vpop.f32.mrf.mxu1  ;;  %8329 = vadd.xlane.f32.xlu1 %v8328_v8  ;;  %v8143_v8 = vrot.slane %v8127_v6, %v14986_v14 }
 0x7c3   : > { %v15690_v27 = vmax.f32 %v15165_v4, 0.0  ;;  %v15172_v2 = vadd.f32 %v14982_v58, %v7981_v54  ;;  %v8262_v13 = vmul.f32 %v8205_v63, %v15688_v40  ;;  %v8337_v51 = vsel %vm1166_vm7, %v8263_v5, 0.0 }
 0x7c4   : > { %v11057_v26 = vpop.f32.mrf.mxu1  ;;  %v8213_v45 = vrot.slane %v8143_v8, %v14994_v59 }
 0x7c5   : > { %v15693_v19 = vmax.f32 %v15172_v2, 0.0  ;;  %v15181_v1 = vadd.f32 %v11057_v26, %v14982_v58  ;;  %v8334_v33 = vsel %vm1166_vm7, %v8262_v13, 0.0  ;;  %v8265_v40 = vmul.f32 %v8209_v52, %v15690_v27 }
 0x7c6   : > { %8332 = vadd.xlane.f32.xlu0 %v8331_v53  ;;  %v7991_v54 = vpop.f32.mrf.mxu1  ;;  %8335 = vadd.xlane.f32.xlu1 %v8334_v33  ;;  %v8157_v13 = vrot.slane %v8129_v18, %v14986_v14 }
 0x7c7   : > { %v15696_v63 = vmax.f32 %v15181_v1, 0.0  ;;  %v15189_v53 = vadd.f32 %v14982_v58, %v7991_v54  ;;  %v8264_v26 = vmul.f32 %v8209_v52, %v15693_v19  ;;  %v8343_v5 = vsel %vm1166_vm7, %v8265_v40, 0.0 }
 0x7c8   : > { %v11060_v17 = vpop.f32.mrf.mxu1  ;;  %v8159_v19 = vcombine.high %v8143_v8, %v8143_v8  ;;  %v8161_v42 = vcombine.high %v8157_v13, %v8157_v13 }
 0x7c9   : > { %v15694_v6 = vmax.f32 %v15189_v53, 0.0  ;;  %v15197_v33 = vadd.f32 %v11060_v17, %v14982_v58  ;;  %v8340_v27 = vsel %vm1166_vm7, %v8264_v26, 0.0  ;;  %v8267_v17 = vmul.f32 %v8213_v45, %v15696_v63 }
 0x7ca   : > { %8338 = vadd.xlane.f32.xlu0 %v8337_v51  ;;  %v8001_v54 = vpop.f32.mrf.mxu1  ;;  %8341 = vadd.xlane.f32.xlu1 %v8340_v27  ;;  %v8217_v51 = vrot.slane %v8157_v13, %v14994_v59 }
 0x7cb   : > { %v15698_v41 = vmax.f32 %v15197_v33, 0.0  ;;  %v15204_v52 = vadd.f32 %v14982_v58, %v8001_v54  ;;  %v8266_v14 = vmul.f32 %v8213_v45, %v15694_v6 }
 0x7cc   : > { %v11063_v18 = vpop.f32.mrf.mxu1 }
 0x7cd   : > { %v8056_v26 = vmax.f32 %v15204_v52, 0.0  ;;  %v15213_v27 = vadd.f32 %v11063_v18, %v14982_v58  ;;  %v8346_v40 = vsel %vm1166_vm7, %v8266_v14, 0.0  ;;  %v8269_v6 = vmul.f32 %v8217_v51, %v15698_v41 }
 0x7ce   : > { %8344 = vadd.xlane.f32.xlu0 %v8343_v5  ;;  %v8011_v54 = vpop.f32.mrf.mxu1  ;;  %8347 = vadd.xlane.f32.xlu1 %v8346_v40  ;;  %v8349_v5 = vsel %vm1166_vm7, %v8267_v17, 0.0  ;;  %v8221_v41 = vrot.slane %v8159_v19, %v14994_v59 }
 0x7cf   : > { %v8059_v9 = vmax.f32 %v15213_v27, 0.0  ;;  %v15220_v45 = vadd.f32 %v14982_v58, %v8011_v54  ;;  %v8268_v63 = vmul.f32 %v8217_v51, %v8056_v26  ;;  %v8355_v54 = vsel %vm1166_vm7, %v8269_v6, 0.0 }
 0x7d0   : > { %v11066_v18 = vpop.f32.mrf.mxu1 }
 0x7d1   : > { %v8058_v8 = vmax.f32 %v15220_v45, 0.0  ;;  %v15227_v14 = vadd.f32 %v11066_v18, %v14982_v58  ;;  %v8352_v40 = vsel %vm1166_vm7, %v8268_v63, 0.0  ;;  %v8225_v18 = vrot.slane %v8161_v42, %v14994_v59  ;;  %v8601_v42 = vld [vmem:[%s15466_s4 + $0x30] sm:$0xff] }
 0x7d2   : > { %8350 = vadd.xlane.f32.xlu0 %v8349_v5  ;;  %v8021_v48 = vpop.f32.mrf.mxu1  ;;  %8353 = vadd.xlane.f32.xlu1 %v8352_v40  ;;  %v8271_v5 = vmul.f32 %v8221_v41, %v8059_v9 }
 0x7d3   : > { %v15700_v17 = vmax.f32 %v15227_v14, 0.0  ;;  %v15234_v51 = vadd.f32 %v14982_v58, %v8021_v48  ;;  %v8270_v13 = vmul.f32 %v8221_v41, %v8058_v8  ;;  %v8602_v41 = vld [vmem:[%s15466_s4 + $0x38] sm:$0xff] }
 0x7d4   : > { %v8361_v6 = vsel %vm1166_vm7, %v8271_v5, 0.0  ;;  %11067 = vmatprep.subr.mxu0 %v8602_v41  ;;  %v15265_v5 = vld [vmem:[%s15466_s4 + $0x18] sm:$0xff] }
 0x7d5   : > { %v8060_v63 = vmax.f32 %v15234_v51, 0.0  ;;  %v8358_v19 = vsel %vm1166_vm7, %v8270_v13, 0.0  ;;  %v8273_v48 = vmul.f32 %v8225_v18, %v15700_v17  ;;  %11068 = vmatpush3.msra.mxu0 %v8602_v41  ;;  %v8599_v13 = vld [vmem:[%s15466_s4 + $0x20] sm:$0xff] }
 0x7d6   : > { %8356 = vadd.xlane.f32.xlu0 %v8355_v54  ;;  %8359 = vadd.xlane.f32.xlu1 %v8358_v19  ;;  %v8600_v54 = vld [vmem:[%s15466_s4 + $0x28] sm:$0xff] }
 0x7d7   : > { %v8272_v58 = vmul.f32 %v8225_v18, %v8060_v63  ;;  %v8367_v59 = vsel %vm1166_vm7, %v8273_v48, 0.0  ;;  %11069 = vmatprep.subr.mxu0 %v8601_v42 }
 0x7d8   : > { %11070 = vmatpush3.msra.mxu0 %v8601_v42 }
 0x7d9   : > { %v8364_v40 = vsel %vm1166_vm7, %v8272_v58, 0.0  ;;  %11071 = vmatprep.subr.mxu0 %v8600_v54 }
 0x7da   : > { %8362 = vadd.xlane.f32.xlu0 %v8361_v6  ;;  %8365 = vadd.xlane.f32.xlu1 %v8364_v40 }
 0x7db   : > { %11072 = vmatpush3.msra.mxu0 %v8600_v54 }
 0x7dc   : > { %11073 = vmatprep.subr.mxu0 %v8599_v13 }
 0x7dd   : > { %11074 = vmatpush3.msra.mxu0 %v8599_v13 }
 0x7de   : > { %8368 = vadd.xlane.f32.xlu0 %v8367_v59  ;;  %11078 = vmatprep.subr.mxu0 %v15265_v5 }
 0x825   : > { %v8279_v19 = vpop.xlane.xlu1 %8278 }
 0x827   : > { %v8276_v18 = vpop.xlane.xlu0 %8275 }
 0x828   : > { %11140 = vtanh.f32 %v8276_v18 }
 0x829   : > { %11142 = vtanh.f32 %v8279_v19 }
 0x82b   : > { %v8285_v6 = vpop.xlane.xlu0 %8284 }
 0x82c   : > { %11144 = vtanh.f32 %v8285_v6 }
 0x82f   : > { %v8282_v58 = vpop.xlane.xlu0 %8281  ;;  %v8288_v48 = vpop.xlane.xlu1 %8287 }
 0x830   : > { %11146 = vtanh.f32 %v8282_v58 }
 0x831   : > { %11148 = vtanh.f32 %v8288_v48 }
 0x833   : > { %v8291_v41 = vpop.xlane.xlu0 %8290  ;;  %v8294_v59 = vpop.xlane.xlu1 %8293 }
 0x834   : > { %11150 = vtanh.f32 %v8291_v41 }
 0x835   : > { %v11141_v40 = vpop.eup %11140  ;;  %11152 = vtanh.f32 %v8294_v59 }
 0x836   : > { %v11143_v42 = vpop.eup %11142  ;;  %v8402_v54 = vmul.f32 %v11141_v40, %v8030_v11 }
 0x837   : > { %v8297_v13 = vpop.xlane.xlu0 %8296  ;;  %v8403_v19 = vmul.f32 %v11143_v42, %v8031_v61  ;;  %v8300_v18 = vpop.xlane.xlu1 %8299 }
 0x838   : > { %11154 = vtanh.f32 %v8297_v13  ;;  %v8434_v6 = vsel %vm1166_vm7, %v8402_v54, 0.0 }
 0x839   : > { %v11145_v17 = vpop.eup %11144  ;;  %11156 = vtanh.f32 %v8300_v18  ;;  %v8435_v59 = vsel %vm1166_vm7, %v8403_v19, 0.0 }
 0x83a   : > { %v8405_v48 = vmul.f32 %v11145_v17, %v8033_v24  ;;  %v8436_v11 = vadd.f32 %v8435_v59, %v8434_v6 }
 0x83b   : > { %v8303_v58 = vpop.xlane.xlu0 %8302  ;;  %v8306_v55 = vpop.xlane.xlu1 %8305 }
 0x83c   : > { %11158 = vtanh.f32 %v8303_v58  ;;  %v8444_v42 = vsel %vm1166_vm7, %v8405_v48, 0.0  ;;  %v8437_v19 = vrot.slane %v8436_v11, 4 }
 0x83d   : > { %v11147_v41 = vpop.eup %11146  ;;  %11160 = vtanh.f32 %v8306_v55 }
 0x83e   : > { %v8404_v40 = vmul.f32 %v11147_v41, %v8032_v39  ;;  %v11149_v44 = vpop.eup %11148 }
 0x83f   : > { %v8309_v61 = vpop.xlane.xlu0 %8308  ;;  %v8406_v54 = vmul.f32 %v11149_v44, %v8034_v62  ;;  %v8312_v13 = vpop.xlane.xlu1 %8311 }
 0x840   : > { %v8443_v23 = vsel %vm1166_vm7, %v8404_v40, 0.0  ;;  %11162 = vtanh.f32 %v8309_v61  ;;  %v8438_v40 = vadd.f32 %v8437_v19, %v8436_v11 }
 0x841   : > { %v11151_v24 = vpop.eup %11150  ;;  %v8445_v17 = vadd.f32 %v8444_v42, %v8443_v23  ;;  %11164 = vtanh.f32 %v8312_v13  ;;  %v8452_v58 = vsel %vm1166_vm7, %v8406_v54, 0.0 }
 0x842   : > { %v8407_v18 = vmul.f32 %v11151_v24, %v8035_v31  ;;  %v11153_v3 = vpop.eup %11152  ;;  %v8439_v11 = vrot.slane %v8438_v40, 2 }
 0x843   : > { %v8446_v39 = vrot.slane %v8445_v17, 4  ;;  %v8315_v6 = vpop.xlane.xlu0 %8314  ;;  %v8408_v30 = vmul.f32 %v11153_v3, %v8036_v49  ;;  %v8318_v55 = vpop.xlane.xlu1 %8317 }
 0x844   : > { %v8453_v48 = vsel %vm1166_vm7, %v8407_v18, 0.0  ;;  %11166 = vtanh.f32 %v8315_v6 }
 0x845   : > { %v11155_v62 = vpop.eup %11154  ;;  %v8447_v41 = vadd.f32 %v8446_v39, %v8445_v17  ;;  %v8454_v59 = vadd.f32 %v8453_v48, %v8452_v58  ;;  %11168 = vtanh.f32 %v8318_v55  ;;  %v8461_v54 = vsel %vm1166_vm7, %v8408_v30, 0.0 }
 0x846   : > { %v8409_v12 = vmul.f32 %v11155_v62, %v8037_v20  ;;  %v11157_v31 = vpop.eup %11156  ;;  %v8440_v62 = vadd.f32 %v8439_v11, %v8438_v40 }
 0x847   : > { %v8448_v44 = vrot.slane %v8447_v41, 2  ;;  %v8455_v61 = vrot.slane %v8454_v59, 4  ;;  %v8321_v42 = vpop.xlane.xlu0 %8320  ;;  %v8410_v50 = vmul.f32 %v11157_v31, %v8038_v25  ;;  %v8324_v17 = vpop.xlane.xlu1 %8323 }
 0x848   : > { %v8462_v23 = vsel %vm1166_vm7, %v8409_v12, 0.0  ;;  %11170 = vtanh.f32 %v8321_v42  ;;  %v8441_v43 = vrot.slane %v8440_v62, 1 }
 0x849   : > { %v11159_v49 = vpop.eup %11158  ;;  %v8463_v24 = vadd.f32 %v8462_v23, %v8461_v54  ;;  %v8456_v13 = vadd.f32 %v8455_v61, %v8454_v59  ;;  %v8449_v19 = vadd.f32 %v8448_v44, %v8447_v41  ;;  %v8470_v39 = vsel %vm1166_vm7, %v8410_v50, 0.0 }
 0x84a   : > { %v8411_v36 = vmul.f32 %v11159_v49, %v8039_v15  ;;  %v11161_v20 = vpop.eup %11160 }
 0x84b   : > { %v8464_v18 = vrot.slane %v8463_v24, 4  ;;  %v8327_v3 = vpop.xlane.xlu0 %8326  ;;  %v8412_v29 = vmul.f32 %v11161_v20, %v8040_v0  ;;  %v8330_v30 = vpop.xlane.xlu1 %8329  ;;  %v8457_v32 = vrot.slane %v8456_v13, 2  ;;  %v8450_v59 = vrot.slane %v8449_v19, 1 }
 0x84c   : > { %v8471_v6 = vsel %vm1166_vm7, %v8411_v36, 0.0  ;;  %11172 = vtanh.f32 %v8327_v3 }
 0x84d   : > { %v11163_v25 = vpop.eup %11162  ;;  %v8465_v58 = vadd.f32 %v8464_v18, %v8463_v24  ;;  %v8472_v48 = vadd.f32 %v8471_v6, %v8470_v39  ;;  %11174 = vtanh.f32 %v8324_v17  ;;  %v8479_v21 = vsel %vm1166_vm7, %v8412_v29, 0.0 }
 0x84e   : > { %v8413_v15 = vmul.f32 %v11163_v25, %v8041_v46  ;;  %11176 = vtanh.f32 %v8330_v30  ;;  %v11165_v41 = vpop.eup %11164  ;;  %v8458_v46 = vadd.f32 %v8457_v32, %v8456_v13  ;;  %v8451_v24 = vadd.f32 %v8450_v59, %v8449_v19 }
 0x84f   : > { %v8473_v55 = vrot.slane %v8472_v48, 4  ;;  %v8333_v12 = vpop.xlane.xlu0 %8332  ;;  %v8466_v31 = vrot.slane %v8465_v58, 2  ;;  %v8414_v44 = vmul.f32 %v11165_v41, %v8042_v7  ;;  %v8336_v42 = vpop.xlane.xlu1 %8335  ;;  %v16349_v39 = vmax.f32 %v15100_v60, 0.0 }
 0x850   : > { %v8480_v0 = vsel %vm1166_vm7, %v8413_v15, 0.0  ;;  %11178 = vtanh.f32 %v8333_v12  ;;  %v8442_v19 = vadd.f32 %v8441_v43, %v8440_v62  ;;  %v8459_v29 = vrot.slane %v8458_v46, 1 }
 0x851   : > { %v11167_v61 = vpop.eup %11166  ;;  %v8481_v40 = vadd.f32 %v8480_v0, %v8479_v21  ;;  %v8474_v54 = vadd.f32 %v8473_v55, %v8472_v48  ;;  %11180 = vtanh.f32 %v8336_v42  ;;  %v8467_v17 = vadd.f32 %v8466_v31, %v8465_v58 }
 0x852   : > { %v8415_v23 = vmul.f32 %v11167_v61, %v8043_v16  ;;  %v11169_v50 = vpop.eup %11168  ;;  %v8488_v56 = vsel %vm1166_vm7, %v8414_v44, 0.0  ;;  %v8580_v30 = vmul.f32 0.0625, %v8451_v24  ;;  %v8460_v62 = vadd.f32 %v8459_v29, %v8458_v46 }
 0x853   : > { %v8339_v49 = vpop.xlane.xlu0 %8338  ;;  %v8475_v11 = vrot.slane %v8474_v54, 2  ;;  %v8482_v36 = vrot.slane %v8481_v40, 4  ;;  %v8416_v20 = vmul.f32 %v11169_v50, %v8044_v28  ;;  %v8342_v13 = vpop.xlane.xlu1 %8341  ;;  %v8468_v32 = vrot.slane %v8467_v17, 1 }
 0x854   : > { %v8489_v7 = vsel %vm1166_vm7, %v8415_v23, 0.0  ;;  %11182 = vtanh.f32 %v8339_v49  ;;  %v8579_v21 = vmul.f32 0.0625, %v8442_v19  ;;  %v16350_v44 = vmax.f32 %v15117_v22, 0.0 }
 0x855   : > { %v11171_v18 = vpop.eup %11170  ;;  %v8476_v3 = vadd.f32 %v8475_v11, %v8474_v54  ;;  %v8483_v35 = vadd.f32 %v8482_v36, %v8481_v40  ;;  %v8490_v16 = vadd.f32 %v8489_v7, %v8488_v56  ;;  %11184 = vtanh.f32 %v8342_v13 }
 0x856   : > { %v8417_v6 = vmul.f32 %v11171_v18, %v16349_v39  ;;  %v8497_v10 = vsel %vm1166_vm7, %v8416_v20, 0.0  ;;  %v8469_v23 = vadd.f32 %v8468_v32, %v8467_v17  ;;  %v8620_v50 = vsel %vm16351_vm0, %v8580_v30, %v8579_v21 }
 0x857   : > { %v8345_v25 = vpop.xlane.xlu0 %8344  ;;  %v8484_v58 = vrot.slane %v8483_v35, 2  ;;  %v8491_v48 = vrot.slane %v8490_v16, 4  ;;  %v8348_v41 = vpop.xlane.xlu1 %8347  ;;  %v8477_v59 = vrot.slane %v8476_v3, 1  ;;  %v16352_v24 = vmax.f32 %v15124_v34, 0.0 }
 0x858   : > { %11186 = vtanh.f32 %v8345_v25  ;;  %v8498_v28 = vsel %vm1166_vm7, %v8417_v6, 0.0  ;;  %v16353_v20 = vmax.f32 %v15139_v57, 0.0  ;;  %v16354_v18 = vmax.f32 %v15132_v38, 0.0 }
 0x859   : > { %v11173_v15 = vpop.eup %11172  ;;  %v8485_v55 = vadd.f32 %v8484_v58, %v8483_v35  ;;  %v8492_v12 = vadd.f32 %v8491_v48, %v8490_v16  ;;  %v8499_v60 = vadd.f32 %v8498_v28, %v8497_v10  ;;  %11188 = vtanh.f32 %v8348_v41 }
 0x85a   : > { %v11175_v31 = vpop.eup %11174  ;;  %v8419_v61 = vmul.f32 %v11173_v15, %v16350_v44  ;;  %v8478_v56 = vadd.f32 %v8477_v59, %v8476_v3  ;;  %v8581_v35 = vmul.f32 0.0625, %v8460_v62  ;;  %v16355_v3 = vmax.f32 %v15157_v37, 0.0 }
 0x85b   : > { %v11177_v0 = vpop.eup %11176  ;;  %v8351_v40 = vpop.xlane.xlu0 %8350  ;;  %v8486_v42 = vrot.slane %v8485_v55, 1  ;;  %v8493_v54 = vrot.slane %v8492_v12, 2  ;;  %v8500_v43 = vrot.slane %v8499_v60, 4  ;;  %v8418_v11 = vmul.f32 %v11175_v31, %v16352_v24 }
 0x85c   : > { %11190 = vtanh.f32 %v8351_v40  ;;  %v8354_v36 = vpop.xlane.xlu1 %8353  ;;  %v8420_v22 = vmul.f32 %v11177_v0, %v16353_v20  ;;  %v8507_v17 = vsel %vm1166_vm7, %v8419_v61, 0.0  ;;  %v8582_v57 = vmul.f32 0.0625, %v8469_v23 }
 0x85d   : > { %v11179_v49 = vpop.eup %11178  ;;  %v8494_v46 = vadd.f32 %v8493_v54, %v8492_v12  ;;  %v8501_v7 = vadd.f32 %v8500_v43, %v8499_v60  ;;  %11192 = vtanh.f32 %v8354_v36  ;;  %v8487_v6 = vadd.f32 %v8486_v42, %v8485_v55 }
 0x85e   : > { %v8421_v13 = vmul.f32 %v11179_v49, %v16354_v18  ;;  %v11181_v16 = vpop.eup %11180  ;;  %v8506_v38 = vsel %vm1166_vm7, %v8418_v11, 0.0  ;;  %v8583_v10 = vmul.f32 0.0625, %v8478_v56  ;;  %v8515_v15 = vsel %vm1166_vm7, %v8420_v22, 0.0 }
 0x85f   : > { %v8357_v39 = vpop.xlane.xlu0 %8356  ;;  %v8495_v19 = vrot.slane %v8494_v46, 1  ;;  %v8502_v34 = vrot.slane %v8501_v7, 2  ;;  %v8422_v25 = vmul.f32 %v11181_v16, %v16355_v3  ;;  %v8508_v28 = vadd.f32 %v8507_v17, %v8506_v38 }
 0x860   : > { %v8516_v29 = vsel %vm1166_vm7, %v8421_v13, 0.0  ;;  %11194 = vtanh.f32 %v8357_v39  ;;  %v8360_v48 = vpop.xlane.xlu1 %8359  ;;  %v16356_v41 = vmax.f32 %v15150_v47, 0.0  ;;  %v8584_v31 = vmul.f32 0.0625, %v8487_v6 }
 0x861   : > { %v11183_v58 = vpop.eup %11182  ;;  %v8496_v30 = vadd.f32 %v8495_v19, %v8494_v46  ;;  %v8503_v32 = vadd.f32 %v8502_v34, %v8501_v7  ;;  %11196 = vtanh.f32 %v8360_v48  ;;  %v8517_v12 = vadd.f32 %v8516_v29, %v8515_v15 }
 0x862   : > { %v8423_v59 = vmul.f32 %v11183_v58, %v16356_v41  ;;  %v11185_v55 = vpop.eup %11184  ;;  %v8621_v62 = vsel %vm16357_vm1, %v8581_v35, %v8620_v50  ;;  %v8524_v21 = vsel %vm1166_vm7, %v8422_v25, 0.0  ;;  %v16358_v44 = vmax.f32 %v15172_v2, 0.0 }
 0x863   : > { %v8363_v37 = vpop.xlane.xlu0 %8362  ;;  %v8504_v60 = vrot.slane %v8503_v32, 1  ;;  %v8585_v43 = vmul.f32 0.0625, %v8496_v30  ;;  %v8622_v23 = vsel %vm7611_vm12, %v8582_v57, %v8621_v62  ;;  %v8509_v49 = vrot.slane %v8508_v28, 4 }
 0x864   : > { %v8525_v0 = vsel %vm1166_vm7, %v8423_v59, 0.0  ;;  %v8424_v61 = vmul.f32 %v11185_v55, %v16358_v44  ;;  %11198 = vtanh.f32 %v8363_v37  ;;  %v8366_v47 = vpop.xlane.xlu1 %8365  ;;  %v16359_v24 = vmax.f32 %v15165_v4, 0.0 }
 0x865   : > { %v11187_v40 = vpop.eup %11186  ;;  %v8526_v42 = vadd.f32 %v8525_v0, %v8524_v21  ;;  %v8505_v54 = vadd.f32 %v8504_v60, %v8503_v32  ;;  %11200 = vtanh.f32 %v8366_v47  ;;  %v8623_v50 = vsel %vm7613_vm13, %v8583_v10, %v8622_v23 }
 0x866   : > { %v8425_v11 = vmul.f32 %v11187_v40, %v16359_v24  ;;  %v11189_v36 = vpop.eup %11188  ;;  %v8518_v56 = vrot.slane %v8517_v12, 4  ;;  %v8533_v2 = vsel %vm1166_vm7, %v8424_v61, 0.0  ;;  %v8624_v20 = vsel %vm7615_vm14, %v8584_v31, %v8623_v50 }
 0x867   : > { %v8369_v46 = vpop.xlane.xlu0 %8368  ;;  %v8586_v7 = vmul.f32 0.0625, %v8505_v54  ;;  %v8527_v22 = vrot.slane %v8526_v42, 4  ;;  %v16360_v13 = vmax.f32 %v15189_v53, 0.0  ;;  %v8625_v17 = vsel %vm7617_vm15, %v8585_v43, %v8624_v20 }
 0x868   : > { %v8534_v18 = vsel %vm1166_vm7, %v8425_v11, 0.0  ;;  %11202 = vtanh.f32 %v8369_v46  ;;  %v16361_v39 = vmax.f32 %v15181_v1, 0.0  ;;  %v8510_v29 = vadd.f32 %v8509_v49, %v8508_v28 }
 0x869   : > { %v8426_v35 = vmul.f32 %v11189_v36, %v16360_v13  ;;  %v11191_v4 = vpop.eup %11190  ;;  %v8535_v16 = vadd.f32 %v8534_v18, %v8533_v2  ;;  %v8626_v19 = vsel %vm7619_vm11, %v8586_v7, %v8625_v17  ;;  %v8519_v3 = vadd.f32 %v8518_v56, %v8517_v12 }
 0x86a   : > { %v8427_v6 = vmul.f32 %v11191_v4, %v16361_v39  ;;  %v11193_v34 = vpop.eup %11192  ;;  %11075 = vmatprep.mubr.msk.f32.mxu0 %vm1166_vm7, %v8626_v19  ;;  %v8528_v57 = vadd.f32 %v8527_v22, %v8526_v42  ;;  %v16362_v32 = vmax.f32 %v15197_v33, 0.0  ;;  %v8511_v28 = vrot.slane %v8510_v29, 2 }
 0x86b   : > { %v8536_v25 = vrot.slane %v8535_v16, 4  ;;  %v8542_v53 = vsel %vm1166_vm7, %v8426_v35, 0.0  ;;  %v8428_v38 = vmul.f32 %v11193_v34, %v8056_v26  ;;  %v8520_v41 = vrot.slane %v8519_v3, 2 }
 0x86c   : > { %v8543_v58 = vsel %vm1166_vm7, %v8427_v6, 0.0  ;;  %v8529_v55 = vrot.slane %v8528_v57, 2  ;;  %v8512_v0 = vadd.f32 %v8511_v28, %v8510_v29 }
 0x86d   : > { %v11195_v48 = vpop.eup %11194  ;;  %v8537_v30 = vadd.f32 %v8536_v25, %v8535_v16  ;;  %v8544_v1 = vadd.f32 %v8543_v58, %v8542_v53  ;;  %v8551_v12 = vsel %vm1166_vm7, %v8428_v38, 0.0  ;;  %v8521_v44 = vadd.f32 %v8520_v41, %v8519_v3 }
 0x86e   : > { %v8429_v10 = vmul.f32 %v11195_v48, %v16362_v32  ;;  %v11197_v15 = vpop.eup %11196  ;;  %v8530_v42 = vadd.f32 %v8529_v55, %v8528_v57  ;;  %v8513_v56 = vrot.slane %v8512_v0, 1 }
 0x86f   : > { %v8545_v59 = vrot.slane %v8544_v1, 4  ;;  %v8430_v60 = vmul.f32 %v11197_v15, %v8058_v8  ;;  %v8538_v26 = vrot.slane %v8537_v30, 2  ;;  %v8522_v11 = vrot.slane %v8521_v44, 1 }
 0x870   : > { %v8552_v37 = vsel %vm1166_vm7, %v8429_v10, 0.0  ;;  %v8531_v2 = vrot.slane %v8530_v42, 1  ;;  %v8514_v17 = vadd.f32 %v8513_v56, %v8512_v0  ;;  %v16367_v0 = vld [vmem:[#allocation24_spill] sm:$0xff] }
 0x871   : > { %v11199_v52 = vpop.eup %11198  ;;  %v8546_v31 = vadd.f32 %v8545_v59, %v8544_v1  ;;  %v8553_v62 = vadd.f32 %v8552_v37, %v8551_v12  ;;  %v8560_v47 = vsel %vm1166_vm7, %v8430_v60, 0.0  ;;  %v8539_v43 = vadd.f32 %v8538_v26, %v8537_v30 }
 0x872   : > { %v8431_v33 = vmul.f32 %v11199_v52, %v8059_v9  ;;  %v11201_v21 = vpop.eup %11200  ;;  %v16363_v9 = vmax.f32 %v15227_v14, 0.0  ;;  %v8523_v13 = vadd.f32 %v8522_v11, %v8521_v44  ;;  %v8532_v14 = vadd.f32 %v8531_v2, %v8530_v42  ;;  %v8802_v44 = vld [vmem:[%s15466_s4 + $0x70] sm:$0xff]  ;;  %v8799_v42 = vld [vmem:[%s15466_s4 + $0x58] sm:$0xff] }
 0x873   : > { %v8547_v61 = vrot.slane %v8546_v31, 2  ;;  %v8554_v40 = vrot.slane %v8553_v62, 4  ;;  %v8432_v45 = vmul.f32 %v11201_v21, %v8060_v63  ;;  %v8540_v20 = vrot.slane %v8539_v43, 1  ;;  %v8595_v21 = vld [vmem:[%s15466_s4] sm:$0xff] }
 0x874   : > { %v8561_v54 = vsel %vm1166_vm7, %v8431_v33, 0.0  ;;  %v8588_v29 = vmul.f32 0.0625, %v8523_v13  ;;  %v8589_v53 = vmul.f32 0.0625, %v8532_v14  ;;  %v8587_v58 = vmul.f32 0.0625, %v8514_v17  ;;  %v8596_v33 = vld [vmem:[%s15466_s4 + $0x8] sm:$0xff] }
 0x875   : > { %v11203_v8 = vpop.eup %11202  ;;  %v8555_v23 = vadd.f32 %v8554_v40, %v8553_v62  ;;  %v8562_v49 = vadd.f32 %v8561_v54, %v8560_v47  ;;  %v8548_v24 = vadd.f32 %v8547_v61, %v8546_v31  ;;  %v8569_v46 = vsel %vm1166_vm7, %v8432_v45, 0.0  ;;  %v8597_v31 = vld [vmem:[%s15466_s4 + $0x10] sm:$0xff]  ;;  %v16366_v62 = vld [vmem:[#allocation26_spill] sm:$0xff]  ;;  %v8801_v61 = vld [vmem:[%s15466_s4 + $0x68] sm:$0xff] }
 0x876   : > { %v8433_v27 = vmul.f32 %v11203_v8, %v16363_v9  ;;  %v8541_v39 = vadd.f32 %v8540_v20, %v8539_v43  ;;  %v8627_v15 = vsel %vm16364_vm5, %v8588_v29, %v8587_v58  ;;  %v8800_v40 = vld [vmem:[%s15466_s4 + $0x60] sm:$0xff]  ;;  %v8798_v47 = vld [vmem:[%s15466_s4 + $0x50] sm:$0xff]  ;;  %v8797_v54 = vld [vmem:[%s15466_s4 + $0x48] sm:$0xff] }
 0x877   : > { %v8556_v50 = vrot.slane %v8555_v23, 2  ;;  %v8563_v36 = vrot.slane %v8562_v49, 4  ;;  %v8549_v18 = vrot.slane %v8548_v24, 1  ;;  %v8628_v41 = vsel %vm16365_vm6, %v8589_v53, %v8627_v15  ;;  %v8796_v45 = vld [vmem:[%s15466_s4 + $0x40] sm:$0xff]  ;;  %v8897_v20 = vld [vmem:[%s15466_s4 + $0xa8] sm:$0xff] }
 0x878   : > { %v8570_v7 = vsel %vm1166_vm7, %v8433_v27, 0.0  ;;  %v8590_v38 = vmul.f32 0.0625, %v8541_v39  ;;  %v8900_v8 = vld [vmem:[%s15466_s4 + $0xc0] sm:$0xff] }
 0x879   : > { %v8557_v51 = vadd.f32 %v8556_v50, %v8555_v23  ;;  %v8564_v63 = vadd.f32 %v8563_v36, %v8562_v49  ;;  %v8571_v22 = vadd.f32 %v8570_v7, %v8569_v46  ;;  %v8550_v34 = vadd.f32 %v8549_v18, %v8548_v24  ;;  %v9576_v24 = vld [vmem:[%s15466_s4 + $0x80] ss:$0 sm:$0xff]  ;;  %v8899_v46 = vld [vmem:[%s15466_s4 + $0xb8] sm:$0xff]  ;;  %v8898_v7 = vld [vmem:[%s15466_s4 + $0xb0] sm:$0xff] }
 0x87a   : > { %v8629_v55 = vsel %vm7611_vm12, %v8590_v38, %v8628_v41  ;;  %v8893_v18 = vld [vmem:[%s15466_s4 + $0x88] sm:$0xff]  ;;  %v9577_v13 = vld [vmem:[%s15466_s4 + $0x81] ss:$0 sm:$0xff] }
 0x87b   : > { %v8565_v35 = vrot.slane %v8564_v63, 2  ;;  %v8572_v4 = vrot.slane %v8571_v22, 4  ;;  %v8558_v16 = vrot.slane %v8557_v51, 1  ;;  %v8591_v1 = vmul.f32 0.0625, %v8550_v34 }
 0x87d   : > { %v8573_v6 = vadd.f32 %v8572_v4, %v8571_v22  ;;  %v8566_v19 = vadd.f32 %v8565_v35, %v8564_v63  ;;  %v8559_v3 = vadd.f32 %v8558_v16, %v8557_v51  ;;  %v8630_v12 = vsel %vm7613_vm13, %v8591_v1, %v8629_v55  ;;  %v8896_v51 = vld [vmem:[%s15466_s4 + $0xa0] sm:$0xff]  ;;  %v8895_v63 = vld [vmem:[%s15466_s4 + $0x98] sm:$0xff]  ;;  %v8894_v22 = vld [vmem:[%s15466_s4 + $0x90] sm:$0xff] }
 0x87f   : > { %v8567_v25 = vrot.slane %v8566_v19, 1  ;;  %v8574_v57 = vrot.slane %v8573_v6, 2  ;;  %v8592_v10 = vmul.f32 0.0625, %v8559_v3 }
 0x881   : > { %v8568_v48 = vadd.f32 %v8567_v25, %v8566_v19  ;;  %v8575_v30 = vadd.f32 %v8574_v57, %v8573_v6  ;;  %v8631_v60 = vsel %vm7615_vm14, %v8592_v10, %v8630_v12  ;;  %v9580_v19 = vld [vmem:[%s15466_s4 + $0xc8] ss:$0 sm:$0xff] }
 0x883   : > { %v8576_v32 = vrot.slane %v8575_v30, 1  ;;  %v8593_v28 = vmul.f32 0.0625, %v8568_v48 }
 0x885   : > { %v8577_v59 = vadd.f32 %v8576_v32, %v8575_v30  ;;  %v8632_v52 = vsel %vm7617_vm15, %v8593_v28, %v8631_v60 }
 0x887   : > { %v8594_v37 = vmul.f32 0.0625, %v8577_v59 }
 0x889   : > { %v8633_v26 = vsel %vm7619_vm11, %v8594_v37, %v8632_v52  ;;  %vm8987_vm11 = vcmask 15360  }
 0x88a   : > { %11076 = vmatmul.mubr.msk.f32.vlgmr.msra.gmra.mxu0 %vm1166_vm7, %v8633_v26 }
 0x88b   : > { %11079 = vmatpush3.msra.mxu0 %v15265_v5  ;;  %11086 = vmatprep.mubr.msk.f32.mxu0 %vm1166_vm7, %v16366_v62  ;;  %v8803_v5 = vld [vmem:[%s15466_s4 + $0x78] sm:$0xff] }
 0x88c   : > { %11080 = vmatprep.subr.mxu0 %v8597_v31 }
 0x88d   : > { %11081 = vmatpush3.msra.mxu0 %v8597_v31 }
 0x88e   : > { %11082 = vmatprep.subr.mxu0 %v8596_v33 }
 0x88f   : > { %11083 = vmatpush3.msra.mxu0 %v8596_v33 }
 0x890   : > { %11084 = vmatprep.subr.mxu0 %v8595_v21 }
 0x891   : > { %11085 = vmatpush3.msra.mxu0 %v8595_v21 }
 0x892   : > { %11087 = vmatmul.mubr.msk.f32.vlgmr.msra.gmra.mxu0 %vm1166_vm7, %v16367_v0  ;;  %11089 = vmatprep.subr.mxu0 %v8803_v5  ;;  %vm8809_vm7 = vcmask 523264  }
 0x893   : > { %11090 = vmatpush3.msra.mxu0 %v8803_v5 }
 0x894   : > { %11091 = vmatprep.subr.mxu0 %v8802_v44 }
 0x895   : > { %11092 = vmatpush3.msra.mxu0 %v8802_v44 }
 0x896   : > { %11093 = vmatprep.subr.mxu0 %v8801_v61 }
 0x897   : > { %11094 = vmatpush3.msra.mxu0 %v8801_v61 }
 0x898   : > { %11095 = vmatprep.subr.mxu0 %v8800_v40 }
 0x899   : > { %11096 = vmatpush3.msra.mxu0 %v8800_v40 }
 0x89a   : > { %11097 = vmatprep.subr.mxu0 %v8799_v42 }
 0x89b   : > { %11098 = vmatpush3.msra.mxu0 %v8799_v42 }
 0x89c   : > { %11099 = vmatprep.subr.mxu0 %v8798_v47 }
 0x89d   : > { %11100 = vmatpush3.msra.mxu0 %v8798_v47 }
 0x89e   : > { %11101 = vmatprep.subr.mxu0 %v8797_v54 }
 0x89f   : > { %11102 = vmatpush3.msra.mxu0 %v8797_v54 }
 0x8a0   : > { %11103 = vmatprep.subr.mxu0 %v8796_v45 }
 0x8a1   : > { %11104 = vmatpush3.msra.mxu0 %v8796_v45 }
 0x8a2   : > { %11108 = vmatprep.subr.mxu0 %v8900_v8 }
 0x94a   : > { %v11077_v43 = vpop.f32.mrf.mxu0 }
 0x94c   : > { %v8704_v23 = vpop.f32.mrf.mxu0 }
 0x952   : > { %v11088_v49 = vpop.f32.mrf.mxu0 }
 0x953   : > { %v8785_v9 = vadd.f32 %v11088_v49, %v11077_v43 }
 0x954   : > { %v8779_v27 = vpop.f32.mrf.mxu0 }
 0x955   : > { %v8780_v11 = vadd.f32 %v8779_v27, %v8704_v23  ;;  %v8793_v50 = vadd.f32 %v9576_v24, %v8785_v9 }
 0x957   : > { %v8792_v36 = vadd.f32 %v9576_v24, %v8780_v11  ;;  %v8795_v2 = vmax.f32 %v8793_v50, 0.0 }
 0x959   : > { %v8794_v56 = vmax.f32 %v8792_v36, 0.0 }
 0x95b   : > { %11105 = vmatprep.mubr.msk.f32.mxu0 %vm8809_vm7, %v8794_v56 }
 0x95c   : > { %11106 = vmatmul.mubr.msk.f32.vlgmr.msra.gmra.mxu0 %vm8809_vm7, %v8795_v2 }
 0x95d   : > { %11109 = vmatpush3.msra.mxu0 %v8900_v8 }
 0x95e   : > { %11110 = vmatprep.subr.mxu0 %v8899_v46 }
 0x95f   : > { %11111 = vmatpush3.msra.mxu0 %v8899_v46 }
 0x960   : > { %11112 = vmatprep.subr.mxu0 %v8898_v7 }
 0x961   : > { %11113 = vmatpush3.msra.mxu0 %v8898_v7 }
 0x962   : > { %11114 = vmatprep.subr.mxu0 %v8897_v20 }
 0x963   : > { %11115 = vmatpush3.msra.mxu0 %v8897_v20 }
 0x964   : > { %11116 = vmatprep.subr.mxu0 %v8896_v51 }
 0x965   : > { %11117 = vmatpush3.msra.mxu0 %v8896_v51 }
 0x966   : > { %11118 = vmatprep.subr.mxu0 %v8895_v63 }
 0x967   : > { %11119 = vmatpush3.msra.mxu0 %v8895_v63 }
 0x968   : > { %11120 = vmatprep.subr.mxu0 %v8894_v22 }
 0x969   : > { %11121 = vmatpush3.msra.mxu0 %v8894_v22 }
 0x96a   : > { %11122 = vmatprep.subr.mxu0 %v8893_v18 }
 0x96b   : > { %11123 = vmatpush3.msra.mxu0 %v8893_v18 }
 0xa1c   : > { %v11107_v35 = vpop.f32.mrf.mxu0 }
 0xa1d   : > { %v8888_v4 = vadd.f32 %v11107_v35, %v9577_v13 }
 0xa1e   : > { %v8882_v16 = vpop.f32.mrf.mxu0 }
 0xa1f   : > { %v8883_v14 = vadd.f32 %v9577_v13, %v8882_v16  ;;  %v8892_v39 = vmax.f32 %v8888_v4, 0.0 }
 0xa21   : > { %v8891_v17 = vmax.f32 %v8883_v14, 0.0 }
 0xa23   : > { %11124 = vmatprep.mubr.msk.f32.mxu0 %vm8809_vm7, %v8891_v17 }
 0xa24   : > { %11125 = vmatmul.mubr.msk.f32.vlgmr.msra.gmra.mxu0 %vm8809_vm7, %v8892_v39 }
 0xae4   : > { %v11126_v6 = vpop.f32.mrf.mxu0 }
 0xae5   : > { %v8984_v3 = vadd.f32 %v11126_v6, %v9580_v19 }
 0xae6   : > { %v8978_v34 = vpop.f32.mrf.mxu0 }
 0xae7   : > { %v8979_v29 = vadd.f32 %v9580_v19, %v8978_v34  ;;  %8989 = vst.msk [vmem:[%s270_s20 + $0x8] sm:$0xff] %vm8987_vm11, %v8984_v3 }
 0xae9   : > { %8988 = vst.msk [vmem:[%s270_s20] sm:$0xff] %vm8987_vm11, %v8979_v29 }
 0xaea PF: > { %s15_s18 = sadd.s32 1, %s11225_s18  }
 0xaeb   : > { %p12_p6 = scmp.ge.s32.totalorder %s15_s18, 6  }
 0xaed   :  { %14 = sbr.rel (!%p12_p6) target bundleno = 1 (0x1), region = 76 }

</bundles_post_ra>
